<compile_context>
chip_gen: v7x
topology: tpu7x:2x2x1
jax: 0.10.0
libtpu: 0.0.40
codegen_flags: <defaults>
</compile_context>

<pallas_src>
import math
import functools
import numpy as np

import jax
import jax.numpy as jnp
from jax import lax
from jax.experimental import pallas as pl
from jax.experimental.pallas import tpu as pltpu

EPS = 1e-5                      # nn.LayerNorm default
SQRT2 = math.sqrt(2.0)
MXU_DTYPE = jnp.bfloat16        # MXU operand dtype (f32 accumulation everywhere)


# ------------------------------ tiling helpers ------------------------------

def _choose_window_rows(H, W, ws, target_tokens=256, max_tokens=2048):
    """Window-rows per grid step; must divide H // ws."""
    nwr = H // ws
    tokens_per_row = ws * W
    rh = max(1, target_tokens // tokens_per_row)
    rh = min(rh, max(1, max_tokens // tokens_per_row), nwr)
    while nwr % rh != 0:
        rh -= 1
    return max(rh, 1)


# ------------------------------ Pallas kernel -------------------------------

def _make_swin_kernel(num_heads, head_dim, dim, scale, ws, rh, nww):
    """Fused norm1 + W-MSA + residual + norm2 + MLP + residual for one tile."""
    L = ws * ws
    gh = rh * ws               # image rows in the tile
    Wt = nww * ws              # image cols in the tile (= full W)
    T = gh * Wt                # tokens in the tile

    def kernel(x_ref, g1_ref, b1_ref, qkvw_ref, qkvb_ref, projw_ref, projb_ref,
               bias_ref, g2_ref, b2_ref, w1_ref, fb1_ref, w2_ref, fb2_ref,
               o_ref):
        # --- load tile (image layout) and fused LayerNorm (norm1) ------------
        xr = x_ref[0].astype(jnp.float32)               # (gh, Wt, C)
        x2 = xr.reshape(T, dim)
        mu = jnp.mean(x2, axis=-1, keepdims=True)
        var = jnp.mean((x2 - mu) ** 2, axis=-1, keepdims=True)
        xn = (x2 - mu) * lax.rsqrt(var + EPS) * g1_ref[...] + b1_ref[...]

        # --- QKV projection over all tile tokens (bf16 MXU, f32 acc) ---------
        qkv = jnp.dot(xn.astype(MXU_DTYPE), qkvw_ref[...],
                      preferred_element_type=jnp.float32) + qkvb_ref[...]
        qkv3 = qkv.reshape(gh, Wt, 3 * dim)

        # --- per window-column attention (windows via static slices only) ----
        h_rows = []
        for c in range(nww):
            # (gh, ws, 3C) -> (rh, L, 3C): window-batched qkv for column c
            blk = qkv3[:, c * ws:(c + 1) * ws, :].reshape(rh, L, 3 * dim)
            acc = jnp.zeros((rh * L, dim), jnp.float32)
            for h in range(num_heads):
                lo = h * head_dim
                q = blk[:, :, lo:lo + head_dim] * scale
                k = blk[:, :, dim + lo:dim + lo + head_dim]
                v = blk[:, :, 2 * dim + lo:2 * dim + lo + head_dim]

                s = jnp.einsum('wqd,wkd->wqk',
                               q.astype(MXU_DTYPE), k.astype(MXU_DTYPE),
                               preferred_element_type=jnp.float32)   # (rh,L,L)
                boff = (c * num_heads + h) * rh
                s = s + bias_ref[0, boff:boff + rh]                  # bias(+mask)
                s = s - jnp.max(s, axis=-1, keepdims=True)
                e = jnp.exp(s)
                p = e * pl.reciprocal(jnp.sum(e, axis=-1, keepdims=True),
                                      approx=True)                   # softmax

                o_h = jnp.einsum('wqk,wkd->wqd',
                                 p.astype(MXU_DTYPE), v.astype(MXU_DTYPE),
                                 preferred_element_type=jnp.float32)  # (rh,L,hd)

                # proj(concat_h o_h) == sum_h o_h @ W_proj[h*hd:(h+1)*hd, :]
                acc = acc + jnp.dot(
                    o_h.reshape(rh * L, head_dim).astype(MXU_DTYPE),
                    projw_ref[lo:lo + head_dim, :],
                    preferred_element_type=jnp.float32)

            out_c = acc + projb_ref[...]                             # (rh*L, C)
            # residual (raw x) for the same tokens, same ordering
            resid_c = xr[:, c * ws:(c + 1) * ws, :].reshape(rh * L, dim)
            h_rows.append(out_c + resid_c)

        # concat along sublane axis (cheap) -> one big-M MLP matmul
        hh = jnp.concatenate(h_rows, axis=0)                         # (T, C)

        # --- norm2 + MLP (exact GELU) + residual ------------------------------
        mu2 = jnp.mean(hh, axis=-1, keepdims=True)
        var2 = jnp.mean((hh - mu2) ** 2, axis=-1, keepdims=True)
        n2 = (hh - mu2) * lax.rsqrt(var2 + EPS) * g2_ref[...] + b2_ref[...]
        z = jnp.dot(n2.astype(MXU_DTYPE), w1_ref[...],
                    preferred_element_type=jnp.float32) + fb1_ref[...]
        z = 0.5 * z * (1.0 + lax.erf(z / SQRT2))
        y = jnp.dot(z.astype(MXU_DTYPE), w2_ref[...],
                    preferred_element_type=jnp.float32) + fb2_ref[...]
        out = (hh + y).reshape(nww, rh, ws, ws, dim)

        # scatter back to image layout: one static-slice store per window column
        for c in range(nww):
            o_ref[0, :, c * ws:(c + 1) * ws, :] = (
                out[c].reshape(gh, ws, dim).astype(o_ref.dtype))

    return kernel


def swin_block_pallas(x_img, p, bias_g, *, num_heads, window_size, rh):
    """x_img: (B, H, W, C) already cyclically shifted if needed."""
    B, H, W, C = x_img.shape
    ws = window_size
    L = ws * ws
    nww = W // ws
    gh = rh * ws
    ng = H // gh
    hd = C // num_heads
    Hdn = p["fc1_w"].shape[1]
    scale = hd ** (-0.5)

    kernel = _make_swin_kernel(num_heads, hd, C, scale, ws, rh, nww)
    const = lambda b, r: (0, 0)

    # TODO(synk): pad C to a multiple of 128 lanes for lane-dense stores at
    # small channel counts (real Swin stages >=128 are already lane-dense).
    return pl.pallas_call(
        kernel,
        out_shape=jax.ShapeDtypeStruct((B, H, W, C), x_img.dtype),
        grid=(B, ng),
        in_specs=[
            pl.BlockSpec((1, gh, W, C), lambda b, r: (b, r, 0, 0)),
            pl.BlockSpec((1, C), const),                  # ln1 gamma
            pl.BlockSpec((1, C), const),                  # ln1 beta
            pl.BlockSpec((C, 3 * C), const),              # qkv W   (VMEM-resident)
            pl.BlockSpec((1, 3 * C), const),              # qkv b
            pl.BlockSpec((C, C), const),                  # proj W  (VMEM-resident)
            pl.BlockSpec((1, C), const),                  # proj b
            # bias regrouped per window-row-group: indexed by grid row only.
            pl.BlockSpec((1, nww * num_heads * rh, L, L),
                         lambda b, r: (r, 0, 0, 0)),
            pl.BlockSpec((1, C), const),                  # ln2 gamma
            pl.BlockSpec((1, C), const),                  # ln2 beta
            pl.BlockSpec((C, Hdn), const),                # fc1 W   (VMEM-resident)
            pl.BlockSpec((1, Hdn), const),                # fc1 b
            pl.BlockSpec((Hdn, C), const),                # fc2 W   (VMEM-resident)
            pl.BlockSpec((1, C), const),                  # fc2 b
        ],
        out_specs=pl.BlockSpec((1, gh, W, C), lambda b, r: (b, r, 0, 0)),
        compiler_params=pltpu.CompilerParams(
            dimension_semantics=("parallel", "parallel")),
    )(x_img,
      p["ln1_g"].reshape(1, C), p["ln1_b"].reshape(1, C),
      p["qkv_w"].astype(MXU_DTYPE), p["qkv_b"].reshape(1, 3 * C),
      p["proj_w"].astype(MXU_DTYPE), p["proj_b"].reshape(1, C),
      bias_g,
      p["ln2_g"].reshape(1, C), p["ln2_b"].reshape(1, C),
      p["fc1_w"].astype(MXU_DTYPE), p["fc1_b"].reshape(1, Hdn),
      p["fc2_w"].astype(MXU_DTYPE), p["fc2_b"].reshape(1, C))


# ------------------------------ JAX glue code -------------------------------

def relative_position_index_np(ws):
    coords = np.stack(np.meshgrid(np.arange(ws), np.arange(ws), indexing="ij"))
    coords_flat = coords.reshape(2, -1)
    rel = coords_flat[:, :, None] - coords_flat[:, None, :]
    rel = rel.transpose(1, 2, 0).copy()
    rel[:, :, 0] += ws - 1
    rel[:, :, 1] += ws - 1
    rel[:, :, 0] *= 2 * ws - 1
    return rel.sum(-1)                                   # (L, L) int


def create_mask_np(H, W, ws, ss):
    img = np.zeros((1, H, W, 1), np.float32)
    slices = (slice(0, -ws), slice(-ws, -ss), slice(-ss, None))
    cnt = 0
    for hs in slices:
        for wss in slices:
            img[:, hs, wss, :] = cnt
            cnt += 1
    mw = img.reshape(1, H // ws, ws, W // ws, ws, 1)
    mw = mw.transpose(0, 1, 3, 2, 4, 5).reshape(-1, ws * ws)
    am = mw[:, None, :] - mw[:, :, None]
    return np.where(am != 0, -100.0, 0.0).astype(np.float32)   # (nW, L, L)


def build_attn_bias(rel_bias, H, W, ws, shift, rh):
    """(num_groups, nww*nh*rh, L, L) bias = rel-pos bias (+ shift mask),
    regrouped so the kernel indexes it by (window-column, head, window-row)."""
    nh, L, _ = rel_bias.shape
    nwr, nww = H // ws, W // ws
    nW = nwr * nww
    if shift:
        mask = jnp.asarray(create_mask_np(H, W, ws, ws // 2))      # (nW, L, L)
        bias = rel_bias[:, None, :, :] + mask[None, :, :, :]
    else:
        bias = jnp.broadcast_to(rel_bias[:, None, :, :], (nh, nW, L, L))
    ng = nwr // rh
    bias = bias.reshape(nh, ng, rh, nww, L, L)
    bias = jnp.transpose(bias, (1, 3, 0, 2, 4, 5))                 # (ng,nww,nh,rh,L,L)
    return bias.reshape(ng, nww * nh * rh, L, L).astype(jnp.float32)


def swin_block_forward(x, p, bias_g, *, window_size, num_heads, shift, rh):
    ws = window_size
    ss = ws // 2 if shift else 0
    # LN/attention/MLP are per-token or per-window, so the whole block may be
    # computed in shifted coordinates and un-shifted at the end.
    xr = jnp.roll(x, shift=(-ss, -ss), axis=(1, 2)) if ss > 0 else x
    out_r = swin_block_pallas(xr, p, bias_g, num_heads=num_heads,
                              window_size=ws, rh=rh)
    # TODO(synk): fold the cyclic roll into the kernel (whole-image tiles would
    # allow an in-VMEM pltpu.roll) to remove the remaining HBM passes in
    # shifted-window mode.
    return jnp.roll(out_r, shift=(ss, ss), axis=(1, 2)) if ss > 0 else out_r


# ------------------------- pure-JAX reference (check) ------------------------

def window_partition(x, ws):
    B, H, W, C = x.shape
    x = x.reshape(B, H // ws, ws, W // ws, ws, C)
    x = x.transpose(0, 1, 3, 2, 4, 5)
    return x.reshape(-1, ws * ws, C)


def window_reverse(xw, ws, B, H, W, C):
    x = xw.reshape(B, H // ws, W // ws, ws, ws, C)
    x = x.transpose(0, 1, 3, 2, 4, 5)
    return x.reshape(B, H, W, C)


def swin_block_reference(x, p, *, window_size, num_heads, shift):
    B, H, W, C = x.shape
    ws = window_size
    L = ws * ws
    ss = ws // 2 if shift else 0
    hd = C // num_heads
    scale = hd ** (-0.5)

    def ln(v, g, b):
        mu = jnp.mean(v, -1, keepdims=True)
        var = jnp.mean((v - mu) ** 2, -1, keepdims=True)
        return (v - mu) / jnp.sqrt(var + EPS) * g + b

    xc = x
    xn = ln(x, p["ln1_g"], p["ln1_b"])
    if ss > 0:
        xn = jnp.roll(xn, shift=(-ss, -ss), axis=(1, 2))
    xw = window_partition(xn, ws)                        # (Bn, L, C)
    Bn = xw.shape[0]
    qkv = xw @ p["qkv_w"] + p["qkv_b"]                   # (Bn, L, 3C)
    qkv = qkv.reshape(Bn, L, 3, num_heads, hd).transpose(2, 0, 3, 1, 4)
    q, k, v = qkv[0], qkv[1], qkv[2]                     # (Bn, nh, L, hd)
    attn = (q * scale) @ jnp.swapaxes(k, -2, -1)         # (Bn, nh, L, L)
    attn = attn + p["rel_bias"][None]
    if ss > 0:
        mask = jnp.asarray(create_mask_np(H, W, ws, ss))
        nW = mask.shape[0]
        attn = attn.reshape(Bn // nW, nW, num_heads, L, L) + mask[None, :, None]
        attn = attn.reshape(Bn, num_heads, L, L)
    attn = jax.nn.softmax(attn, axis=-1)
    o = attn @ v                                         # (Bn, nh, L, hd)
    o = o.transpose(0, 2, 1, 3).reshape(Bn, L, C)
    o = o @ p["proj_w"] + p["proj_b"]
    o = window_reverse(o, ws, B, H, W, C)
    if ss > 0:
        o = jnp.roll(o, shift=(ss, ss), axis=(1, 2))
    h = o + xc
    n2 = ln(h, p["ln2_g"], p["ln2_b"])
    z = n2 @ p["fc1_w"] + p["fc1_b"]
    z = 0.5 * z * (1.0 + lax.erf(z / SQRT2))
    y = z @ p["fc2_w"] + p["fc2_b"]
    return h + y


# ---------------------------------- main -------------------------------------

def init_params(key, dim, num_heads, window_size, mlp_ratio):
    hidden = int(dim * mlp_ratio)
    L = window_size * window_size
    ks = jax.random.split(key, 8)
    table = 0.02 * jax.random.normal(ks[0], ((2 * window_size - 1) ** 2, num_heads),
                                     jnp.float32)
    rpi = jnp.asarray(relative_position_index_np(window_size)).reshape(-1)
    rel_bias = table[rpi].reshape(L, L, num_heads).transpose(2, 0, 1)  # (nh, L, L)
    p = {
        "ln1_g": jnp.ones((dim,), jnp.float32),
        "ln1_b": jnp.zeros((dim,), jnp.float32),
        "ln2_g": jnp.ones((dim,), jnp.float32),
        "ln2_b": jnp.zeros((dim,), jnp.float32),
        # linear weights stored as (in, out); forward is x @ W + b
        "qkv_w": 0.02 * jax.random.normal(ks[1], (dim, 3 * dim), jnp.float32),
        "qkv_b": 0.02 * jax.random.normal(ks[2], (3 * dim,), jnp.float32),
        "proj_w": 0.02 * jax.random.normal(ks[3], (dim, dim), jnp.float32),
        "proj_b": 0.02 * jax.random.normal(ks[4], (dim,), jnp.float32),
        "fc1_w": 0.02 * jax.random.normal(ks[5], (dim, hidden), jnp.float32),
        "fc1_b": jnp.zeros((hidden,), jnp.float32),
        "fc2_w": 0.02 * jax.random.normal(ks[6], (hidden, dim), jnp.float32),
        "fc2_b": jnp.zeros((dim,), jnp.float32),
        "rel_bias": rel_bias,
    }
    return p


if __name__ == "__main__":
    B, H, W, C = 2, 16, 16, 32
    window_size, num_heads, mlp_ratio = 4, 4, 4.0

    key = jax.random.PRNGKey(0)
    kx, kp = jax.random.split(key)
    x = jax.random.normal(kx, (B, H, W, C), jnp.float32)
    params = init_params(kp, C, num_heads, window_size, mlp_ratio)

    rh = _choose_window_rows(H, W, window_size)          # window-rows per grid step

    for shift in (False, True):
        bias_g = build_attn_bias(params["rel_bias"], H, W, window_size, shift, rh)
        fwd = jax.jit(functools.partial(swin_block_forward,
                                        window_size=window_size,
                                        num_heads=num_heads, shift=shift, rh=rh))
        out = jax.block_until_ready(fwd(x, params, bias_g))
        ref = jax.block_until_ready(
            swin_block_reference(x, params, window_size=window_size,
                                 num_heads=num_heads, shift=shift))
        assert out.shape == (B, H, W, C)
        # bf16 MXU operands + approx-reciprocal softmax => loosened tolerance.
        assert np.allclose(np.asarray(out), np.asarray(ref), atol=2e-2, rtol=2e-2)

    print("KERNEL_OK")
</pallas_src>

<mosaic_0001>
module attributes {stable_mosaic.version = 11 : i64} {
  func.func @kernel(%arg0: i32, %arg1: i32, %arg2: memref<1x16x16x32xf32, #tpu.memory_space<vmem>>, %arg3: memref<1x32xf32, #tpu.memory_space<vmem>>, %arg4: memref<1x32xf32, #tpu.memory_space<vmem>>, %arg5: memref<32x96xbf16, #tpu.memory_space<vmem>>, %arg6: memref<1x96xf32, #tpu.memory_space<vmem>>, %arg7: memref<32x32xbf16, #tpu.memory_space<vmem>>, %arg8: memref<1x32xf32, #tpu.memory_space<vmem>>, %arg9: memref<1x64x16x16xf32, #tpu.memory_space<vmem>>, %arg10: memref<1x32xf32, #tpu.memory_space<vmem>>, %arg11: memref<1x32xf32, #tpu.memory_space<vmem>>, %arg12: memref<32x128xbf16, #tpu.memory_space<vmem>>, %arg13: memref<1x128xf32, #tpu.memory_space<vmem>>, %arg14: memref<128x32xbf16, #tpu.memory_space<vmem>>, %arg15: memref<1x32xf32, #tpu.memory_space<vmem>>, %arg16: memref<1x16x16x32xf32, #tpu.memory_space<vmem>>) attributes {dimension_semantics = [#tpu.dimension_semantics<parallel>, #tpu.dimension_semantics<parallel>], iteration_bounds = array<i64: 2, 1>, scalar_prefetch = 0 : i64, scratch_operands = 0 : i64, tpu.core_type = #tpu.core_type<tc>, window_params = [{transform_indices = @transform_0, window_bounds = array<i64: 1, 16, 16, 32>}, {pipeline_mode = #tpu.pipeline_mode<synchronous>, transform_indices = @transform_1, window_bounds = array<i64: 1, 32>}, {pipeline_mode = #tpu.pipeline_mode<synchronous>, transform_indices = @transform_2, window_bounds = array<i64: 1, 32>}, {pipeline_mode = #tpu.pipeline_mode<synchronous>, transform_indices = @transform_3, window_bounds = array<i64: 32, 96>}, {pipeline_mode = #tpu.pipeline_mode<synchronous>, transform_indices = @transform_4, window_bounds = array<i64: 1, 96>}, {pipeline_mode = #tpu.pipeline_mode<synchronous>, transform_indices = @transform_5, window_bounds = array<i64: 32, 32>}, {pipeline_mode = #tpu.pipeline_mode<synchronous>, transform_indices = @transform_6, window_bounds = array<i64: 1, 32>}, {transform_indices = @transform_7, window_bounds = array<i64: 1, 64, 16, 16>}, {pipeline_mode = #tpu.pipeline_mode<synchronous>, transform_indices = @transform_8, window_bounds = array<i64: 1, 32>}, {pipeline_mode = #tpu.pipeline_mode<synchronous>, transform_indices = @transform_9, window_bounds = array<i64: 1, 32>}, {pipeline_mode = #tpu.pipeline_mode<synchronous>, transform_indices = @transform_10, window_bounds = array<i64: 32, 128>}, {pipeline_mode = #tpu.pipeline_mode<synchronous>, transform_indices = @transform_11, window_bounds = array<i64: 1, 128>}, {pipeline_mode = #tpu.pipeline_mode<synchronous>, transform_indices = @transform_12, window_bounds = array<i64: 128, 32>}, {pipeline_mode = #tpu.pipeline_mode<synchronous>, transform_indices = @transform_13, window_bounds = array<i64: 1, 32>}, {transform_indices = @transform_14, window_bounds = array<i64: 1, 16, 16, 32>}]} {
    %c0 = arith.constant 0 : index
    %c0_0 = arith.constant 0 : index
    %c0_1 = arith.constant 0 : index
    %c0_2 = arith.constant 0 : index
    %0 = vector.load %arg2[%c0, %c0_0, %c0_1, %c0_2] : memref<1x16x16x32xf32, #tpu.memory_space<vmem>>, vector<1x16x16x32xf32>
    %1 = vector.shape_cast %0 : vector<1x16x16x32xf32> to vector<16x16x32xf32>
    %2 = vector.shape_cast %1 : vector<16x16x32xf32> to vector<256x32xf32>
    %cst = arith.constant dense<0.000000e+00> : vector<256xf32>
    %3 = vector.multi_reduction <add>, %2, %cst [1] : vector<256x32xf32> to vector<256xf32>
    %4 = vector.shape_cast %3 : vector<256xf32> to vector<256x1xf32>
    %cst_3 = arith.constant 3.200000e+01 : f32
    %5 = vector.broadcast %cst_3 : f32 to vector<256x1xf32>
    %6 = arith.divf %4, %5 : vector<256x1xf32>
    %7 = vector.broadcast %6 : vector<256x1xf32> to vector<256x32xf32>
    %8 = arith.subf %2, %7 : vector<256x32xf32>
    %9 = arith.mulf %8, %8 : vector<256x32xf32>
    %cst_4 = arith.constant dense<0.000000e+00> : vector<256xf32>
    %10 = vector.multi_reduction <add>, %9, %cst_4 [1] : vector<256x32xf32> to vector<256xf32>
    %11 = vector.shape_cast %10 : vector<256xf32> to vector<256x1xf32>
    %cst_5 = arith.constant 3.200000e+01 : f32
    %12 = vector.broadcast %cst_5 : f32 to vector<256x1xf32>
    %13 = arith.divf %11, %12 : vector<256x1xf32>
    %14 = vector.broadcast %6 : vector<256x1xf32> to vector<256x32xf32>
    %15 = arith.subf %2, %14 : vector<256x32xf32>
    %cst_6 = arith.constant 9.99999974E-6 : f32
    %16 = vector.broadcast %cst_6 : f32 to vector<256x1xf32>
    %17 = arith.addf %13, %16 : vector<256x1xf32>
    %18 = math.rsqrt %17 : vector<256x1xf32>
    %19 = vector.broadcast %18 : vector<256x1xf32> to vector<256x32xf32>
    %20 = arith.mulf %15, %19 : vector<256x32xf32>
    %c0_7 = arith.constant 0 : index
    %c0_8 = arith.constant 0 : index
    %21 = vector.load %arg3[%c0_7, %c0_8] : memref<1x32xf32, #tpu.memory_space<vmem>>, vector<1x32xf32>
    %22 = vector.broadcast %21 : vector<1x32xf32> to vector<256x32xf32>
    %23 = arith.mulf %20, %22 : vector<256x32xf32>
    %c0_9 = arith.constant 0 : index
    %c0_10 = arith.constant 0 : index
    %24 = vector.load %arg4[%c0_9, %c0_10] : memref<1x32xf32, #tpu.memory_space<vmem>>, vector<1x32xf32>
    %25 = vector.broadcast %24 : vector<1x32xf32> to vector<256x32xf32>
    %26 = arith.addf %23, %25 : vector<256x32xf32>
    %27 = arith.truncf %26 : vector<256x32xf32> to vector<256x32xbf16>
    %c0_11 = arith.constant 0 : index
    %c0_12 = arith.constant 0 : index
    %28 = vector.load %arg5[%c0_11, %c0_12] : memref<32x96xbf16, #tpu.memory_space<vmem>>, vector<32x96xbf16>
    %cst_13 = arith.constant dense<0.000000e+00> : vector<256x96xf32>
    %29 = tpu.matmul %27, %28, %cst_13 {dimension_numbers = #tpu.dot_dimension_numbers<[1], [0], [0], [1], [0, 0, 1, 1], [], []>} : vector<256x32xbf16>, vector<32x96xbf16>, vector<256x96xf32> -> vector<256x96xf32>
    %c0_14 = arith.constant 0 : index
    %c0_15 = arith.constant 0 : index
    %30 = vector.load %arg6[%c0_14, %c0_15] : memref<1x96xf32, #tpu.memory_space<vmem>>, vector<1x96xf32>
    %31 = vector.broadcast %30 : vector<1x96xf32> to vector<256x96xf32>
    %32 = arith.addf %29, %31 : vector<256x96xf32>
    %33 = vector.shape_cast %32 : vector<256x96xf32> to vector<16x16x96xf32>
    %34 = vector.extract_strided_slice %33 {offsets = [0, 0, 0], sizes = [16, 4, 96], strides = [1, 1, 1]} : vector<16x16x96xf32> to vector<16x4x96xf32>
    %35 = vector.shape_cast %34 : vector<16x4x96xf32> to vector<4x16x96xf32>
    %cst_16 = arith.constant 0.000000e+00 : f32
    %36 = vector.broadcast %cst_16 : f32 to vector<64x32xf32>
    %37 = vector.extract_strided_slice %35 {offsets = [0, 0, 0], sizes = [4, 16, 8], strides = [1, 1, 1]} : vector<4x16x96xf32> to vector<4x16x8xf32>
    %cst_17 = arith.constant 0.353553385 : f32
    %38 = vector.broadcast %cst_17 : f32 to vector<4x16x8xf32>
    %39 = arith.mulf %37, %38 : vector<4x16x8xf32>
    %40 = vector.extract_strided_slice %35 {offsets = [0, 0, 32], sizes = [4, 16, 8], strides = [1, 1, 1]} : vector<4x16x96xf32> to vector<4x16x8xf32>
    %41 = vector.extract_strided_slice %35 {offsets = [0, 0, 64], sizes = [4, 16, 8], strides = [1, 1, 1]} : vector<4x16x96xf32> to vector<4x16x8xf32>
    %42 = arith.truncf %39 : vector<4x16x8xf32> to vector<4x16x8xbf16>
    %43 = arith.truncf %40 : vector<4x16x8xf32> to vector<4x16x8xbf16>
    "tpu.trace_start"() <{level = 10 : i32, message = "wqd,wkd->wqk"}> : () -> ()
    %cst_18 = arith.constant dense<0.000000e+00> : vector<4x16x16xf32>
    %44 = tpu.matmul %42, %43, %cst_18 {dimension_numbers = #tpu.dot_dimension_numbers<[2], [2], [1], [1], [0, 0, 0, 1, 1, 1], [0], [0]>} : vector<4x16x8xbf16>, vector<4x16x8xbf16>, vector<4x16x16xf32> -> vector<4x16x16xf32>
    "tpu.trace_stop"() : () -> ()
    %c0_19 = arith.constant 0 : index
    %c0_20 = arith.constant 0 : index
    %c0_21 = arith.constant 0 : index
    %c0_22 = arith.constant 0 : index
    %45 = vector.load %arg9[%c0_19, %c0_20, %c0_21, %c0_22] : memref<1x64x16x16xf32, #tpu.memory_space<vmem>>, vector<1x4x16x16xf32>
    %46 = vector.shape_cast %45 : vector<1x4x16x16xf32> to vector<4x16x16xf32>
    %47 = arith.addf %44, %46 : vector<4x16x16xf32>
    %cst_23 = arith.constant dense<0xFF800000> : vector<4x16xf32>
    %48 = vector.multi_reduction <maximumf>, %47, %cst_23 [2] : vector<4x16x16xf32> to vector<4x16xf32>
    %49 = vector.shape_cast %48 : vector<4x16xf32> to vector<4x16x1xf32>
    %50 = vector.broadcast %49 : vector<4x16x1xf32> to vector<4x16x16xf32>
    %51 = arith.subf %47, %50 : vector<4x16x16xf32>
    %52 = math.exp %51 : vector<4x16x16xf32>
    %cst_24 = arith.constant dense<0.000000e+00> : vector<4x16xf32>
    %53 = vector.multi_reduction <add>, %52, %cst_24 [2] : vector<4x16x16xf32> to vector<4x16xf32>
    %54 = vector.shape_cast %53 : vector<4x16xf32> to vector<4x16x1xf32>
    %55 = tpu.reciprocal %54 {approx = true} : vector<4x16x1xf32> -> vector<4x16x1xf32>
    %56 = vector.broadcast %55 : vector<4x16x1xf32> to vector<4x16x16xf32>
    %57 = arith.mulf %52, %56 : vector<4x16x16xf32>
    %58 = arith.truncf %57 : vector<4x16x16xf32> to vector<4x16x16xbf16>
    %59 = arith.truncf %41 : vector<4x16x8xf32> to vector<4x16x8xbf16>
    "tpu.trace_start"() <{level = 10 : i32, message = "wqk,wkd->wqd"}> : () -> ()
    %cst_25 = arith.constant dense<0.000000e+00> : vector<4x16x8xf32>
    %60 = tpu.matmul %58, %59, %cst_25 {dimension_numbers = #tpu.dot_dimension_numbers<[2], [1], [1], [2], [0, 0, 0, 1, 1, 2], [0], [0]>} : vector<4x16x16xbf16>, vector<4x16x8xbf16>, vector<4x16x8xf32> -> vector<4x16x8xf32>
    "tpu.trace_stop"() : () -> ()
    %61 = vector.shape_cast %60 : vector<4x16x8xf32> to vector<64x8xf32>
    %62 = arith.truncf %61 : vector<64x8xf32> to vector<64x8xbf16>
    %c0_26 = arith.constant 0 : index
    %c0_27 = arith.constant 0 : index
    %63 = vector.load %arg7[%c0_26, %c0_27] : memref<32x32xbf16, #tpu.memory_space<vmem>>, vector<8x32xbf16>
    %cst_28 = arith.constant dense<0.000000e+00> : vector<64x32xf32>
    %64 = tpu.matmul %62, %63, %cst_28 {dimension_numbers = #tpu.dot_dimension_numbers<[1], [0], [0], [1], [0, 0, 1, 1], [], []>} : vector<64x8xbf16>, vector<8x32xbf16>, vector<64x32xf32> -> vector<64x32xf32>
    %65 = arith.addf %36, %64 : vector<64x32xf32>
    %66 = vector.extract_strided_slice %35 {offsets = [0, 0, 8], sizes = [4, 16, 8], strides = [1, 1, 1]} : vector<4x16x96xf32> to vector<4x16x8xf32>
    %cst_29 = arith.constant 0.353553385 : f32
    %67 = vector.broadcast %cst_29 : f32 to vector<4x16x8xf32>
    %68 = arith.mulf %66, %67 : vector<4x16x8xf32>
    %69 = vector.extract_strided_slice %35 {offsets = [0, 0, 40], sizes = [4, 16, 8], strides = [1, 1, 1]} : vector<4x16x96xf32> to vector<4x16x8xf32>
    %70 = vector.extract_strided_slice %35 {offsets = [0, 0, 72], sizes = [4, 16, 8], strides = [1, 1, 1]} : vector<4x16x96xf32> to vector<4x16x8xf32>
    %71 = arith.truncf %68 : vector<4x16x8xf32> to vector<4x16x8xbf16>
    %72 = arith.truncf %69 : vector<4x16x8xf32> to vector<4x16x8xbf16>
    "tpu.trace_start"() <{level = 10 : i32, message = "wqd,wkd->wqk"}> : () -> ()
    %cst_30 = arith.constant dense<0.000000e+00> : vector<4x16x16xf32>
    %73 = tpu.matmul %71, %72, %cst_30 {dimension_numbers = #tpu.dot_dimension_numbers<[2], [2], [1], [1], [0, 0, 0, 1, 1, 1], [0], [0]>} : vector<4x16x8xbf16>, vector<4x16x8xbf16>, vector<4x16x16xf32> -> vector<4x16x16xf32>
    "tpu.trace_stop"() : () -> ()
    %c0_31 = arith.constant 0 : index
    %c4 = arith.constant 4 : index
    %c0_32 = arith.constant 0 : index
    %c0_33 = arith.constant 0 : index
    %74 = vector.load %arg9[%c0_31, %c4, %c0_32, %c0_33] : memref<1x64x16x16xf32, #tpu.memory_space<vmem>>, vector<1x4x16x16xf32>
    %75 = vector.shape_cast %74 : vector<1x4x16x16xf32> to vector<4x16x16xf32>
    %76 = arith.addf %73, %75 : vector<4x16x16xf32>
    %cst_34 = arith.constant dense<0xFF800000> : vector<4x16xf32>
    %77 = vector.multi_reduction <maximumf>, %76, %cst_34 [2] : vector<4x16x16xf32> to vector<4x16xf32>
    %78 = vector.shape_cast %77 : vector<4x16xf32> to vector<4x16x1xf32>
    %79 = vector.broadcast %78 : vector<4x16x1xf32> to vector<4x16x16xf32>
    %80 = arith.subf %76, %79 : vector<4x16x16xf32>
    %81 = math.exp %80 : vector<4x16x16xf32>
    %cst_35 = arith.constant dense<0.000000e+00> : vector<4x16xf32>
    %82 = vector.multi_reduction <add>, %81, %cst_35 [2] : vector<4x16x16xf32> to vector<4x16xf32>
    %83 = vector.shape_cast %82 : vector<4x16xf32> to vector<4x16x1xf32>
    %84 = tpu.reciprocal %83 {approx = true} : vector<4x16x1xf32> -> vector<4x16x1xf32>
    %85 = vector.broadcast %84 : vector<4x16x1xf32> to vector<4x16x16xf32>
    %86 = arith.mulf %81, %85 : vector<4x16x16xf32>
    %87 = arith.truncf %86 : vector<4x16x16xf32> to vector<4x16x16xbf16>
    %88 = arith.truncf %70 : vector<4x16x8xf32> to vector<4x16x8xbf16>
    "tpu.trace_start"() <{level = 10 : i32, message = "wqk,wkd->wqd"}> : () -> ()
    %cst_36 = arith.constant dense<0.000000e+00> : vector<4x16x8xf32>
    %89 = tpu.matmul %87, %88, %cst_36 {dimension_numbers = #tpu.dot_dimension_numbers<[2], [1], [1], [2], [0, 0, 0, 1, 1, 2], [0], [0]>} : vector<4x16x16xbf16>, vector<4x16x8xbf16>, vector<4x16x8xf32> -> vector<4x16x8xf32>
    "tpu.trace_stop"() : () -> ()
    %90 = vector.shape_cast %89 : vector<4x16x8xf32> to vector<64x8xf32>
    %91 = arith.truncf %90 : vector<64x8xf32> to vector<64x8xbf16>
    %c8 = arith.constant 8 : index
    %c0_37 = arith.constant 0 : index
    %92 = vector.load %arg7[%c8, %c0_37] : memref<32x32xbf16, #tpu.memory_space<vmem>>, vector<8x32xbf16>
    %cst_38 = arith.constant dense<0.000000e+00> : vector<64x32xf32>
    %93 = tpu.matmul %91, %92, %cst_38 {dimension_numbers = #tpu.dot_dimension_numbers<[1], [0], [0], [1], [0, 0, 1, 1], [], []>} : vector<64x8xbf16>, vector<8x32xbf16>, vector<64x32xf32> -> vector<64x32xf32>
    %94 = arith.addf %65, %93 : vector<64x32xf32>
    %95 = vector.extract_strided_slice %35 {offsets = [0, 0, 16], sizes = [4, 16, 8], strides = [1, 1, 1]} : vector<4x16x96xf32> to vector<4x16x8xf32>
    %cst_39 = arith.constant 0.353553385 : f32
    %96 = vector.broadcast %cst_39 : f32 to vector<4x16x8xf32>
    %97 = arith.mulf %95, %96 : vector<4x16x8xf32>
    %98 = vector.extract_strided_slice %35 {offsets = [0, 0, 48], sizes = [4, 16, 8], strides = [1, 1, 1]} : vector<4x16x96xf32> to vector<4x16x8xf32>
    %99 = vector.extract_strided_slice %35 {offsets = [0, 0, 80], sizes = [4, 16, 8], strides = [1, 1, 1]} : vector<4x16x96xf32> to vector<4x16x8xf32>
    %100 = arith.truncf %97 : vector<4x16x8xf32> to vector<4x16x8xbf16>
    %101 = arith.truncf %98 : vector<4x16x8xf32> to vector<4x16x8xbf16>
    "tpu.trace_start"() <{level = 10 : i32, message = "wqd,wkd->wqk"}> : () -> ()
    %cst_40 = arith.constant dense<0.000000e+00> : vector<4x16x16xf32>
    %102 = tpu.matmul %100, %101, %cst_40 {dimension_numbers = #tpu.dot_dimension_numbers<[2], [2], [1], [1], [0, 0, 0, 1, 1, 1], [0], [0]>} : vector<4x16x8xbf16>, vector<4x16x8xbf16>, vector<4x16x16xf32> -> vector<4x16x16xf32>
    "tpu.trace_stop"() : () -> ()
    %c0_41 = arith.constant 0 : index
    %c8_42 = arith.constant 8 : index
    %c0_43 = arith.constant 0 : index
    %c0_44 = arith.constant 0 : index
    %103 = vector.load %arg9[%c0_41, %c8_42, %c0_43, %c0_44] : memref<1x64x16x16xf32, #tpu.memory_space<vmem>>, vector<1x4x16x16xf32>
    %104 = vector.shape_cast %103 : vector<1x4x16x16xf32> to vector<4x16x16xf32>
    %105 = arith.addf %102, %104 : vector<4x16x16xf32>
    %cst_45 = arith.constant dense<0xFF800000> : vector<4x16xf32>
    %106 = vector.multi_reduction <maximumf>, %105, %cst_45 [2] : vector<4x16x16xf32> to vector<4x16xf32>
    %107 = vector.shape_cast %106 : vector<4x16xf32> to vector<4x16x1xf32>
    %108 = vector.broadcast %107 : vector<4x16x1xf32> to vector<4x16x16xf32>
    %109 = arith.subf %105, %108 : vector<4x16x16xf32>
    %110 = math.exp %109 : vector<4x16x16xf32>
    %cst_46 = arith.constant dense<0.000000e+00> : vector<4x16xf32>
    %111 = vector.multi_reduction <add>, %110, %cst_46 [2] : vector<4x16x16xf32> to vector<4x16xf32>
    %112 = vector.shape_cast %111 : vector<4x16xf32> to vector<4x16x1xf32>
    %113 = tpu.reciprocal %112 {approx = true} : vector<4x16x1xf32> -> vector<4x16x1xf32>
    %114 = vector.broadcast %113 : vector<4x16x1xf32> to vector<4x16x16xf32>
    %115 = arith.mulf %110, %114 : vector<4x16x16xf32>
    %116 = arith.truncf %115 : vector<4x16x16xf32> to vector<4x16x16xbf16>
    %117 = arith.truncf %99 : vector<4x16x8xf32> to vector<4x16x8xbf16>
    "tpu.trace_start"() <{level = 10 : i32, message = "wqk,wkd->wqd"}> : () -> ()
    %cst_47 = arith.constant dense<0.000000e+00> : vector<4x16x8xf32>
    %118 = tpu.matmul %116, %117, %cst_47 {dimension_numbers = #tpu.dot_dimension_numbers<[2], [1], [1], [2], [0, 0, 0, 1, 1, 2], [0], [0]>} : vector<4x16x16xbf16>, vector<4x16x8xbf16>, vector<4x16x8xf32> -> vector<4x16x8xf32>
    "tpu.trace_stop"() : () -> ()
    %119 = vector.shape_cast %118 : vector<4x16x8xf32> to vector<64x8xf32>
    %120 = arith.truncf %119 : vector<64x8xf32> to vector<64x8xbf16>
    %c16 = arith.constant 16 : index
    %c0_48 = arith.constant 0 : index
    %121 = vector.load %arg7[%c16, %c0_48] : memref<32x32xbf16, #tpu.memory_space<vmem>>, vector<8x32xbf16>
    %cst_49 = arith.constant dense<0.000000e+00> : vector<64x32xf32>
    %122 = tpu.matmul %120, %121, %cst_49 {dimension_numbers = #tpu.dot_dimension_numbers<[1], [0], [0], [1], [0, 0, 1, 1], [], []>} : vector<64x8xbf16>, vector<8x32xbf16>, vector<64x32xf32> -> vector<64x32xf32>
    %123 = arith.addf %94, %122 : vector<64x32xf32>
    %124 = vector.extract_strided_slice %35 {offsets = [0, 0, 24], sizes = [4, 16, 8], strides = [1, 1, 1]} : vector<4x16x96xf32> to vector<4x16x8xf32>
    %cst_50 = arith.constant 0.353553385 : f32
    %125 = vector.broadcast %cst_50 : f32 to vector<4x16x8xf32>
    %126 = arith.mulf %124, %125 : vector<4x16x8xf32>
    %127 = vector.extract_strided_slice %35 {offsets = [0, 0, 56], sizes = [4, 16, 8], strides = [1, 1, 1]} : vector<4x16x96xf32> to vector<4x16x8xf32>
    %128 = vector.extract_strided_slice %35 {offsets = [0, 0, 88], sizes = [4, 16, 8], strides = [1, 1, 1]} : vector<4x16x96xf32> to vector<4x16x8xf32>
    %129 = arith.truncf %126 : vector<4x16x8xf32> to vector<4x16x8xbf16>
    %130 = arith.truncf %127 : vector<4x16x8xf32> to vector<4x16x8xbf16>
    "tpu.trace_start"() <{level = 10 : i32, message = "wqd,wkd->wqk"}> : () -> ()
    %cst_51 = arith.constant dense<0.000000e+00> : vector<4x16x16xf32>
    %131 = tpu.matmul %129, %130, %cst_51 {dimension_numbers = #tpu.dot_dimension_numbers<[2], [2], [1], [1], [0, 0, 0, 1, 1, 1], [0], [0]>} : vector<4x16x8xbf16>, vector<4x16x8xbf16>, vector<4x16x16xf32> -> vector<4x16x16xf32>
    "tpu.trace_stop"() : () -> ()
    %c0_52 = arith.constant 0 : index
    %c12 = arith.constant 12 : index
    %c0_53 = arith.constant 0 : index
    %c0_54 = arith.constant 0 : index
    %132 = vector.load %arg9[%c0_52, %c12, %c0_53, %c0_54] : memref<1x64x16x16xf32, #tpu.memory_space<vmem>>, vector<1x4x16x16xf32>
    %133 = vector.shape_cast %132 : vector<1x4x16x16xf32> to vector<4x16x16xf32>
    %134 = arith.addf %131, %133 : vector<4x16x16xf32>
    %cst_55 = arith.constant dense<0xFF800000> : vector<4x16xf32>
    %135 = vector.multi_reduction <maximumf>, %134, %cst_55 [2] : vector<4x16x16xf32> to vector<4x16xf32>
    %136 = vector.shape_cast %135 : vector<4x16xf32> to vector<4x16x1xf32>
    %137 = vector.broadcast %136 : vector<4x16x1xf32> to vector<4x16x16xf32>
    %138 = arith.subf %134, %137 : vector<4x16x16xf32>
    %139 = math.exp %138 : vector<4x16x16xf32>
    %cst_56 = arith.constant dense<0.000000e+00> : vector<4x16xf32>
    %140 = vector.multi_reduction <add>, %139, %cst_56 [2] : vector<4x16x16xf32> to vector<4x16xf32>
    %141 = vector.shape_cast %140 : vector<4x16xf32> to vector<4x16x1xf32>
    %142 = tpu.reciprocal %141 {approx = true} : vector<4x16x1xf32> -> vector<4x16x1xf32>
    %143 = vector.broadcast %142 : vector<4x16x1xf32> to vector<4x16x16xf32>
    %144 = arith.mulf %139, %143 : vector<4x16x16xf32>
    %145 = arith.truncf %144 : vector<4x16x16xf32> to vector<4x16x16xbf16>
    %146 = arith.truncf %128 : vector<4x16x8xf32> to vector<4x16x8xbf16>
    "tpu.trace_start"() <{level = 10 : i32, message = "wqk,wkd->wqd"}> : () -> ()
    %cst_57 = arith.constant dense<0.000000e+00> : vector<4x16x8xf32>
    %147 = tpu.matmul %145, %146, %cst_57 {dimension_numbers = #tpu.dot_dimension_numbers<[2], [1], [1], [2], [0, 0, 0, 1, 1, 2], [0], [0]>} : vector<4x16x16xbf16>, vector<4x16x8xbf16>, vector<4x16x8xf32> -> vector<4x16x8xf32>
    "tpu.trace_stop"() : () -> ()
    %148 = vector.shape_cast %147 : vector<4x16x8xf32> to vector<64x8xf32>
    %149 = arith.truncf %148 : vector<64x8xf32> to vector<64x8xbf16>
    %c24 = arith.constant 24 : index
    %c0_58 = arith.constant 0 : index
    %150 = vector.load %arg7[%c24, %c0_58] : memref<32x32xbf16, #tpu.memory_space<vmem>>, vector<8x32xbf16>
    %cst_59 = arith.constant dense<0.000000e+00> : vector<64x32xf32>
    %151 = tpu.matmul %149, %150, %cst_59 {dimension_numbers = #tpu.dot_dimension_numbers<[1], [0], [0], [1], [0, 0, 1, 1], [], []>} : vector<64x8xbf16>, vector<8x32xbf16>, vector<64x32xf32> -> vector<64x32xf32>
    %152 = arith.addf %123, %151 : vector<64x32xf32>
    %c0_60 = arith.constant 0 : index
    %c0_61 = arith.constant 0 : index
    %153 = vector.load %arg8[%c0_60, %c0_61] : memref<1x32xf32, #tpu.memory_space<vmem>>, vector<1x32xf32>
    %154 = vector.broadcast %153 : vector<1x32xf32> to vector<64x32xf32>
    %155 = arith.addf %152, %154 : vector<64x32xf32>
    %156 = vector.extract_strided_slice %1 {offsets = [0, 0, 0], sizes = [16, 4, 32], strides = [1, 1, 1]} : vector<16x16x32xf32> to vector<16x4x32xf32>
    %157 = vector.shape_cast %156 : vector<16x4x32xf32> to vector<64x32xf32>
    %158 = arith.addf %155, %157 : vector<64x32xf32>
    %159 = vector.extract_strided_slice %33 {offsets = [0, 4, 0], sizes = [16, 4, 96], strides = [1, 1, 1]} : vector<16x16x96xf32> to vector<16x4x96xf32>
    %160 = vector.shape_cast %159 : vector<16x4x96xf32> to vector<4x16x96xf32>
    %cst_62 = arith.constant 0.000000e+00 : f32
    %161 = vector.broadcast %cst_62 : f32 to vector<64x32xf32>
    %162 = vector.extract_strided_slice %160 {offsets = [0, 0, 0], sizes = [4, 16, 8], strides = [1, 1, 1]} : vector<4x16x96xf32> to vector<4x16x8xf32>
    %cst_63 = arith.constant 0.353553385 : f32
    %163 = vector.broadcast %cst_63 : f32 to vector<4x16x8xf32>
    %164 = arith.mulf %162, %163 : vector<4x16x8xf32>
    %165 = vector.extract_strided_slice %160 {offsets = [0, 0, 32], sizes = [4, 16, 8], strides = [1, 1, 1]} : vector<4x16x96xf32> to vector<4x16x8xf32>
    %166 = vector.extract_strided_slice %160 {offsets = [0, 0, 64], sizes = [4, 16, 8], strides = [1, 1, 1]} : vector<4x16x96xf32> to vector<4x16x8xf32>
    %167 = arith.truncf %164 : vector<4x16x8xf32> to vector<4x16x8xbf16>
    %168 = arith.truncf %165 : vector<4x16x8xf32> to vector<4x16x8xbf16>
    "tpu.trace_start"() <{level = 10 : i32, message = "wqd,wkd->wqk"}> : () -> ()
    %cst_64 = arith.constant dense<0.000000e+00> : vector<4x16x16xf32>
    %169 = tpu.matmul %167, %168, %cst_64 {dimension_numbers = #tpu.dot_dimension_numbers<[2], [2], [1], [1], [0, 0, 0, 1, 1, 1], [0], [0]>} : vector<4x16x8xbf16>, vector<4x16x8xbf16>, vector<4x16x16xf32> -> vector<4x16x16xf32>
    "tpu.trace_stop"() : () -> ()
    %c0_65 = arith.constant 0 : index
    %c16_66 = arith.constant 16 : index
    %c0_67 = arith.constant 0 : index
    %c0_68 = arith.constant 0 : index
    %170 = vector.load %arg9[%c0_65, %c16_66, %c0_67, %c0_68] : memref<1x64x16x16xf32, #tpu.memory_space<vmem>>, vector<1x4x16x16xf32>
    %171 = vector.shape_cast %170 : vector<1x4x16x16xf32> to vector<4x16x16xf32>
    %172 = arith.addf %169, %171 : vector<4x16x16xf32>
    %cst_69 = arith.constant dense<0xFF800000> : vector<4x16xf32>
    %173 = vector.multi_reduction <maximumf>, %172, %cst_69 [2] : vector<4x16x16xf32> to vector<4x16xf32>
    %174 = vector.shape_cast %173 : vector<4x16xf32> to vector<4x16x1xf32>
    %175 = vector.broadcast %174 : vector<4x16x1xf32> to vector<4x16x16xf32>
    %176 = arith.subf %172, %175 : vector<4x16x16xf32>
    %177 = math.exp %176 : vector<4x16x16xf32>
    %cst_70 = arith.constant dense<0.000000e+00> : vector<4x16xf32>
    %178 = vector.multi_reduction <add>, %177, %cst_70 [2] : vector<4x16x16xf32> to vector<4x16xf32>
    %179 = vector.shape_cast %178 : vector<4x16xf32> to vector<4x16x1xf32>
    %180 = tpu.reciprocal %179 {approx = true} : vector<4x16x1xf32> -> vector<4x16x1xf32>
    %181 = vector.broadcast %180 : vector<4x16x1xf32> to vector<4x16x16xf32>
    %182 = arith.mulf %177, %181 : vector<4x16x16xf32>
    %183 = arith.truncf %182 : vector<4x16x16xf32> to vector<4x16x16xbf16>
    %184 = arith.truncf %166 : vector<4x16x8xf32> to vector<4x16x8xbf16>
    "tpu.trace_start"() <{level = 10 : i32, message = "wqk,wkd->wqd"}> : () -> ()
    %cst_71 = arith.constant dense<0.000000e+00> : vector<4x16x8xf32>
    %185 = tpu.matmul %183, %184, %cst_71 {dimension_numbers = #tpu.dot_dimension_numbers<[2], [1], [1], [2], [0, 0, 0, 1, 1, 2], [0], [0]>} : vector<4x16x16xbf16>, vector<4x16x8xbf16>, vector<4x16x8xf32> -> vector<4x16x8xf32>
    "tpu.trace_stop"() : () -> ()
    %186 = vector.shape_cast %185 : vector<4x16x8xf32> to vector<64x8xf32>
    %187 = arith.truncf %186 : vector<64x8xf32> to vector<64x8xbf16>
    %c0_72 = arith.constant 0 : index
    %c0_73 = arith.constant 0 : index
    %188 = vector.load %arg7[%c0_72, %c0_73] : memref<32x32xbf16, #tpu.memory_space<vmem>>, vector<8x32xbf16>
    %cst_74 = arith.constant dense<0.000000e+00> : vector<64x32xf32>
    %189 = tpu.matmul %187, %188, %cst_74 {dimension_numbers = #tpu.dot_dimension_numbers<[1], [0], [0], [1], [0, 0, 1, 1], [], []>} : vector<64x8xbf16>, vector<8x32xbf16>, vector<64x32xf32> -> vector<64x32xf32>
    %190 = arith.addf %161, %189 : vector<64x32xf32>
    %191 = vector.extract_strided_slice %160 {offsets = [0, 0, 8], sizes = [4, 16, 8], strides = [1, 1, 1]} : vector<4x16x96xf32> to vector<4x16x8xf32>
    %cst_75 = arith.constant 0.353553385 : f32
    %192 = vector.broadcast %cst_75 : f32 to vector<4x16x8xf32>
    %193 = arith.mulf %191, %192 : vector<4x16x8xf32>
    %194 = vector.extract_strided_slice %160 {offsets = [0, 0, 40], sizes = [4, 16, 8], strides = [1, 1, 1]} : vector<4x16x96xf32> to vector<4x16x8xf32>
    %195 = vector.extract_strided_slice %160 {offsets = [0, 0, 72], sizes = [4, 16, 8], strides = [1, 1, 1]} : vector<4x16x96xf32> to vector<4x16x8xf32>
    %196 = arith.truncf %193 : vector<4x16x8xf32> to vector<4x16x8xbf16>
    %197 = arith.truncf %194 : vector<4x16x8xf32> to vector<4x16x8xbf16>
    "tpu.trace_start"() <{level = 10 : i32, message = "wqd,wkd->wqk"}> : () -> ()
    %cst_76 = arith.constant dense<0.000000e+00> : vector<4x16x16xf32>
    %198 = tpu.matmul %196, %197, %cst_76 {dimension_numbers = #tpu.dot_dimension_numbers<[2], [2], [1], [1], [0, 0, 0, 1, 1, 1], [0], [0]>} : vector<4x16x8xbf16>, vector<4x16x8xbf16>, vector<4x16x16xf32> -> vector<4x16x16xf32>
    "tpu.trace_stop"() : () -> ()
    %c0_77 = arith.constant 0 : index
    %c20 = arith.constant 20 : index
    %c0_78 = arith.constant 0 : index
    %c0_79 = arith.constant 0 : index
    %199 = vector.load %arg9[%c0_77, %c20, %c0_78, %c0_79] : memref<1x64x16x16xf32, #tpu.memory_space<vmem>>, vector<1x4x16x16xf32>
    %200 = vector.shape_cast %199 : vector<1x4x16x16xf32> to vector<4x16x16xf32>
    %201 = arith.addf %198, %200 : vector<4x16x16xf32>
    %cst_80 = arith.constant dense<0xFF800000> : vector<4x16xf32>
    %202 = vector.multi_reduction <maximumf>, %201, %cst_80 [2] : vector<4x16x16xf32> to vector<4x16xf32>
    %203 = vector.shape_cast %202 : vector<4x16xf32> to vector<4x16x1xf32>
    %204 = vector.broadcast %203 : vector<4x16x1xf32> to vector<4x16x16xf32>
    %205 = arith.subf %201, %204 : vector<4x16x16xf32>
    %206 = math.exp %205 : vector<4x16x16xf32>
    %cst_81 = arith.constant dense<0.000000e+00> : vector<4x16xf32>
    %207 = vector.multi_reduction <add>, %206, %cst_81 [2] : vector<4x16x16xf32> to vector<4x16xf32>
    %208 = vector.shape_cast %207 : vector<4x16xf32> to vector<4x16x1xf32>
    %209 = tpu.reciprocal %208 {approx = true} : vector<4x16x1xf32> -> vector<4x16x1xf32>
    %210 = vector.broadcast %209 : vector<4x16x1xf32> to vector<4x16x16xf32>
    %211 = arith.mulf %206, %210 : vector<4x16x16xf32>
    %212 = arith.truncf %211 : vector<4x16x16xf32> to vector<4x16x16xbf16>
    %213 = arith.truncf %195 : vector<4x16x8xf32> to vector<4x16x8xbf16>
    "tpu.trace_start"() <{level = 10 : i32, message = "wqk,wkd->wqd"}> : () -> ()
    %cst_82 = arith.constant dense<0.000000e+00> : vector<4x16x8xf32>
    %214 = tpu.matmul %212, %213, %cst_82 {dimension_numbers = #tpu.dot_dimension_numbers<[2], [1], [1], [2], [0, 0, 0, 1, 1, 2], [0], [0]>} : vector<4x16x16xbf16>, vector<4x16x8xbf16>, vector<4x16x8xf32> -> vector<4x16x8xf32>
    "tpu.trace_stop"() : () -> ()
    %215 = vector.shape_cast %214 : vector<4x16x8xf32> to vector<64x8xf32>
    %216 = arith.truncf %215 : vector<64x8xf32> to vector<64x8xbf16>
    %c8_83 = arith.constant 8 : index
    %c0_84 = arith.constant 0 : index
    %217 = vector.load %arg7[%c8_83, %c0_84] : memref<32x32xbf16, #tpu.memory_space<vmem>>, vector<8x32xbf16>
    %cst_85 = arith.constant dense<0.000000e+00> : vector<64x32xf32>
    %218 = tpu.matmul %216, %217, %cst_85 {dimension_numbers = #tpu.dot_dimension_numbers<[1], [0], [0], [1], [0, 0, 1, 1], [], []>} : vector<64x8xbf16>, vector<8x32xbf16>, vector<64x32xf32> -> vector<64x32xf32>
    %219 = arith.addf %190, %218 : vector<64x32xf32>
    %220 = vector.extract_strided_slice %160 {offsets = [0, 0, 16], sizes = [4, 16, 8], strides = [1, 1, 1]} : vector<4x16x96xf32> to vector<4x16x8xf32>
    %cst_86 = arith.constant 0.353553385 : f32
    %221 = vector.broadcast %cst_86 : f32 to vector<4x16x8xf32>
    %222 = arith.mulf %220, %221 : vector<4x16x8xf32>
    %223 = vector.extract_strided_slice %160 {offsets = [0, 0, 48], sizes = [4, 16, 8], strides = [1, 1, 1]} : vector<4x16x96xf32> to vector<4x16x8xf32>
    %224 = vector.extract_strided_slice %160 {offsets = [0, 0, 80], sizes = [4, 16, 8], strides = [1, 1, 1]} : vector<4x16x96xf32> to vector<4x16x8xf32>
    %225 = arith.truncf %222 : vector<4x16x8xf32> to vector<4x16x8xbf16>
    %226 = arith.truncf %223 : vector<4x16x8xf32> to vector<4x16x8xbf16>
    "tpu.trace_start"() <{level = 10 : i32, message = "wqd,wkd->wqk"}> : () -> ()
    %cst_87 = arith.constant dense<0.000000e+00> : vector<4x16x16xf32>
    %227 = tpu.matmul %225, %226, %cst_87 {dimension_numbers = #tpu.dot_dimension_numbers<[2], [2], [1], [1], [0, 0, 0, 1, 1, 1], [0], [0]>} : vector<4x16x8xbf16>, vector<4x16x8xbf16>, vector<4x16x16xf32> -> vector<4x16x16xf32>
    "tpu.trace_stop"() : () -> ()
    %c0_88 = arith.constant 0 : index
    %c24_89 = arith.constant 24 : index
    %c0_90 = arith.constant 0 : index
    %c0_91 = arith.constant 0 : index
    %228 = vector.load %arg9[%c0_88, %c24_89, %c0_90, %c0_91] : memref<1x64x16x16xf32, #tpu.memory_space<vmem>>, vector<1x4x16x16xf32>
    %229 = vector.shape_cast %228 : vector<1x4x16x16xf32> to vector<4x16x16xf32>
    %230 = arith.addf %227, %229 : vector<4x16x16xf32>
    %cst_92 = arith.constant dense<0xFF800000> : vector<4x16xf32>
    %231 = vector.multi_reduction <maximumf>, %230, %cst_92 [2] : vector<4x16x16xf32> to vector<4x16xf32>
    %232 = vector.shape_cast %231 : vector<4x16xf32> to vector<4x16x1xf32>
    %233 = vector.broadcast %232 : vector<4x16x1xf32> to vector<4x16x16xf32>
    %234 = arith.subf %230, %233 : vector<4x16x16xf32>
    %235 = math.exp %234 : vector<4x16x16xf32>
    %cst_93 = arith.constant dense<0.000000e+00> : vector<4x16xf32>
    %236 = vector.multi_reduction <add>, %235, %cst_93 [2] : vector<4x16x16xf32> to vector<4x16xf32>
    %237 = vector.shape_cast %236 : vector<4x16xf32> to vector<4x16x1xf32>
    %238 = tpu.reciprocal %237 {approx = true} : vector<4x16x1xf32> -> vector<4x16x1xf32>
    %239 = vector.broadcast %238 : vector<4x16x1xf32> to vector<4x16x16xf32>
    %240 = arith.mulf %235, %239 : vector<4x16x16xf32>
    %241 = arith.truncf %240 : vector<4x16x16xf32> to vector<4x16x16xbf16>
    %242 = arith.truncf %224 : vector<4x16x8xf32> to vector<4x16x8xbf16>
    "tpu.trace_start"() <{level = 10 : i32, message = "wqk,wkd->wqd"}> : () -> ()
    %cst_94 = arith.constant dense<0.000000e+00> : vector<4x16x8xf32>
    %243 = tpu.matmul %241, %242, %cst_94 {dimension_numbers = #tpu.dot_dimension_numbers<[2], [1], [1], [2], [0, 0, 0, 1, 1, 2], [0], [0]>} : vector<4x16x16xbf16>, vector<4x16x8xbf16>, vector<4x16x8xf32> -> vector<4x16x8xf32>
    "tpu.trace_stop"() : () -> ()
    %244 = vector.shape_cast %243 : vector<4x16x8xf32> to vector<64x8xf32>
    %245 = arith.truncf %244 : vector<64x8xf32> to vector<64x8xbf16>
    %c16_95 = arith.constant 16 : index
    %c0_96 = arith.constant 0 : index
    %246 = vector.load %arg7[%c16_95, %c0_96] : memref<32x32xbf16, #tpu.memory_space<vmem>>, vector<8x32xbf16>
    %cst_97 = arith.constant dense<0.000000e+00> : vector<64x32xf32>
    %247 = tpu.matmul %245, %246, %cst_97 {dimension_numbers = #tpu.dot_dimension_numbers<[1], [0], [0], [1], [0, 0, 1, 1], [], []>} : vector<64x8xbf16>, vector<8x32xbf16>, vector<64x32xf32> -> vector<64x32xf32>
    %248 = arith.addf %219, %247 : vector<64x32xf32>
    %249 = vector.extract_strided_slice %160 {offsets = [0, 0, 24], sizes = [4, 16, 8], strides = [1, 1, 1]} : vector<4x16x96xf32> to vector<4x16x8xf32>
    %cst_98 = arith.constant 0.353553385 : f32
    %250 = vector.broadcast %cst_98 : f32 to vector<4x16x8xf32>
    %251 = arith.mulf %249, %250 : vector<4x16x8xf32>
    %252 = vector.extract_strided_slice %160 {offsets = [0, 0, 56], sizes = [4, 16, 8], strides = [1, 1, 1]} : vector<4x16x96xf32> to vector<4x16x8xf32>
    %253 = vector.extract_strided_slice %160 {offsets = [0, 0, 88], sizes = [4, 16, 8], strides = [1, 1, 1]} : vector<4x16x96xf32> to vector<4x16x8xf32>
    %254 = arith.truncf %251 : vector<4x16x8xf32> to vector<4x16x8xbf16>
    %255 = arith.truncf %252 : vector<4x16x8xf32> to vector<4x16x8xbf16>
    "tpu.trace_start"() <{level = 10 : i32, message = "wqd,wkd->wqk"}> : () -> ()
    %cst_99 = arith.constant dense<0.000000e+00> : vector<4x16x16xf32>
    %256 = tpu.matmul %254, %255, %cst_99 {dimension_numbers = #tpu.dot_dimension_numbers<[2], [2], [1], [1], [0, 0, 0, 1, 1, 1], [0], [0]>} : vector<4x16x8xbf16>, vector<4x16x8xbf16>, vector<4x16x16xf32> -> vector<4x16x16xf32>
    "tpu.trace_stop"() : () -> ()
    %c0_100 = arith.constant 0 : index
    %c28 = arith.constant 28 : index
    %c0_101 = arith.constant 0 : index
    %c0_102 = arith.constant 0 : index
    %257 = vector.load %arg9[%c0_100, %c28, %c0_101, %c0_102] : memref<1x64x16x16xf32, #tpu.memory_space<vmem>>, vector<1x4x16x16xf32>
    %258 = vector.shape_cast %257 : vector<1x4x16x16xf32> to vector<4x16x16xf32>
    %259 = arith.addf %256, %258 : vector<4x16x16xf32>
    %cst_103 = arith.constant dense<0xFF800000> : vector<4x16xf32>
    %260 = vector.multi_reduction <maximumf>, %259, %cst_103 [2] : vector<4x16x16xf32> to vector<4x16xf32>
    %261 = vector.shape_cast %260 : vector<4x16xf32> to vector<4x16x1xf32>
    %262 = vector.broadcast %261 : vector<4x16x1xf32> to vector<4x16x16xf32>
    %263 = arith.subf %259, %262 : vector<4x16x16xf32>
    %264 = math.exp %263 : vector<4x16x16xf32>
    %cst_104 = arith.constant dense<0.000000e+00> : vector<4x16xf32>
    %265 = vector.multi_reduction <add>, %264, %cst_104 [2] : vector<4x16x16xf32> to vector<4x16xf32>
    %266 = vector.shape_cast %265 : vector<4x16xf32> to vector<4x16x1xf32>
    %267 = tpu.reciprocal %266 {approx = true} : vector<4x16x1xf32> -> vector<4x16x1xf32>
    %268 = vector.broadcast %267 : vector<4x16x1xf32> to vector<4x16x16xf32>
    %269 = arith.mulf %264, %268 : vector<4x16x16xf32>
    %270 = arith.truncf %269 : vector<4x16x16xf32> to vector<4x16x16xbf16>
    %271 = arith.truncf %253 : vector<4x16x8xf32> to vector<4x16x8xbf16>
    "tpu.trace_start"() <{level = 10 : i32, message = "wqk,wkd->wqd"}> : () -> ()
    %cst_105 = arith.constant dense<0.000000e+00> : vector<4x16x8xf32>
    %272 = tpu.matmul %270, %271, %cst_105 {dimension_numbers = #tpu.dot_dimension_numbers<[2], [1], [1], [2], [0, 0, 0, 1, 1, 2], [0], [0]>} : vector<4x16x16xbf16>, vector<4x16x8xbf16>, vector<4x16x8xf32> -> vector<4x16x8xf32>
    "tpu.trace_stop"() : () -> ()
    %273 = vector.shape_cast %272 : vector<4x16x8xf32> to vector<64x8xf32>
    %274 = arith.truncf %273 : vector<64x8xf32> to vector<64x8xbf16>
    %c24_106 = arith.constant 24 : index
    %c0_107 = arith.constant 0 : index
    %275 = vector.load %arg7[%c24_106, %c0_107] : memref<32x32xbf16, #tpu.memory_space<vmem>>, vector<8x32xbf16>
    %cst_108 = arith.constant dense<0.000000e+00> : vector<64x32xf32>
    %276 = tpu.matmul %274, %275, %cst_108 {dimension_numbers = #tpu.dot_dimension_numbers<[1], [0], [0], [1], [0, 0, 1, 1], [], []>} : vector<64x8xbf16>, vector<8x32xbf16>, vector<64x32xf32> -> vector<64x32xf32>
    %277 = arith.addf %248, %276 : vector<64x32xf32>
    %c0_109 = arith.constant 0 : index
    %c0_110 = arith.constant 0 : index
    %278 = vector.load %arg8[%c0_109, %c0_110] : memref<1x32xf32, #tpu.memory_space<vmem>>, vector<1x32xf32>
    %279 = vector.broadcast %278 : vector<1x32xf32> to vector<64x32xf32>
    %280 = arith.addf %277, %279 : vector<64x32xf32>
    %281 = vector.extract_strided_slice %1 {offsets = [0, 4, 0], sizes = [16, 4, 32], strides = [1, 1, 1]} : vector<16x16x32xf32> to vector<16x4x32xf32>
    %282 = vector.shape_cast %281 : vector<16x4x32xf32> to vector<64x32xf32>
    %283 = arith.addf %280, %282 : vector<64x32xf32>
    %284 = vector.extract_strided_slice %33 {offsets = [0, 8, 0], sizes = [16, 4, 96], strides = [1, 1, 1]} : vector<16x16x96xf32> to vector<16x4x96xf32>
    %285 = vector.shape_cast %284 : vector<16x4x96xf32> to vector<4x16x96xf32>
    %cst_111 = arith.constant 0.000000e+00 : f32
    %286 = vector.broadcast %cst_111 : f32 to vector<64x32xf32>
    %287 = vector.extract_strided_slice %285 {offsets = [0, 0, 0], sizes = [4, 16, 8], strides = [1, 1, 1]} : vector<4x16x96xf32> to vector<4x16x8xf32>
    %cst_112 = arith.constant 0.353553385 : f32
    %288 = vector.broadcast %cst_112 : f32 to vector<4x16x8xf32>
    %289 = arith.mulf %287, %288 : vector<4x16x8xf32>
    %290 = vector.extract_strided_slice %285 {offsets = [0, 0, 32], sizes = [4, 16, 8], strides = [1, 1, 1]} : vector<4x16x96xf32> to vector<4x16x8xf32>
    %291 = vector.extract_strided_slice %285 {offsets = [0, 0, 64], sizes = [4, 16, 8], strides = [1, 1, 1]} : vector<4x16x96xf32> to vector<4x16x8xf32>
    %292 = arith.truncf %289 : vector<4x16x8xf32> to vector<4x16x8xbf16>
    %293 = arith.truncf %290 : vector<4x16x8xf32> to vector<4x16x8xbf16>
    "tpu.trace_start"() <{level = 10 : i32, message = "wqd,wkd->wqk"}> : () -> ()
    %cst_113 = arith.constant dense<0.000000e+00> : vector<4x16x16xf32>
    %294 = tpu.matmul %292, %293, %cst_113 {dimension_numbers = #tpu.dot_dimension_numbers<[2], [2], [1], [1], [0, 0, 0, 1, 1, 1], [0], [0]>} : vector<4x16x8xbf16>, vector<4x16x8xbf16>, vector<4x16x16xf32> -> vector<4x16x16xf32>
    "tpu.trace_stop"() : () -> ()
    %c0_114 = arith.constant 0 : index
    %c32 = arith.constant 32 : index
    %c0_115 = arith.constant 0 : index
    %c0_116 = arith.constant 0 : index
    %295 = vector.load %arg9[%c0_114, %c32, %c0_115, %c0_116] : memref<1x64x16x16xf32, #tpu.memory_space<vmem>>, vector<1x4x16x16xf32>
    %296 = vector.shape_cast %295 : vector<1x4x16x16xf32> to vector<4x16x16xf32>
    %297 = arith.addf %294, %296 : vector<4x16x16xf32>
    %cst_117 = arith.constant dense<0xFF800000> : vector<4x16xf32>
    %298 = vector.multi_reduction <maximumf>, %297, %cst_117 [2] : vector<4x16x16xf32> to vector<4x16xf32>
    %299 = vector.shape_cast %298 : vector<4x16xf32> to vector<4x16x1xf32>
    %300 = vector.broadcast %299 : vector<4x16x1xf32> to vector<4x16x16xf32>
    %301 = arith.subf %297, %300 : vector<4x16x16xf32>
    %302 = math.exp %301 : vector<4x16x16xf32>
    %cst_118 = arith.constant dense<0.000000e+00> : vector<4x16xf32>
    %303 = vector.multi_reduction <add>, %302, %cst_118 [2] : vector<4x16x16xf32> to vector<4x16xf32>
    %304 = vector.shape_cast %303 : vector<4x16xf32> to vector<4x16x1xf32>
    %305 = tpu.reciprocal %304 {approx = true} : vector<4x16x1xf32> -> vector<4x16x1xf32>
    %306 = vector.broadcast %305 : vector<4x16x1xf32> to vector<4x16x16xf32>
    %307 = arith.mulf %302, %306 : vector<4x16x16xf32>
    %308 = arith.truncf %307 : vector<4x16x16xf32> to vector<4x16x16xbf16>
    %309 = arith.truncf %291 : vector<4x16x8xf32> to vector<4x16x8xbf16>
    "tpu.trace_start"() <{level = 10 : i32, message = "wqk,wkd->wqd"}> : () -> ()
    %cst_119 = arith.constant dense<0.000000e+00> : vector<4x16x8xf32>
    %310 = tpu.matmul %308, %309, %cst_119 {dimension_numbers = #tpu.dot_dimension_numbers<[2], [1], [1], [2], [0, 0, 0, 1, 1, 2], [0], [0]>} : vector<4x16x16xbf16>, vector<4x16x8xbf16>, vector<4x16x8xf32> -> vector<4x16x8xf32>
    "tpu.trace_stop"() : () -> ()
    %311 = vector.shape_cast %310 : vector<4x16x8xf32> to vector<64x8xf32>
    %312 = arith.truncf %311 : vector<64x8xf32> to vector<64x8xbf16>
    %c0_120 = arith.constant 0 : index
    %c0_121 = arith.constant 0 : index
    %313 = vector.load %arg7[%c0_120, %c0_121] : memref<32x32xbf16, #tpu.memory_space<vmem>>, vector<8x32xbf16>
    %cst_122 = arith.constant dense<0.000000e+00> : vector<64x32xf32>
    %314 = tpu.matmul %312, %313, %cst_122 {dimension_numbers = #tpu.dot_dimension_numbers<[1], [0], [0], [1], [0, 0, 1, 1], [], []>} : vector<64x8xbf16>, vector<8x32xbf16>, vector<64x32xf32> -> vector<64x32xf32>
    %315 = arith.addf %286, %314 : vector<64x32xf32>
    %316 = vector.extract_strided_slice %285 {offsets = [0, 0, 8], sizes = [4, 16, 8], strides = [1, 1, 1]} : vector<4x16x96xf32> to vector<4x16x8xf32>
    %cst_123 = arith.constant 0.353553385 : f32
    %317 = vector.broadcast %cst_123 : f32 to vector<4x16x8xf32>
    %318 = arith.mulf %316, %317 : vector<4x16x8xf32>
    %319 = vector.extract_strided_slice %285 {offsets = [0, 0, 40], sizes = [4, 16, 8], strides = [1, 1, 1]} : vector<4x16x96xf32> to vector<4x16x8xf32>
    %320 = vector.extract_strided_slice %285 {offsets = [0, 0, 72], sizes = [4, 16, 8], strides = [1, 1, 1]} : vector<4x16x96xf32> to vector<4x16x8xf32>
    %321 = arith.truncf %318 : vector<4x16x8xf32> to vector<4x16x8xbf16>
    %322 = arith.truncf %319 : vector<4x16x8xf32> to vector<4x16x8xbf16>
    "tpu.trace_start"() <{level = 10 : i32, message = "wqd,wkd->wqk"}> : () -> ()
    %cst_124 = arith.constant dense<0.000000e+00> : vector<4x16x16xf32>
    %323 = tpu.matmul %321, %322, %cst_124 {dimension_numbers = #tpu.dot_dimension_numbers<[2], [2], [1], [1], [0, 0, 0, 1, 1, 1], [0], [0]>} : vector<4x16x8xbf16>, vector<4x16x8xbf16>, vector<4x16x16xf32> -> vector<4x16x16xf32>
    "tpu.trace_stop"() : () -> ()
    %c0_125 = arith.constant 0 : index
    %c36 = arith.constant 36 : index
    %c0_126 = arith.constant 0 : index
    %c0_127 = arith.constant 0 : index
    %324 = vector.load %arg9[%c0_125, %c36, %c0_126, %c0_127] : memref<1x64x16x16xf32, #tpu.memory_space<vmem>>, vector<1x4x16x16xf32>
    %325 = vector.shape_cast %324 : vector<1x4x16x16xf32> to vector<4x16x16xf32>
    %326 = arith.addf %323, %325 : vector<4x16x16xf32>
    %cst_128 = arith.constant dense<0xFF800000> : vector<4x16xf32>
    %327 = vector.multi_reduction <maximumf>, %326, %cst_128 [2] : vector<4x16x16xf32> to vector<4x16xf32>
    %328 = vector.shape_cast %327 : vector<4x16xf32> to vector<4x16x1xf32>
    %329 = vector.broadcast %328 : vector<4x16x1xf32> to vector<4x16x16xf32>
    %330 = arith.subf %326, %329 : vector<4x16x16xf32>
    %331 = math.exp %330 : vector<4x16x16xf32>
    %cst_129 = arith.constant dense<0.000000e+00> : vector<4x16xf32>
    %332 = vector.multi_reduction <add>, %331, %cst_129 [2] : vector<4x16x16xf32> to vector<4x16xf32>
    %333 = vector.shape_cast %332 : vector<4x16xf32> to vector<4x16x1xf32>
    %334 = tpu.reciprocal %333 {approx = true} : vector<4x16x1xf32> -> vector<4x16x1xf32>
    %335 = vector.broadcast %334 : vector<4x16x1xf32> to vector<4x16x16xf32>
    %336 = arith.mulf %331, %335 : vector<4x16x16xf32>
    %337 = arith.truncf %336 : vector<4x16x16xf32> to vector<4x16x16xbf16>
    %338 = arith.truncf %320 : vector<4x16x8xf32> to vector<4x16x8xbf16>
    "tpu.trace_start"() <{level = 10 : i32, message = "wqk,wkd->wqd"}> : () -> ()
    %cst_130 = arith.constant dense<0.000000e+00> : vector<4x16x8xf32>
    %339 = tpu.matmul %337, %338, %cst_130 {dimension_numbers = #tpu.dot_dimension_numbers<[2], [1], [1], [2], [0, 0, 0, 1, 1, 2], [0], [0]>} : vector<4x16x16xbf16>, vector<4x16x8xbf16>, vector<4x16x8xf32> -> vector<4x16x8xf32>
    "tpu.trace_stop"() : () -> ()
    %340 = vector.shape_cast %339 : vector<4x16x8xf32> to vector<64x8xf32>
    %341 = arith.truncf %340 : vector<64x8xf32> to vector<64x8xbf16>
    %c8_131 = arith.constant 8 : index
    %c0_132 = arith.constant 0 : index
    %342 = vector.load %arg7[%c8_131, %c0_132] : memref<32x32xbf16, #tpu.memory_space<vmem>>, vector<8x32xbf16>
    %cst_133 = arith.constant dense<0.000000e+00> : vector<64x32xf32>
    %343 = tpu.matmul %341, %342, %cst_133 {dimension_numbers = #tpu.dot_dimension_numbers<[1], [0], [0], [1], [0, 0, 1, 1], [], []>} : vector<64x8xbf16>, vector<8x32xbf16>, vector<64x32xf32> -> vector<64x32xf32>
    %344 = arith.addf %315, %343 : vector<64x32xf32>
    %345 = vector.extract_strided_slice %285 {offsets = [0, 0, 16], sizes = [4, 16, 8], strides = [1, 1, 1]} : vector<4x16x96xf32> to vector<4x16x8xf32>
    %cst_134 = arith.constant 0.353553385 : f32
    %346 = vector.broadcast %cst_134 : f32 to vector<4x16x8xf32>
    %347 = arith.mulf %345, %346 : vector<4x16x8xf32>
    %348 = vector.extract_strided_slice %285 {offsets = [0, 0, 48], sizes = [4, 16, 8], strides = [1, 1, 1]} : vector<4x16x96xf32> to vector<4x16x8xf32>
    %349 = vector.extract_strided_slice %285 {offsets = [0, 0, 80], sizes = [4, 16, 8], strides = [1, 1, 1]} : vector<4x16x96xf32> to vector<4x16x8xf32>
    %350 = arith.truncf %347 : vector<4x16x8xf32> to vector<4x16x8xbf16>
    %351 = arith.truncf %348 : vector<4x16x8xf32> to vector<4x16x8xbf16>
    "tpu.trace_start"() <{level = 10 : i32, message = "wqd,wkd->wqk"}> : () -> ()
    %cst_135 = arith.constant dense<0.000000e+00> : vector<4x16x16xf32>
    %352 = tpu.matmul %350, %351, %cst_135 {dimension_numbers = #tpu.dot_dimension_numbers<[2], [2], [1], [1], [0, 0, 0, 1, 1, 1], [0], [0]>} : vector<4x16x8xbf16>, vector<4x16x8xbf16>, vector<4x16x16xf32> -> vector<4x16x16xf32>
    "tpu.trace_stop"() : () -> ()
    %c0_136 = arith.constant 0 : index
    %c40 = arith.constant 40 : index
    %c0_137 = arith.constant 0 : index
    %c0_138 = arith.constant 0 : index
    %353 = vector.load %arg9[%c0_136, %c40, %c0_137, %c0_138] : memref<1x64x16x16xf32, #tpu.memory_space<vmem>>, vector<1x4x16x16xf32>
    %354 = vector.shape_cast %353 : vector<1x4x16x16xf32> to vector<4x16x16xf32>
    %355 = arith.addf %352, %354 : vector<4x16x16xf32>
    %cst_139 = arith.constant dense<0xFF800000> : vector<4x16xf32>
    %356 = vector.multi_reduction <maximumf>, %355, %cst_139 [2] : vector<4x16x16xf32> to vector<4x16xf32>
    %357 = vector.shape_cast %356 : vector<4x16xf32> to vector<4x16x1xf32>
    %358 = vector.broadcast %357 : vector<4x16x1xf32> to vector<4x16x16xf32>
    %359 = arith.subf %355, %358 : vector<4x16x16xf32>
    %360 = math.exp %359 : vector<4x16x16xf32>
    %cst_140 = arith.constant dense<0.000000e+00> : vector<4x16xf32>
    %361 = vector.multi_reduction <add>, %360, %cst_140 [2] : vector<4x16x16xf32> to vector<4x16xf32>
    %362 = vector.shape_cast %361 : vector<4x16xf32> to vector<4x16x1xf32>
    %363 = tpu.reciprocal %362 {approx = true} : vector<4x16x1xf32> -> vector<4x16x1xf32>
    %364 = vector.broadcast %363 : vector<4x16x1xf32> to vector<4x16x16xf32>
    %365 = arith.mulf %360, %364 : vector<4x16x16xf32>
    %366 = arith.truncf %365 : vector<4x16x16xf32> to vector<4x16x16xbf16>
    %367 = arith.truncf %349 : vector<4x16x8xf32> to vector<4x16x8xbf16>
    "tpu.trace_start"() <{level = 10 : i32, message = "wqk,wkd->wqd"}> : () -> ()
    %cst_141 = arith.constant dense<0.000000e+00> : vector<4x16x8xf32>
    %368 = tpu.matmul %366, %367, %cst_141 {dimension_numbers = #tpu.dot_dimension_numbers<[2], [1], [1], [2], [0, 0, 0, 1, 1, 2], [0], [0]>} : vector<4x16x16xbf16>, vector<4x16x8xbf16>, vector<4x16x8xf32> -> vector<4x16x8xf32>
    "tpu.trace_stop"() : () -> ()
    %369 = vector.shape_cast %368 : vector<4x16x8xf32> to vector<64x8xf32>
    %370 = arith.truncf %369 : vector<64x8xf32> to vector<64x8xbf16>
    %c16_142 = arith.constant 16 : index
    %c0_143 = arith.constant 0 : index
    %371 = vector.load %arg7[%c16_142, %c0_143] : memref<32x32xbf16, #tpu.memory_space<vmem>>, vector<8x32xbf16>
    %cst_144 = arith.constant dense<0.000000e+00> : vector<64x32xf32>
    %372 = tpu.matmul %370, %371, %cst_144 {dimension_numbers = #tpu.dot_dimension_numbers<[1], [0], [0], [1], [0, 0, 1, 1], [], []>} : vector<64x8xbf16>, vector<8x32xbf16>, vector<64x32xf32> -> vector<64x32xf32>
    %373 = arith.addf %344, %372 : vector<64x32xf32>
    %374 = vector.extract_strided_slice %285 {offsets = [0, 0, 24], sizes = [4, 16, 8], strides = [1, 1, 1]} : vector<4x16x96xf32> to vector<4x16x8xf32>
    %cst_145 = arith.constant 0.353553385 : f32
    %375 = vector.broadcast %cst_145 : f32 to vector<4x16x8xf32>
    %376 = arith.mulf %374, %375 : vector<4x16x8xf32>
    %377 = vector.extract_strided_slice %285 {offsets = [0, 0, 56], sizes = [4, 16, 8], strides = [1, 1, 1]} : vector<4x16x96xf32> to vector<4x16x8xf32>
    %378 = vector.extract_strided_slice %285 {offsets = [0, 0, 88], sizes = [4, 16, 8], strides = [1, 1, 1]} : vector<4x16x96xf32> to vector<4x16x8xf32>
    %379 = arith.truncf %376 : vector<4x16x8xf32> to vector<4x16x8xbf16>
    %380 = arith.truncf %377 : vector<4x16x8xf32> to vector<4x16x8xbf16>
    "tpu.trace_start"() <{level = 10 : i32, message = "wqd,wkd->wqk"}> : () -> ()
    %cst_146 = arith.constant dense<0.000000e+00> : vector<4x16x16xf32>
    %381 = tpu.matmul %379, %380, %cst_146 {dimension_numbers = #tpu.dot_dimension_numbers<[2], [2], [1], [1], [0, 0, 0, 1, 1, 1], [0], [0]>} : vector<4x16x8xbf16>, vector<4x16x8xbf16>, vector<4x16x16xf32> -> vector<4x16x16xf32>
    "tpu.trace_stop"() : () -> ()
    %c0_147 = arith.constant 0 : index
    %c44 = arith.constant 44 : index
    %c0_148 = arith.constant 0 : index
    %c0_149 = arith.constant 0 : index
    %382 = vector.load %arg9[%c0_147, %c44, %c0_148, %c0_149] : memref<1x64x16x16xf32, #tpu.memory_space<vmem>>, vector<1x4x16x16xf32>
    %383 = vector.shape_cast %382 : vector<1x4x16x16xf32> to vector<4x16x16xf32>
    %384 = arith.addf %381, %383 : vector<4x16x16xf32>
    %cst_150 = arith.constant dense<0xFF800000> : vector<4x16xf32>
    %385 = vector.multi_reduction <maximumf>, %384, %cst_150 [2] : vector<4x16x16xf32> to vector<4x16xf32>
    %386 = vector.shape_cast %385 : vector<4x16xf32> to vector<4x16x1xf32>
    %387 = vector.broadcast %386 : vector<4x16x1xf32> to vector<4x16x16xf32>
    %388 = arith.subf %384, %387 : vector<4x16x16xf32>
    %389 = math.exp %388 : vector<4x16x16xf32>
    %cst_151 = arith.constant dense<0.000000e+00> : vector<4x16xf32>
    %390 = vector.multi_reduction <add>, %389, %cst_151 [2] : vector<4x16x16xf32> to vector<4x16xf32>
    %391 = vector.shape_cast %390 : vector<4x16xf32> to vector<4x16x1xf32>
    %392 = tpu.reciprocal %391 {approx = true} : vector<4x16x1xf32> -> vector<4x16x1xf32>
    %393 = vector.broadcast %392 : vector<4x16x1xf32> to vector<4x16x16xf32>
    %394 = arith.mulf %389, %393 : vector<4x16x16xf32>
    %395 = arith.truncf %394 : vector<4x16x16xf32> to vector<4x16x16xbf16>
    %396 = arith.truncf %378 : vector<4x16x8xf32> to vector<4x16x8xbf16>
    "tpu.trace_start"() <{level = 10 : i32, message = "wqk,wkd->wqd"}> : () -> ()
    %cst_152 = arith.constant dense<0.000000e+00> : vector<4x16x8xf32>
    %397 = tpu.matmul %395, %396, %cst_152 {dimension_numbers = #tpu.dot_dimension_numbers<[2], [1], [1], [2], [0, 0, 0, 1, 1, 2], [0], [0]>} : vector<4x16x16xbf16>, vector<4x16x8xbf16>, vector<4x16x8xf32> -> vector<4x16x8xf32>
    "tpu.trace_stop"() : () -> ()
    %398 = vector.shape_cast %397 : vector<4x16x8xf32> to vector<64x8xf32>
    %399 = arith.truncf %398 : vector<64x8xf32> to vector<64x8xbf16>
    %c24_153 = arith.constant 24 : index
    %c0_154 = arith.constant 0 : index
    %400 = vector.load %arg7[%c24_153, %c0_154] : memref<32x32xbf16, #tpu.memory_space<vmem>>, vector<8x32xbf16>
    %cst_155 = arith.constant dense<0.000000e+00> : vector<64x32xf32>
    %401 = tpu.matmul %399, %400, %cst_155 {dimension_numbers = #tpu.dot_dimension_numbers<[1], [0], [0], [1], [0, 0, 1, 1], [], []>} : vector<64x8xbf16>, vector<8x32xbf16>, vector<64x32xf32> -> vector<64x32xf32>
    %402 = arith.addf %373, %401 : vector<64x32xf32>
    %c0_156 = arith.constant 0 : index
    %c0_157 = arith.constant 0 : index
    %403 = vector.load %arg8[%c0_156, %c0_157] : memref<1x32xf32, #tpu.memory_space<vmem>>, vector<1x32xf32>
    %404 = vector.broadcast %403 : vector<1x32xf32> to vector<64x32xf32>
    %405 = arith.addf %402, %404 : vector<64x32xf32>
    %406 = vector.extract_strided_slice %1 {offsets = [0, 8, 0], sizes = [16, 4, 32], strides = [1, 1, 1]} : vector<16x16x32xf32> to vector<16x4x32xf32>
    %407 = vector.shape_cast %406 : vector<16x4x32xf32> to vector<64x32xf32>
    %408 = arith.addf %405, %407 : vector<64x32xf32>
    %409 = vector.extract_strided_slice %33 {offsets = [0, 12, 0], sizes = [16, 4, 96], strides = [1, 1, 1]} : vector<16x16x96xf32> to vector<16x4x96xf32>
    %410 = vector.shape_cast %409 : vector<16x4x96xf32> to vector<4x16x96xf32>
    %cst_158 = arith.constant 0.000000e+00 : f32
    %411 = vector.broadcast %cst_158 : f32 to vector<64x32xf32>
    %412 = vector.extract_strided_slice %410 {offsets = [0, 0, 0], sizes = [4, 16, 8], strides = [1, 1, 1]} : vector<4x16x96xf32> to vector<4x16x8xf32>
    %cst_159 = arith.constant 0.353553385 : f32
    %413 = vector.broadcast %cst_159 : f32 to vector<4x16x8xf32>
    %414 = arith.mulf %412, %413 : vector<4x16x8xf32>
    %415 = vector.extract_strided_slice %410 {offsets = [0, 0, 32], sizes = [4, 16, 8], strides = [1, 1, 1]} : vector<4x16x96xf32> to vector<4x16x8xf32>
    %416 = vector.extract_strided_slice %410 {offsets = [0, 0, 64], sizes = [4, 16, 8], strides = [1, 1, 1]} : vector<4x16x96xf32> to vector<4x16x8xf32>
    %417 = arith.truncf %414 : vector<4x16x8xf32> to vector<4x16x8xbf16>
    %418 = arith.truncf %415 : vector<4x16x8xf32> to vector<4x16x8xbf16>
    "tpu.trace_start"() <{level = 10 : i32, message = "wqd,wkd->wqk"}> : () -> ()
    %cst_160 = arith.constant dense<0.000000e+00> : vector<4x16x16xf32>
    %419 = tpu.matmul %417, %418, %cst_160 {dimension_numbers = #tpu.dot_dimension_numbers<[2], [2], [1], [1], [0, 0, 0, 1, 1, 1], [0], [0]>} : vector<4x16x8xbf16>, vector<4x16x8xbf16>, vector<4x16x16xf32> -> vector<4x16x16xf32>
    "tpu.trace_stop"() : () -> ()
    %c0_161 = arith.constant 0 : index
    %c48 = arith.constant 48 : index
    %c0_162 = arith.constant 0 : index
    %c0_163 = arith.constant 0 : index
    %420 = vector.load %arg9[%c0_161, %c48, %c0_162, %c0_163] : memref<1x64x16x16xf32, #tpu.memory_space<vmem>>, vector<1x4x16x16xf32>
    %421 = vector.shape_cast %420 : vector<1x4x16x16xf32> to vector<4x16x16xf32>
    %422 = arith.addf %419, %421 : vector<4x16x16xf32>
    %cst_164 = arith.constant dense<0xFF800000> : vector<4x16xf32>
    %423 = vector.multi_reduction <maximumf>, %422, %cst_164 [2] : vector<4x16x16xf32> to vector<4x16xf32>
    %424 = vector.shape_cast %423 : vector<4x16xf32> to vector<4x16x1xf32>
    %425 = vector.broadcast %424 : vector<4x16x1xf32> to vector<4x16x16xf32>
    %426 = arith.subf %422, %425 : vector<4x16x16xf32>
    %427 = math.exp %426 : vector<4x16x16xf32>
    %cst_165 = arith.constant dense<0.000000e+00> : vector<4x16xf32>
    %428 = vector.multi_reduction <add>, %427, %cst_165 [2] : vector<4x16x16xf32> to vector<4x16xf32>
    %429 = vector.shape_cast %428 : vector<4x16xf32> to vector<4x16x1xf32>
    %430 = tpu.reciprocal %429 {approx = true} : vector<4x16x1xf32> -> vector<4x16x1xf32>
    %431 = vector.broadcast %430 : vector<4x16x1xf32> to vector<4x16x16xf32>
    %432 = arith.mulf %427, %431 : vector<4x16x16xf32>
    %433 = arith.truncf %432 : vector<4x16x16xf32> to vector<4x16x16xbf16>
    %434 = arith.truncf %416 : vector<4x16x8xf32> to vector<4x16x8xbf16>
    "tpu.trace_start"() <{level = 10 : i32, message = "wqk,wkd->wqd"}> : () -> ()
    %cst_166 = arith.constant dense<0.000000e+00> : vector<4x16x8xf32>
    %435 = tpu.matmul %433, %434, %cst_166 {dimension_numbers = #tpu.dot_dimension_numbers<[2], [1], [1], [2], [0, 0, 0, 1, 1, 2], [0], [0]>} : vector<4x16x16xbf16>, vector<4x16x8xbf16>, vector<4x16x8xf32> -> vector<4x16x8xf32>
    "tpu.trace_stop"() : () -> ()
    %436 = vector.shape_cast %435 : vector<4x16x8xf32> to vector<64x8xf32>
    %437 = arith.truncf %436 : vector<64x8xf32> to vector<64x8xbf16>
    %c0_167 = arith.constant 0 : index
    %c0_168 = arith.constant 0 : index
    %438 = vector.load %arg7[%c0_167, %c0_168] : memref<32x32xbf16, #tpu.memory_space<vmem>>, vector<8x32xbf16>
    %cst_169 = arith.constant dense<0.000000e+00> : vector<64x32xf32>
    %439 = tpu.matmul %437, %438, %cst_169 {dimension_numbers = #tpu.dot_dimension_numbers<[1], [0], [0], [1], [0, 0, 1, 1], [], []>} : vector<64x8xbf16>, vector<8x32xbf16>, vector<64x32xf32> -> vector<64x32xf32>
    %440 = arith.addf %411, %439 : vector<64x32xf32>
    %441 = vector.extract_strided_slice %410 {offsets = [0, 0, 8], sizes = [4, 16, 8], strides = [1, 1, 1]} : vector<4x16x96xf32> to vector<4x16x8xf32>
    %cst_170 = arith.constant 0.353553385 : f32
    %442 = vector.broadcast %cst_170 : f32 to vector<4x16x8xf32>
    %443 = arith.mulf %441, %442 : vector<4x16x8xf32>
    %444 = vector.extract_strided_slice %410 {offsets = [0, 0, 40], sizes = [4, 16, 8], strides = [1, 1, 1]} : vector<4x16x96xf32> to vector<4x16x8xf32>
    %445 = vector.extract_strided_slice %410 {offsets = [0, 0, 72], sizes = [4, 16, 8], strides = [1, 1, 1]} : vector<4x16x96xf32> to vector<4x16x8xf32>
    %446 = arith.truncf %443 : vector<4x16x8xf32> to vector<4x16x8xbf16>
    %447 = arith.truncf %444 : vector<4x16x8xf32> to vector<4x16x8xbf16>
    "tpu.trace_start"() <{level = 10 : i32, message = "wqd,wkd->wqk"}> : () -> ()
    %cst_171 = arith.constant dense<0.000000e+00> : vector<4x16x16xf32>
    %448 = tpu.matmul %446, %447, %cst_171 {dimension_numbers = #tpu.dot_dimension_numbers<[2], [2], [1], [1], [0, 0, 0, 1, 1, 1], [0], [0]>} : vector<4x16x8xbf16>, vector<4x16x8xbf16>, vector<4x16x16xf32> -> vector<4x16x16xf32>
    "tpu.trace_stop"() : () -> ()
    %c0_172 = arith.constant 0 : index
    %c52 = arith.constant 52 : index
    %c0_173 = arith.constant 0 : index
    %c0_174 = arith.constant 0 : index
    %449 = vector.load %arg9[%c0_172, %c52, %c0_173, %c0_174] : memref<1x64x16x16xf32, #tpu.memory_space<vmem>>, vector<1x4x16x16xf32>
    %450 = vector.shape_cast %449 : vector<1x4x16x16xf32> to vector<4x16x16xf32>
    %451 = arith.addf %448, %450 : vector<4x16x16xf32>
    %cst_175 = arith.constant dense<0xFF800000> : vector<4x16xf32>
    %452 = vector.multi_reduction <maximumf>, %451, %cst_175 [2] : vector<4x16x16xf32> to vector<4x16xf32>
    %453 = vector.shape_cast %452 : vector<4x16xf32> to vector<4x16x1xf32>
    %454 = vector.broadcast %453 : vector<4x16x1xf32> to vector<4x16x16xf32>
    %455 = arith.subf %451, %454 : vector<4x16x16xf32>
    %456 = math.exp %455 : vector<4x16x16xf32>
    %cst_176 = arith.constant dense<0.000000e+00> : vector<4x16xf32>
    %457 = vector.multi_reduction <add>, %456, %cst_176 [2] : vector<4x16x16xf32> to vector<4x16xf32>
    %458 = vector.shape_cast %457 : vector<4x16xf32> to vector<4x16x1xf32>
    %459 = tpu.reciprocal %458 {approx = true} : vector<4x16x1xf32> -> vector<4x16x1xf32>
    %460 = vector.broadcast %459 : vector<4x16x1xf32> to vector<4x16x16xf32>
    %461 = arith.mulf %456, %460 : vector<4x16x16xf32>
    %462 = arith.truncf %461 : vector<4x16x16xf32> to vector<4x16x16xbf16>
    %463 = arith.truncf %445 : vector<4x16x8xf32> to vector<4x16x8xbf16>
    "tpu.trace_start"() <{level = 10 : i32, message = "wqk,wkd->wqd"}> : () -> ()
    %cst_177 = arith.constant dense<0.000000e+00> : vector<4x16x8xf32>
    %464 = tpu.matmul %462, %463, %cst_177 {dimension_numbers = #tpu.dot_dimension_numbers<[2], [1], [1], [2], [0, 0, 0, 1, 1, 2], [0], [0]>} : vector<4x16x16xbf16>, vector<4x16x8xbf16>, vector<4x16x8xf32> -> vector<4x16x8xf32>
    "tpu.trace_stop"() : () -> ()
    %465 = vector.shape_cast %464 : vector<4x16x8xf32> to vector<64x8xf32>
    %466 = arith.truncf %465 : vector<64x8xf32> to vector<64x8xbf16>
    %c8_178 = arith.constant 8 : index
    %c0_179 = arith.constant 0 : index
    %467 = vector.load %arg7[%c8_178, %c0_179] : memref<32x32xbf16, #tpu.memory_space<vmem>>, vector<8x32xbf16>
    %cst_180 = arith.constant dense<0.000000e+00> : vector<64x32xf32>
    %468 = tpu.matmul %466, %467, %cst_180 {dimension_numbers = #tpu.dot_dimension_numbers<[1], [0], [0], [1], [0, 0, 1, 1], [], []>} : vector<64x8xbf16>, vector<8x32xbf16>, vector<64x32xf32> -> vector<64x32xf32>
    %469 = arith.addf %440, %468 : vector<64x32xf32>
    %470 = vector.extract_strided_slice %410 {offsets = [0, 0, 16], sizes = [4, 16, 8], strides = [1, 1, 1]} : vector<4x16x96xf32> to vector<4x16x8xf32>
    %cst_181 = arith.constant 0.353553385 : f32
    %471 = vector.broadcast %cst_181 : f32 to vector<4x16x8xf32>
    %472 = arith.mulf %470, %471 : vector<4x16x8xf32>
    %473 = vector.extract_strided_slice %410 {offsets = [0, 0, 48], sizes = [4, 16, 8], strides = [1, 1, 1]} : vector<4x16x96xf32> to vector<4x16x8xf32>
    %474 = vector.extract_strided_slice %410 {offsets = [0, 0, 80], sizes = [4, 16, 8], strides = [1, 1, 1]} : vector<4x16x96xf32> to vector<4x16x8xf32>
    %475 = arith.truncf %472 : vector<4x16x8xf32> to vector<4x16x8xbf16>
    %476 = arith.truncf %473 : vector<4x16x8xf32> to vector<4x16x8xbf16>
    "tpu.trace_start"() <{level = 10 : i32, message = "wqd,wkd->wqk"}> : () -> ()
    %cst_182 = arith.constant dense<0.000000e+00> : vector<4x16x16xf32>
    %477 = tpu.matmul %475, %476, %cst_182 {dimension_numbers = #tpu.dot_dimension_numbers<[2], [2], [1], [1], [0, 0, 0, 1, 1, 1], [0], [0]>} : vector<4x16x8xbf16>, vector<4x16x8xbf16>, vector<4x16x16xf32> -> vector<4x16x16xf32>
    "tpu.trace_stop"() : () -> ()
    %c0_183 = arith.constant 0 : index
    %c56 = arith.constant 56 : index
    %c0_184 = arith.constant 0 : index
    %c0_185 = arith.constant 0 : index
    %478 = vector.load %arg9[%c0_183, %c56, %c0_184, %c0_185] : memref<1x64x16x16xf32, #tpu.memory_space<vmem>>, vector<1x4x16x16xf32>
    %479 = vector.shape_cast %478 : vector<1x4x16x16xf32> to vector<4x16x16xf32>
    %480 = arith.addf %477, %479 : vector<4x16x16xf32>
    %cst_186 = arith.constant dense<0xFF800000> : vector<4x16xf32>
    %481 = vector.multi_reduction <maximumf>, %480, %cst_186 [2] : vector<4x16x16xf32> to vector<4x16xf32>
    %482 = vector.shape_cast %481 : vector<4x16xf32> to vector<4x16x1xf32>
    %483 = vector.broadcast %482 : vector<4x16x1xf32> to vector<4x16x16xf32>
    %484 = arith.subf %480, %483 : vector<4x16x16xf32>
    %485 = math.exp %484 : vector<4x16x16xf32>
    %cst_187 = arith.constant dense<0.000000e+00> : vector<4x16xf32>
    %486 = vector.multi_reduction <add>, %485, %cst_187 [2] : vector<4x16x16xf32> to vector<4x16xf32>
    %487 = vector.shape_cast %486 : vector<4x16xf32> to vector<4x16x1xf32>
    %488 = tpu.reciprocal %487 {approx = true} : vector<4x16x1xf32> -> vector<4x16x1xf32>
    %489 = vector.broadcast %488 : vector<4x16x1xf32> to vector<4x16x16xf32>
    %490 = arith.mulf %485, %489 : vector<4x16x16xf32>
    %491 = arith.truncf %490 : vector<4x16x16xf32> to vector<4x16x16xbf16>
    %492 = arith.truncf %474 : vector<4x16x8xf32> to vector<4x16x8xbf16>
    "tpu.trace_start"() <{level = 10 : i32, message = "wqk,wkd->wqd"}> : () -> ()
    %cst_188 = arith.constant dense<0.000000e+00> : vector<4x16x8xf32>
    %493 = tpu.matmul %491, %492, %cst_188 {dimension_numbers = #tpu.dot_dimension_numbers<[2], [1], [1], [2], [0, 0, 0, 1, 1, 2], [0], [0]>} : vector<4x16x16xbf16>, vector<4x16x8xbf16>, vector<4x16x8xf32> -> vector<4x16x8xf32>
    "tpu.trace_stop"() : () -> ()
    %494 = vector.shape_cast %493 : vector<4x16x8xf32> to vector<64x8xf32>
    %495 = arith.truncf %494 : vector<64x8xf32> to vector<64x8xbf16>
    %c16_189 = arith.constant 16 : index
    %c0_190 = arith.constant 0 : index
    %496 = vector.load %arg7[%c16_189, %c0_190] : memref<32x32xbf16, #tpu.memory_space<vmem>>, vector<8x32xbf16>
    %cst_191 = arith.constant dense<0.000000e+00> : vector<64x32xf32>
    %497 = tpu.matmul %495, %496, %cst_191 {dimension_numbers = #tpu.dot_dimension_numbers<[1], [0], [0], [1], [0, 0, 1, 1], [], []>} : vector<64x8xbf16>, vector<8x32xbf16>, vector<64x32xf32> -> vector<64x32xf32>
    %498 = arith.addf %469, %497 : vector<64x32xf32>
    %499 = vector.extract_strided_slice %410 {offsets = [0, 0, 24], sizes = [4, 16, 8], strides = [1, 1, 1]} : vector<4x16x96xf32> to vector<4x16x8xf32>
    %cst_192 = arith.constant 0.353553385 : f32
    %500 = vector.broadcast %cst_192 : f32 to vector<4x16x8xf32>
    %501 = arith.mulf %499, %500 : vector<4x16x8xf32>
    %502 = vector.extract_strided_slice %410 {offsets = [0, 0, 56], sizes = [4, 16, 8], strides = [1, 1, 1]} : vector<4x16x96xf32> to vector<4x16x8xf32>
    %503 = vector.extract_strided_slice %410 {offsets = [0, 0, 88], sizes = [4, 16, 8], strides = [1, 1, 1]} : vector<4x16x96xf32> to vector<4x16x8xf32>
    %504 = arith.truncf %501 : vector<4x16x8xf32> to vector<4x16x8xbf16>
    %505 = arith.truncf %502 : vector<4x16x8xf32> to vector<4x16x8xbf16>
    "tpu.trace_start"() <{level = 10 : i32, message = "wqd,wkd->wqk"}> : () -> ()
    %cst_193 = arith.constant dense<0.000000e+00> : vector<4x16x16xf32>
    %506 = tpu.matmul %504, %505, %cst_193 {dimension_numbers = #tpu.dot_dimension_numbers<[2], [2], [1], [1], [0, 0, 0, 1, 1, 1], [0], [0]>} : vector<4x16x8xbf16>, vector<4x16x8xbf16>, vector<4x16x16xf32> -> vector<4x16x16xf32>
    "tpu.trace_stop"() : () -> ()
    %c0_194 = arith.constant 0 : index
    %c60 = arith.constant 60 : index
    %c0_195 = arith.constant 0 : index
    %c0_196 = arith.constant 0 : index
    %507 = vector.load %arg9[%c0_194, %c60, %c0_195, %c0_196] : memref<1x64x16x16xf32, #tpu.memory_space<vmem>>, vector<1x4x16x16xf32>
    %508 = vector.shape_cast %507 : vector<1x4x16x16xf32> to vector<4x16x16xf32>
    %509 = arith.addf %506, %508 : vector<4x16x16xf32>
    %cst_197 = arith.constant dense<0xFF800000> : vector<4x16xf32>
    %510 = vector.multi_reduction <maximumf>, %509, %cst_197 [2] : vector<4x16x16xf32> to vector<4x16xf32>
    %511 = vector.shape_cast %510 : vector<4x16xf32> to vector<4x16x1xf32>
    %512 = vector.broadcast %511 : vector<4x16x1xf32> to vector<4x16x16xf32>
    %513 = arith.subf %509, %512 : vector<4x16x16xf32>
    %514 = math.exp %513 : vector<4x16x16xf32>
    %cst_198 = arith.constant dense<0.000000e+00> : vector<4x16xf32>
    %515 = vector.multi_reduction <add>, %514, %cst_198 [2] : vector<4x16x16xf32> to vector<4x16xf32>
    %516 = vector.shape_cast %515 : vector<4x16xf32> to vector<4x16x1xf32>
    %517 = tpu.reciprocal %516 {approx = true} : vector<4x16x1xf32> -> vector<4x16x1xf32>
    %518 = vector.broadcast %517 : vector<4x16x1xf32> to vector<4x16x16xf32>
    %519 = arith.mulf %514, %518 : vector<4x16x16xf32>
    %520 = arith.truncf %519 : vector<4x16x16xf32> to vector<4x16x16xbf16>
    %521 = arith.truncf %503 : vector<4x16x8xf32> to vector<4x16x8xbf16>
    "tpu.trace_start"() <{level = 10 : i32, message = "wqk,wkd->wqd"}> : () -> ()
    %cst_199 = arith.constant dense<0.000000e+00> : vector<4x16x8xf32>
    %522 = tpu.matmul %520, %521, %cst_199 {dimension_numbers = #tpu.dot_dimension_numbers<[2], [1], [1], [2], [0, 0, 0, 1, 1, 2], [0], [0]>} : vector<4x16x16xbf16>, vector<4x16x8xbf16>, vector<4x16x8xf32> -> vector<4x16x8xf32>
    "tpu.trace_stop"() : () -> ()
    %523 = vector.shape_cast %522 : vector<4x16x8xf32> to vector<64x8xf32>
    %524 = arith.truncf %523 : vector<64x8xf32> to vector<64x8xbf16>
    %c24_200 = arith.constant 24 : index
    %c0_201 = arith.constant 0 : index
    %525 = vector.load %arg7[%c24_200, %c0_201] : memref<32x32xbf16, #tpu.memory_space<vmem>>, vector<8x32xbf16>
    %cst_202 = arith.constant dense<0.000000e+00> : vector<64x32xf32>
    %526 = tpu.matmul %524, %525, %cst_202 {dimension_numbers = #tpu.dot_dimension_numbers<[1], [0], [0], [1], [0, 0, 1, 1], [], []>} : vector<64x8xbf16>, vector<8x32xbf16>, vector<64x32xf32> -> vector<64x32xf32>
    %527 = arith.addf %498, %526 : vector<64x32xf32>
    %c0_203 = arith.constant 0 : index
    %c0_204 = arith.constant 0 : index
    %528 = vector.load %arg8[%c0_203, %c0_204] : memref<1x32xf32, #tpu.memory_space<vmem>>, vector<1x32xf32>
    %529 = vector.broadcast %528 : vector<1x32xf32> to vector<64x32xf32>
    %530 = arith.addf %527, %529 : vector<64x32xf32>
    %531 = vector.extract_strided_slice %1 {offsets = [0, 12, 0], sizes = [16, 4, 32], strides = [1, 1, 1]} : vector<16x16x32xf32> to vector<16x4x32xf32>
    %532 = vector.shape_cast %531 : vector<16x4x32xf32> to vector<64x32xf32>
    %533 = arith.addf %530, %532 : vector<64x32xf32>
    %534 = tpu.concatenate %158, %283, %408, %533 in 0 : vector<64x32xf32>, vector<64x32xf32>, vector<64x32xf32>, vector<64x32xf32> -> vector<256x32xf32>
    %cst_205 = arith.constant dense<0.000000e+00> : vector<256xf32>
    %535 = vector.multi_reduction <add>, %534, %cst_205 [1] : vector<256x32xf32> to vector<256xf32>
    %536 = vector.shape_cast %535 : vector<256xf32> to vector<256x1xf32>
    %cst_206 = arith.constant 3.200000e+01 : f32
    %537 = vector.broadcast %cst_206 : f32 to vector<256x1xf32>
    %538 = arith.divf %536, %537 : vector<256x1xf32>
    %539 = vector.broadcast %538 : vector<256x1xf32> to vector<256x32xf32>
    %540 = arith.subf %534, %539 : vector<256x32xf32>
    %541 = arith.mulf %540, %540 : vector<256x32xf32>
    %cst_207 = arith.constant dense<0.000000e+00> : vector<256xf32>
    %542 = vector.multi_reduction <add>, %541, %cst_207 [1] : vector<256x32xf32> to vector<256xf32>
    %543 = vector.shape_cast %542 : vector<256xf32> to vector<256x1xf32>
    %cst_208 = arith.constant 3.200000e+01 : f32
    %544 = vector.broadcast %cst_208 : f32 to vector<256x1xf32>
    %545 = arith.divf %543, %544 : vector<256x1xf32>
    %546 = vector.broadcast %538 : vector<256x1xf32> to vector<256x32xf32>
    %547 = arith.subf %534, %546 : vector<256x32xf32>
    %cst_209 = arith.constant 9.99999974E-6 : f32
    %548 = vector.broadcast %cst_209 : f32 to vector<256x1xf32>
    %549 = arith.addf %545, %548 : vector<256x1xf32>
    %550 = math.rsqrt %549 : vector<256x1xf32>
    %551 = vector.broadcast %550 : vector<256x1xf32> to vector<256x32xf32>
    %552 = arith.mulf %547, %551 : vector<256x32xf32>
    %c0_210 = arith.constant 0 : index
    %c0_211 = arith.constant 0 : index
    %553 = vector.load %arg10[%c0_210, %c0_211] : memref<1x32xf32, #tpu.memory_space<vmem>>, vector<1x32xf32>
    %554 = vector.broadcast %553 : vector<1x32xf32> to vector<256x32xf32>
    %555 = arith.mulf %552, %554 : vector<256x32xf32>
    %c0_212 = arith.constant 0 : index
    %c0_213 = arith.constant 0 : index
    %556 = vector.load %arg11[%c0_212, %c0_213] : memref<1x32xf32, #tpu.memory_space<vmem>>, vector<1x32xf32>
    %557 = vector.broadcast %556 : vector<1x32xf32> to vector<256x32xf32>
    %558 = arith.addf %555, %557 : vector<256x32xf32>
    %559 = arith.truncf %558 : vector<256x32xf32> to vector<256x32xbf16>
    %c0_214 = arith.constant 0 : index
    %c0_215 = arith.constant 0 : index
    %560 = vector.load %arg12[%c0_214, %c0_215] : memref<32x128xbf16, #tpu.memory_space<vmem>>, vector<32x128xbf16>
    %cst_216 = arith.constant dense<0.000000e+00> : vector<256x128xf32>
    %561 = tpu.matmul %559, %560, %cst_216 {dimension_numbers = #tpu.dot_dimension_numbers<[1], [0], [0], [1], [0, 0, 1, 1], [], []>} : vector<256x32xbf16>, vector<32x128xbf16>, vector<256x128xf32> -> vector<256x128xf32>
    %c0_217 = arith.constant 0 : index
    %c0_218 = arith.constant 0 : index
    %562 = vector.load %arg13[%c0_217, %c0_218] : memref<1x128xf32, #tpu.memory_space<vmem>>, vector<1x128xf32>
    %563 = vector.broadcast %562 : vector<1x128xf32> to vector<256x128xf32>
    %564 = arith.addf %561, %563 : vector<256x128xf32>
    %cst_219 = arith.constant 5.000000e-01 : f32
    %565 = vector.broadcast %cst_219 : f32 to vector<256x128xf32>
    %566 = arith.mulf %565, %564 : vector<256x128xf32>
    %cst_220 = arith.constant 1.41421354 : f32
    %567 = vector.broadcast %cst_220 : f32 to vector<256x128xf32>
    %568 = arith.divf %564, %567 : vector<256x128xf32>
    %569 = math.erf %568 : vector<256x128xf32>
    %cst_221 = arith.constant 1.000000e+00 : f32
    %570 = vector.broadcast %cst_221 : f32 to vector<256x128xf32>
    %571 = arith.addf %570, %569 : vector<256x128xf32>
    %572 = arith.mulf %566, %571 : vector<256x128xf32>
    %573 = arith.truncf %572 : vector<256x128xf32> to vector<256x128xbf16>
    %c0_222 = arith.constant 0 : index
    %c0_223 = arith.constant 0 : index
    %574 = vector.load %arg14[%c0_222, %c0_223] : memref<128x32xbf16, #tpu.memory_space<vmem>>, vector<128x32xbf16>
    %cst_224 = arith.constant dense<0.000000e+00> : vector<256x32xf32>
    %575 = tpu.matmul %573, %574, %cst_224 {dimension_numbers = #tpu.dot_dimension_numbers<[1], [0], [0], [1], [0, 0, 1, 1], [], []>} : vector<256x128xbf16>, vector<128x32xbf16>, vector<256x32xf32> -> vector<256x32xf32>
    %c0_225 = arith.constant 0 : index
    %c0_226 = arith.constant 0 : index
    %576 = vector.load %arg15[%c0_225, %c0_226] : memref<1x32xf32, #tpu.memory_space<vmem>>, vector<1x32xf32>
    %577 = vector.broadcast %576 : vector<1x32xf32> to vector<256x32xf32>
    %578 = arith.addf %575, %577 : vector<256x32xf32>
    %579 = arith.addf %534, %578 : vector<256x32xf32>
    %580 = vector.shape_cast %579 : vector<256x32xf32> to vector<4x4x4x4x32xf32>
    %581 = vector.extract_strided_slice %580 {offsets = [0, 0, 0, 0, 0], sizes = [1, 4, 4, 4, 32], strides = [1, 1, 1, 1, 1]} : vector<4x4x4x4x32xf32> to vector<1x4x4x4x32xf32>
    %582 = vector.shape_cast %581 : vector<1x4x4x4x32xf32> to vector<4x4x4x32xf32>
    %583 = vector.shape_cast %582 : vector<4x4x4x32xf32> to vector<16x4x32xf32>
    %c0_227 = arith.constant 0 : index
    %c0_228 = arith.constant 0 : index
    %c0_229 = arith.constant 0 : index
    %c0_230 = arith.constant 0 : index
    %584 = vector.load %arg16[%c0_227, %c0_228, %c0_229, %c0_230] : memref<1x16x16x32xf32, #tpu.memory_space<vmem>>, vector<1x16x4x32xf32>
    %585 = vector.shape_cast %584 : vector<1x16x4x32xf32> to vector<16x4x32xf32>
    %586 = vector.shape_cast %583 : vector<16x4x32xf32> to vector<1x16x4x32xf32>
    tpu.vector_store %arg16[%c0_227, %c0_228, %c0_229, %c0_230], %586 {strides = array<i32>} : memref<1x16x16x32xf32, #tpu.memory_space<vmem>>, vector<1x16x4x32xf32>,
    %587 = vector.extract_strided_slice %580 {offsets = [1, 0, 0, 0, 0], sizes = [1, 4, 4, 4, 32], strides = [1, 1, 1, 1, 1]} : vector<4x4x4x4x32xf32> to vector<1x4x4x4x32xf32>
    %588 = vector.shape_cast %587 : vector<1x4x4x4x32xf32> to vector<4x4x4x32xf32>
    %589 = vector.shape_cast %588 : vector<4x4x4x32xf32> to vector<16x4x32xf32>
    %c0_231 = arith.constant 0 : index
    %c0_232 = arith.constant 0 : index
    %c4_233 = arith.constant 4 : index
    %c0_234 = arith.constant 0 : index
    %590 = vector.load %arg16[%c0_231, %c0_232, %c4_233, %c0_234] : memref<1x16x16x32xf32, #tpu.memory_space<vmem>>, vector<1x16x4x32xf32>
    %591 = vector.shape_cast %590 : vector<1x16x4x32xf32> to vector<16x4x32xf32>
    %592 = vector.shape_cast %589 : vector<16x4x32xf32> to vector<1x16x4x32xf32>
    tpu.vector_store %arg16[%c0_231, %c0_232, %c4_233, %c0_234], %592 {strides = array<i32>} : memref<1x16x16x32xf32, #tpu.memory_space<vmem>>, vector<1x16x4x32xf32>,
    %593 = vector.extract_strided_slice %580 {offsets = [2, 0, 0, 0, 0], sizes = [1, 4, 4, 4, 32], strides = [1, 1, 1, 1, 1]} : vector<4x4x4x4x32xf32> to vector<1x4x4x4x32xf32>
    %594 = vector.shape_cast %593 : vector<1x4x4x4x32xf32> to vector<4x4x4x32xf32>
    %595 = vector.shape_cast %594 : vector<4x4x4x32xf32> to vector<16x4x32xf32>
    %c0_235 = arith.constant 0 : index
    %c0_236 = arith.constant 0 : index
    %c8_237 = arith.constant 8 : index
    %c0_238 = arith.constant 0 : index
    %596 = vector.load %arg16[%c0_235, %c0_236, %c8_237, %c0_238] : memref<1x16x16x32xf32, #tpu.memory_space<vmem>>, vector<1x16x4x32xf32>
    %597 = vector.shape_cast %596 : vector<1x16x4x32xf32> to vector<16x4x32xf32>
    %598 = vector.shape_cast %595 : vector<16x4x32xf32> to vector<1x16x4x32xf32>
    tpu.vector_store %arg16[%c0_235, %c0_236, %c8_237, %c0_238], %598 {strides = array<i32>} : memref<1x16x16x32xf32, #tpu.memory_space<vmem>>, vector<1x16x4x32xf32>,
    %599 = vector.extract_strided_slice %580 {offsets = [3, 0, 0, 0, 0], sizes = [1, 4, 4, 4, 32], strides = [1, 1, 1, 1, 1]} : vector<4x4x4x4x32xf32> to vector<1x4x4x4x32xf32>
    %600 = vector.shape_cast %599 : vector<1x4x4x4x32xf32> to vector<4x4x4x32xf32>
    %601 = vector.shape_cast %600 : vector<4x4x4x32xf32> to vector<16x4x32xf32>
    %c0_239 = arith.constant 0 : index
    %c0_240 = arith.constant 0 : index
    %c12_241 = arith.constant 12 : index
    %c0_242 = arith.constant 0 : index
    %602 = vector.load %arg16[%c0_239, %c0_240, %c12_241, %c0_242] : memref<1x16x16x32xf32, #tpu.memory_space<vmem>>, vector<1x16x4x32xf32>
    %603 = vector.shape_cast %602 : vector<1x16x4x32xf32> to vector<16x4x32xf32>
    %604 = vector.shape_cast %601 : vector<16x4x32xf32> to vector<1x16x4x32xf32>
    tpu.vector_store %arg16[%c0_239, %c0_240, %c12_241, %c0_242], %604 {strides = array<i32>} : memref<1x16x16x32xf32, #tpu.memory_space<vmem>>, vector<1x16x4x32xf32>,
    return
  }
  func.func @transform_0(%arg0: i32, %arg1: i32) -> (i32, i32, i32, i32) {
    %c0_i32 = arith.constant 0 : i32
    %c0_i32_0 = arith.constant 0 : i32
    %c0_i32_1 = arith.constant 0 : i32
    return %arg0, %arg1, %c0_i32, %c0_i32_0 : i32, i32, i32, i32
  }
  func.func @transform_1(%arg0: i32, %arg1: i32) -> (i32, i32) {
    %c0_i32 = arith.constant 0 : i32
    %c0_i32_0 = arith.constant 0 : i32
    %c0_i32_1 = arith.constant 0 : i32
    return %c0_i32, %c0_i32_0 : i32, i32
  }
  func.func @transform_2(%arg0: i32, %arg1: i32) -> (i32, i32) {
    %c0_i32 = arith.constant 0 : i32
    %c0_i32_0 = arith.constant 0 : i32
    %c0_i32_1 = arith.constant 0 : i32
    return %c0_i32, %c0_i32_0 : i32, i32
  }
  func.func @transform_3(%arg0: i32, %arg1: i32) -> (i32, i32) {
    %c0_i32 = arith.constant 0 : i32
    %c0_i32_0 = arith.constant 0 : i32
    %c0_i32_1 = arith.constant 0 : i32
    return %c0_i32, %c0_i32_0 : i32, i32
  }
  func.func @transform_4(%arg0: i32, %arg1: i32) -> (i32, i32) {
    %c0_i32 = arith.constant 0 : i32
    %c0_i32_0 = arith.constant 0 : i32
    %c0_i32_1 = arith.constant 0 : i32
    return %c0_i32, %c0_i32_0 : i32, i32
  }
  func.func @transform_5(%arg0: i32, %arg1: i32) -> (i32, i32) {
    %c0_i32 = arith.constant 0 : i32
    %c0_i32_0 = arith.constant 0 : i32
    %c0_i32_1 = arith.constant 0 : i32
    return %c0_i32, %c0_i32_0 : i32, i32
  }
  func.func @transform_6(%arg0: i32, %arg1: i32) -> (i32, i32) {
    %c0_i32 = arith.constant 0 : i32
    %c0_i32_0 = arith.constant 0 : i32
    %c0_i32_1 = arith.constant 0 : i32
    return %c0_i32, %c0_i32_0 : i32, i32
  }
  func.func @transform_7(%arg0: i32, %arg1: i32) -> (i32, i32, i32, i32) {
    %c0_i32 = arith.constant 0 : i32
    %c0_i32_0 = arith.constant 0 : i32
    %c0_i32_1 = arith.constant 0 : i32
    %c0_i32_2 = arith.constant 0 : i32
    return %arg1, %c0_i32, %c0_i32_0, %c0_i32_1 : i32, i32, i32, i32
  }
  func.func @transform_8(%arg0: i32, %arg1: i32) -> (i32, i32) {
    %c0_i32 = arith.constant 0 : i32
    %c0_i32_0 = arith.constant 0 : i32
    %c0_i32_1 = arith.constant 0 : i32
    return %c0_i32, %c0_i32_0 : i32, i32
  }
  func.func @transform_9(%arg0: i32, %arg1: i32) -> (i32, i32) {
    %c0_i32 = arith.constant 0 : i32
    %c0_i32_0 = arith.constant 0 : i32
    %c0_i32_1 = arith.constant 0 : i32
    return %c0_i32, %c0_i32_0 : i32, i32
  }
  func.func @transform_10(%arg0: i32, %arg1: i32) -> (i32, i32) {
    %c0_i32 = arith.constant 0 : i32
    %c0_i32_0 = arith.constant 0 : i32
    %c0_i32_1 = arith.constant 0 : i32
    return %c0_i32, %c0_i32_0 : i32, i32
  }
  func.func @transform_11(%arg0: i32, %arg1: i32) -> (i32, i32) {
    %c0_i32 = arith.constant 0 : i32
    %c0_i32_0 = arith.constant 0 : i32
    %c0_i32_1 = arith.constant 0 : i32
    return %c0_i32, %c0_i32_0 : i32, i32
  }
  func.func @transform_12(%arg0: i32, %arg1: i32) -> (i32, i32) {
    %c0_i32 = arith.constant 0 : i32
    %c0_i32_0 = arith.constant 0 : i32
    %c0_i32_1 = arith.constant 0 : i32
    return %c0_i32, %c0_i32_0 : i32, i32
  }
  func.func @transform_13(%arg0: i32, %arg1: i32) -> (i32, i32) {
    %c0_i32 = arith.constant 0 : i32
    %c0_i32_0 = arith.constant 0 : i32
    %c0_i32_1 = arith.constant 0 : i32
    return %c0_i32, %c0_i32_0 : i32, i32
  }
  func.func @transform_14(%arg0: i32, %arg1: i32) -> (i32, i32, i32, i32) {
    %c0_i32 = arith.constant 0 : i32
    %c0_i32_0 = arith.constant 0 : i32
    %c0_i32_1 = arith.constant 0 : i32
    return %arg0, %arg1, %c0_i32, %c0_i32_0 : i32, i32, i32, i32
  }
}

</mosaic_0001>

<bundles_post_ra>
// kernel: swin_block_forward.1
= control target key start
LH: loop header
LB: loop body
LE: loop exit
PB: predicated region body
PF: predicated region fallthrough
CT: control target
= control target key end

     0   :  { %s19866_s0 = inlined_call_operand.vmem [shape: f32[2,16,16,32], index: 0, kind: input, shape index: {}]   ;;  %s19867_s1 = inlined_call_operand.vmem [shape: f32[1,32], index: 1, kind: input, shape index: {}]   ;;  %s19868_s2 = inlined_call_operand.vmem [shape: f32[1,32], index: 2, kind: input, shape index: {}]   ;;  %s19869_s3 = inlined_call_operand.vmem [shape: bf16[32,96], index: 3, kind: input, shape index: {}]   ;;  %s19870_s4 = inlined_call_operand.vmem [shape: f32[1,96], index: 4, kind: input, shape index: {}]   ;;  %s19871_s5 = inlined_call_operand.vmem [shape: bf16[32,32], index: 5, kind: input, shape index: {}]   ;;  %s19872_s6 = inlined_call_operand.vmem [shape: f32[1,32], index: 6, kind: input, shape index: {}]   ;;  %s19873_s7 = inlined_call_operand.vmem [shape: f32[1,64,16,16], index: 7, kind: input, shape index: {}]   ;;  %s19874_s8 = inlined_call_operand.vmem [shape: f32[1,32], index: 8, kind: input, shape index: {}]   ;;  %s19875_s9 = inlined_call_operand.vmem [shape: f32[1,32], index: 9, kind: input, shape index: {}]   ;;  %s19876_s10 = inlined_call_operand.vmem [shape: bf16[32,128], index: 10, kind: input, shape index: {}]   ;;  %s19877_s11 = inlined_call_operand.vmem [shape: f32[1,128], index: 11, kind: input, shape index: {}]   ;;  %s19878_s12 = inlined_call_operand.vmem [shape: bf16[128,32], index: 12, kind: input, shape index: {}]   ;;  %s19879_s13 = inlined_call_operand.vmem [shape: f32[1,32], index: 13, kind: input, shape index: {}]   ;;  %s19880_s14 = inlined_call_operand.hbm [shape: f32[2,16,16,32], index: 14, kind: output, shape index: {}]  }
   0x1   :  { %19939 = sst [smem:[#allocation32_spill]] %s19866_s0 }
   0x2   :  { %19940 = sst [smem:[#allocation33_spill]] %s19867_s1 }
   0x3   :  { %19941 = sst [smem:[#allocation34_spill]] %s19868_s2 }
   0x4   :  { %19942 = sst [smem:[#allocation35_spill]] %s19869_s3 }
   0x5   :  { %19943 = sst [smem:[#allocation36_spill]] %s19870_s4 }
   0x6   :  { %19944 = sst [smem:[#allocation37_spill]] %s19880_s14 }
   0x7   :  { %19 = vsyncpa [#allocation3], 0 }
   0x8   :  { %21 = vsyncpa [#allocation3 + $0x1], 0  ;;  %s15669_s29 = smov 0   ;;  %s15671_s30 = smov 0  }
   0x9   :  { %s15673_s15 = smov 0   ;;  %s15675_s16 = smov 0  }
   0xa   :  { %s15677_s17 = smov 0   ;;  %s15679_s18 = smov 0  }
   0xb LB: > { %19945 = sst [smem:[#allocation5_spill]] %s15556_s29  ;;  %s12673_s19 = sadd.s32 4294967295, %s15576_s18   ;;  %s15576_s18 = sphi %s15679_s18, %s27_s18   ;;  %s15572_s17 = sphi %s15677_s17, %s20058_s17   ;;  %s15568_s16 = sphi %s15675_s16, %s20057_s16   ;;  %s15564_s15 = sphi %s15673_s15, %s20056_s15   ;;  %s15560_s30 = sphi %s15671_s30, %s20060_s30   ;;  %s15556_s29 = sphi %s15669_s29, %s20059_s29  }
   0xc   : > { %19946 = sst [smem:[#allocation6_spill]] %s15564_s15  ;;  %s12674_s20 = sadd.s32 4294967294, %s15576_s18  }
   0xd   : > { %19947 = sst [smem:[#allocation7_spill]] %s15572_s17  ;;  %s39_s21 = sadd.s32 1, %s15572_s17 }
   0xe   : > { %19948 = sst [smem:[#allocation8_spill]] %s15576_s18  ;;  %s354_s22 = sadd.s32 1, %s15564_s15 }
   0xf   : > { %p41_p0 = scmp.ge.s32.totalorder %s39_s21, 2  ;;  %p364_p1 = scmp.ne.s32.totalorder %s15564_s15, %s15560_s30 }
  0x10   : > { %p365_p2 = scmp.eq.s32.totalorder %s12673_s19, 1  ;;  %p370_p3 = scmp.ne.s32.totalorder %s15560_s30, %s15556_s29 }
  0x11   : > { %s20062_s21 = smov (%p41_p0, %s39_s21), 0  ;;  %p371_p5 = scmp.eq.s32.totalorder %s12674_s20, 1 }
  0x12   : > { %19949 = sst [smem:[#allocation9_spill]] %s20062_s21  ;;  %p15709_p4 = por %p365_p2, %p364_p1 }
  0x13   : > { %s349_s24 = ssub.s32 %s15572_s17, %s20062_s21  ;;  %p12678_p6 = scmp.ge.s32.totalorder %s15576_s18, 1 }
  0x14   : > { %s19950_s23 = scalar_select %p15709_p4, 1, 0 }
  0x15   : > { %p352_p7 = scmp.eq.s32.totalorder %s349_s24, 0  ;;  %p15716_p8 = por %p371_p5, %p370_p3 }
  0x16   : > { %19951 = sst [smem:[#allocation10_spill]] %s19950_s23  ;;  %p447_p9 = scmp.lt.s32.totalorder %s15576_s18, 3 }
  0x17   : > { %s19952_s25 = scalar_select %p15716_p8, 1, 0 }
  0x18   : > { %s15722_s26 = scalar_select %p352_p7, %s15564_s15, %s354_s22  }
  0x19   : > { %19953 = sst [smem:[#allocation11_spill]] %s19952_s25  ;;  %p448_p10 = pnand %p12678_p6, %p447_p9 }
  0x1a   : > { %19954 = sst [smem:[#allocation12_spill]] %s15722_s26 }
  0x1b   : > { %451 = sbr.rel (%p448_p10) target bundleno = 12356 (0x3044), region = 76 }
  0x22   : > { %p504_p11 = scmp.lt.s32.totalorder %s15568_s16, 1  ;;  %vm553_vm0 = vcmask 261120   ;;  %s19955_s0 = sld [smem:[#allocation32_spill]]  ;;  %vm15579_vm1 = vmmov 0   ;;  %vm1396_vm2 = vcmask 64512   ;;  %vm1594_vm3 = vcmask 130048  }
  0x23   : > { %s19956_s3 = sld [smem:[#allocation35_spill]]  ;;  %s19957_s1 = sld [smem:[#allocation33_spill]]  ;;  %vm2394_vm4 = vcmask 1043456   ;;  %vm12494_vm5 = vcmask 257024  }
  0x24   : > { %s505_s27 = scalar_select %p504_p11, %s15568_s16, 1 }
  0x25   : > { %s19958_s2 = sld [smem:[#allocation34_spill]]  ;;  %s19959_s4 = sld [smem:[#allocation36_spill]] }
  0x26   : > { %s13086_s28 = sshll.u32 %s505_s27, 8  ;;  %s19882_s19 = smov 96  }
  0x27   : > { %s19884_s20 = smov 120   ;;  %s19890_s22 = smov 56  }
  0x28   : > { %s15729_s21 = scalar_lea.vmem %s19955_s0, %s13086_s28  ;;  %s19888_s28 = smov 64  }
  0x29   : > { %v15732_v0 = vld [vmem:[%s15729_s21] sm:$0xff]  ;;  %v15735_v1 = vld [vmem:[%s15729_s21 + $0x10] sm:$0xff]  ;;  %v15738_v2 = vld [vmem:[%s15729_s21 + $0x8] sm:$0xff]  ;;  %s19895_s24 = smov 80   ;;  %s19903_s27 = smov 72  }
  0x2a   : > { %v554_v3 = vsel %vm553_vm0, %v15732_v0, 0.0  ;;  %v560_v4 = vsel %vm553_vm0, %v15735_v1, 0.0  ;;  %v15745_v5 = vld [vmem:[%s15729_s21 + $0x18] sm:$0xff]  ;;  %v557_v6 = vsel %vm553_vm0, %v15738_v2, 0.0  ;;  %v15752_v8 = vld [vmem:[%s15729_s21 + $0x20] sm:$0xff]  ;;  %v15755_v9 = vld [vmem:[%s15729_s21 + $0x28] sm:$0xff] }
  0x2b   : > { %555 = vadd.xlane.f32.xlu0 %v554_v3  ;;  %561 = vadd.xlane.f32.xlu1 %v560_v4  ;;  %v563_v7 = vsel %vm553_vm0, %v15745_v5, 0.0  ;;  %v566_v10 = vsel %vm553_vm0, %v15752_v8, 0.0  ;;  %v569_v11 = vsel %vm553_vm0, %v15755_v9, 0.0  ;;  %v15762_v12 = vld [vmem:[%s15729_s21 + $0x30] sm:$0xff]  ;;  %v15765_v13 = vld [vmem:[%s15729_s21 + $0x38] sm:$0xff]  ;;  %v15770_v15 = vld [vmem:[%s15729_s21 + $0x40] sm:$0xff] }
  0x2c   : > { %v572_v14 = vsel %vm553_vm0, %v15762_v12, 0.0  ;;  %v575_v16 = vsel %vm553_vm0, %v15765_v13, 0.0  ;;  %v15775_v17 = vld [vmem:[%s15729_s21 + $0x48] sm:$0xff]  ;;  %v578_v18 = vsel %vm553_vm0, %v15770_v15, 0.0  ;;  %v15782_v20 = vld [vmem:[%s15729_s21 + $0x50] sm:$0xff]  ;;  %v15785_v21 = vld [vmem:[%s15729_s21 + $0x58] sm:$0xff] }
  0x2d   : > { %v581_v19 = vsel %vm553_vm0, %v15775_v17, 0.0  ;;  %v584_v22 = vsel %vm553_vm0, %v15782_v20, 0.0  ;;  %v587_v23 = vsel %vm553_vm0, %v15785_v21, 0.0  ;;  %v15792_v24 = vld [vmem:[%s15729_s21 + $0x60] sm:$0xff]  ;;  %v15795_v25 = vld [vmem:[%s15729_s21 + $0x68] sm:$0xff]  ;;  %v15802_v28 = vld [vmem:[%s15729_s21 + $0x70] sm:$0xff] }
  0x2e   : > { %v590_v26 = vsel %vm553_vm0, %v15792_v24, 0.0  ;;  %v593_v27 = vsel %vm553_vm0, %v15795_v25, 0.0  ;;  %v15805_v29 = vld [vmem:[%s15729_s21 + $0x78] sm:$0xff]  ;;  %v596_v30 = vsel %vm553_vm0, %v15802_v28, 0.0  ;;  %v15812_v32 = vld [vmem:[%s15729_s21 + $0x80] sm:$0xff]  ;;  %v15815_v33 = vld [vmem:[%s15729_s21 + $0x88] sm:$0xff] }
  0x2f   : > { %558 = vadd.xlane.f32.xlu0 %v557_v6  ;;  %564 = vadd.xlane.f32.xlu1 %v563_v7  ;;  %v599_v31 = vsel %vm553_vm0, %v15805_v29, 0.0  ;;  %v602_v34 = vsel %vm553_vm0, %v15812_v32, 0.0  ;;  %v605_v35 = vsel %vm553_vm0, %v15815_v33, 0.0  ;;  %v15822_v36 = vld [vmem:[%s15729_s21 + $0x90] sm:$0xff]  ;;  %v15825_v37 = vld [vmem:[%s15729_s21 + $0x98] sm:$0xff]  ;;  %v15832_v40 = vld [vmem:[%s15729_s21 + $0xa0] sm:$0xff] }
  0x30   : > { %v608_v38 = vsel %vm553_vm0, %v15822_v36, 0.0  ;;  %v611_v39 = vsel %vm553_vm0, %v15825_v37, 0.0  ;;  %v15835_v41 = vld [vmem:[%s15729_s21 + $0xa8] sm:$0xff]  ;;  %v614_v42 = vsel %vm553_vm0, %v15832_v40, 0.0  ;;  %v15842_v44 = vld [vmem:[%s15729_s21 + $0xc0] sm:$0xff]  ;;  %v15852_v48 = vld [vmem:[%s15729_s21 + $0xb0] sm:$0xff] }
  0x31   : > { %v617_v43 = vsel %vm553_vm0, %v15835_v41, 0.0  ;;  %v15845_v45 = vld [vmem:[%s15729_s21 + $0xc8] sm:$0xff]  ;;  %v626_v46 = vsel %vm553_vm0, %v15842_v44, 0.0  ;;  %v15855_v49 = vld [vmem:[%s15729_s21 + $0xb8] sm:$0xff]  ;;  %v620_v50 = vsel %vm553_vm0, %v15852_v48, 0.0  ;;  %v15862_v52 = vld [vmem:[%s15729_s21 + $0xd0] sm:$0xff] }
  0x32   : > { %v629_v47 = vsel %vm553_vm0, %v15845_v45, 0.0  ;;  %v623_v51 = vsel %vm553_vm0, %v15855_v49, 0.0  ;;  %v15865_v53 = vld [vmem:[%s15729_s21 + $0xd8] sm:$0xff]  ;;  %v632_v54 = vsel %vm553_vm0, %v15862_v52, 0.0  ;;  %v15872_v56 = vld [vmem:[%s15729_s21 + $0xe0] sm:$0xff]  ;;  %v15875_v57 = vld [vmem:[%s15729_s21 + $0xe8] sm:$0xff] }
  0x33   : > { %567 = vadd.xlane.f32.xlu0 %v566_v10  ;;  %570 = vadd.xlane.f32.xlu1 %v569_v11  ;;  %v635_v55 = vsel %vm553_vm0, %v15865_v53, 0.0  ;;  %v638_v58 = vsel %vm553_vm0, %v15872_v56, 0.0  ;;  %v641_v59 = vsel %vm553_vm0, %v15875_v57, 0.0  ;;  %v15882_v60 = vld [vmem:[%s15729_s21 + $0xf0] sm:$0xff]  ;;  %v15885_v61 = vld [vmem:[%s15729_s21 + $0xf8] sm:$0xff]  ;;  %s19901_s0 = smov 104  }
  0x34   : > { %v644_v62 = vsel %vm553_vm0, %v15882_v60, 0.0  ;;  %v647_v63 = vsel %vm553_vm0, %v15885_v61, 0.0  ;;  %s19978_s26 = smov 48   ;;  %s19987_s14 = smov 40  }
  0x37   : > { %573 = vadd.xlane.f32.xlu0 %v572_v14  ;;  %576 = vadd.xlane.f32.xlu1 %v575_v16 }
  0x3b   : > { %579 = vadd.xlane.f32.xlu0 %v578_v18  ;;  %582 = vadd.xlane.f32.xlu1 %v581_v19 }
  0x3f   : > { %585 = vadd.xlane.f32.xlu0 %v584_v22  ;;  %588 = vadd.xlane.f32.xlu1 %v587_v23 }
  0x43   : > { %591 = vadd.xlane.f32.xlu0 %v590_v26  ;;  %594 = vadd.xlane.f32.xlu1 %v593_v27 }
  0x47   : > { %597 = vadd.xlane.f32.xlu0 %v596_v30  ;;  %600 = vadd.xlane.f32.xlu1 %v599_v31 }
  0x4b   : > { %603 = vadd.xlane.f32.xlu0 %v602_v34  ;;  %606 = vadd.xlane.f32.xlu1 %v605_v35 }
  0x4f   : > { %609 = vadd.xlane.f32.xlu0 %v608_v38  ;;  %612 = vadd.xlane.f32.xlu1 %v611_v39 }
  0x53   : > { %615 = vadd.xlane.f32.xlu0 %v614_v42  ;;  %618 = vadd.xlane.f32.xlu1 %v617_v43 }
  0x57   : > { %627 = vadd.xlane.f32.xlu0 %v626_v46  ;;  %630 = vadd.xlane.f32.xlu1 %v629_v47 }
  0x5b   : > { %621 = vadd.xlane.f32.xlu0 %v620_v50  ;;  %624 = vadd.xlane.f32.xlu1 %v623_v51 }
  0x5f   : > { %633 = vadd.xlane.f32.xlu0 %v632_v54  ;;  %636 = vadd.xlane.f32.xlu1 %v635_v55 }
  0x63   : > { %639 = vadd.xlane.f32.xlu0 %v638_v58  ;;  %642 = vadd.xlane.f32.xlu1 %v641_v59 }
  0x67   : > { %645 = vadd.xlane.f32.xlu0 %v644_v62  ;;  %648 = vadd.xlane.f32.xlu1 %v647_v63 }
  0xb8   : > { %v556_v3 = vpop.xlane.xlu0 %555  ;;  %v562_v4 = vpop.xlane.xlu1 %561 }
  0xb9   : > { %v651_v6 = vmul.f32 0.03125, %v556_v3  ;;  %v653_v7 = vmul.f32 0.03125, %v562_v4 }
  0xbb   : > { %v15892_v10 = vsub.f32 %v15732_v0, %v651_v6  ;;  %v15895_v11 = vsub.f32 %v15735_v1, %v653_v7 }
  0xbc   : > { %v559_v14 = vpop.xlane.xlu0 %558  ;;  %v565_v16 = vpop.xlane.xlu1 %564 }
  0xbd   : > { %v652_v18 = vmul.f32 0.03125, %v559_v14  ;;  %v654_v19 = vmul.f32 0.03125, %v565_v16  ;;  %v715_v22 = vmul.f32 %v15892_v10, %v15892_v10  ;;  %v717_v23 = vmul.f32 %v15895_v11, %v15895_v11 }
  0xbf   : > { %v15902_v26 = vsub.f32 %v15738_v2, %v652_v18  ;;  %v15905_v27 = vsub.f32 %v15745_v5, %v654_v19  ;;  %v747_v0 = vsel %vm553_vm0, %v715_v22, 0.0  ;;  %v753_v31 = vsel %vm553_vm0, %v717_v23, 0.0 }
  0xc0   : > { %748 = vadd.xlane.f32.xlu0 %v747_v0  ;;  %v568_v1 = vpop.xlane.xlu0 %567  ;;  %v571_v30 = vpop.xlane.xlu1 %570 }
  0xc1   : > { %v655_v34 = vmul.f32 0.03125, %v568_v1  ;;  %v656_v35 = vmul.f32 0.03125, %v571_v30  ;;  %v716_v38 = vmul.f32 %v15902_v26, %v15902_v26  ;;  %v718_v39 = vmul.f32 %v15905_v27, %v15905_v27 }
  0xc3   : > { %v15914_v2 = vsub.f32 %v15752_v8, %v655_v34  ;;  %v15917_v5 = vsub.f32 %v15755_v9, %v656_v35  ;;  %v750_v42 = vsel %vm553_vm0, %v716_v38, 0.0  ;;  %v756_v47 = vsel %vm553_vm0, %v718_v39, 0.0 }
  0xc4   : > { %754 = vadd.xlane.f32.xlu0 %v753_v31  ;;  %751 = vadd.xlane.f32.xlu1 %v750_v42  ;;  %v574_v43 = vpop.xlane.xlu0 %573  ;;  %v577_v46 = vpop.xlane.xlu1 %576 }
  0xc5   : > { %v657_v50 = vmul.f32 0.03125, %v574_v43  ;;  %v658_v51 = vmul.f32 0.03125, %v577_v46  ;;  %v719_v54 = vmul.f32 %v15914_v2, %v15914_v2  ;;  %v720_v8 = vmul.f32 %v15917_v5, %v15917_v5 }
  0xc7   : > { %v15926_v55 = vsub.f32 %v15762_v12, %v657_v50  ;;  %v15929_v9 = vsub.f32 %v15765_v13, %v658_v51  ;;  %v759_v58 = vsel %vm553_vm0, %v719_v54, 0.0  ;;  %v762_v63 = vsel %vm553_vm0, %v720_v8, 0.0 }
  0xc8   : > { %757 = vadd.xlane.f32.xlu1 %v756_v47  ;;  %760 = vadd.xlane.f32.xlu0 %v759_v58  ;;  %v580_v59 = vpop.xlane.xlu0 %579  ;;  %v583_v62 = vpop.xlane.xlu1 %582 }
  0xc9   : > { %v659_v3 = vmul.f32 0.03125, %v580_v59  ;;  %v660_v4 = vmul.f32 0.03125, %v583_v62  ;;  %v721_v6 = vmul.f32 %v15926_v55, %v15926_v55  ;;  %v722_v12 = vmul.f32 %v15929_v9, %v15929_v9 }
  0xcb   : > { %v15938_v7 = vsub.f32 %v15770_v15, %v659_v3  ;;  %v15941_v13 = vsub.f32 %v15775_v17, %v660_v4  ;;  %v765_v14 = vsel %vm553_vm0, %v721_v6, 0.0  ;;  %v768_v19 = vsel %vm553_vm0, %v722_v12, 0.0 }
  0xcc   : > { %763 = vadd.xlane.f32.xlu1 %v762_v63  ;;  %766 = vadd.xlane.f32.xlu0 %v765_v14  ;;  %v586_v16 = vpop.xlane.xlu0 %585  ;;  %v589_v18 = vpop.xlane.xlu1 %588 }
  0xcd   : > { %v661_v22 = vmul.f32 0.03125, %v586_v16  ;;  %v662_v23 = vmul.f32 0.03125, %v589_v18  ;;  %v723_v0 = vmul.f32 %v15938_v7, %v15938_v7  ;;  %v724_v15 = vmul.f32 %v15941_v13, %v15941_v13 }
  0xcf   : > { %v15950_v1 = vsub.f32 %v15782_v20, %v661_v22  ;;  %v15953_v17 = vsub.f32 %v15785_v21, %v662_v23  ;;  %v771_v30 = vsel %vm553_vm0, %v723_v0, 0.0  ;;  %v774_v35 = vsel %vm553_vm0, %v724_v15, 0.0 }
  0xd0   : > { %769 = vadd.xlane.f32.xlu1 %v768_v19  ;;  %772 = vadd.xlane.f32.xlu0 %v771_v30  ;;  %v592_v31 = vpop.xlane.xlu0 %591  ;;  %v595_v34 = vpop.xlane.xlu1 %594 }
  0xd1   : > { %v663_v38 = vmul.f32 0.03125, %v592_v31  ;;  %v664_v39 = vmul.f32 0.03125, %v595_v34  ;;  %v725_v42 = vmul.f32 %v15950_v1, %v15950_v1  ;;  %v726_v20 = vmul.f32 %v15953_v17, %v15953_v17 }
  0xd3   : > { %v15962_v43 = vsub.f32 %v15792_v24, %v663_v38  ;;  %v15965_v21 = vsub.f32 %v15795_v25, %v664_v39  ;;  %v777_v46 = vsel %vm553_vm0, %v725_v42, 0.0  ;;  %v780_v51 = vsel %vm553_vm0, %v726_v20, 0.0 }
  0xd4   : > { %775 = vadd.xlane.f32.xlu1 %v774_v35  ;;  %778 = vadd.xlane.f32.xlu0 %v777_v46  ;;  %v598_v47 = vpop.xlane.xlu0 %597  ;;  %v601_v50 = vpop.xlane.xlu1 %600 }
  0xd5   : > { %v665_v54 = vmul.f32 0.03125, %v598_v47  ;;  %v666_v8 = vmul.f32 0.03125, %v601_v50  ;;  %v727_v58 = vmul.f32 %v15962_v43, %v15962_v43  ;;  %v728_v24 = vmul.f32 %v15965_v21, %v15965_v21 }
  0xd7   : > { %v15974_v59 = vsub.f32 %v15802_v28, %v665_v54  ;;  %v15977_v25 = vsub.f32 %v15805_v29, %v666_v8  ;;  %v783_v62 = vsel %vm553_vm0, %v727_v58, 0.0  ;;  %v786_v4 = vsel %vm553_vm0, %v728_v24, 0.0  ;;  %v14718_v58 = vld [vmem:[%s19956_s3] sm:$0xff]  }
  0xd8   : > { %781 = vadd.xlane.f32.xlu1 %v780_v51  ;;  %784 = vadd.xlane.f32.xlu0 %v783_v62  ;;  %v604_v63 = vpop.xlane.xlu0 %603  ;;  %v607_v3 = vpop.xlane.xlu1 %606 }
  0xd9   : > { %v667_v6 = vmul.f32 0.03125, %v604_v63  ;;  %v668_v12 = vmul.f32 0.03125, %v607_v3  ;;  %v729_v14 = vmul.f32 %v15974_v59, %v15974_v59  ;;  %v730_v28 = vmul.f32 %v15977_v25, %v15977_v25  ;;  %13484 = vmatprep.subr.bf16.mxu0 %v14718_v58  ;;  %14532 = vmatprep.subr.bf16.mxu1 %v14718_v58 }
  0xda   : > { %13485 = vmatpush3.bf16.msra.mxu0 %v14718_v58  ;;  %14534 = vmatpush3.bf16.msra.mxu1 %v14718_v58 }
  0xdb   : > { %v15986_v16 = vsub.f32 %v15812_v32, %v667_v6  ;;  %v15989_v29 = vsub.f32 %v15815_v33, %v668_v12  ;;  %v789_v18 = vsel %vm553_vm0, %v729_v14, 0.0  ;;  %v792_v23 = vsel %vm553_vm0, %v730_v28, 0.0  ;;  %v14719_v28 = vld [vmem:[%s19956_s3 + $0x8] sm:$0xff]   ;;  %s19976_s3 = smov 80  }
  0xdc   : > { %787 = vadd.xlane.f32.xlu1 %v786_v4  ;;  %790 = vadd.xlane.f32.xlu0 %v789_v18  ;;  %v610_v19 = vpop.xlane.xlu0 %609  ;;  %v613_v22 = vpop.xlane.xlu1 %612 }
  0xdd   : > { %v669_v0 = vmul.f32 0.03125, %v610_v19  ;;  %v670_v15 = vmul.f32 0.03125, %v613_v22  ;;  %v731_v30 = vmul.f32 %v15986_v16, %v15986_v16  ;;  %v732_v32 = vmul.f32 %v15989_v29, %v15989_v29  ;;  %13486 = vmatprep.subr.bf16.mxu0 %v14719_v28  ;;  %14533 = vmatprep.subr.bf16.mxu1 %v14719_v28 }
  0xde   : > { %13487 = vmatpush3.bf16.msra.mxu0 %v14719_v28  ;;  %14535 = vmatpush3.bf16.msra.mxu1 %v14719_v28 }
  0xdf   : > { %v15998_v31 = vsub.f32 %v15822_v36, %v669_v0  ;;  %v16001_v33 = vsub.f32 %v15825_v37, %v670_v15  ;;  %v795_v34 = vsel %vm553_vm0, %v731_v30, 0.0  ;;  %v798_v39 = vsel %vm553_vm0, %v732_v32, 0.0 }
  0xe0   : > { %793 = vadd.xlane.f32.xlu1 %v792_v23  ;;  %796 = vadd.xlane.f32.xlu0 %v795_v34  ;;  %v616_v35 = vpop.xlane.xlu0 %615  ;;  %v619_v38 = vpop.xlane.xlu1 %618 }
  0xe1   : > { %v671_v42 = vmul.f32 0.03125, %v616_v35  ;;  %v672_v20 = vmul.f32 0.03125, %v619_v38  ;;  %v733_v46 = vmul.f32 %v15998_v31, %v15998_v31  ;;  %v734_v36 = vmul.f32 %v16001_v33, %v16001_v33 }
  0xe3   : > { %v16010_v47 = vsub.f32 %v15832_v40, %v671_v42  ;;  %v16013_v37 = vsub.f32 %v15835_v41, %v672_v20  ;;  %v801_v50 = vsel %vm553_vm0, %v733_v46, 0.0  ;;  %v804_v8 = vsel %vm553_vm0, %v734_v36, 0.0 }
  0xe4   : > { %799 = vadd.xlane.f32.xlu1 %v798_v39  ;;  %802 = vadd.xlane.f32.xlu0 %v801_v50  ;;  %v628_v51 = vpop.xlane.xlu0 %627  ;;  %v631_v54 = vpop.xlane.xlu1 %630 }
  0xe5   : > { %v675_v24 = vmul.f32 0.03125, %v628_v51  ;;  %v676_v62 = vmul.f32 0.03125, %v631_v54  ;;  %v735_v40 = vmul.f32 %v16010_v47, %v16010_v47  ;;  %v736_v41 = vmul.f32 %v16013_v37, %v16013_v37 }
  0xe7   : > { %v16025_v63 = vsub.f32 %v15842_v44, %v675_v24  ;;  %v16028_v3 = vsub.f32 %v15845_v45, %v676_v62  ;;  %v807_v4 = vsel %vm553_vm0, %v735_v40, 0.0  ;;  %v810_v14 = vsel %vm553_vm0, %v736_v41, 0.0 }
  0xe8   : > { %805 = vadd.xlane.f32.xlu1 %v804_v8  ;;  %808 = vadd.xlane.f32.xlu0 %v807_v4  ;;  %v622_v6 = vpop.xlane.xlu0 %621  ;;  %v625_v12 = vpop.xlane.xlu1 %624 }
  0xe9   : > { %v673_v18 = vmul.f32 0.03125, %v622_v6  ;;  %v674_v44 = vmul.f32 0.03125, %v625_v12  ;;  %v739_v45 = vmul.f32 %v16025_v63, %v16025_v63  ;;  %v740_v19 = vmul.f32 %v16028_v3, %v16028_v3 }
  0xeb   : > { %v16040_v22 = vsub.f32 %v15852_v48, %v673_v18  ;;  %v16043_v23 = vsub.f32 %v15855_v49, %v674_v44  ;;  %v819_v0 = vsel %vm553_vm0, %v739_v45, 0.0  ;;  %v822_v32 = vsel %vm553_vm0, %v740_v19, 0.0 }
  0xec   : > { %811 = vadd.xlane.f32.xlu1 %v810_v14  ;;  %820 = vadd.xlane.f32.xlu0 %v819_v0  ;;  %v634_v15 = vpop.xlane.xlu0 %633  ;;  %v637_v30 = vpop.xlane.xlu1 %636 }
  0xed   : > { %v677_v34 = vmul.f32 0.03125, %v634_v15  ;;  %v678_v35 = vmul.f32 0.03125, %v637_v30  ;;  %v737_v38 = vmul.f32 %v16040_v22, %v16040_v22  ;;  %v738_v48 = vmul.f32 %v16043_v23, %v16043_v23 }
  0xef   : > { %v16052_v49 = vsub.f32 %v15862_v52, %v677_v34  ;;  %v16055_v39 = vsub.f32 %v15865_v53, %v678_v35  ;;  %v813_v42 = vsel %vm553_vm0, %v737_v38, 0.0  ;;  %v816_v36 = vsel %vm553_vm0, %v738_v48, 0.0 }
  0xf0   : > { %823 = vadd.xlane.f32.xlu1 %v822_v32  ;;  %814 = vadd.xlane.f32.xlu0 %v813_v42  ;;  %v640_v20 = vpop.xlane.xlu0 %639  ;;  %v643_v46 = vpop.xlane.xlu1 %642 }
  0xf1   : > { %v679_v50 = vmul.f32 0.03125, %v640_v20  ;;  %v680_v51 = vmul.f32 0.03125, %v643_v46  ;;  %v741_v54 = vmul.f32 %v16052_v49, %v16052_v49  ;;  %v742_v52 = vmul.f32 %v16055_v39, %v16055_v39 }
  0xf3   : > { %v16064_v8 = vsub.f32 %v15872_v56, %v679_v50  ;;  %v16067_v53 = vsub.f32 %v15875_v57, %v680_v51  ;;  %v825_v58 = vsel %vm553_vm0, %v741_v54, 0.0  ;;  %v828_v40 = vsel %vm553_vm0, %v742_v52, 0.0 }
  0xf4   : > { %817 = vadd.xlane.f32.xlu1 %v816_v36  ;;  %826 = vadd.xlane.f32.xlu0 %v825_v58  ;;  %v646_v24 = vpop.xlane.xlu0 %645  ;;  %v649_v62 = vpop.xlane.xlu1 %648 }
  0xf5   : > { %v681_v41 = vmul.f32 0.03125, %v646_v24  ;;  %v682_v4 = vmul.f32 0.03125, %v649_v62  ;;  %v743_v6 = vmul.f32 %v16064_v8, %v16064_v8  ;;  %v744_v56 = vmul.f32 %v16067_v53, %v16067_v53 }
  0xf7   : > { %v16076_v12 = vsub.f32 %v15882_v60, %v681_v41  ;;  %v16079_v57 = vsub.f32 %v15885_v61, %v682_v4  ;;  %v831_v14 = vsel %vm553_vm0, %v743_v6, 0.0  ;;  %v834_v28 = vsel %vm553_vm0, %v744_v56, 0.0 }
  0xf8   : > { %829 = vadd.xlane.f32.xlu1 %v828_v40  ;;  %832 = vadd.xlane.f32.xlu0 %v831_v14 }
  0xf9   : > { %v745_v18 = vmul.f32 %v16076_v12, %v16076_v12  ;;  %v746_v44 = vmul.f32 %v16079_v57, %v16079_v57 }
  0xfb   : > { %v837_v45 = vsel %vm553_vm0, %v745_v18, 0.0  ;;  %v840_v60 = vsel %vm553_vm0, %v746_v44, 0.0 }
  0xfc   : > { %835 = vadd.xlane.f32.xlu1 %v834_v28  ;;  %838 = vadd.xlane.f32.xlu0 %v837_v45  ;;  %v16093_v28 = vld [vmem:[%s19957_s1] ss:$0 sm:$0xff]  ;;  %s19907_s1 = smov 40  }
 0x100   : > { %841 = vadd.xlane.f32.xlu1 %v840_v60 }
 0x14d   : > { %v749_v61 = vpop.xlane.xlu0 %748 }
 0x14e   : > { %v843_v19 = vmul.f32 0.03125, %v749_v61 }
 0x150   : > { %v875_v0 = vadd.f32 1e-05, %v843_v19 }
 0x151   : > { %v752_v15 = vpop.xlane.xlu1 %751  ;;  %v755_v30 = vpop.xlane.xlu0 %754 }
 0x152   : > { %14762 = vrsqrt.f32 %v875_v0  ;;  %v844_v32 = vmul.f32 0.03125, %v752_v15  ;;  %v845_v34 = vmul.f32 0.03125, %v755_v30 }
 0x154   : > { %v876_v35 = vadd.f32 1e-05, %v844_v32  ;;  %v877_v38 = vadd.f32 1e-05, %v845_v34  ;;  %v16100_v32 = vld [vmem:[%s19958_s2] ss:$0 sm:$0xff] }
 0x155   : > { %v758_v48 = vpop.xlane.xlu1 %757  ;;  %v761_v42 = vpop.xlane.xlu0 %760  ;;  %s19971_s2 = smov 96  }
 0x156   : > { %14764 = vrsqrt.f32 %v876_v35  ;;  %v846_v20 = vmul.f32 0.03125, %v758_v48  ;;  %v847_v46 = vmul.f32 0.03125, %v761_v42 }
 0x157   : > { %14766 = vrsqrt.f32 %v877_v38 }
 0x158   : > { %v878_v36 = vadd.f32 1e-05, %v846_v20  ;;  %v879_v50 = vadd.f32 1e-05, %v847_v46 }
 0x159   : > { %v764_v51 = vpop.xlane.xlu1 %763  ;;  %v767_v54 = vpop.xlane.xlu0 %766 }
 0x15a   : > { %14768 = vrsqrt.f32 %v878_v36  ;;  %v848_v52 = vmul.f32 0.03125, %v764_v51  ;;  %v849_v58 = vmul.f32 0.03125, %v767_v54 }
 0x15b   : > { %14770 = vrsqrt.f32 %v879_v50 }
 0x15c   : > { %v14763_v24 = vpop.eup %14762  ;;  %v880_v62 = vadd.f32 1e-05, %v848_v52  ;;  %v881_v40 = vadd.f32 1e-05, %v849_v58 }
 0x15d   : > { %v770_v41 = vpop.xlane.xlu1 %769  ;;  %v773_v4 = vpop.xlane.xlu0 %772  ;;  %v939_v6 = vmul.f32 %v14763_v24, %v15892_v10 }
 0x15e   : > { %14772 = vrsqrt.f32 %v880_v62  ;;  %v850_v56 = vmul.f32 0.03125, %v770_v41  ;;  %v851_v14 = vmul.f32 0.03125, %v773_v4 }
 0x15f   : > { %14774 = vrsqrt.f32 %v881_v40  ;;  %v978_v15 = vmul.f32 %v16093_v28, %v939_v6 }
 0x160   : > { %v14765_v18 = vpop.eup %14764  ;;  %v882_v44 = vadd.f32 1e-05, %v850_v56  ;;  %v883_v45 = vadd.f32 1e-05, %v851_v14 }
 0x161   : > { %v14767_v60 = vpop.eup %14766  ;;  %v776_v61 = vpop.xlane.xlu1 %775  ;;  %v940_v0 = vmul.f32 %v14765_v18, %v15902_v26  ;;  %v1017_v36 = vadd.f32 %v16100_v32, %v978_v15 }
 0x162   : > { %v779_v19 = vpop.xlane.xlu0 %778  ;;  %14776 = vrsqrt.f32 %v882_v44  ;;  %v852_v10 = vmul.f32 0.03125, %v776_v61  ;;  %v941_v34 = vmul.f32 %v14767_v60, %v15895_v11 }
 0x163   : > { %v853_v30 = vmul.f32 0.03125, %v779_v19  ;;  %14778 = vrsqrt.f32 %v883_v45  ;;  %v979_v35 = vmul.f32 %v16093_v28, %v940_v0 }
 0x164   : > { %v14769_v38 = vpop.eup %14768  ;;  %v884_v48 = vadd.f32 1e-05, %v852_v10  ;;  %v980_v54 = vmul.f32 %v16093_v28, %v941_v34 }
 0x165   : > { %v885_v42 = vadd.f32 1e-05, %v853_v30  ;;  %v14771_v20 = vpop.eup %14770  ;;  %v782_v26 = vpop.xlane.xlu1 %781  ;;  %v1018_v50 = vadd.f32 %v16100_v32, %v979_v35  ;;  %v942_v51 = vmul.f32 %v14769_v38, %v15905_v27 }
 0x166   : > { %v785_v46 = vpop.xlane.xlu0 %784  ;;  %14780 = vrsqrt.f32 %v884_v48  ;;  %v854_v52 = vmul.f32 0.03125, %v782_v26  ;;  %v943_v62 = vmul.f32 %v14771_v20, %v15914_v2  ;;  %v1019_v27 = vadd.f32 %v16100_v32, %v980_v54 }
 0x167   : > { %v855_v11 = vmul.f32 0.03125, %v785_v46  ;;  %14782 = vrsqrt.f32 %v885_v42  ;;  %v1049_v58 = vpack.c.bf16 %v1018_v50, %v1017_v36  ;;  %v981_v24 = vmul.f32 %v16093_v28, %v942_v51 }
 0x168   : > { %v14773_v40 = vpop.eup %14772  ;;  %v886_v41 = vadd.f32 1e-05, %v854_v52  ;;  %v982_v45 = vmul.f32 %v16093_v28, %v943_v62 }
 0x169   : > { %v887_v4 = vadd.f32 1e-05, %v855_v11  ;;  %v14775_v6 = vpop.eup %14774  ;;  %v788_v56 = vpop.xlane.xlu1 %787  ;;  %13488 = vmatprep.mubr.msk.bf16.mxu0 %vm553_vm0, %v1049_v58  ;;  %v1020_v18 = vadd.f32 %v16100_v32, %v981_v24  ;;  %v944_v44 = vmul.f32 %v14773_v40, %v15917_v5 }
 0x16a   : > { %v791_v14 = vpop.xlane.xlu0 %790  ;;  %14784 = vrsqrt.f32 %v886_v41  ;;  %v856_v60 = vmul.f32 0.03125, %v788_v56  ;;  %v945_v2 = vmul.f32 %v14775_v6, %v15926_v55  ;;  %v1021_v5 = vadd.f32 %v16100_v32, %v982_v45 }
 0x16b   : > { %v857_v61 = vmul.f32 0.03125, %v791_v14  ;;  %14786 = vrsqrt.f32 %v887_v4  ;;  %v1050_v19 = vpack.c.bf16 %v1020_v18, %v1019_v27  ;;  %v983_v0 = vmul.f32 %v16093_v28, %v944_v44 }
 0x16c   : > { %v14777_v15 = vpop.eup %14776  ;;  %v888_v10 = vadd.f32 1e-05, %v856_v60  ;;  %v984_v55 = vmul.f32 %v16093_v28, %v945_v2 }
 0x16d   : > { %v889_v30 = vadd.f32 1e-05, %v857_v61  ;;  %v14779_v34 = vpop.eup %14778  ;;  %v794_v35 = vpop.xlane.xlu1 %793  ;;  %13489 = vmatmul.mubr.msk.bf16.vlgmr.msra.gmra.mrb[0].mxu0 %vm553_vm0, %v1050_v19  ;;  %v1022_v48 = vadd.f32 %v16100_v32, %v983_v0  ;;  %v946_v42 = vmul.f32 %v14777_v15, %v15929_v9 }
 0x16e   : > { %v797_v38 = vpop.xlane.xlu0 %796  ;;  %14788 = vrsqrt.f32 %v888_v10  ;;  %v858_v20 = vmul.f32 0.03125, %v794_v35  ;;  %v947_v50 = vmul.f32 %v14779_v34, %v15938_v7  ;;  %v1023_v9 = vadd.f32 %v16100_v32, %v984_v55 }
 0x16f   : > { %v859_v26 = vmul.f32 0.03125, %v797_v38  ;;  %14790 = vrsqrt.f32 %v889_v30  ;;  %v1051_v46 = vpack.c.bf16 %v1022_v48, %v1021_v5  ;;  %v985_v36 = vmul.f32 %v16093_v28, %v946_v42 }
 0x170   : > { %v14781_v51 = vpop.eup %14780  ;;  %v890_v54 = vadd.f32 1e-05, %v858_v20  ;;  %v986_v41 = vmul.f32 %v16093_v28, %v947_v50 }
 0x171   : > { %v891_v52 = vadd.f32 1e-05, %v859_v26  ;;  %v14783_v11 = vpop.eup %14782  ;;  %v800_v58 = vpop.xlane.xlu1 %799  ;;  %13492 = vmatprep.mubr.msk.bf16.mxu0 %vm553_vm0, %v1051_v46  ;;  %v1024_v62 = vadd.f32 %v16100_v32, %v985_v36  ;;  %v948_v40 = vmul.f32 %v14781_v51, %v15941_v13 }
 0x172   : > { %v803_v24 = vpop.xlane.xlu0 %802  ;;  %14792 = vrsqrt.f32 %v890_v54  ;;  %v860_v4 = vmul.f32 0.03125, %v800_v58  ;;  %v949_v7 = vmul.f32 %v14783_v11, %v15950_v1  ;;  %v1025_v13 = vadd.f32 %v16100_v32, %v986_v41 }
 0x173   : > { %v861_v6 = vmul.f32 0.03125, %v803_v24  ;;  %14794 = vrsqrt.f32 %v891_v52  ;;  %v1052_v56 = vpack.c.bf16 %v1024_v62, %v1023_v9  ;;  %v987_v14 = vmul.f32 %v16093_v28, %v948_v40 }
 0x174   : > { %v14785_v27 = vpop.eup %14784  ;;  %v892_v18 = vadd.f32 1e-05, %v860_v4  ;;  %v988_v1 = vmul.f32 %v16093_v28, %v949_v7 }
 0x175   : > { %v893_v44 = vadd.f32 1e-05, %v861_v6  ;;  %v14787_v45 = vpop.eup %14786  ;;  %v806_v60 = vpop.xlane.xlu1 %805  ;;  %13493 = vmatmul.mubr.msk.bf16.gmra.mrb[4].mxu0 %vm553_vm0, %v1052_v56  ;;  %v1026_v2 = vadd.f32 %v16100_v32, %v987_v14  ;;  %v950_v19 = vmul.f32 %v14785_v27, %v15953_v17 }
 0x176   : > { %v809_v61 = vpop.xlane.xlu0 %808  ;;  %14796 = vrsqrt.f32 %v892_v18  ;;  %v862_v0 = vmul.f32 0.03125, %v806_v60  ;;  %v951_v34 = vmul.f32 %v14787_v45, %v15962_v43  ;;  %v1027_v17 = vadd.f32 %v16100_v32, %v988_v1 }
 0x177   : > { %v863_v15 = vmul.f32 0.03125, %v809_v61  ;;  %14798 = vrsqrt.f32 %v893_v44  ;;  %v1053_v10 = vpack.c.bf16 %v1026_v2, %v1025_v13  ;;  %v989_v30 = vmul.f32 %v16093_v28, %v950_v19 }
 0x178   : > { %v14789_v35 = vpop.eup %14788  ;;  %v894_v38 = vadd.f32 1e-05, %v862_v0  ;;  %v990_v46 = vmul.f32 %v16093_v28, %v951_v34 }
 0x179   : > { %v895_v5 = vadd.f32 1e-05, %v863_v15  ;;  %v14791_v48 = vpop.eup %14790  ;;  %v812_v42 = vpop.xlane.xlu1 %811  ;;  %13496 = vmatprep.mubr.msk.bf16.mxu0 %vm553_vm0, %v1053_v10  ;;  %v1028_v20 = vadd.f32 %v16100_v32, %v989_v30  ;;  %v952_v26 = vmul.f32 %v14789_v35, %v15965_v21 }
 0x17a   : > { %v821_v55 = vpop.xlane.xlu0 %820  ;;  %14800 = vrsqrt.f32 %v894_v38  ;;  %v864_v36 = vmul.f32 0.03125, %v812_v42  ;;  %v953_v43 = vmul.f32 %v14791_v48, %v15974_v59  ;;  %v1029_v21 = vadd.f32 %v16100_v32, %v990_v46 }
 0x17b   : > { %v867_v50 = vmul.f32 0.03125, %v821_v55  ;;  %14802 = vrsqrt.f32 %v895_v5  ;;  %v1054_v51 = vpack.c.bf16 %v1028_v20, %v1027_v17  ;;  %v991_v54 = vmul.f32 %v16093_v28, %v952_v26 }
 0x17c   : > { %v14793_v52 = vpop.eup %14792  ;;  %v896_v11 = vadd.f32 1e-05, %v864_v36  ;;  %v992_v59 = vmul.f32 %v16093_v28, %v953_v43 }
 0x17d   : > { %v899_v58 = vadd.f32 1e-05, %v867_v50  ;;  %v14795_v24 = vpop.eup %14794  ;;  %v824_v9 = vpop.xlane.xlu1 %823  ;;  %13497 = vmatmul.mubr.msk.bf16.gmra.mrb[8].mxu0 %vm553_vm0, %v1054_v51  ;;  %v1030_v40 = vadd.f32 %v16100_v32, %v991_v54  ;;  %v954_v41 = vmul.f32 %v14793_v52, %v15977_v25 }
 0x17e   : > { %v815_v62 = vpop.xlane.xlu0 %814  ;;  %14804 = vrsqrt.f32 %v896_v11  ;;  %v868_v4 = vmul.f32 0.03125, %v824_v9  ;;  %v955_v14 = vmul.f32 %v14795_v24, %v15986_v16  ;;  %v1031_v25 = vadd.f32 %v16100_v32, %v992_v59 }
 0x17f   : > { %v865_v6 = vmul.f32 0.03125, %v815_v62  ;;  %14806 = vrsqrt.f32 %v899_v58  ;;  %v1055_v7 = vpack.c.bf16 %v1030_v40, %v1029_v21  ;;  %v993_v56 = vmul.f32 %v16093_v28, %v954_v41 }
 0x180   : > { %v14797_v27 = vpop.eup %14796  ;;  %v900_v18 = vadd.f32 1e-05, %v868_v4  ;;  %v994_v19 = vmul.f32 %v16093_v28, %v955_v14 }
 0x181   : > { %v897_v44 = vadd.f32 1e-05, %v865_v6  ;;  %v14799_v45 = vpop.eup %14798  ;;  %v818_v60 = vpop.xlane.xlu1 %817  ;;  %13500 = vmatprep.mubr.msk.bf16.mxu0 %vm553_vm0, %v1055_v7  ;;  %v1032_v13 = vadd.f32 %v16100_v32, %v993_v56  ;;  %v956_v2 = vmul.f32 %v14797_v27, %v15989_v29 }
 0x182   : > { %v827_v61 = vpop.xlane.xlu0 %826  ;;  %14808 = vrsqrt.f32 %v900_v18  ;;  %v866_v1 = vmul.f32 0.03125, %v818_v60  ;;  %v957_v16 = vmul.f32 %v14799_v45, %v15998_v31  ;;  %v1033_v29 = vadd.f32 %v16100_v32, %v994_v19 }
 0x183   : > { %v869_v0 = vmul.f32 0.03125, %v827_v61  ;;  %14810 = vrsqrt.f32 %v897_v44  ;;  %v1056_v15 = vpack.c.bf16 %v1032_v13, %v1031_v25  ;;  %v995_v10 = vmul.f32 %v16093_v28, %v956_v2 }
 0x184   : > { %v14801_v30 = vpop.eup %14800  ;;  %v898_v34 = vadd.f32 1e-05, %v866_v1  ;;  %v996_v31 = vmul.f32 %v16093_v28, %v957_v16 }
 0x185   : > { %v901_v35 = vadd.f32 1e-05, %v869_v0  ;;  %v14803_v38 = vpop.eup %14802  ;;  %v830_v5 = vpop.xlane.xlu1 %829  ;;  %13501 = vmatmul.mubr.msk.bf16.gmra.mrb[12].mxu0 %vm553_vm0, %v1056_v15  ;;  %v1034_v42 = vadd.f32 %v16100_v32, %v995_v10  ;;  %v958_v55 = vmul.f32 %v14801_v30, %v16001_v33 }
 0x186   : > { %v833_v48 = vpop.xlane.xlu0 %832  ;;  %14812 = vrsqrt.f32 %v898_v34  ;;  %v870_v17 = vmul.f32 0.03125, %v830_v5  ;;  %v959_v36 = vmul.f32 %v14803_v38, %v16010_v47  ;;  %v1035_v33 = vadd.f32 %v16100_v32, %v996_v31 }
 0x187   : > { %v871_v20 = vmul.f32 0.03125, %v833_v48  ;;  %14814 = vrsqrt.f32 %v901_v35  ;;  %v1057_v26 = vpack.c.bf16 %v1034_v42, %v1033_v29  ;;  %v997_v46 = vmul.f32 %v16093_v28, %v958_v55 }
 0x188   : > { %v14805_v50 = vpop.eup %14804  ;;  %v902_v43 = vadd.f32 1e-05, %v870_v17  ;;  %v998_v9 = vmul.f32 %v16093_v28, %v959_v36 }
 0x189   : > { %v903_v51 = vadd.f32 1e-05, %v871_v20  ;;  %v14807_v54 = vpop.eup %14806  ;;  %v836_v52 = vpop.xlane.xlu1 %835  ;;  %13504 = vmatprep.mubr.msk.bf16.mxu0 %vm553_vm0, %v1057_v26  ;;  %v1036_v58 = vadd.f32 %v16100_v32, %v997_v46  ;;  %v960_v24 = vmul.f32 %v14805_v50, %v16013_v37 }
 0x18a   : > { %v839_v11 = vpop.xlane.xlu0 %838  ;;  %14816 = vrsqrt.f32 %v902_v43  ;;  %v872_v62 = vmul.f32 0.03125, %v836_v52  ;;  %v963_v47 = vmul.f32 %v14807_v54, %v16025_v63  ;;  %v1037_v37 = vadd.f32 %v16100_v32, %v998_v9 }
 0x18b   : > { %v873_v21 = vmul.f32 0.03125, %v839_v11  ;;  %14818 = vrsqrt.f32 %v903_v51  ;;  %v1058_v40 = vpack.c.bf16 %v1036_v58, %v1035_v33  ;;  %v999_v41 = vmul.f32 %v16093_v28, %v960_v24  ;;  %v16214_v11 = vld [vmem:[%s19959_s4] ss:$0 sm:$0xff] }
 0x18c   : > { %v14809_v59 = vpop.eup %14808  ;;  %v904_v4 = vadd.f32 1e-05, %v872_v62  ;;  %v1002_v18 = vmul.f32 %v16093_v28, %v963_v47 }
 0x18d   : > { %v905_v6 = vadd.f32 1e-05, %v873_v21  ;;  %v14811_v7 = vpop.eup %14810  ;;  %v842_v56 = vpop.xlane.xlu1 %841  ;;  %13505 = vmatmul.mubr.msk.bf16.gmra.mrb[16].mxu0 %vm553_vm0, %v1058_v40  ;;  %v1038_v14 = vadd.f32 %v16100_v32, %v999_v41  ;;  %v964_v27 = vmul.f32 %v14809_v59, %v16028_v3 }
 0x18e   : > { %14820 = vrsqrt.f32 %v904_v4  ;;  %v874_v63 = vmul.f32 0.03125, %v842_v56  ;;  %v961_v44 = vmul.f32 %v14811_v7, %v16040_v22  ;;  %v1041_v2 = vadd.f32 %v16100_v32, %v1002_v18 }
 0x18f   : > { %14822 = vrsqrt.f32 %v905_v6  ;;  %v1059_v45 = vpack.c.bf16 %v1038_v14, %v1037_v37  ;;  %v1003_v60 = vmul.f32 %v16093_v28, %v964_v27  ;;  %v19897_v4 = vmov 0.0  }
 0x190   : > { %v14813_v61 = vpop.eup %14812  ;;  %v906_v25 = vadd.f32 1e-05, %v874_v63  ;;  %v1000_v1 = vmul.f32 %v16093_v28, %v961_v44  ;;  %13520 = vmatprep.subr.bf16.mxu1 %v19897_v4  ;;  %13568 = vmatprep.subr.bf16.mxu0 %v19897_v4 }
 0x191   : > { %v14815_v13 = vpop.eup %14814  ;;  %13508 = vmatprep.mubr.msk.bf16.mxu0 %vm553_vm0, %v1059_v45  ;;  %v1042_v19 = vadd.f32 %v16100_v32, %v1003_v60  ;;  %v962_v3 = vmul.f32 %v14813_v61, %v16043_v23 }
 0x192   : > { %14824 = vrsqrt.f32 %v906_v25  ;;  %v965_v22 = vmul.f32 %v14815_v13, %v16052_v49  ;;  %v1039_v30 = vadd.f32 %v16100_v32, %v1000_v1 }
 0x193   : > { %v1061_v0 = vpack.c.bf16 %v1042_v19, %v1041_v2  ;;  %v1001_v16 = vmul.f32 %v16093_v28, %v962_v3 }
 0x194   : > { %v14817_v15 = vpop.eup %14816  ;;  %v1004_v23 = vmul.f32 %v16093_v28, %v965_v22 }
 0x195   : > { %v14819_v10 = vpop.eup %14818  ;;  %13512 = vmatprep.mubr.msk.bf16.mxu1 %vm553_vm0, %v1061_v0  ;;  %v1040_v34 = vadd.f32 %v16100_v32, %v1001_v16  ;;  %v966_v35 = vmul.f32 %v14817_v15, %v16055_v39 }
 0x196   : > { %v967_v38 = vmul.f32 %v14819_v10, %v16064_v8  ;;  %v1043_v42 = vadd.f32 %v16100_v32, %v1004_v23 }
 0x197   : > { %v1060_v5 = vpack.c.bf16 %v1040_v34, %v1039_v30  ;;  %v1005_v49 = vmul.f32 %v16093_v28, %v966_v35 }
 0x198   : > { %v14821_v48 = vpop.eup %14820  ;;  %v1006_v17 = vmul.f32 %v16093_v28, %v967_v38 }
 0x199   : > { %v14823_v29 = vpop.eup %14822  ;;  %13509 = vmatmul.mubr.msk.bf16.gmra.mrb[20].mxu0 %vm553_vm0, %v1060_v5  ;;  %v1044_v55 = vadd.f32 %v16100_v32, %v1005_v49  ;;  %v968_v31 = vmul.f32 %v14821_v48, %v16067_v53 }
 0x19a   : > { %v969_v39 = vmul.f32 %v14823_v29, %v16076_v12  ;;  %v1045_v46 = vadd.f32 %v16100_v32, %v1006_v17  ;;  %13570 = vmatprep.mubr.msk.bf16.mxu0 %vm15579_vm1, %v19897_v4 }
 0x19b   : > { %v1062_v20 = vpack.c.bf16 %v1044_v55, %v1043_v42  ;;  %v1007_v8 = vmul.f32 %v16093_v28, %v968_v31 }
 0x19c   : > { %v14825_v26 = vpop.eup %14824  ;;  %v1008_v43 = vmul.f32 %v16093_v28, %v969_v39 }
 0x19d   : > { %13513 = vmatmul.mubr.msk.bf16.vlgmr.msra.gmra.mrb[0].mxu1 %vm553_vm0, %v1062_v20  ;;  %v1046_v36 = vadd.f32 %v16100_v32, %v1007_v8  ;;  %v970_v50 = vmul.f32 %v14825_v26, %v16079_v57 }
 0x19e   : > { %v1047_v12 = vadd.f32 %v16100_v32, %v1008_v43 }
 0x19f   : > { %v1063_v51 = vpack.c.bf16 %v1046_v36, %v1045_v46  ;;  %v1009_v53 = vmul.f32 %v16093_v28, %v970_v50 }
 0x1a1   : > { %13516 = vmatprep.mubr.msk.bf16.mxu1 %vm553_vm0, %v1063_v51  ;;  %v1048_v54 = vadd.f32 %v16100_v32, %v1009_v53 }
 0x1a3   : > { %v1064_v52 = vpack.c.bf16 %v1048_v54, %v1047_v12 }
 0x1a5   : > { %13517 = vmatmul.mubr.msk.bf16.gmra.mrb[4].mxu1 %vm553_vm0, %v1064_v52 }
 0x1a6   : > { %13522 = vmatprep.mubr.msk.bf16.mxu1 %vm15579_vm1, %v19897_v4 }
 0x240   : > { %v13490_v57 = vpop.f32.mrb[0].mxu0 }
 0x241   : > { %v1179_v33 = vadd.f32 %v13490_v57, %v16214_v11  ;;  %v1170_v58 = vpop.f32.mrb[1].mxu0 }
 0x242   : > { %v1171_v28 = vadd.f32 %v16214_v11, %v1170_v58  ;;  %v13491_v24 = vpop.f32.mrb[2].mxu0 }
 0x243   : > { %v1298_v9 = vmul.f32 0.35355338, %v1179_v33  ;;  %v3771_v62 = vcombine.high %v1179_v33, %v1179_v33  ;;  %v16219_v21 = vadd.f32 %v13491_v24, %v16214_v11  ;;  %v1173_v32 = vpop.f32.mrb[3].mxu0 }
 0x244   : > { %v1297_v47 = vmul.f32 0.35355338, %v1171_v28  ;;  %v1365_v40 = vcombine.low %v1171_v28, %v1179_v33  ;;  %v3770_v41 = vcombine.high %v1171_v28, %v1171_v28  ;;  %v12776_v59 = vcombine.high %v1171_v28, %v1179_v33 }
 0x245   : > { %v3803_v6 = vmul.f32 0.35355338, %v3771_v62  ;;  %v16224_v7 = vmul.f32 0.35355338, %v16219_v21  ;;  %v8729_v56 = vcombine.high %v16219_v21, %v16219_v21  ;;  %v1174_v37 = vadd.f32 %v16214_v11, %v1173_v32 }
 0x246   : > { %v1329_v14 = vcombine.low %v1297_v47, %v1298_v9  ;;  %v3802_v27 = vmul.f32 0.35355338, %v3770_v41 }
 0x247   : > { %v8761_v18 = vmul.f32 0.35355338, %v8729_v56  ;;  %v16229_v63 = vmul.f32 0.35355338, %v1174_v37  ;;  %v6325_v44 = vcombine.low %v1174_v37, %v16219_v21  ;;  %v8728_v45 = vcombine.high %v1174_v37, %v1174_v37 }
 0x248   : > { %v12954_v60 = vcombine.high %v1174_v37, %v16219_v21  ;;  %v13494_v61 = vpop.f32.mrb[4].mxu0  ;;  %v3834_v25 = vcombine.low %v3802_v27, %v3803_v6 }
 0x249   : > { %v6289_v13 = vcombine.low %v16229_v63, %v16224_v7  ;;  %v8760_v2 = vmul.f32 0.35355338, %v8728_v45  ;;  %v1195_v19 = vadd.f32 %v13494_v61, %v16214_v11  ;;  %v1186_v3 = vpop.f32.mrb[5].mxu0 }
 0x24a   : > { %v1187_v1 = vadd.f32 %v16214_v11, %v1186_v3  ;;  %v13495_v22 = vpop.f32.mrb[6].mxu0 }
 0x24b   : > { %v8792_v0 = vcombine.low %v8760_v2, %v8761_v18  ;;  %v1300_v16 = vmul.f32 0.35355338, %v1195_v19  ;;  %v3773_v15 = vcombine.high %v1195_v19, %v1195_v19  ;;  %v1198_v10 = vadd.f32 %v13495_v22, %v16214_v11  ;;  %v1189_v30 = vpop.f32.mrb[7].mxu0 }
 0x24c   : > { %v1299_v34 = vmul.f32 0.35355338, %v1187_v1  ;;  %v1366_v35 = vcombine.low %v1187_v1, %v1195_v19  ;;  %v3772_v23 = vcombine.high %v1187_v1, %v1187_v1  ;;  %v12777_v38 = vcombine.high %v1187_v1, %v1195_v19 }
 0x24d   : > { %v3805_v5 = vmul.f32 0.35355338, %v3773_v15  ;;  %v6260_v49 = vmul.f32 0.35355338, %v1198_v10  ;;  %v8731_v48 = vcombine.high %v1198_v10, %v1198_v10  ;;  %v1190_v29 = vadd.f32 %v16214_v11, %v1189_v30 }
 0x24e   : > { %v1330_v42 = vcombine.low %v1299_v34, %v1300_v16  ;;  %v16243_v55 = vpack.c.bf16 %v1366_v35, %v1365_v40  ;;  %v3804_v31 = vmul.f32 0.35355338, %v3772_v23  ;;  %v16245_v17 = vpack.c.bf16 %v12777_v38, %v12776_v59 }
 0x24f   : > { %v8763_v39 = vmul.f32 0.35355338, %v8731_v48  ;;  %v6259_v20 = vmul.f32 0.35355338, %v1190_v29  ;;  %v6326_v8 = vcombine.low %v1190_v29, %v1198_v10  ;;  %v8730_v26 = vcombine.high %v1190_v29, %v1190_v29 }
 0x250   : > { %v16247_v46 = vpack.c.bf16 %v1330_v42, %v1329_v14  ;;  %v12955_v36 = vcombine.high %v1190_v29, %v1198_v10  ;;  %1394 = vrot.lane.b32.xlu0 %v16243_v55, %s19882_s19  ;;  %v13498_v50 = vpop.f32.mrb[8].mxu0  ;;  %v3835_v43 = vcombine.low %v3804_v31, %v3805_v5 }
 0x251   : > { %v6290_v51 = vcombine.low %v6259_v20, %v6260_v49  ;;  %v16251_v53 = vpack.c.bf16 %v6326_v8, %v6325_v44  ;;  %v8762_v12 = vmul.f32 0.35355338, %v8730_v26  ;;  %v1211_v54 = vadd.f32 %v13498_v50, %v16214_v11  ;;  %v1202_v52 = vpop.f32.mrb[9].mxu0 }
 0x252   : > { %v16254_v57 = vpack.c.bf16 %v12955_v36, %v12954_v60  ;;  %v1203_v33 = vadd.f32 %v16214_v11, %v1202_v52  ;;  %v13499_v58 = vpop.f32.mrb[10].mxu0  ;;  %v16257_v28 = vpack.c.bf16 %v3835_v43, %v3834_v25 }
 0x253   : > { %v8793_v24 = vcombine.low %v8762_v12, %v8763_v39  ;;  %v1302_v9 = vmul.f32 0.35355338, %v1211_v54  ;;  %v3775_v62 = vcombine.high %v1211_v54, %v1211_v54  ;;  %v1214_v21 = vadd.f32 %v13499_v58, %v16214_v11  ;;  %v1205_v32 = vpop.f32.mrb[11].mxu0 }
 0x254   : > { %v1301_v47 = vmul.f32 0.35355338, %v1203_v33  ;;  %v1367_v40 = vcombine.low %v1203_v33, %v1211_v54  ;;  %v3774_v41 = vcombine.high %v1203_v33, %v1203_v33  ;;  %v12778_v59 = vcombine.high %v1203_v33, %v1211_v54 }
 0x255   : > { %v16260_v6 = vpack.c.bf16 %v8793_v24, %v8792_v0  ;;  %v16262_v7 = vmul.f32 0.35355338, %v3775_v62  ;;  %v16264_v56 = vmul.f32 0.35355338, %v1214_v21  ;;  %v8733_v37 = vcombine.high %v1214_v21, %v1214_v21 }
 0x256   : > { %v1331_v14 = vcombine.low %v1301_v47, %v1302_v9  ;;  %v16266_v27 = vmul.f32 0.35355338, %v3774_v41  ;;  %v1206_v18 = vadd.f32 %v16214_v11, %v1205_v32  ;;  %v16269_v63 = vpack.c.bf16 %v6290_v51, %v6289_v13 }
 0x257   : > { %v8765_v44 = vmul.f32 0.35355338, %v8733_v37 }
 0x258   : > { %v16271_v45 = vmul.f32 0.35355338, %v1206_v18  ;;  %v6327_v60 = vcombine.low %v1206_v18, %v1214_v21  ;;  %v8732_v61 = vcombine.high %v1206_v18, %v1206_v18  ;;  %v12956_v25 = vcombine.high %v1206_v18, %v1214_v21  ;;  %v13502_v2 = vpop.f32.mrb[12].mxu0 }
 0x259   : > { %v1227_v19 = vadd.f32 %v13502_v2, %v16214_v11  ;;  %v1218_v3 = vpop.f32.mrb[13].mxu0  ;;  %v3836_v1 = vcombine.low %v16266_v27, %v16262_v7 }
 0x25a   : > { %v6291_v22 = vcombine.low %v16271_v45, %v16264_v56  ;;  %v8764_v0 = vmul.f32 0.35355338, %v8732_v61  ;;  %v1219_v13 = vadd.f32 %v16214_v11, %v1218_v3  ;;  %v13503_v16 = vpop.f32.mrb[14].mxu0 }
 0x25b   : > { %v1304_v15 = vmul.f32 0.35355338, %v1227_v19  ;;  %v3777_v10 = vcombine.high %v1227_v19, %v1227_v19  ;;  %v1230_v30 = vadd.f32 %v13503_v16, %v16214_v11  ;;  %v1221_v34 = vpop.f32.mrb[15].mxu0 }
 0x25c   : > { %v8794_v35 = vcombine.low %v8764_v0, %v8765_v44  ;;  %v1303_v23 = vmul.f32 0.35355338, %v1219_v13  ;;  %v1368_v38 = vcombine.low %v1219_v13, %v1227_v19  ;;  %v3776_v5 = vcombine.high %v1219_v13, %v1219_v13 }
 0x25d   : > { %v3809_v49 = vmul.f32 0.35355338, %v3777_v10  ;;  %v12779_v48 = vcombine.high %v1219_v13, %v1227_v19  ;;  %v6264_v29 = vmul.f32 0.35355338, %v1230_v30  ;;  %v8735_v42 = vcombine.high %v1230_v30, %v1230_v30 }
 0x25e   : > { %v1332_v31 = vcombine.low %v1303_v23, %v1304_v15  ;;  %v16280_v39 = vpack.c.bf16 %v1368_v38, %v1367_v40  ;;  %v3808_v20 = vmul.f32 0.35355338, %v3776_v5  ;;  %v1222_v8 = vadd.f32 %v16214_v11, %v1221_v34 }
 0x25f   : > { %v16283_v26 = vpack.c.bf16 %v12779_v48, %v12778_v59  ;;  %v8767_v36 = vmul.f32 0.35355338, %v8735_v42 }
 0x260   : > { %v3837_v50 = vcombine.low %v3808_v20, %v3809_v49  ;;  %v6263_v43 = vmul.f32 0.35355338, %v1222_v8  ;;  %v6328_v51 = vcombine.low %v1222_v8, %v1230_v30  ;;  %v8734_v12 = vcombine.high %v1222_v8, %v1222_v8  ;;  %1445 = vrot.lane.b32.xlu1 %v16280_v39, %s19882_s19  ;;  %v13506_v54 = vpop.f32.mrb[16].mxu0 }
 0x261   : > { %v12957_v52 = vcombine.high %v1222_v8, %v1230_v30  ;;  %v1243_v33 = vadd.f32 %v13506_v54, %v16214_v11  ;;  %v1234_v58 = vpop.f32.mrb[17].mxu0  ;;  %v16288_v24 = vpack.c.bf16 %v1332_v31, %v1331_v14 }
 0x262   : > { %v6292_v9 = vcombine.low %v6263_v43, %v6264_v29  ;;  %v16290_v62 = vpack.c.bf16 %v6328_v51, %v6327_v60  ;;  %v8766_v21 = vmul.f32 0.35355338, %v8734_v12  ;;  %v1235_v32 = vadd.f32 %v16214_v11, %v1234_v58  ;;  %v13507_v47 = vpop.f32.mrb[18].mxu0 }
 0x263   : > { %v16293_v40 = vpack.c.bf16 %v12957_v52, %v12956_v25  ;;  %v16295_v41 = vmul.f32 0.35355338, %v1243_v33  ;;  %v3779_v59 = vcombine.high %v1243_v33, %v1243_v33  ;;  %v16298_v7 = vadd.f32 %v13507_v47, %v16214_v11  ;;  %v1237_v56 = vpop.f32.mrb[19].mxu0 }
 0x264   : > { %v8795_v37 = vcombine.low %v8766_v21, %v8767_v36  ;;  %v16300_v27 = vmul.f32 0.35355338, %v1235_v32  ;;  %v1369_v14 = vcombine.low %v1235_v32, %v1243_v33  ;;  %v3778_v18 = vcombine.high %v1235_v32, %v1235_v32 }
 0x265   : > { %v3811_v44 = vmul.f32 0.35355338, %v3779_v59  ;;  %v12780_v45 = vcombine.high %v1235_v32, %v1243_v33  ;;  %v6266_v60 = vmul.f32 0.35355338, %v16298_v7  ;;  %v8737_v61 = vcombine.high %v16298_v7, %v16298_v7 }
 0x266   : > { %v16305_v25 = vpack.c.bf16 %v8795_v37, %v8794_v35  ;;  %v1333_v2 = vcombine.low %v16300_v27, %v16295_v41  ;;  %v3810_v19 = vmul.f32 0.35355338, %v3778_v18  ;;  %v1238_v3 = vadd.f32 %v16214_v11, %v1237_v56 }
 0x267   : > { %v16310_v0 = vmul.f32 0.35355338, %v8737_v61  ;;  %v16312_v13 = vpack.c.bf16 %v3837_v50, %v3836_v1  ;;  %v16314_v16 = vpack.c.bf16 %v6292_v9, %v6291_v22 }
 0x268   : > { %19960 = vst [vmem:[#allocation13_spill] sm:$0xff] %v16305_v25  ;;  %v3838_v15 = vcombine.low %v3810_v19, %v3811_v44  ;;  %v6265_v10 = vmul.f32 0.35355338, %v1238_v3  ;;  %v6329_v30 = vcombine.low %v1238_v3, %v16298_v7  ;;  %v8736_v34 = vcombine.high %v1238_v3, %v1238_v3 }
 0x269   : > { %v12958_v35 = vcombine.high %v1238_v3, %v16298_v7 }
 0x26a   : > { %v6293_v23 = vcombine.low %v6265_v10, %v6266_v60  ;;  %v8768_v38 = vmul.f32 0.35355338, %v8736_v34 }
 0x26c   : > { %v8796_v5 = vcombine.low %v8768_v38, %v16310_v0  ;;  %v13510_v49 = vpop.f32.mrb[20].mxu0 }
 0x26d   : > { %v1259_v48 = vadd.f32 %v13510_v49, %v16214_v11  ;;  %v1250_v29 = vpop.f32.mrb[21].mxu0 }
 0x26e   : > { %v1251_v1 = vadd.f32 %v16214_v11, %v1250_v29  ;;  %v13511_v42 = vpop.f32.mrb[22].mxu0 }
 0x26f   : > { %v1308_v22 = vmul.f32 0.35355338, %v1259_v48  ;;  %v3781_v31 = vcombine.high %v1259_v48, %v1259_v48  ;;  %v1262_v20 = vadd.f32 %v13511_v42, %v16214_v11  ;;  %v1253_v8 = vpop.f32.mrb[23].mxu0 }
 0x270   : > { %v1307_v36 = vmul.f32 0.35355338, %v1251_v1  ;;  %v1370_v50 = vcombine.low %v1251_v1, %v1259_v48  ;;  %v3780_v43 = vcombine.high %v1251_v1, %v1251_v1  ;;  %v12781_v51 = vcombine.high %v1251_v1, %v1259_v48  ;;  %v13514_v12 = vpop.f32.mrb[0].mxu1 }
 0x271   : > { %v3813_v54 = vmul.f32 0.35355338, %v3781_v31  ;;  %v6268_v52 = vmul.f32 0.35355338, %v1262_v20  ;;  %v8739_v33 = vcombine.high %v1262_v20, %v1262_v20  ;;  %v1254_v58 = vadd.f32 %v16214_v11, %v1253_v8  ;;  %v1266_v9 = vpop.f32.mrb[1].mxu1 }
 0x272   : > { %v1334_v21 = vcombine.low %v1307_v36, %v1308_v22  ;;  %v16323_v32 = vpack.c.bf16 %v1370_v50, %v1369_v14  ;;  %v3812_v47 = vmul.f32 0.35355338, %v3780_v43  ;;  %v16325_v59 = vpack.c.bf16 %v12781_v51, %v12780_v45  ;;  %v13515_v7 = vpop.f32.mrb[2].mxu1 }
 0x273   : > { %v8771_v56 = vmul.f32 0.35355338, %v8739_v33  ;;  %v6267_v37 = vmul.f32 0.35355338, %v1254_v58  ;;  %v6330_v18 = vcombine.low %v1254_v58, %v1262_v20  ;;  %v8738_v44 = vcombine.high %v1254_v58, %v1254_v58  ;;  %v1269_v60 = vpop.f32.mrb[3].mxu1 }
 0x274   : > { %v3839_v61 = vcombine.low %v3812_v47, %v3813_v54  ;;  %v12959_v19 = vcombine.high %v1254_v58, %v1262_v20  ;;  %v1275_v3 = vadd.f32 %v13514_v12, %v16214_v11  ;;  %v1267_v0 = vadd.f32 %v16214_v11, %v1266_v9  ;;  %1495 = vrot.lane.b32.xlu1 %v16323_v32, %s19882_s19 }
 0x275   : > { %v6294_v14 = vcombine.low %v6267_v37, %v6268_v52  ;;  %v16331_v10 = vpack.c.bf16 %v6330_v18, %v6329_v30  ;;  %v8770_v45 = vmul.f32 0.35355338, %v8738_v44  ;;  %v1278_v34 = vadd.f32 %v13515_v7, %v16214_v11 }
 0x276   : > { %v16334_v38 = vpack.c.bf16 %v3839_v61, %v3838_v15  ;;  %v16336_v49 = vpack.c.bf16 %v12959_v19, %v12958_v35  ;;  %v1310_v48 = vmul.f32 0.35355338, %v1275_v3  ;;  %v3783_v29 = vcombine.high %v1275_v3, %v1275_v3 }
 0x277   : > { %v16338_v1 = vpack.c.bf16 %v6294_v14, %v6293_v23  ;;  %v8797_v42 = vcombine.low %v8770_v45, %v8771_v56  ;;  %v1309_v22 = vmul.f32 0.35355338, %v1267_v0  ;;  %v1371_v31 = vcombine.low %v1267_v0, %v1275_v3 }
 0x278   : > { %v3815_v20 = vmul.f32 0.35355338, %v3783_v29  ;;  %v3782_v8 = vcombine.high %v1267_v0, %v1267_v0  ;;  %v12782_v36 = vcombine.high %v1267_v0, %v1275_v3  ;;  %v6270_v50 = vmul.f32 0.35355338, %v1278_v34  ;;  %v13518_v30 = vpop.f32.mrb[4].mxu1 }
 0x279   : > { %v16340_v43 = vpack.c.bf16 %v8797_v42, %v8796_v5  ;;  %v1335_v51 = vcombine.low %v1309_v22, %v1310_v48  ;;  %v8741_v12 = vcombine.high %v1278_v34, %v1278_v34  ;;  %v1270_v15 = vadd.f32 %v16214_v11, %v1269_v60  ;;  %v1282_v35 = vpop.f32.mrb[5].mxu1 }
 0x27a   : > { %v3814_v54 = vmul.f32 0.35355338, %v3782_v8  ;;  %v1291_v52 = vadd.f32 %v13518_v30, %v16214_v11  ;;  %v1283_v23 = vadd.f32 %v16214_v11, %v1282_v35  ;;  %v13519_v33 = vpop.f32.mrb[6].mxu1  ;;  %v16348_v58 = vpack.c.bf16 %v1334_v21, %v1333_v2 }
 0x27b   : > { %19961 = vst [vmem:[#allocation14_spill] sm:$0xff] %v16340_v43  ;;  %v8773_v9 = vmul.f32 0.35355338, %v8741_v12  ;;  %v6269_v47 = vmul.f32 0.35355338, %v1270_v15  ;;  %v6331_v5 = vcombine.low %v1270_v15, %v1278_v34  ;;  %v8740_v7 = vcombine.high %v1270_v15, %v1270_v15  ;;  %v1285_v56 = vpop.f32.mrb[7].mxu1 }
 0x27c   : > { %v12960_v37 = vcombine.high %v1270_v15, %v1278_v34  ;;  %v1312_v18 = vmul.f32 0.35355338, %v1291_v52  ;;  %v3785_v44 = vcombine.high %v1291_v52, %v1291_v52  ;;  %v1311_v60 = vmul.f32 0.35355338, %v1283_v23 }
 0x27d   : > { %v6295_v61 = vcombine.low %v6269_v47, %v6270_v50  ;;  %v8772_v19 = vmul.f32 0.35355338, %v8740_v7  ;;  %v1372_v3 = vcombine.low %v1283_v23, %v1291_v52  ;;  %v3784_v0 = vcombine.high %v1283_v23, %v1283_v23 }
 0x27e   : > { %v3817_v14 = vmul.f32 0.35355338, %v3785_v44  ;;  %v1336_v45 = vcombine.low %v1311_v60, %v1312_v18  ;;  %v12783_v48 = vcombine.high %v1283_v23, %v1291_v52  ;;  %v1294_v41 = vadd.f32 %v13519_v33, %v16214_v11 }
 0x27f   : > { %v8798_v27 = vcombine.low %v8772_v19, %v8773_v9  ;;  %v16351_v2 = vpack.c.bf16 %v1372_v3, %v1371_v31  ;;  %v3816_v21 = vmul.f32 0.35355338, %v3784_v0  ;;  %v1286_v29 = vadd.f32 %v16214_v11, %v1285_v56  ;;  %v1386_v3 = vld [vmem:[%s19873_s7 + $0x8] sm:$0xff] }
 0x280   : > { %v16354_v42 = vpack.c.bf16 %v12783_v48, %v12782_v36  ;;  %v6272_v34 = vmul.f32 0.35355338, %v1294_v41  ;;  %v8743_v22 = vcombine.high %v1294_v41, %v1294_v41  ;;  %v16356_v8 = vpack.c.bf16 %v1336_v45, %v1335_v51 }
 0x281   : > { %v6271_v50 = vmul.f32 0.35355338, %v1286_v29  ;;  %v6332_v30 = vcombine.low %v1286_v29, %v1294_v41  ;;  %v8742_v12 = vcombine.high %v1286_v29, %v1286_v29  ;;  %v12961_v15 = vcombine.high %v1286_v29, %v1294_v41  ;;  %1545 = vrot.lane.b32.xlu1 %v16351_v2, %s19882_s19  ;;  %v1387_v29 = vld [vmem:[%s19873_s7 + $0x10] sm:$0xff]  ;;  %s19886_s19 = smov 88  }
 0x282   : > { %v8775_v35 = vmul.f32 0.35355338, %v8743_v22  ;;  %v3840_v52 = vcombine.low %v3814_v54, %v3815_v20  ;;  %v3841_v31 = vcombine.low %v3816_v21, %v3817_v14  ;;  %v1388_v22 = vld [vmem:[%s19873_s7 + $0x18] sm:$0xff] }
 0x283   : > { %v6296_v23 = vcombine.low %v6271_v50, %v6272_v34  ;;  %v16360_v33 = vpack.c.bf16 %v6332_v30, %v6331_v5  ;;  %v8774_v11 = vmul.f32 0.35355338, %v8742_v12  ;;  %v16362_v36 = vpack.c.bf16 %v12961_v15, %v12960_v37 }
 0x284   : > { %v16364_v9 = vpack.c.bf16 %v3841_v31, %v3840_v52 }
 0x285   : > { %v8799_v51 = vcombine.low %v8774_v11, %v8775_v35  ;;  %v16366_v47 = vpack.c.bf16 %v6296_v23, %v6295_v61  ;;  %v1385_v61 = vld [vmem:[%s19873_s7] sm:$0xff] }
 0x286   : > { %v1389_v23 = vld [vmem:[%s19873_s7 + $0x20] sm:$0xff] }
 0x287   : > { %v16368_v7 = vpack.c.bf16 %v8799_v51, %v8798_v27  ;;  %v1390_v51 = vld [vmem:[%s19873_s7 + $0x28] sm:$0xff] }
 0x289   : > { %19962 = vst [vmem:[#allocation15_spill] sm:$0xff] %v16368_v7 }
 0x2c2   : > { %v1395_v56 = vpop.permute.xlu0 %1394 }
 0x2c3   : > { %v1401_v18 = vsel %vm1396_vm2, %v1395_v56, 0 }
 0x2c4   : > { %13521 = vmatpush3.bf16.xpose.msra.mxu1 %v1401_v18 }
 0x2c5   : > { %13526 = vmatprep.subr.bf16.mxu1 %v19897_v4 }
 0x2cb   : > { %13523 = vmatmul.mubr.msk.bf16.vlgmr.msra.gmra.mrb[8].mxu1 %vm1396_vm2, %v16247_v46 }
 0x2cc   : > { %13528 = vmatprep.mubr.msk.bf16.mxu1 %vm15579_vm1, %v19897_v4 }
 0x2d2   : > { %v1446_v20 = vpop.permute.xlu1 %1445 }
 0x2d3   : > { %v1451_v54 = vsel %vm1396_vm2, %v1446_v20, 0 }
 0x2d4   : > { %13527 = vmatpush3.bf16.xpose.msra.mxu1 %v1451_v54 }
 0x2d5   : > { %13532 = vmatprep.subr.bf16.mxu1 %v19897_v4 }
 0x2db   : > { %13529 = vmatmul.mubr.msk.bf16.vlgmr.msra.gmra.mrb[12].mxu1 %vm1396_vm2, %v16288_v24 }
 0x2dc   : > { %13534 = vmatprep.mubr.msk.bf16.mxu1 %vm15579_vm1, %v19897_v4 }
 0x2e6   : > { %v1496_v5 = vpop.permute.xlu1 %1495 }
 0x2e7   : > { %v1501_v37 = vsel %vm1396_vm2, %v1496_v5, 0 }
 0x2e8   : > { %13533 = vmatpush3.bf16.xpose.msra.mxu1 %v1501_v37 }
 0x2e9   : > { %13538 = vmatprep.subr.bf16.mxu1 %v19897_v4 }
 0x2ef   : > { %13535 = vmatmul.mubr.msk.bf16.vlgmr.msra.gmra.mrb[16].mxu1 %vm1396_vm2, %v16348_v58 }
 0x2f0   : > { %13540 = vmatprep.mubr.msk.bf16.mxu1 %vm15579_vm1, %v19897_v4 }
 0x2f3   : > { %v1546_v44 = vpop.permute.xlu1 %1545 }
 0x2f4   : > { %v1551_v60 = vsel %vm1396_vm2, %v1546_v44, 0 }
 0x2f5   : > { %13539 = vmatpush3.bf16.xpose.msra.mxu1 %v1551_v60  ;;  %v1391_v60 = vld [vmem:[%s19873_s7 + $0x30] sm:$0xff] }
 0x2f6   : > { %13544 = vmatprep.subr.bf16.mxu1 %v19897_v4 }
 0x2fc   : > { %13541 = vmatmul.mubr.msk.bf16.vlgmr.msra.gmra.mrb[20].mxu1 %vm1396_vm2, %v16356_v8 }
 0x2fd   : > { %13546 = vmatprep.mubr.msk.bf16.mxu1 %vm15579_vm1, %v19897_v4 }
 0x39e   : > { %v1437_v19 = vpop.f32.mrb[8].mxu1 }
 0x39f   : > { %v13524_v0 = vpop.f32.mrb[9].mxu1  ;;  %v1438_v14 = vadd.f32 %v1437_v19, %v1385_v61  ;;  %v1392_v19 = vld [vmem:[%s19873_s7 + $0x38] sm:$0xff] }
 0x3a0   : > { %v1440_v45 = vpop.f32.mrb[10].mxu1 }
 0x3a1   : > { %v13525_v48 = vpop.f32.mrb[11].mxu1  ;;  %v1595_v41 = vsel %vm1594_vm3, %v1438_v14, -inf  ;;  %v1441_v27 = vadd.f32 %v1440_v45, %v1386_v3 }
 0x3a2   : > { %1596 = vmax.xlane.f32.xlu0 %v1595_v41 }
 0x3a3   : > { %v1598_v21 = vsel %vm1594_vm3, %v1441_v27, -inf }
 0x3a4   : > { %1599 = vmax.xlane.f32.xlu1 %v1598_v21 }
 0x3ae   : > { %v1487_v34 = vpop.f32.mrb[12].mxu1 }
 0x3af   : > { %v13530_v50 = vpop.f32.mrb[13].mxu1  ;;  %v1488_v30 = vadd.f32 %v1487_v34, %v1387_v29 }
 0x3b0   : > { %v1490_v12 = vpop.f32.mrb[14].mxu1 }
 0x3b1   : > { %v13531_v15 = vpop.f32.mrb[15].mxu1  ;;  %v1601_v35 = vsel %vm1594_vm3, %v1488_v30, -inf  ;;  %v1491_v52 = vadd.f32 %v1490_v12, %v1388_v22 }
 0x3b2   : > { %1602 = vmax.xlane.f32.xlu0 %v1601_v35 }
 0x3b3   : > { %v1604_v31 = vsel %vm1594_vm3, %v1491_v52, -inf }
 0x3b6   : > { %1605 = vmax.xlane.f32.xlu0 %v1604_v31 }
 0x3c2   : > { %v1537_v11 = vpop.f32.mrb[16].mxu1 }
 0x3c3   : > { %v13536_v56 = vpop.f32.mrb[17].mxu1  ;;  %v1538_v18 = vadd.f32 %v1537_v11, %v1389_v23 }
 0x3c4   : > { %v1540_v20 = vpop.f32.mrb[18].mxu1 }
 0x3c5   : > { %v13537_v54 = vpop.f32.mrb[19].mxu1  ;;  %v1607_v5 = vsel %vm1594_vm3, %v1538_v18, -inf  ;;  %v1541_v37 = vadd.f32 %v1540_v20, %v1390_v51 }
 0x3c6   : > { %1608 = vmax.xlane.f32.xlu0 %v1607_v5 }
 0x3c7   : > { %v1610_v44 = vsel %vm1594_vm3, %v1541_v37, -inf }
 0x3c8   : > { %1611 = vmax.xlane.f32.xlu1 %v1610_v44 }
 0x3cf   : > { %v1587_v61 = vpop.f32.mrb[20].mxu1 }
 0x3d0   : > { %v13542_v3 = vpop.f32.mrb[21].mxu1  ;;  %v1588_v0 = vadd.f32 %v1587_v61, %v1391_v60 }
 0x3d1   : > { %v1590_v45 = vpop.f32.mrb[22].mxu1 }
 0x3d2   : > { %v13543_v48 = vpop.f32.mrb[23].mxu1  ;;  %v1613_v41 = vsel %vm1594_vm3, %v1588_v0, -inf  ;;  %v1591_v21 = vadd.f32 %v1590_v45, %v1392_v19 }
 0x3d3   : > { %1614 = vmax.xlane.f32.xlu0 %v1613_v41 }
 0x3d4   : > { %v1616_v29 = vsel %vm1594_vm3, %v1591_v21, -inf }
 0x3d5   : > { %1617 = vmax.xlane.f32.xlu1 %v1616_v29 }
 0x42f   : > { %v1597_v34 = vpop.xlane.xlu0 %1596 }
 0x430   : > { %v1619_v22 = vsub.f32 %v1438_v14, %v1597_v34 }
 0x431   : > { %v1600_v50 = vpop.xlane.xlu1 %1599 }
 0x432   : > { %v1627_v12 = vmul.f32 1.442695, %v1619_v22  ;;  %v1620_v15 = vsub.f32 %v1441_v27, %v1600_v50 }
 0x434   : > { %14826 = vpow2.f32 %v1627_v12  ;;  %v1629_v35 = vmul.f32 1.442695, %v1620_v15 }
 0x436   : > { %14828 = vpow2.f32 %v1629_v35 }
 0x43e   : > { %v16426_v31 = vpop.eup %14826 }
 0x43f   : > { %v1603_v23 = vpop.xlane.xlu0 %1602  ;;  %v1643_v11 = vsel %vm1594_vm3, %v16426_v31, 0.0 }
 0x440   : > { %v16430_v51 = vpop.eup %14828  ;;  %v1621_v56 = vsub.f32 %v1488_v30, %v1603_v23  ;;  %1644 = vadd.xlane.f32.xlu0 %v1643_v11 }
 0x441   : > { %v1646_v20 = vsel %vm1594_vm3, %v16430_v51, 0.0 }
 0x442   : > { %v1631_v14 = vmul.f32 1.442695, %v1621_v56  ;;  %1647 = vadd.xlane.f32.xlu1 %v1646_v20 }
 0x443   : > { %v1606_v54 = vpop.xlane.xlu0 %1605 }
 0x444   : > { %14830 = vpow2.f32 %v1631_v14  ;;  %v1622_v27 = vsub.f32 %v1491_v52, %v1606_v54 }
 0x446   : > { %v1633_v5 = vmul.f32 1.442695, %v1622_v27 }
 0x448   : > { %14832 = vpow2.f32 %v1633_v5 }
 0x44e   : > { %v16434_v44 = vpop.eup %14830 }
 0x44f   : > { %v1649_v60 = vsel %vm1594_vm3, %v16434_v44, 0.0 }
 0x450   : > { %1650 = vadd.xlane.f32.xlu0 %v1649_v60 }
 0x452   : > { %v16438_v61 = vpop.eup %14832 }
 0x453   : > { %v1609_v30 = vpop.xlane.xlu0 %1608  ;;  %v1652_v19 = vsel %vm1594_vm3, %v16438_v61, 0.0 }
 0x454   : > { %v1623_v3 = vsub.f32 %v1538_v18, %v1609_v30  ;;  %1653 = vadd.xlane.f32.xlu1 %v1652_v19 }
 0x455   : > { %v1612_v41 = vpop.xlane.xlu1 %1611 }
 0x456   : > { %v1635_v45 = vmul.f32 1.442695, %v1623_v3  ;;  %v1624_v29 = vsub.f32 %v1541_v37, %v1612_v41 }
 0x458   : > { %14834 = vpow2.f32 %v1635_v45  ;;  %v1637_v18 = vmul.f32 1.442695, %v1624_v29 }
 0x45a   : > { %14836 = vpow2.f32 %v1637_v18 }
 0x460   : > { %v1615_v12 = vpop.xlane.xlu0 %1614 }
 0x461   : > { %v1625_v15 = vsub.f32 %v1588_v0, %v1615_v12 }
 0x462   : > { %v16442_v48 = vpop.eup %14834  ;;  %v1618_v34 = vpop.xlane.xlu1 %1617 }
 0x463   : > { %v1655_v52 = vsel %vm1594_vm3, %v16442_v48, 0.0  ;;  %v1626_v22 = vsub.f32 %v1591_v21, %v1618_v34  ;;  %v1639_v35 = vmul.f32 1.442695, %v1625_v15 }
 0x464   : > { %1656 = vadd.xlane.f32.xlu0 %v1655_v52  ;;  %v14837_v23 = vpop.eup %14836 }
 0x465   : > { %1734 = vrot.lane.b32.xlu1 %v16280_v39, %s19888_s28  ;;  %v1641_v50 = vmul.f32 1.442695, %v1626_v22  ;;  %v1658_v11 = vsel %vm1594_vm3, %v14837_v23, 0.0 }
 0x467   : > { %14838 = vpow2.f32 %v1641_v50 }
 0x468   : > { %14840 = vpow2.f32 %v1639_v35 }
 0x469   : > { %1781 = vrot.lane.b32.xlu1 %v16323_v32, %s19888_s28 }
 0x471   : > { %v16453_v56 = vpop.eup %14838 }
 0x472   : > { %v1664_v37 = vsel %vm1594_vm3, %v16453_v56, 0.0  ;;  %v16457_v20 = vpop.eup %14840 }
 0x473   : > { %v1661_v21 = vsel %vm1594_vm3, %v16457_v20, 0.0 }
 0x47a   : > { %1687 = vrot.lane.b32.xlu0 %v16243_v55, %s19888_s28 }
 0x48d   : > { %1659 = vadd.xlane.f32.xlu1 %v1658_v11 }
 0x491   : > { %1665 = vadd.xlane.f32.xlu1 %v1664_v37 }
 0x499   : > { %1662 = vadd.xlane.f32.xlu0 %v1661_v21 }
 0x4a2   : > { %1828 = vrot.lane.b32.xlu1 %v16351_v2, %s19888_s28  ;;  %s19979_s28 = smov 72  }
 0x4a6   : > { %1942 = vrot.lane.b32.xlu1 %v16288_v24, %s19884_s20 }
 0x4aa   : > { %2046 = vrot.lane.b32.xlu1 %v16356_v8, %s19884_s20 }
 0x4ae   : > { %1890 = vrot.lane.b32.xlu1 %v16247_v46, %s19884_s20 }
 0x4af   : > { %1944 = vrot.lane.b32.xlu0 %v16280_v39, %s19886_s19 }
 0x4b2   : > { %1994 = vrot.lane.b32.xlu1 %v16348_v58, %s19884_s20  ;;  %s19893_s20 = smov 112  }
 0x4b3   : > { %2048 = vrot.lane.b32.xlu0 %v16351_v2, %s19886_s19 }
 0x4b7   : > { %1892 = vrot.lane.b32.xlu0 %v16243_v55, %s19886_s19 }
 0x4bb   : > { %1996 = vrot.lane.b32.xlu0 %v16323_v32, %s19886_s19  ;;  %s19963_s19 = smov 56  }
 0x4cd   : > { %v1645_v14 = vpop.xlane.xlu0 %1644 }
 0x4cf   : > { %v1648_v0 = vpop.xlane.xlu1 %1647 }
 0x4d0   : > { %14842 = vrcp.f32 %v1648_v0 }
 0x4d1   : > { %14844 = vrcp.f32 %v1645_v14 }
 0x4da   : > { %v14843_v5 = vpop.eup %14842 }
 0x4db   : > { %v14845_v30 = vpop.eup %14844  ;;  %v1676_v19 = vmul.f32 %v14843_v5, %v16430_v51 }
 0x4dc   : > { %v1675_v3 = vmul.f32 %v14845_v30, %v16426_v31 }
 0x4dd   : > { %v1651_v27 = vpop.xlane.xlu0 %1650 }
 0x4de   : > { %v1683_v52 = vpack.c.bf16 %v1676_v19, %v1675_v3 }
 0x4e1   : > { %v1654_v54 = vpop.xlane.xlu1 %1653 }
 0x4e2   : > { %14846 = vrcp.f32 %v1654_v54 }
 0x4e3   : > { %14848 = vrcp.f32 %v1651_v27 }
 0x4e5   : > { %v1735_v29 = vpop.permute.xlu1 %1734 }
 0x4e9   : > { %v1782_v22 = vpop.permute.xlu1 %1781 }
 0x4ec   : > { %v14847_v41 = vpop.eup %14846 }
 0x4ed   : > { %v14849_v34 = vpop.eup %14848  ;;  %v1678_v18 = vmul.f32 %v14847_v41, %v16438_v61 }
 0x4ee   : > { %v1677_v31 = vmul.f32 %v14849_v34, %v16434_v44 }
 0x4f0   : > { %v1684_v51 = vpack.c.bf16 %v1678_v18, %v1677_v31 }
 0x4f1   : > { %v1657_v60 = vpop.xlane.xlu0 %1656 }
 0x4f2   : > { %14850 = vrcp.f32 %v1657_v60 }
 0x4f5   : > { %v1688_v45 = vpop.permute.xlu0 %1687 }
 0x4f6   : > { %13545 = vmatpush3.bf16.msra.mxu1 %v1688_v45 }
 0x4f7   : > { %13550 = vmatprep.subr.bf16.mxu1 %v19897_v4 }
 0x4f9   : > { %13547 = vmatmul.mubr.msk.bf16.vlgmr.msra.gmra.mrb[24].mxu1 %vm1594_vm3, %v1683_v52 }
 0x4fa   : > { %13551 = vmatpush3.bf16.msra.mxu1 %v1735_v29  ;;  %13552 = vmatprep.mubr.msk.bf16.mxu1 %vm15579_vm1, %v19897_v4 }
 0x4fb   : > { %13556 = vmatprep.subr.bf16.mxu1 %v19897_v4 }
 0x4fc   : > { %v14851_v15 = vpop.eup %14850 }
 0x4fd   : > { %v1679_v35 = vmul.f32 %v14851_v15, %v16442_v48 }
 0x501   : > { %13553 = vmatmul.mubr.msk.bf16.vlgmr.msra.gmra.mrb[28].mxu1 %vm1594_vm3, %v1684_v51 }
 0x502   : > { %13557 = vmatpush3.bf16.msra.mxu1 %v1782_v22  ;;  %13558 = vmatprep.mubr.msk.bf16.mxu1 %vm15579_vm1, %v19897_v4 }
 0x503   : > { %13562 = vmatprep.subr.bf16.mxu1 %v19897_v4 }
 0x51a   : > { %v1660_v50 = vpop.xlane.xlu1 %1659 }
 0x51b   : > { %14852 = vrcp.f32 %v1660_v50 }
 0x51e   : > { %v1666_v12 = vpop.xlane.xlu1 %1665 }
 0x51f   : > { %14854 = vrcp.f32 %v1666_v12 }
 0x522   : > { %v1829_v37 = vpop.permute.xlu1 %1828 }
 0x525   : > { %v14853_v61 = vpop.eup %14852 }
 0x526   : > { %v1680_v44 = vmul.f32 %v14853_v61, %v14837_v23  ;;  %v1663_v11 = vpop.xlane.xlu0 %1662  ;;  %v1943_v14 = vpop.permute.xlu1 %1942 }
 0x527   : > { %14856 = vrcp.f32 %v1663_v11 }
 0x528   : > { %v1685_v21 = vpack.c.bf16 %v1680_v44, %v1679_v35 }
 0x529   : > { %v14855_v27 = vpop.eup %14854 }
 0x52a   : > { %v1945_v0 = vpop.permute.xlu0 %1944  ;;  %13559 = vmatmul.mubr.msk.bf16.vlgmr.msra.gmra.mrb[32].mxu1 %vm1594_vm3, %v1685_v21  ;;  %v1682_v48 = vmul.f32 %v14855_v27, %v16453_v56  ;;  %v2047_v19 = vpop.permute.xlu1 %2046 }
 0x52b   : > { %13563 = vmatpush3.bf16.msra.mxu1 %v1829_v37  ;;  %13564 = vmatprep.mubr.msk.bf16.mxu1 %vm15579_vm1, %v19897_v4  ;;  %v1950_v45 = vsel %vm1396_vm2, %v1945_v0, 0 }
 0x52c   : > { %13574 = vmatprep.subr.bf16.mxu1 %v19897_v4 }
 0x52e   : > { %v2049_v54 = vpop.permute.xlu0 %2048  ;;  %v1891_v56 = vpop.permute.xlu1 %1890 }
 0x52f   : > { %v2054_v41 = vsel %vm1396_vm2, %v2049_v54, 0 }
 0x531   : > { %v14857_v5 = vpop.eup %14856 }
 0x532   : > { %v1681_v23 = vmul.f32 %v14857_v5, %v16457_v20  ;;  %v1893_v60 = vpop.permute.xlu0 %1892  ;;  %v1995_v29 = vpop.permute.xlu1 %1994 }
 0x533   : > { %v1898_v30 = vsel %vm1396_vm2, %v1893_v60, 0 }
 0x534   : > { %13569 = vmatpush3.bf16.xpose.msra.mxu0 %v1898_v30  ;;  %v1686_v3 = vpack.c.bf16 %v1682_v48, %v1681_v23  ;;  %v12713_v30 = vld [vmem:[%s19873_s7 + $0x50] sm:$0xff] }
 0x535   : > { %13580 = vmatprep.subr.bf16.mxu0 %v19897_v4 }
 0x536   : > { %13565 = vmatmul.mubr.msk.bf16.vlgmr.msra.gmra.mrb[36].mxu1 %vm1594_vm3, %v1686_v3  ;;  %v1997_v52 = vpop.permute.xlu0 %1996 }
 0x537   : > { %13575 = vmatpush3.bf16.xpose.msra.mxu1 %v1950_v45  ;;  %13576 = vmatprep.mubr.msk.bf16.mxu1 %vm15579_vm1, %v19897_v4  ;;  %v2002_v20 = vsel %vm1396_vm2, %v1997_v52, 0  ;;  %v12714_v52 = vld [vmem:[%s19873_s7 + $0x58] sm:$0xff] }
 0x538   : > { %13586 = vmatprep.subr.bf16.mxu1 %v19897_v4 }
 0x53b   : > { %13571 = vmatmul.mubr.msk.bf16.vlgmr.msra.gmra.mrb[24].mxu0 %vm1396_vm2, %v1891_v56 }
 0x53c   : > { %13581 = vmatpush3.bf16.xpose.msra.mxu0 %v2002_v20  ;;  %13582 = vmatprep.mubr.msk.bf16.mxu0 %vm15579_vm1, %v19897_v4 }
 0x53d   : > { %13592 = vmatprep.subr.bf16.mxu0 %v19897_v4 }
 0x53e   : > { %13577 = vmatmul.mubr.msk.bf16.vlgmr.msra.gmra.mrb[40].mxu1 %vm1396_vm2, %v1943_v14 }
 0x53f   : > { %13587 = vmatpush3.bf16.xpose.msra.mxu1 %v2054_v41  ;;  %13588 = vmatprep.mubr.msk.bf16.mxu1 %vm15579_vm1, %v19897_v4 }
 0x540   : > { %13598 = vmatprep.subr.bf16.mxu1 %v19897_v4 }
 0x543   : > { %13583 = vmatmul.mubr.msk.bf16.vlgmr.msra.gmra.mrb[28].mxu0 %vm1396_vm2, %v1995_v29 }
 0x544   : > { %13594 = vmatprep.mubr.msk.bf16.mxu0 %vm15579_vm1, %v19897_v4 }
 0x546   : > { %13589 = vmatmul.mubr.msk.bf16.vlgmr.msra.gmra.mrb[44].mxu1 %vm1396_vm2, %v2047_v19 }
 0x547   : > { %13600 = vmatprep.mubr.msk.bf16.mxu1 %vm15579_vm1, %v19897_v4 }
 0x5cc   : > { %v16522_v34 = vpop.f32.mrb[24].mxu1 }
 0x5cd   : > { %v13548_v18 = vpop.f32.mrb[25].mxu1 }
 0x5ce   : > { %v16524_v31 = vpop.f32.mrb[26].mxu1 }
 0x5cf   : > { %v13549_v22 = vpop.f32.mrb[27].mxu1 }
 0x5d4   : > { %v16528_v50 = vpop.f32.mrb[28].mxu1 }
 0x5d5   : > { %v13554_v12 = vpop.f32.mrb[29].mxu1 }
 0x5d6   : > { %v16530_v15 = vpop.f32.mrb[30].mxu1 }
 0x5d7   : > { %v13555_v35 = vpop.f32.mrb[31].mxu1 }
 0x5fd   : > { %v16534_v44 = vpop.f32.mrb[32].mxu1 }
 0x5fe   : > { %v13560_v11 = vpop.f32.mrb[33].mxu1 }
 0x5ff   : > { %v16536_v37 = vpop.f32.mrb[34].mxu1 }
 0x600   : > { %v13561_v0 = vpop.f32.mrb[35].mxu1 }
 0x601   : > { %v12717_v0 = vld [vmem:[%s19873_s7 + $0x70] sm:$0xff] }
 0x609   : > { %v16540_v14 = vpop.f32.mrb[36].mxu1 }
 0x60a   : > { %v13566_v54 = vpop.f32.mrb[37].mxu1 }
 0x60b   : > { %v16542_v27 = vpop.f32.mrb[38].mxu1 }
 0x60c   : > { %v13567_v48 = vpop.f32.mrb[39].mxu1 }
 0x60e   : > { %v16546_v23 = vpop.f32.mrb[24].mxu0 }
 0x60f   : > { %v13572_v60 = vpop.f32.mrb[25].mxu0 }
 0x610   : > { %v16551_v19 = vpop.f32.mrb[26].mxu0 }
 0x611   : > { %v13573_v3 = vpop.f32.mrb[27].mxu0  ;;  %v1986_v45 = vpop.f32.mrb[40].mxu1 }
 0x612   : > { %v13578_v56 = vpop.f32.mrb[41].mxu1  ;;  %v1987_v20 = vadd.f32 %v12713_v30, %v1986_v45  ;;  %v12718_v30 = vld [vmem:[%s19873_s7 + $0x78] sm:$0xff] }
 0x613   : > { %v1989_v41 = vpop.f32.mrb[42].mxu1 }
 0x614   : > { %v1990_v29 = vadd.f32 %v12714_v52, %v1989_v41  ;;  %v13579_v18 = vpop.f32.mrb[43].mxu1  ;;  %v2103_v22 = vsel %vm1594_vm3, %v1987_v20, -inf }
 0x615   : > { %2104 = vmax.xlane.f32.xlu0 %v2103_v22 }
 0x616   : > { %v2038_v12 = vpop.f32.mrb[28].mxu0  ;;  %v2106_v35 = vsel %vm1594_vm3, %v1990_v29, -inf }
 0x617   : > { %v13584_v11 = vpop.f32.mrb[29].mxu0  ;;  %2107 = vmax.xlane.f32.xlu1 %v2106_v35 }
 0x618   : > { %v2041_v54 = vpop.f32.mrb[30].mxu0 }
 0x619   : > { %v13585_v48 = vpop.f32.mrb[31].mxu0  ;;  %v2090_v60 = vpop.f32.mrb[44].mxu1 }
 0x61a   : > { %v13590_v3 = vpop.f32.mrb[45].mxu1  ;;  %v2091_v45 = vadd.f32 %v12717_v0, %v2090_v60 }
 0x61b   : > { %v2093_v52 = vpop.f32.mrb[46].mxu1 }
 0x61c   : > { %v2094_v56 = vadd.f32 %v12718_v30, %v2093_v52  ;;  %v13591_v41 = vpop.f32.mrb[47].mxu1  ;;  %v2115_v18 = vsel %vm1594_vm3, %v2091_v45, -inf }
 0x61d   : > { %2116 = vmax.xlane.f32.xlu0 %v2115_v18 }
 0x61e   : > { %v2118_v22 = vsel %vm1594_vm3, %v2094_v56, -inf }
 0x621   : > { %2119 = vmax.xlane.f32.xlu0 %v2118_v22  ;;  %v12715_v22 = vld [vmem:[%s19873_s7 + $0x60] sm:$0xff] }
 0x6a2   : > { %v2105_v35 = vpop.xlane.xlu0 %2104 }
 0x6a3   : > { %v2123_v11 = vsub.f32 %v1987_v20, %v2105_v35  ;;  %v16590_v35 = vadd.f32 %v12715_v22, %v2038_v12 }
 0x6a4   : > { %v2108_v5 = vpop.xlane.xlu1 %2107 }
 0x6a5   : > { %v2133_v48 = vmul.f32 1.442695, %v2123_v11  ;;  %v2124_v21 = vsub.f32 %v1990_v29, %v2108_v5 }
 0x6a7   : > { %14858 = vpow2.f32 %v2133_v48  ;;  %v2135_v61 = vmul.f32 1.442695, %v2124_v21  ;;  %v12716_v48 = vld [vmem:[%s19873_s7 + $0x68] sm:$0xff] }
 0x6a9   : > { %14860 = vpow2.f32 %v2135_v61 }
 0x6aa   : > { %v2117_v51 = vpop.xlane.xlu0 %2116 }
 0x6ab   : > { %v2127_v3 = vsub.f32 %v2091_v45, %v2117_v51  ;;  %v12711_v45 = vld [vmem:[%s19873_s7 + $0x40] sm:$0xff] }
 0x6ad   : > { %v2141_v0 = vmul.f32 1.442695, %v2127_v3  ;;  %v16598_v3 = vadd.f32 %v12716_v48, %v2041_v54  ;;  %v12712_v54 = vld [vmem:[%s19873_s7 + $0x48] sm:$0xff] }
 0x6ae   : > { %v2120_v51 = vpop.xlane.xlu0 %2119 }
 0x6af   : > { %14862 = vpow2.f32 %v2141_v0  ;;  %v2128_v61 = vsub.f32 %v2094_v56, %v2120_v51  ;;  %v1935_v56 = vadd.f32 %v12711_v45, %v16546_v23  ;;  %v2109_v23 = vsel %vm1594_vm3, %v16590_v35, -inf }
 0x6b0   : > { %v2112_v12 = vsel %vm1594_vm3, %v16598_v3, -inf  ;;  %v16616_v0 = vadd.f32 %v12712_v54, %v16551_v19 }
 0x6b1   : > { %v14859_v60 = vpop.eup %14858  ;;  %v2143_v21 = vmul.f32 1.442695, %v2128_v61  ;;  %v2097_v11 = vsel %vm1594_vm3, %v1935_v56, -inf }
 0x6b2   : > { %v2151_v30 = vsel %vm1594_vm3, %v14859_v60, 0.0 }
 0x6b3   : > { %v14861_v52 = vpop.eup %14860  ;;  %2152 = vadd.xlane.f32.xlu0 %v2151_v30  ;;  %14864 = vpow2.f32 %v2143_v21  ;;  %v2100_v30 = vsel %vm1594_vm3, %v16616_v0, -inf }
 0x6b4   : > { %v2154_v41 = vsel %vm1594_vm3, %v14861_v52, 0.0 }
 0x6b5   : > { %2155 = vadd.xlane.f32.xlu1 %v2154_v41 }
 0x6b9   : > { %v16568_v18 = vpop.eup %14862 }
 0x6ba   : > { %v2163_v5 = vsel %vm1594_vm3, %v16568_v18, 0.0 }
 0x6bb   : > { %2164 = vadd.xlane.f32.xlu0 %v2163_v5 }
 0x6bd   : > { %v14865_v20 = vpop.eup %14864 }
 0x6be   : > { %v2166_v29 = vsel %vm1594_vm3, %v14865_v20, 0.0 }
 0x6c6   : > { %2330 = vrot.lane.b32.xlu1 %v16351_v2, %s19890_s22 }
 0x6d1   : > { %2236 = vrot.lane.b32.xlu0 %v16280_v39, %s19890_s22  ;;  %s19905_s22 = smov 48  }
 0x6d5   : > { %2605 = vrot.lane.b32.xlu0 %v16280_v39, %s19895_s24 }
 0x6d9   : > { %2656 = vrot.lane.b32.xlu0 %v16323_v32, %s19895_s24 }
 0x6dd   : > { %2707 = vrot.lane.b32.xlu0 %v16351_v2, %s19895_s24 }
 0x6ea   : > { %2167 = vadd.xlane.f32.xlu1 %v2166_v29 }
 0x6fb   : > { %2554 = vrot.lane.b32.xlu1 %v16243_v55, %s19895_s24  ;;  %s19973_s24 = smov 88  }
 0x6fc   : > { %2098 = vmax.xlane.f32.xlu0 %v2097_v11 }
 0x6ff   : > { %2552 = vrot.lane.b32.xlu1 %v16247_v46, %s19893_s20 }
 0x700   : > { %2110 = vmax.xlane.f32.xlu0 %v2109_v23 }
 0x703   : > { %2603 = vrot.lane.b32.xlu1 %v16288_v24, %s19893_s20 }
 0x704   : > { %2113 = vmax.xlane.f32.xlu0 %v2112_v12 }
 0x707   : > { %2654 = vrot.lane.b32.xlu1 %v16348_v58, %s19893_s20 }
 0x70b   : > { %2705 = vrot.lane.b32.xlu1 %v16356_v8, %s19893_s20 }
 0x72f   : > { %2101 = vmax.xlane.f32.xlu1 %v2100_v30 }
 0x740   : > { %v2153_v41 = vpop.xlane.xlu0 %2152 }
 0x741   : > { %14866 = vrcp.f32 %v2153_v41 }
 0x742   : > { %v2156_v5 = vpop.xlane.xlu1 %2155 }
 0x743   : > { %14868 = vrcp.f32 %v2156_v5 }
 0x746   : > { %v2331_v19 = vpop.permute.xlu1 %2330 }
 0x748   : > { %v2165_v51 = vpop.xlane.xlu0 %2164 }
 0x749   : > { %14870 = vrcp.f32 %v2165_v51 }
 0x74b   : > { %v14867_v61 = vpop.eup %14866 }
 0x74c   : > { %v2237_v21 = vpop.permute.xlu0 %2236  ;;  %v2179_v45 = vmul.f32 %v14867_v61, %v14859_v60 }
 0x74d   : > { %v14869_v29 = vpop.eup %14868  ;;  %13599 = vmatpush3.bf16.msra.mxu1 %v2237_v21 }
 0x74e   : > { %v2180_v22 = vmul.f32 %v14869_v29, %v14861_v52  ;;  %13610 = vmatprep.subr.bf16.mxu1 %v19897_v4 }
 0x750   : > { %v2186_v11 = vpack.c.bf16 %v2180_v22, %v2179_v45  ;;  %v2606_v23 = vpop.permute.xlu0 %2605 }
 0x752   : > { %13601 = vmatmul.mubr.msk.bf16.vlgmr.msra.gmra.mrb[48].mxu1 %vm1594_vm3, %v2186_v11 }
 0x753   : > { %13611 = vmatpush3.bf16.msra.mxu1 %v2331_v19  ;;  %13612 = vmatprep.mubr.msk.bf16.mxu1 %vm15579_vm1, %v19897_v4  ;;  %v14871_v54 = vpop.eup %14870 }
 0x754   : > { %13636 = vmatprep.subr.bf16.mxu1 %v19897_v4  ;;  %v2657_v12 = vpop.permute.xlu0 %2656  ;;  %v2183_v52 = vmul.f32 %v14871_v54, %v16568_v18 }
 0x758   : > { %v2708_v5 = vpop.permute.xlu0 %2707 }
 0x777   : > { %v2168_v48 = vpop.xlane.xlu1 %2167 }
 0x778   : > { %14872 = vrcp.f32 %v2168_v48 }
 0x77b   : > { %v2555_v41 = vpop.permute.xlu1 %2554 }
 0x77c   : > { %v2560_v21 = vsel %vm1396_vm2, %v2555_v41, 0 }
 0x77f   : > { %v2553_v11 = vpop.permute.xlu1 %2552 }
 0x782   : > { %v14873_v60 = vpop.eup %14872 }
 0x783   : > { %v2184_v30 = vmul.f32 %v14873_v60, %v14865_v20  ;;  %v2611_v20 = vsel %vm1396_vm2, %v2606_v23, 0  ;;  %v2604_v48 = vpop.permute.xlu1 %2603 }
 0x785   : > { %v2188_v61 = vpack.c.bf16 %v2184_v30, %v2183_v52  ;;  %v2713_v52 = vsel %vm1396_vm2, %v2708_v5, 0 }
 0x787   : > { %13613 = vmatmul.mubr.msk.bf16.vlgmr.msra.gmra.mrb[52].mxu1 %vm1594_vm3, %v2188_v61 }
 0x788   : > { %13637 = vmatpush3.bf16.xpose.msra.mxu1 %v2560_v21  ;;  %13638 = vmatprep.mubr.msk.bf16.mxu1 %vm15579_vm1, %v19897_v4 }
 0x789   : > { %v2099_v51 = vpop.xlane.xlu0 %2098  ;;  %13642 = vmatprep.subr.bf16.mxu1 %v19897_v4 }
 0x78a   : > { %v2121_v29 = vsub.f32 %v1935_v56, %v2099_v51  ;;  %v2662_v56 = vsel %vm1396_vm2, %v2657_v12, 0  ;;  %v2655_v12 = vpop.permute.xlu1 %2654 }
 0x78c   : > { %v2129_v45 = vmul.f32 1.442695, %v2121_v29 }
 0x78d   : > { %v2111_v22 = vpop.xlane.xlu0 %2110 }
 0x78e   : > { %14874 = vpow2.f32 %v2129_v45  ;;  %v2125_v18 = vsub.f32 %v16590_v35, %v2111_v22  ;;  %v2706_v30 = vpop.permute.xlu1 %2705 }
 0x78f   : > { %13639 = vmatmul.mubr.msk.bf16.vlgmr.msra.gmra.mrb[56].mxu1 %vm1396_vm2, %v2553_v11 }
 0x790   : > { %v2137_v19 = vmul.f32 1.442695, %v2125_v18  ;;  %13643 = vmatpush3.bf16.xpose.msra.mxu1 %v2611_v20  ;;  %13644 = vmatprep.mubr.msk.bf16.mxu1 %vm15579_vm1, %v19897_v4 }
 0x791   : > { %13648 = vmatprep.subr.bf16.mxu1 %v19897_v4  ;;  %v2114_v41 = vpop.xlane.xlu0 %2113 }
 0x792   : > { %14876 = vpow2.f32 %v2137_v19  ;;  %v2126_v5 = vsub.f32 %v16598_v3, %v2114_v41 }
 0x794   : > { %v2139_v51 = vmul.f32 1.442695, %v2126_v5 }
 0x797   : > { %13645 = vmatmul.mubr.msk.bf16.vlgmr.msra.gmra.mrb[60].mxu1 %vm1396_vm2, %v2604_v48 }
 0x798   : > { %v16639_v54 = vpop.eup %14874  ;;  %13649 = vmatpush3.bf16.xpose.msra.mxu1 %v2662_v56  ;;  %13650 = vmatprep.mubr.msk.bf16.mxu1 %vm15579_vm1, %v19897_v4 }
 0x799   : > { %v2145_v35 = vsel %vm1594_vm3, %v16639_v54, 0.0  ;;  %13654 = vmatprep.subr.bf16.mxu1 %v19897_v4 }
 0x79a   : > { %2146 = vadd.xlane.f32.xlu0 %v2145_v35 }
 0x79c   : > { %v16646_v23 = vpop.eup %14876 }
 0x79d   : > { %v2157_v60 = vsel %vm1594_vm3, %v16646_v23, 0.0 }
 0x79e   : > { %2158 = vadd.xlane.f32.xlu0 %v2157_v60 }
 0x79f   : > { %13651 = vmatmul.mubr.msk.bf16.vlgmr.msra.gmra.mrb[64].mxu1 %vm1396_vm2, %v2655_v12 }
 0x7a0   : > { %13655 = vmatpush3.bf16.xpose.msra.mxu1 %v2713_v52  ;;  %13656 = vmatprep.mubr.msk.bf16.mxu1 %vm15579_vm1, %v19897_v4 }
 0x7a1   : > { %13666 = vmatprep.subr.bf16.mxu1 %v19897_v4 }
 0x7a7   : > { %13657 = vmatmul.mubr.msk.bf16.vlgmr.msra.gmra.mrb[68].mxu1 %vm1396_vm2, %v2706_v30 }
 0x7a8   : > { %13668 = vmatprep.mubr.msk.bf16.mxu1 %vm15579_vm1, %v19897_v4 }
 0x7b4   : > { %2189 = vrot.lane.b32.xlu0 %v16243_v55, %s19963_s19 }
 0x7bc   : > { %v2102_v61 = vpop.xlane.xlu1 %2101 }
 0x7bd   : > { %v2122_v21 = vsub.f32 %v16616_v0, %v2102_v61 }
 0x7bf   : > { %v2131_v29 = vmul.f32 1.442695, %v2122_v21 }
 0x7c1   : > { %14878 = vpow2.f32 %v2131_v29 }
 0x7c2   : > { %14880 = vpow2.f32 %v2139_v51  ;;  %v12735_v51 = vld [vmem:[%s19873_s7 + $0x80] sm:$0xff] }
 0x7cb   : > { %v14879_v45 = vpop.eup %14878 }
 0x7cc   : > { %v2148_v22 = vsel %vm1594_vm3, %v14879_v45, 0.0  ;;  %v14881_v11 = vpop.eup %14880 }
 0x7cd   : > { %2149 = vadd.xlane.f32.xlu1 %v2148_v22  ;;  %v2160_v18 = vsel %vm1594_vm3, %v14881_v11, 0.0  ;;  %v12736_v22 = vld [vmem:[%s19873_s7 + $0x88] sm:$0xff] }
 0x7d1   : > { %2161 = vadd.xlane.f32.xlu1 %v2160_v18 }
 0x7e2   : > { %2283 = vrot.lane.b32.xlu1 %v16323_v32, %s19963_s19 }
 0x825   : > { %v16666_v20 = vpop.f32.mrb[48].mxu1 }
 0x826   : > { %v13602_v3 = vpop.f32.mrb[49].mxu1 }
 0x827   : > { %v2147_v19 = vpop.xlane.xlu0 %2146  ;;  %v16668_v0 = vpop.f32.mrb[50].mxu1 }
 0x828   : > { %v13603_v56 = vpop.f32.mrb[51].mxu1  ;;  %14882 = vrcp.f32 %v2147_v19 }
 0x82b   : > { %v2159_v35 = vpop.xlane.xlu0 %2158 }
 0x82f   : > { %v2190_v60 = vpop.permute.xlu0 %2189 }
 0x830   : > { %13593 = vmatpush3.bf16.msra.mxu0 %v2190_v60 }
 0x831   : > { %13604 = vmatprep.subr.bf16.mxu0 %v19897_v4 }
 0x832   : > { %v14883_v18 = vpop.eup %14882 }
 0x85a   : > { %v2150_v12 = vpop.xlane.xlu1 %2149  ;;  %v16673_v52 = vpop.f32.mrb[52].mxu1 }
 0x85b   : > { %14884 = vrcp.f32 %v2150_v12  ;;  %v13614_v30 = vpop.f32.mrb[53].mxu1 }
 0x85c   : > { %v16675_v41 = vpop.f32.mrb[54].mxu1 }
 0x85d   : > { %v13615_v61 = vpop.f32.mrb[55].mxu1 }
 0x85e   : > { %v2162_v21 = vpop.xlane.xlu1 %2161 }
 0x85f   : > { %14886 = vrcp.f32 %v2162_v21  ;;  %v2177_v21 = vmul.f32 %v14883_v18, %v16639_v54  ;;  %v12738_v54 = vld [vmem:[%s19873_s7 + $0x98] sm:$0xff] }
 0x860   : > { %14888 = vrcp.f32 %v2159_v35 }
 0x862   : > { %v2596_v29 = vpop.f32.mrb[56].mxu1 }
 0x863   : > { %v16685_v3 = vadd.f32 %v12735_v51, %v2596_v29  ;;  %v13640_v19 = vpop.f32.mrb[57].mxu1  ;;  %v12737_v51 = vld [vmem:[%s19873_s7 + $0x90] sm:$0xff] }
 0x864   : > { %v2599_v56 = vpop.f32.mrb[58].mxu1 }
 0x865   : > { %v14885_v60 = vpop.eup %14884  ;;  %v16687_v12 = vadd.f32 %v12736_v22, %v2599_v56  ;;  %v13641_v30 = vpop.f32.mrb[59].mxu1  ;;  %v2756_v61 = vsel %vm1594_vm3, %v16685_v3, -inf }
 0x866   : > { %v2178_v35 = vmul.f32 %v14885_v60, %v14879_v45  ;;  %2757 = vmax.xlane.f32.xlu1 %v2756_v61  ;;  %v2284_v22 = vpop.permute.xlu1 %2283 }
 0x867   : > { %v2759_v5 = vsel %vm1594_vm3, %v16687_v12, -inf }
 0x868   : > { %2760 = vmax.xlane.f32.xlu0 %v2759_v5  ;;  %v2185_v48 = vpack.c.bf16 %v2178_v35, %v2177_v21 }
 0x869   : > { %v14887_v29 = vpop.eup %14886 }
 0x86a   : > { %13595 = vmatmul.mubr.msk.bf16.vlgmr.msra.gmra.mrb[32].mxu0 %vm1594_vm3, %v2185_v48  ;;  %v2647_v19 = vpop.f32.mrb[60].mxu1  ;;  %v14889_v45 = vpop.eup %14888  ;;  %v2182_v5 = vmul.f32 %v14887_v29, %v14881_v11  ;;  %v12740_v11 = vld [vmem:[%s19873_s7 + $0xa8] sm:$0xff] }
 0x86b   : > { %13605 = vmatpush3.bf16.msra.mxu0 %v2284_v22  ;;  %v2648_v18 = vadd.f32 %v12737_v51, %v2647_v19  ;;  %v13646_v56 = vpop.f32.mrb[61].mxu1  ;;  %13606 = vmatprep.mubr.msk.bf16.mxu0 %vm15579_vm1, %v19897_v4  ;;  %v2181_v48 = vmul.f32 %v14889_v45, %v16646_v23  ;;  %v12739_v51 = vld [vmem:[%s19873_s7 + $0xa0] sm:$0xff] }
 0x86c   : > { %v2650_v60 = vpop.f32.mrb[62].mxu1 }
 0x86d   : > { %v2651_v30 = vadd.f32 %v12738_v54, %v2650_v60  ;;  %v13647_v61 = vpop.f32.mrb[63].mxu1  ;;  %v2762_v21 = vsel %vm1594_vm3, %v2648_v18, -inf  ;;  %v2187_v43 = vpack.c.bf16 %v2182_v5, %v2181_v48 }
 0x86e   : > { %2763 = vmax.xlane.f32.xlu0 %v2762_v21  ;;  %v12742_v61 = vld [vmem:[%s19873_s7 + $0xb8] sm:$0xff] }
 0x86f   : > { %v2765_v35 = vsel %vm1594_vm3, %v2651_v30, -inf }
 0x870   : > { %2766 = vmax.xlane.f32.xlu1 %v2765_v35 }
 0x872   : > { %13607 = vmatmul.mubr.msk.bf16.vlgmr.msra.gmra.mrb[36].mxu0 %vm1594_vm3, %v2187_v43  ;;  %v2698_v22 = vpop.f32.mrb[64].mxu1  ;;  %v12741_v43 = vld [vmem:[%s19873_s7 + $0xb0] sm:$0xff] }
 0x873   : > { %v2699_v29 = vadd.f32 %v12739_v51, %v2698_v22  ;;  %v13652_v19 = vpop.f32.mrb[65].mxu1 }
 0x874   : > { %v2701_v54 = vpop.f32.mrb[66].mxu1 }
 0x875   : > { %v2702_v23 = vadd.f32 %v12740_v11, %v2701_v54  ;;  %v13653_v45 = vpop.f32.mrb[67].mxu1  ;;  %v2768_v56 = vsel %vm1594_vm3, %v2699_v29, -inf  ;;  %v2381_v54 = vld [vmem:[%s19871_s5 + $0x4] sm:$0xf] }
 0x876   : > { %2769 = vmax.xlane.f32.xlu0 %v2768_v56  ;;  %14632 = vmatprep.subr.msk.bf16.mxu0 %vm2394_vm4, %v2381_v54  ;;  %v2396_v45 = vsel %vm2394_vm4, %v2381_v54, 0  ;;  %v16734_v56 = vld [vmem:[%s19871_s5] sm:$0xf] }
 0x877   : > { %v2771_v5 = vsel %vm1594_vm3, %v2702_v23, -inf  ;;  %13617 = vmatpush3.bf16.msra.mxu0 %v2396_v45 }
 0x878   : > { %2772 = vmax.xlane.f32.xlu1 %v2771_v5  ;;  %14633 = vmatprep.subr.msk.bf16.mxu0 %vm2394_vm4, %v16734_v56 }
 0x87a   : > { %v2749_v60 = vpop.f32.mrb[68].mxu1 }
 0x87b   : > { %v2750_v21 = vadd.f32 %v12741_v43, %v2749_v60  ;;  %v13658_v48 = vpop.f32.mrb[69].mxu1 }
 0x87c   : > { %v2752_v35 = vpop.f32.mrb[70].mxu1 }
 0x87d   : > { %v16721_v51 = vadd.f32 %v12742_v61, %v2752_v35  ;;  %v13659_v22 = vpop.f32.mrb[71].mxu1  ;;  %v2774_v11 = vsel %vm1594_vm3, %v2750_v21, -inf }
 0x87e   : > { %2775 = vmax.xlane.f32.xlu0 %v2774_v11 }
 0x87f   : > { %v2777_v19 = vsel %vm1594_vm3, %v16721_v51, -inf }
 0x880   : > { %2778 = vmax.xlane.f32.xlu1 %v2777_v19 }
 0x8f3   : > { %v2758_v5 = vpop.xlane.xlu1 %2757 }
 0x8f4   : > { %v2780_v43 = vsub.f32 %v16685_v3, %v2758_v5 }
 0x8f5   : > { %v2761_v60 = vpop.xlane.xlu0 %2760 }
 0x8f6   : > { %v2788_v61 = vmul.f32 1.442695, %v2780_v43  ;;  %v2781_v48 = vsub.f32 %v16687_v12, %v2761_v60 }
 0x8f8   : > { %14890 = vpow2.f32 %v2788_v61  ;;  %v2790_v35 = vmul.f32 1.442695, %v2781_v48 }
 0x8fa   : > { %14892 = vpow2.f32 %v2790_v35 }
 0x8fb   : > { %v2764_v22 = vpop.xlane.xlu0 %2763 }
 0x8fc   : > { %v2782_v11 = vsub.f32 %v2648_v18, %v2764_v22 }
 0x8fd   : > { %v2767_v19 = vpop.xlane.xlu1 %2766 }
 0x8fe   : > { %v2792_v54 = vmul.f32 1.442695, %v2782_v11  ;;  %v2783_v45 = vsub.f32 %v2651_v30, %v2767_v19 }
 0x900   : > { %14894 = vpow2.f32 %v2792_v54  ;;  %v2794_v4 = vmul.f32 1.442695, %v2783_v45 }
 0x902   : > { %v16740_v7 = vpop.eup %14890  ;;  %14896 = vpow2.f32 %v2794_v4 }
 0x903   : > { %v2770_v25 = vpop.xlane.xlu0 %2769  ;;  %v2804_v3 = vsel %vm1594_vm3, %v16740_v7, 0.0 }
 0x904   : > { %v16744_v5 = vpop.eup %14892  ;;  %v2784_v12 = vsub.f32 %v2699_v29, %v2770_v25  ;;  %2805 = vadd.xlane.f32.xlu0 %v2804_v3 }
 0x905   : > { %v2773_v43 = vpop.xlane.xlu1 %2772  ;;  %v2807_v18 = vsel %vm1594_vm3, %v16744_v5, 0.0 }
 0x906   : > { %v2796_v60 = vmul.f32 1.442695, %v2784_v12  ;;  %v2785_v61 = vsub.f32 %v2702_v23, %v2773_v43  ;;  %2808 = vadd.xlane.f32.xlu1 %v2807_v18 }
 0x908   : > { %14898 = vpow2.f32 %v2796_v60  ;;  %v2798_v30 = vmul.f32 1.442695, %v2785_v61 }
 0x90a   : > { %v16748_v48 = vpop.eup %14894  ;;  %14900 = vpow2.f32 %v2798_v30 }
 0x90b   : > { %v2776_v4 = vpop.xlane.xlu0 %2775  ;;  %v2810_v35 = vsel %vm1594_vm3, %v16748_v48, 0.0 }
 0x90c   : > { %v16752_v22 = vpop.eup %14896  ;;  %v2786_v25 = vsub.f32 %v2750_v21, %v2776_v4  ;;  %2811 = vadd.xlane.f32.xlu0 %v2810_v35 }
 0x90d   : > { %v2813_v29 = vsel %vm1594_vm3, %v16752_v22, 0.0  ;;  %v2779_v12 = vpop.xlane.xlu1 %2778 }
 0x90e   : > { %v2800_v11 = vmul.f32 1.442695, %v2786_v25  ;;  %2814 = vadd.xlane.f32.xlu1 %v2813_v29  ;;  %v2787_v43 = vsub.f32 %v16721_v51, %v2779_v12  ;;  %v2476_v25 = vsel %vm2394_vm4, %v16734_v56, 0  ;;  %v19964_v51 = vpack.c.bf16 %v16668_v0, %v16666_v20 }
 0x90f   : > { %v19967_v20 = vpack.c.bf16 %v16524_v31, %v16522_v34  ;;  %v19968_v12 = vpack.c.bf16 %v16530_v15, %v16528_v50 }
 0x910   : > { %14902 = vpow2.f32 %v2800_v11  ;;  %v2802_v18 = vmul.f32 1.442695, %v2787_v43  ;;  %v19969_v43 = vpack.c.bf16 %v16536_v37, %v16534_v44 }
 0x912   : > { %v16756_v23 = vpop.eup %14898  ;;  %14904 = vpow2.f32 %v2802_v18 }
 0x913   : > { %v2816_v19 = vsel %vm1594_vm3, %v16756_v23, 0.0 }
 0x914   : > { %v16760_v54 = vpop.eup %14900  ;;  %2817 = vadd.xlane.f32.xlu0 %v2816_v19 }
 0x915   : > { %v2819_v45 = vsel %vm1594_vm3, %v16760_v54, 0.0 }
 0x916   : > { %2820 = vadd.xlane.f32.xlu1 %v2819_v45 }
 0x91a   : > { %v16764_v21 = vpop.eup %14902 }
 0x91b   : > { %v2822_v3 = vsel %vm1594_vm3, %v16764_v21, 0.0 }
 0x91c   : > { %2823 = vadd.xlane.f32.xlu0 %v2822_v3  ;;  %v16792_v56 = vpop.eup %14904 }
 0x91d   : > { %v2825_v0 = vsel %vm1594_vm3, %v16792_v56, 0.0 }
 0x927   : > { %2895 = vrot.lane.b32.xlu1 %v16280_v39, %s19905_s22 }
 0x92b   : > { %2942 = vrot.lane.b32.xlu1 %v16323_v32, %s19905_s22 }
 0x932   : > { %2848 = vrot.lane.b32.xlu0 %v16243_v55, %s19905_s22 }
 0x936   : > { %3140 = vrot.lane.b32.xlu0 %v16243_v55, %s19903_s27 }
 0x93a   : > { %3191 = vrot.lane.b32.xlu0 %v16280_v39, %s19903_s27 }
 0x93d   : > { %v2229_v60 = vpop.f32.mrb[32].mxu0 }
 0x93e   : > { %v13596_v61 = vpop.f32.mrb[33].mxu0  ;;  %3189 = vrot.lane.b32.xlu0 %v16288_v24, %s19901_s0  ;;  %v19965_v24 = vmov 0.0  }
 0x93f   : > { %v2232_v30 = vpop.f32.mrb[34].mxu0 }
 0x940   : > { %v2377_v4 = vpack.c.bf16 %v2232_v30, %v2229_v60  ;;  %v13597_v35 = vpop.f32.mrb[35].mxu0 }
 0x942   : > { %13618 = vmatprep.mubr.msk.bf16.mxu0 %vm1396_vm2, %v2377_v4  ;;  %3240 = vrot.lane.b32.xlu0 %v16348_v58, %s19901_s0  ;;  %v19966_v58 = vpack.c.bf16 %v16675_v41, %v16673_v52  ;;  %v19970_v52 = vpack.c.bf16 %v16542_v27, %v16540_v14 }
 0x943   : > { %13619 = vmatmul.mubr.msk.bf16.vlgmr.msra.gmra.mrb[40].mxu0 %vm1396_vm2, %v19964_v51 }
 0x944   : > { %13627 = vmatpush3.bf16.msra.mxu0 %v2476_v25 }
 0x945   : > { %v2323_v29 = vpop.f32.mrb[36].mxu0  ;;  %13660 = vmatprep.subr.bf16.mxu0 %v19965_v24 }
 0x946   : > { %v13608_v11 = vpop.f32.mrb[37].mxu0 }
 0x947   : > { %v2326_v19 = vpop.f32.mrb[38].mxu0 }
 0x948   : > { %v2379_v45 = vpack.c.bf16 %v2326_v19, %v2323_v29  ;;  %v13609_v3 = vpop.f32.mrb[39].mxu0 }
 0x94a   : > { %13622 = vmatprep.mubr.msk.bf16.mxu0 %vm1396_vm2, %v2379_v45 }
 0x94b   : > { %13623 = vmatmul.mubr.msk.bf16.gmra.mrb[44].mxu0 %vm1396_vm2, %v19966_v58 }
 0x94c   : > { %13628 = vmatprep.mubr.msk.bf16.mxu0 %vm1396_vm2, %v19967_v20 }
 0x94f   : > { %2826 = vadd.xlane.f32.xlu1 %v2825_v0 }
 0x953   : > { %13629 = vmatmul.mubr.msk.bf16.vlgmr.msra.gmra.mrb[40].mxu0 %vm1396_vm2, %v19968_v12 }
 0x954   : > { %13632 = vmatprep.mubr.msk.bf16.mxu0 %vm1396_vm2, %v19969_v43 }
 0x95b   : > { %13633 = vmatmul.mubr.msk.bf16.gmra.mrb[44].mxu0 %vm1396_vm2, %v19970_v52 }
 0x95c   : > { %13662 = vmatprep.mubr.msk.bf16.mxu0 %vm15579_vm1, %v19965_v24 }
 0x960   : > { %2989 = vrot.lane.b32.xlu1 %v16351_v2, %s19905_s22  ;;  %s19975_s22 = smov 120  }
 0x964   : > { %3138 = vrot.lane.b32.xlu1 %v16247_v46, %s19901_s0 }
 0x968   : > { %3242 = vrot.lane.b32.xlu1 %v16323_v32, %s19903_s27 }
 0x96c   : > { %3293 = vrot.lane.b32.xlu1 %v16351_v2, %s19903_s27  ;;  %s19980_s27 = smov 104  }
 0x970   : > { %3291 = vrot.lane.b32.xlu1 %v16356_v8, %s19901_s0  ;;  %s19972_s0 = smov 64  }
 0x991   : > { %v2806_v34 = vpop.xlane.xlu0 %2805 }
 0x993   : > { %v2809_v31 = vpop.xlane.xlu1 %2808 }
 0x999   : > { %v2812_v50 = vpop.xlane.xlu0 %2811 }
 0x99a   : > { %14906 = vrcp.f32 %v2812_v50 }
 0x99b   : > { %v2815_v15 = vpop.xlane.xlu1 %2814 }
 0x99c   : > { %14908 = vrcp.f32 %v2815_v15  ;;  %v3040_v15 = vld [vmem:[%s19871_s5 + $0x8] sm:$0xf] }
 0x99d   : > { %14910 = vrcp.f32 %v2809_v31 }
 0x99e   : > { %14912 = vrcp.f32 %v2806_v34 }
 0x9a1   : > { %v2818_v46 = vpop.xlane.xlu0 %2817 }
 0x9a3   : > { %v2821_v44 = vpop.xlane.xlu1 %2820 }
 0x9a4   : > { %v14907_v37 = vpop.eup %14906  ;;  %14914 = vrcp.f32 %v2821_v44  ;;  %v3054_v44 = vsel %vm2394_vm4, %v3040_v15, 0 }
 0x9a5   : > { %v2838_v27 = vmul.f32 %v14907_v37, %v16748_v48  ;;  %14916 = vrcp.f32 %v2818_v46 }
 0x9a6   : > { %v14909_v14 = vpop.eup %14908 }
 0x9a7   : > { %v2839_v41 = vmul.f32 %v14909_v14, %v16752_v22  ;;  %v2896_v18 = vpop.permute.xlu1 %2895  ;;  %v14911_v60 = vpop.eup %14910 }
 0x9a8   : > { %13667 = vmatpush3.bf16.msra.mxu1 %v2896_v18  ;;  %v14913_v30 = vpop.eup %14912  ;;  %v2837_v4 = vmul.f32 %v14911_v60, %v16744_v5 }
 0x9a9   : > { %v2824_v8 = vpop.xlane.xlu0 %2823  ;;  %v2845_v61 = vpack.c.bf16 %v2839_v41, %v2838_v27  ;;  %13678 = vmatprep.subr.bf16.mxu1 %v19965_v24  ;;  %v2836_v48 = vmul.f32 %v14913_v30, %v16740_v7 }
 0x9aa   : > { %14918 = vrcp.f32 %v2824_v8 }
 0x9ab   : > { %13669 = vmatmul.mubr.msk.bf16.vlgmr.msra.gmra.mrb[72].mxu1 %vm1594_vm3, %v2845_v61  ;;  %v2844_v22 = vpack.c.bf16 %v2837_v4, %v2836_v48  ;;  %v2943_v51 = vpop.permute.xlu1 %2942 }
 0x9ac   : > { %13680 = vmatprep.mubr.msk.bf16.mxu1 %vm15579_vm1, %v19965_v24 }
 0x9ad   : > { %v2849_v35 = vpop.permute.xlu0 %2848 }
 0x9ae   : > { %13661 = vmatpush3.bf16.msra.mxu0 %v2849_v35  ;;  %v14915_v25 = vpop.eup %14914 }
 0x9af   : > { %13672 = vmatprep.subr.bf16.mxu0 %v19965_v24  ;;  %v14917_v29 = vpop.eup %14916  ;;  %v2841_v5 = vmul.f32 %v14915_v25, %v16760_v54 }
 0x9b0   : > { %v2840_v11 = vmul.f32 %v14917_v29, %v16756_v23 }
 0x9b1   : > { %13663 = vmatmul.mubr.msk.bf16.vlgmr.msra.gmra.mrb[48].mxu0 %vm1594_vm3, %v2844_v22  ;;  %v3141_v12 = vpop.permute.xlu0 %3140 }
 0x9b2   : > { %13673 = vmatpush3.bf16.msra.mxu0 %v2943_v51  ;;  %13674 = vmatprep.mubr.msk.bf16.mxu0 %vm15579_vm1, %v19965_v24  ;;  %v2846_v19 = vpack.c.bf16 %v2841_v5, %v2840_v11  ;;  %v3146_v23 = vsel %vm1396_vm2, %v3141_v12, 0 }
 0x9b3   : > { %14634 = vmatprep.subr.msk.bf16.mxu0 %vm2394_vm4, %v3040_v15 }
 0x9b4   : > { %v14919_v3 = vpop.eup %14918 }
 0x9b5   : > { %v2842_v20 = vmul.f32 %v14919_v3, %v16764_v21  ;;  %v3192_v52 = vpop.permute.xlu0 %3191  ;;  %v12755_v3 = vld [vmem:[%s19873_s7 + $0xc0] sm:$0xff] }
 0x9b6   : > { %v3197_v31 = vsel %vm1396_vm2, %v3192_v52, 0 }
 0x9b9   : > { %13675 = vmatmul.mubr.msk.bf16.vlgmr.msra.gmra.mrb[52].mxu0 %vm1594_vm3, %v2846_v19 }
 0x9ba   : > { %13685 = vmatpush3.bf16.msra.mxu0 %v3054_v44 }
 0x9bb   : > { %13706 = vmatprep.subr.bf16.mxu0 %v19965_v24 }
 0x9dc   : > { %v2827_v7 = vpop.xlane.xlu1 %2826 }
 0x9dd   : > { %14920 = vrcp.f32 %v2827_v7 }
 0x9e0   : > { %v2990_v45 = vpop.permute.xlu1 %2989 }
 0x9e1   : > { %13679 = vmatpush3.bf16.msra.mxu1 %v2990_v45 }
 0x9e2   : > { %13694 = vmatprep.subr.bf16.mxu1 %v19965_v24 }
 0x9e4   : > { %v3139_v43 = vpop.permute.xlu1 %3138 }
 0x9e7   : > { %v14921_v58 = vpop.eup %14920 }
 0x9e8   : > { %v2843_v0 = vmul.f32 %v14921_v58, %v16792_v56  ;;  %v3243_v34 = vpop.permute.xlu1 %3242  ;;  %v3190_v56 = vpop.permute.xlu0 %3189 }
 0x9e9   : > { %v3248_v48 = vsel %vm1396_vm2, %v3243_v34, 0 }
 0x9ea   : > { %v2847_v54 = vpack.c.bf16 %v2843_v0, %v2842_v20  ;;  %v12756_v20 = vld [vmem:[%s19873_s7 + $0xc8] sm:$0xff] }
 0x9ec   : > { %13681 = vmatmul.mubr.msk.bf16.vlgmr.msra.gmra.mrb[76].mxu1 %vm1594_vm3, %v2847_v54  ;;  %v3294_v21 = vpop.permute.xlu1 %3293  ;;  %v3241_v34 = vpop.permute.xlu0 %3240 }
 0x9ed   : > { %13695 = vmatpush3.bf16.xpose.msra.mxu1 %v3146_v23  ;;  %13696 = vmatprep.mubr.msk.bf16.mxu1 %vm15579_vm1, %v19965_v24  ;;  %v3299_v50 = vsel %vm1396_vm2, %v3294_v21, 0  ;;  %v12757_v21 = vld [vmem:[%s19873_s7 + $0xd0] sm:$0xff] }
 0x9ee   : > { %13700 = vmatprep.subr.bf16.mxu1 %v19965_v24 }
 0x9f0   : > { %v3292_v37 = vpop.permute.xlu1 %3291 }
 0x9f4   : > { %13697 = vmatmul.mubr.msk.bf16.vlgmr.msra.gmra.mrb[80].mxu1 %vm1396_vm2, %v3139_v43 }
 0x9f5   : > { %13701 = vmatpush3.bf16.xpose.msra.mxu1 %v3197_v31  ;;  %13702 = vmatprep.mubr.msk.bf16.mxu1 %vm15579_vm1, %v19965_v24 }
 0x9f6   : > { %13712 = vmatprep.subr.bf16.mxu1 %v19965_v24 }
 0x9fc   : > { %13703 = vmatmul.mubr.msk.bf16.vlgmr.msra.gmra.mrb[84].mxu1 %vm1396_vm2, %v3190_v56 }
 0x9fd   : > { %13713 = vmatpush3.bf16.xpose.msra.mxu1 %v3299_v50  ;;  %13714 = vmatprep.mubr.msk.bf16.mxu1 %vm15579_vm1, %v19965_v24  ;;  %v12758_v50 = vld [vmem:[%s19873_s7 + $0xd8] sm:$0xff] }
 0x9fe   : > { %13724 = vmatprep.subr.bf16.mxu1 %v19965_v24 }
 0xa04   : > { %13715 = vmatmul.mubr.msk.bf16.vlgmr.msra.gmra.mrb[88].mxu1 %vm1396_vm2, %v3292_v37 }
 0xa05   : > { %13726 = vmatprep.mubr.msk.bf16.mxu1 %vm15579_vm1, %v19965_v24 }
 0xa7e   : > { %v2935_v46 = vpop.f32.mrb[72].mxu1 }
 0xa7f   : > { %v13670_v14 = vpop.f32.mrb[73].mxu1 }
 0xa80   : > { %v2938_v27 = vpop.f32.mrb[74].mxu1 }
 0xa81   : > { %v3037_v41 = vpack.c.bf16 %v2938_v27, %v2935_v46  ;;  %v13671_v18 = vpop.f32.mrb[75].mxu1 }
 0xa84   : > { %v2888_v60 = vpop.f32.mrb[48].mxu0 }
 0xa85   : > { %v13664_v8 = vpop.f32.mrb[49].mxu0 }
 0xa86   : > { %v2891_v61 = vpop.f32.mrb[50].mxu0 }
 0xa87   : > { %v3036_v30 = vpack.c.bf16 %v2891_v61, %v2888_v60  ;;  %v13665_v4 = vpop.f32.mrb[51].mxu0 }
 0xa89   : > { %13686 = vmatprep.mubr.msk.bf16.mxu0 %vm1396_vm2, %v3036_v30 }
 0xa8a   : > { %13687 = vmatmul.mubr.msk.bf16.vlgmr.msra.gmra.mrb[40].mxu0 %vm1396_vm2, %v3037_v41 }
 0xa8b   : > { %13707 = vmatpush3.bf16.xpose.msra.mxu0 %v3248_v48 }
 0xa8c   : > { %v2982_v35 = vpop.f32.mrb[52].mxu0  ;;  %13718 = vmatprep.subr.bf16.mxu0 %v19965_v24 }
 0xa8d   : > { %v13676_v22 = vpop.f32.mrb[53].mxu0 }
 0xa8e   : > { %v2985_v25 = vpop.f32.mrb[54].mxu0 }
 0xa8f   : > { %v3038_v51 = vpack.c.bf16 %v2985_v25, %v2982_v35  ;;  %v13677_v29 = vpop.f32.mrb[55].mxu0 }
 0xa91   : > { %13690 = vmatprep.mubr.msk.bf16.mxu0 %vm1396_vm2, %v3038_v51 }
 0xabf   : > { %v3029_v5 = vpop.f32.mrb[76].mxu1 }
 0xac0   : > { %v13682_v11 = vpop.f32.mrb[77].mxu1 }
 0xac1   : > { %v3032_v19 = vpop.f32.mrb[78].mxu1 }
 0xac2   : > { %v3039_v7 = vpack.c.bf16 %v3032_v19, %v3029_v5  ;;  %v13683_v45 = vpop.f32.mrb[79].mxu1 }
 0xac3   : > { %v12761_v45 = vld [vmem:[%s19873_s7 + $0xf0] sm:$0xff] }
 0xac4   : > { %13691 = vmatmul.mubr.msk.bf16.gmra.mrb[44].mxu0 %vm1396_vm2, %v3039_v7  ;;  %v12759_v7 = vld [vmem:[%s19873_s7 + $0xe0] sm:$0xff] }
 0xac5   : > { %13708 = vmatprep.mubr.msk.bf16.mxu0 %vm15579_vm1, %v19965_v24 }
 0xac7   : > { %v3182_v58 = vpop.f32.mrb[80].mxu1 }
 0xac8   : > { %v3183_v0 = vadd.f32 %v12755_v3, %v3182_v58  ;;  %v13698_v12 = vpop.f32.mrb[81].mxu1 }
 0xac9   : > { %v3185_v54 = vpop.f32.mrb[82].mxu1 }
 0xaca   : > { %v3186_v23 = vadd.f32 %v12756_v20, %v3185_v54  ;;  %v13699_v43 = vpop.f32.mrb[83].mxu1  ;;  %v3342_v52 = vsel %vm1594_vm3, %v3183_v0, -inf  ;;  %v12760_v20 = vld [vmem:[%s19873_s7 + $0xe8] sm:$0xff]  ;;  %v12762_v54 = vld [vmem:[%s19873_s7 + $0xf8] sm:$0xff] }
 0xacb   : > { %3343 = vmax.xlane.f32.xlu0 %v3342_v52 }
 0xacc   : > { %13709 = vmatmul.mubr.msk.bf16.vlgmr.msra.gmra.mrb[56].mxu0 %vm1396_vm2, %v3241_v34  ;;  %v3345_v31 = vsel %vm1594_vm3, %v3186_v23, -inf }
 0xacd   : > { %3346 = vmax.xlane.f32.xlu1 %v3345_v31  ;;  %13720 = vmatprep.mubr.msk.bf16.mxu0 %vm15579_vm1, %v19965_v24 }
 0xacf   : > { %v3233_v56 = vpop.f32.mrb[84].mxu1 }
 0xad0   : > { %v3234_v15 = vadd.f32 %v12757_v21, %v3233_v56  ;;  %v13704_v44 = vpop.f32.mrb[85].mxu1 }
 0xad1   : > { %v3236_v37 = vpop.f32.mrb[86].mxu1 }
 0xad2   : > { %v3237_v46 = vadd.f32 %v12758_v50, %v3236_v37  ;;  %v13705_v14 = vpop.f32.mrb[87].mxu1  ;;  %v3348_v27 = vsel %vm1594_vm3, %v3234_v15, -inf }
 0xad3   : > { %3349 = vmax.xlane.f32.xlu0 %v3348_v27 }
 0xad4   : > { %v3351_v41 = vsel %vm1594_vm3, %v3237_v46, -inf }
 0xad7   : > { %3352 = vmax.xlane.f32.xlu0 %v3351_v41  ;;  %v3335_v18 = vpop.f32.mrb[88].mxu1 }
 0xad8   : > { %v13716_v60 = vpop.f32.mrb[89].mxu1  ;;  %v3336_v43 = vadd.f32 %v12761_v45, %v3335_v18 }
 0xad9   : > { %v3338_v8 = vpop.f32.mrb[90].mxu1 }
 0xada   : > { %v13717_v61 = vpop.f32.mrb[91].mxu1  ;;  %v3339_v21 = vadd.f32 %v12762_v54, %v3338_v8  ;;  %v3360_v50 = vsel %vm1594_vm3, %v3336_v43, -inf }
 0xadc   : > { %v3363_v44 = vsel %vm1594_vm3, %v3339_v21, -inf }
 0xb58   : > { %v3344_v30 = vpop.xlane.xlu0 %3343 }
 0xb59   : > { %v3366_v35 = vsub.f32 %v3183_v0, %v3344_v30 }
 0xb5a   : > { %v3347_v48 = vpop.xlane.xlu1 %3346 }
 0xb5b   : > { %v3367_v22 = vsub.f32 %v3186_v23, %v3347_v48  ;;  %v3374_v51 = vmul.f32 1.442695, %v3366_v35 }
 0xb5d   : > { %v3376_v5 = vmul.f32 1.442695, %v3367_v22  ;;  %14922 = vpow2.f32 %v3374_v51 }
 0xb5f   : > { %14924 = vpow2.f32 %v3376_v5 }
 0xb60   : > { %v3350_v4 = vpop.xlane.xlu0 %3349 }
 0xb61   : > { %v3368_v29 = vsub.f32 %v3234_v15, %v3350_v4 }
 0xb63   : > { %v3378_v19 = vmul.f32 1.442695, %v3368_v29 }
 0xb64   : > { %v3353_v25 = vpop.xlane.xlu0 %3352 }
 0xb65   : > { %v3369_v11 = vsub.f32 %v3237_v46, %v3353_v25  ;;  %14926 = vpow2.f32 %v3378_v19 }
 0xb67   : > { %v3380_v3 = vmul.f32 1.442695, %v3369_v11  ;;  %v16912_v15 = vpop.eup %14922 }
 0xb68   : > { %v3390_v46 = vsel %vm1594_vm3, %v16912_v15, 0.0 }
 0xb69   : > { %14928 = vpow2.f32 %v3380_v3  ;;  %v16915_v37 = vpop.eup %14924 }
 0xb6a   : > { %v3393_v27 = vsel %vm1594_vm3, %v16915_v37, 0.0 }
 0xb6f   : > { %v16919_v14 = vpop.eup %14926 }
 0xb70   : > { %v3396_v18 = vsel %vm1594_vm3, %v16919_v14, 0.0 }
 0xb73   : > { %v14929_v41 = vpop.eup %14928 }
 0xb74   : > { %v3399_v60 = vsel %vm1594_vm3, %v14929_v41, 0.0 }
 0xb9f   : > { %v3284_v58 = vpop.f32.mrb[56].mxu0 }
 0xba0   : > { %v3285_v0 = vadd.f32 %v12759_v7, %v3284_v58  ;;  %v13710_v12 = vpop.f32.mrb[57].mxu0 }
 0xba1   : > { %v3287_v23 = vpop.f32.mrb[58].mxu0 }
 0xba2   : > { %v3288_v52 = vadd.f32 %v12760_v20, %v3287_v23  ;;  %v13711_v34 = vpop.f32.mrb[59].mxu0  ;;  %v3354_v31 = vsel %vm1594_vm3, %v3285_v0, -inf }
 0xba3   : > { %3355 = vmax.xlane.f32.xlu0 %v3354_v31 }
 0xba4   : > { %v3357_v56 = vsel %vm1594_vm3, %v3288_v52, -inf }
 0xba5   : > { %3358 = vmax.xlane.f32.xlu1 %v3357_v56 }
 0xba7   : > { %3361 = vmax.xlane.f32.xlu0 %v3360_v50 }
 0xba9   : > { %3364 = vmax.xlane.f32.xlu1 %v3363_v44 }
 0xbab   : > { %3391 = vadd.xlane.f32.xlu0 %v3390_v46 }
 0xbad   : > { %3394 = vadd.xlane.f32.xlu1 %v3393_v27 }
 0xbaf   : > { %3397 = vadd.xlane.f32.xlu0 %v3396_v18 }
 0xbb1   : > { %3400 = vadd.xlane.f32.xlu1 %v3399_v60 }
 0xc30   : > { %v3356_v8 = vpop.xlane.xlu0 %3355 }
 0xc31   : > { %v3370_v61 = vsub.f32 %v3285_v0, %v3356_v8 }
 0xc32   : > { %v3359_v30 = vpop.xlane.xlu1 %3358 }
 0xc33   : > { %v3382_v35 = vmul.f32 1.442695, %v3370_v61  ;;  %v3371_v58 = vsub.f32 %v3288_v52, %v3359_v30 }
 0xc34   : > { %v3362_v4 = vpop.xlane.xlu0 %3361 }
 0xc35   : > { %v3372_v48 = vsub.f32 %v3336_v43, %v3362_v4  ;;  %v3384_v20 = vmul.f32 1.442695, %v3371_v58 }
 0xc36   : > { %v3365_v22 = vpop.xlane.xlu1 %3364 }
 0xc37   : > { %v3386_v25 = vmul.f32 1.442695, %v3372_v48  ;;  %v3373_v51 = vsub.f32 %v3339_v21, %v3365_v22 }
 0xc39   : > { %14930 = vpow2.f32 %v3386_v25  ;;  %v3388_v29 = vmul.f32 1.442695, %v3373_v51 }
 0xc3a   : > { %14932 = vpow2.f32 %v3382_v35 }
 0xc3b   : > { %14934 = vpow2.f32 %v3388_v29 }
 0xc3c   : > { %14936 = vpow2.f32 %v3384_v20 }
 0xc43   : > { %v16926_v5 = vpop.eup %14930 }
 0xc44   : > { %v16928_v11 = vpop.eup %14932  ;;  %v3408_v19 = vsel %vm1594_vm3, %v16926_v5, 0.0 }
 0xc45   : > { %v16932_v7 = vpop.eup %14934  ;;  %3409 = vadd.xlane.f32.xlu0 %v3408_v19  ;;  %v3402_v3 = vsel %vm1594_vm3, %v16928_v11, 0.0 }
 0xc46   : > { %v3411_v45 = vsel %vm1594_vm3, %v16932_v7, 0.0  ;;  %v14937_v0 = vpop.eup %14936 }
 0xc47   : > { %3412 = vadd.xlane.f32.xlu1 %v3411_v45  ;;  %v3405_v12 = vsel %vm1594_vm3, %v14937_v0, 0.0 }
 0xc49   : > { %3403 = vadd.xlane.f32.xlu0 %v3402_v3 }
 0xc58   : > { %3481 = vrot.lane.b32.xlu1 %v16280_v39, %s19907_s1  ;;  %v3392_v39 = vpop.xlane.xlu0 %3391 }
 0xc5c   : > { %3528 = vrot.lane.b32.xlu1 %v16323_v32, %s19907_s1  ;;  %v3398_v54 = vpop.xlane.xlu0 %3397 }
 0xc5f   : > { %3434 = vrot.lane.b32.xlu0 %v16243_v55, %s19907_s1  ;;  %v3395_v55 = vpop.xlane.xlu1 %3394 }
 0xc63   : > { %3884 = vrot.lane.b32.xlu0 %v16245_v17, %s19971_s2  ;;  %v3401_v32 = vpop.xlane.xlu1 %3400 }
 0xc64   : > { %14938 = vrcp.f32 %v3401_v32 }
 0xc65   : > { %14940 = vrcp.f32 %v3395_v55 }
 0xc66   : > { %14942 = vrcp.f32 %v3398_v54 }
 0xc67   : > { %4034 = vrot.lane.b32.xlu0 %v16354_v42, %s19971_s2  ;;  %14944 = vrcp.f32 %v3392_v39 }
 0xc6e   : > { %v14939_v43 = vpop.eup %14938 }
 0xc6f   : > { %v14941_v52 = vpop.eup %14940 }
 0xc70   : > { %v14943_v31 = vpop.eup %14942  ;;  %v3423_v50 = vmul.f32 %v14941_v52, %v16915_v37  ;;  %v3626_v37 = vld [vmem:[%s19871_s5 + $0xc] sm:$0xf] }
 0xc71   : > { %v14945_v56 = vpop.eup %14944  ;;  %v3424_v44 = vmul.f32 %v14943_v31, %v16919_v14  ;;  %v3640_v45 = vsel %vm2394_vm4, %v3626_v37, 0 }
 0xc72   : > { %v3422_v27 = vmul.f32 %v14945_v56, %v16912_v15 }
 0xc80   : > { %3406 = vadd.xlane.f32.xlu1 %v3405_v12 }
 0xc91   : > { %3575 = vrot.lane.b32.xlu1 %v16351_v2, %s19907_s1  ;;  %v3425_v2 = vmul.f32 %v14939_v43, %v14929_v41  ;;  %v3430_v41 = vpack.c.bf16 %v3423_v50, %v3422_v27  ;;  %s19977_s1 = smov 112  }
 0xc93   : > { %v3431_v60 = vpack.c.bf16 %v3425_v2, %v3424_v44 }
 0xc95   : > { %3934 = vrot.lane.b32.xlu1 %v16283_v26, %s19971_s2 }
 0xc99   : > { %3984 = vrot.lane.b32.xlu1 %v16325_v59, %s19971_s2 }
 0xcd2   : > { %v3410_v23 = vpop.xlane.xlu0 %3409 }
 0xcd4   : > { %v3413_v34 = vpop.xlane.xlu1 %3412 }
 0xcd5   : > { %14946 = vrcp.f32 %v3413_v34 }
 0xcd6   : > { %v3404_v21 = vpop.xlane.xlu0 %3403  ;;  %14948 = vrcp.f32 %v3410_v23 }
 0xcd7   : > { %14950 = vrcp.f32 %v3404_v21 }
 0xcd8   : > { %v3482_v46 = vpop.permute.xlu1 %3481 }
 0xcd9   : > { %13725 = vmatpush3.bf16.msra.mxu1 %v3482_v46 }
 0xcda   : > { %v3435_v18 = vpop.permute.xlu0 %3434  ;;  %13736 = vmatprep.subr.bf16.mxu1 %v19965_v24 }
 0xcdb   : > { %13719 = vmatpush3.bf16.msra.mxu0 %v3435_v18 }
 0xcdc   : > { %13727 = vmatmul.mubr.msk.bf16.vlgmr.msra.gmra.mrb[92].mxu1 %vm1594_vm3, %v3431_v60  ;;  %13730 = vmatprep.subr.bf16.mxu0 %v19965_v24  ;;  %v3529_v14 = vpop.permute.xlu1 %3528 }
 0xcdd   : > { %13738 = vmatprep.mubr.msk.bf16.mxu1 %vm15579_vm1, %v19965_v24 }
 0xcde   : > { %13721 = vmatmul.mubr.msk.bf16.vlgmr.msra.gmra.mrb[60].mxu0 %vm1594_vm3, %v3430_v41  ;;  %v3885_v25 = vpop.permute.xlu0 %3884 }
 0xcdf   : > { %13731 = vmatpush3.bf16.msra.mxu0 %v3529_v14  ;;  %13732 = vmatprep.mubr.msk.bf16.mxu0 %vm15579_vm1, %v19965_v24  ;;  %v14947_v15 = vpop.eup %14946 }
 0xce0   : > { %14635 = vmatprep.subr.msk.bf16.mxu0 %vm2394_vm4, %v3626_v37  ;;  %v14949_v61 = vpop.eup %14948  ;;  %v3429_v30 = vmul.f32 %v14947_v15, %v16932_v7  ;;  %v3890_v7 = vsel %vm1396_vm2, %v3885_v25, 0 }
 0xce1   : > { %v3428_v4 = vmul.f32 %v14949_v61, %v16926_v5  ;;  %v14951_v22 = vpop.eup %14950 }
 0xce2   : > { %v3426_v29 = vmul.f32 %v14951_v22, %v16928_v11  ;;  %v4035_v11 = vpop.permute.xlu0 %4034 }
 0xce3   : > { %v3433_v35 = vpack.c.bf16 %v3429_v30, %v3428_v4  ;;  %v4040_v20 = vsel %vm1396_vm2, %v4035_v11, 0  ;;  %v12786_v30 = vld [vmem:[%s19873_s7 + $0x110] sm:$0xff] }
 0xd0d   : > { %v3407_v8 = vpop.xlane.xlu1 %3406 }
 0xd0e   : > { %14952 = vrcp.f32 %v3407_v8 }
 0xd11   : > { %v3576_v48 = vpop.permute.xlu1 %3575 }
 0xd12   : > { %13737 = vmatpush3.bf16.msra.mxu1 %v3576_v48  ;;  %v12787_v48 = vld [vmem:[%s19873_s7 + $0x118] sm:$0xff] }
 0xd13   : > { %13752 = vmatprep.subr.bf16.mxu1 %v19965_v24 }
 0xd15   : > { %13739 = vmatmul.mubr.msk.bf16.vlgmr.msra.gmra.mrb[96].mxu1 %vm1594_vm3, %v3433_v35  ;;  %v3935_v3 = vpop.permute.xlu1 %3934 }
 0xd16   : > { %13754 = vmatprep.mubr.msk.bf16.mxu1 %vm15579_vm1, %v19965_v24  ;;  %v3940_v58 = vsel %vm1396_vm2, %v3935_v3, 0  ;;  %v12791_v3 = vld [vmem:[%s19873_s7 + $0x138] sm:$0xff] }
 0xd18   : > { %v14953_v51 = vpop.eup %14952 }
 0xd19   : > { %v3427_v19 = vmul.f32 %v14953_v51, %v14937_v0  ;;  %v3985_v52 = vpop.permute.xlu1 %3984 }
 0xd1a   : > { %v3990_v2 = vsel %vm1396_vm2, %v3985_v52, 0 }
 0xd1b   : > { %13753 = vmatpush3.bf16.xpose.msra.mxu1 %v3890_v7  ;;  %v3432_v5 = vpack.c.bf16 %v3427_v19, %v3426_v29 }
 0xd1c   : > { %13758 = vmatprep.subr.bf16.mxu1 %v19965_v24 }
 0xd1d   : > { %13733 = vmatmul.mubr.msk.bf16.vlgmr.msra.gmra.mrb[64].mxu0 %vm1594_vm3, %v3432_v5  ;;  %v12790_v5 = vld [vmem:[%s19873_s7 + $0x130] sm:$0xff] }
 0xd1e   : > { %13743 = vmatpush3.bf16.msra.mxu0 %v3640_v45 }
 0xd1f   : > { %13764 = vmatprep.subr.bf16.mxu0 %v19965_v24 }
 0xd22   : > { %13755 = vmatmul.mubr.msk.bf16.vlgmr.msra.gmra.mrb[100].mxu1 %vm1396_vm2, %v16257_v28 }
 0xd23   : > { %13759 = vmatpush3.bf16.xpose.msra.mxu1 %v3940_v58  ;;  %13760 = vmatprep.mubr.msk.bf16.mxu1 %vm15579_vm1, %v19965_v24 }
 0xd24   : > { %13770 = vmatprep.subr.bf16.mxu1 %v19965_v24 }
 0xd2a   : > { %13761 = vmatmul.mubr.msk.bf16.vlgmr.msra.gmra.mrb[104].mxu1 %vm1396_vm2, %v16312_v13 }
 0xd2b   : > { %13771 = vmatpush3.bf16.xpose.msra.mxu1 %v4040_v20  ;;  %13772 = vmatprep.mubr.msk.bf16.mxu1 %vm15579_vm1, %v19965_v24 }
 0xd2c   : > { %13782 = vmatprep.subr.bf16.mxu1 %v19965_v24 }
 0xd32   : > { %13773 = vmatmul.mubr.msk.bf16.vlgmr.msra.gmra.mrb[108].mxu1 %vm1396_vm2, %v16364_v9 }
 0xd33   : > { %13784 = vmatprep.mubr.msk.bf16.mxu1 %vm15579_vm1, %v19965_v24 }
 0xdaf   : > { %v3521_v0 = vpop.f32.mrb[92].mxu1 }
 0xdb0   : > { %v13728_v12 = vpop.f32.mrb[93].mxu1 }
 0xdb1   : > { %v3474_v55 = vpop.f32.mrb[60].mxu0  ;;  %v3524_v39 = vpop.f32.mrb[94].mxu1 }
 0xdb2   : > { %v3623_v32 = vpack.c.bf16 %v3524_v39, %v3521_v0  ;;  %v13722_v54 = vpop.f32.mrb[61].mxu0  ;;  %v13729_v23 = vpop.f32.mrb[95].mxu1 }
 0xdb3   : > { %v3477_v43 = vpop.f32.mrb[62].mxu0 }
 0xdb4   : > { %v3622_v34 = vpack.c.bf16 %v3477_v43, %v3474_v55  ;;  %v13723_v31 = vpop.f32.mrb[63].mxu0 }
 0xdb6   : > { %13744 = vmatprep.mubr.msk.bf16.mxu0 %vm1396_vm2, %v3622_v34 }
 0xdb7   : > { %13745 = vmatmul.mubr.msk.bf16.vlgmr.msra.gmra.mrb[40].mxu0 %vm1396_vm2, %v3623_v32 }
 0xdb8   : > { %13765 = vmatpush3.bf16.xpose.msra.mxu0 %v3990_v2 }
 0xdb9   : > { %13776 = vmatprep.subr.bf16.mxu0 %v19965_v24 }
 0xde8   : > { %v3615_v21 = vpop.f32.mrb[96].mxu1 }
 0xde9   : > { %v13740_v56 = vpop.f32.mrb[97].mxu1 }
 0xdea   : > { %v3618_v50 = vpop.f32.mrb[98].mxu1 }
 0xdeb   : > { %v3625_v44 = vpack.c.bf16 %v3618_v50, %v3615_v21  ;;  %v13741_v46 = vpop.f32.mrb[99].mxu1 }
 0xdf0   : > { %v3568_v27 = vpop.f32.mrb[64].mxu0 }
 0xdf1   : > { %v13734_v18 = vpop.f32.mrb[65].mxu0 }
 0xdf2   : > { %v3571_v60 = vpop.f32.mrb[66].mxu0 }
 0xdf3   : > { %v3624_v41 = vpack.c.bf16 %v3571_v60, %v3568_v27  ;;  %v13735_v37 = vpop.f32.mrb[67].mxu0 }
 0xdf5   : > { %13748 = vmatprep.mubr.msk.bf16.mxu0 %vm1396_vm2, %v3624_v41  ;;  %v17003_v14 = vpop.f32.mrb[100].mxu1 }
 0xdf6   : > { %13749 = vmatmul.mubr.msk.bf16.gmra.mrb[44].mxu0 %vm1396_vm2, %v3625_v44  ;;  %v13756_v15 = vpop.f32.mrb[101].mxu1 }
 0xdf7   : > { %v17006_v8 = vpop.f32.mrb[102].mxu1  ;;  %13766 = vmatprep.mubr.msk.bf16.mxu0 %vm15579_vm1, %v19965_v24 }
 0xdf8   : > { %v13757_v61 = vpop.f32.mrb[103].mxu1 }
 0xdfd   : > { %v3976_v4 = vpop.f32.mrb[104].mxu1 }
 0xdfe   : > { %v3977_v35 = vadd.f32 %v12786_v30, %v3976_v4  ;;  %v13762_v22 = vpop.f32.mrb[105].mxu1  ;;  %13767 = vmatmul.mubr.msk.bf16.vlgmr.msra.gmra.mrb[68].mxu0 %vm1396_vm2, %v16334_v38 }
 0xdff   : > { %v3979_v25 = vpop.f32.mrb[106].mxu1  ;;  %13778 = vmatprep.mubr.msk.bf16.mxu0 %vm15579_vm1, %v19965_v24 }
 0xe00   : > { %v3980_v51 = vadd.f32 %v12787_v48, %v3979_v25  ;;  %v13763_v29 = vpop.f32.mrb[107].mxu1  ;;  %v4089_v19 = vsel %vm1594_vm3, %v3977_v35, -inf }
 0xe01   : > { %4090 = vmax.xlane.f32.xlu0 %v4089_v19 }
 0xe02   : > { %v4092_v7 = vsel %vm1594_vm3, %v3980_v51, -inf }
 0xe03   : > { %4093 = vmax.xlane.f32.xlu1 %v4092_v7 }
 0xe05   : > { %v4076_v45 = vpop.f32.mrb[108].mxu1 }
 0xe06   : > { %v4077_v58 = vadd.f32 %v12790_v5, %v4076_v45  ;;  %v13774_v11 = vpop.f32.mrb[109].mxu1 }
 0xe07   : > { %v4079_v20 = vpop.f32.mrb[110].mxu1  ;;  %v12788_v11 = vld [vmem:[%s19873_s7 + $0x120] sm:$0xff] }
 0xe08   : > { %v4080_v0 = vadd.f32 %v12791_v3, %v4079_v20  ;;  %v13775_v12 = vpop.f32.mrb[111].mxu1  ;;  %v4101_v55 = vsel %vm1594_vm3, %v4077_v58, -inf  ;;  %v12784_v3 = vld [vmem:[%s19873_s7 + $0x100] sm:$0xff] }
 0xe09   : > { %4102 = vmax.xlane.f32.xlu0 %v4101_v55  ;;  %v12789_v12 = vld [vmem:[%s19873_s7 + $0x128] sm:$0xff] }
 0xe0a   : > { %v4104_v39 = vsel %vm1594_vm3, %v4080_v0, -inf }
 0xe0d   : > { %4105 = vmax.xlane.f32.xlu0 %v4104_v39 }
 0xe8a   : > { %v17030_v32 = vpop.f32.mrb[40].mxu0 }
 0xe8b   : > { %v17032_v54 = vpop.f32.mrb[41].mxu0 }
 0xe8c   : > { %v17034_v23 = vpop.f32.mrb[42].mxu0 }
 0xe8d   : > { %v17036_v43 = vpop.f32.mrb[43].mxu0 }
 0xe8e   : > { %v4091_v52 = vpop.xlane.xlu0 %4090 }
 0xe8f   : > { %v4109_v34 = vsub.f32 %v3977_v35, %v4091_v52  ;;  %v12785_v52 = vld [vmem:[%s19873_s7 + $0x108] sm:$0xff] }
 0xe90   : > { %v4094_v31 = vpop.xlane.xlu1 %4093 }
 0xe91   : > { %v4119_v2 = vmul.f32 1.442695, %v4109_v34  ;;  %v4110_v21 = vsub.f32 %v3980_v51, %v4094_v31  ;;  %v17085_v34 = vadd.f32 %v12785_v52, %v17006_v8 }
 0xe93   : > { %14954 = vpow2.f32 %v4119_v2  ;;  %v4121_v56 = vmul.f32 1.442695, %v4110_v21  ;;  %v4086_v31 = vsel %vm1594_vm3, %v17085_v34, -inf }
 0xe95   : > { %14956 = vpow2.f32 %v4121_v56 }
 0xe96   : > { %v4103_v50 = vpop.xlane.xlu0 %4102 }
 0xe97   : > { %v4113_v44 = vsub.f32 %v4077_v58, %v4103_v50  ;;  %v3927_v58 = vadd.f32 %v12784_v3, %v17003_v14 }
 0xe99   : > { %v4127_v46 = vmul.f32 1.442695, %v4113_v44 }
 0xe9a   : > { %v4106_v61 = vpop.xlane.xlu0 %4105 }
 0xe9b   : > { %14958 = vpow2.f32 %v4127_v46  ;;  %v4114_v30 = vsub.f32 %v4080_v0, %v4106_v61  ;;  %v4083_v0 = vsel %vm1594_vm3, %v3927_v58, -inf }
 0xe9d   : > { %v14955_v27 = vpop.eup %14954  ;;  %v4129_v4 = vmul.f32 1.442695, %v4114_v30 }
 0xe9e   : > { %v4137_v18 = vsel %vm1594_vm3, %v14955_v27, 0.0 }
 0xe9f   : > { %v14957_v60 = vpop.eup %14956  ;;  %4138 = vadd.xlane.f32.xlu0 %v4137_v18  ;;  %14960 = vpow2.f32 %v4129_v4 }
 0xea0   : > { %v4140_v41 = vsel %vm1594_vm3, %v14957_v60, 0.0 }
 0xea1   : > { %4141 = vadd.xlane.f32.xlu1 %v4140_v41 }
 0xea5   : > { %v17040_v37 = vpop.eup %14958 }
 0xea6   : > { %v4149_v15 = vsel %vm1594_vm3, %v17040_v37, 0.0 }
 0xea7   : > { %4150 = vadd.xlane.f32.xlu0 %v4149_v15 }
 0xea9   : > { %v14961_v29 = vpop.eup %14960 }
 0xeaa   : > { %v4152_v45 = vsel %vm1594_vm3, %v14961_v29, 0.0 }
 0xeb2   : > { %4316 = vrot.lane.b32.xlu1 %v16354_v42, %s19972_s0 }
 0xebd   : > { %4222 = vrot.lane.b32.xlu0 %v16283_v26, %s19972_s0 }
 0xec1   : > { %4536 = vrot.lane.b32.xlu0 %v16354_v42, %s19973_s24 }
 0xec9   : > { %v17050_v48 = vpop.f32.mrb[44].mxu0 }
 0xeca   : > { %v17052_v35 = vpop.f32.mrb[45].mxu0 }
 0xecb   : > { %v17054_v22 = vpop.f32.mrb[46].mxu0 }
 0xecc   : > { %19974 = vst [vmem:[#allocation16_spill] sm:$0xff] %v17054_v22  ;;  %v17056_v25 = vpop.f32.mrb[47].mxu0 }
 0xed1   : > { %v4026_v51 = vpop.f32.mrb[68].mxu0 }
 0xed2   : > { %v13768_v19 = vpop.f32.mrb[69].mxu0  ;;  %v4027_v20 = vadd.f32 %v12788_v11, %v4026_v51 }
 0xed3   : > { %v4029_v7 = vpop.f32.mrb[70].mxu0 }
 0xed4   : > { %v13769_v5 = vpop.f32.mrb[71].mxu0  ;;  %v17070_v55 = vadd.f32 %v12789_v12, %v4029_v7  ;;  %v4095_v39 = vsel %vm1594_vm3, %v4027_v20, -inf }
 0xed6   : > { %4153 = vadd.xlane.f32.xlu1 %v4152_v45  ;;  %v4098_v14 = vsel %vm1594_vm3, %v17070_v55, -inf }
 0xee0   : > { %4084 = vmax.xlane.f32.xlu0 %v4083_v0 }
 0xee4   : > { %4096 = vmax.xlane.f32.xlu0 %v4095_v39 }
 0xee7   : > { %4432 = vrot.lane.b32.xlu1 %v16283_v26, %s19973_s24 }
 0xee8   : > { %4099 = vmax.xlane.f32.xlu0 %v4098_v14 }
 0xeeb   : > { %4430 = vrot.lane.b32.xlu1 %v16312_v13, %s19975_s22 }
 0xeef   : > { %4534 = vrot.lane.b32.xlu1 %v16364_v9, %s19975_s22 }
 0xf13   : > { %4087 = vmax.xlane.f32.xlu1 %v4086_v31 }
 0xf2c   : > { %v4139_v2 = vpop.xlane.xlu0 %4138 }
 0xf2d   : > { %14962 = vrcp.f32 %v4139_v2 }
 0xf2e   : > { %v4142_v21 = vpop.xlane.xlu1 %4141 }
 0xf2f   : > { %14964 = vrcp.f32 %v4142_v21 }
 0xf32   : > { %v4317_v8 = vpop.permute.xlu1 %4316 }
 0xf34   : > { %v4151_v56 = vpop.xlane.xlu0 %4150 }
 0xf35   : > { %14966 = vrcp.f32 %v4151_v56 }
 0xf37   : > { %v14963_v50 = vpop.eup %14962 }
 0xf38   : > { %v4223_v44 = vpop.permute.xlu0 %4222  ;;  %v4165_v18 = vmul.f32 %v14963_v50, %v14955_v27 }
 0xf39   : > { %v14965_v46 = vpop.eup %14964  ;;  %13783 = vmatpush3.bf16.msra.mxu1 %v4223_v44 }
 0xf3a   : > { %v4166_v41 = vmul.f32 %v14965_v46, %v14957_v60  ;;  %13794 = vmatprep.subr.bf16.mxu1 %v19965_v24 }
 0xf3c   : > { %v4172_v15 = vpack.c.bf16 %v4166_v41, %v4165_v18  ;;  %v4537_v30 = vpop.permute.xlu0 %4536 }
 0xf3e   : > { %13785 = vmatmul.mubr.msk.bf16.vlgmr.msra.gmra.mrb[112].mxu1 %vm1594_vm3, %v4172_v15 }
 0xf3f   : > { %13795 = vmatpush3.bf16.msra.mxu1 %v4317_v8  ;;  %13796 = vmatprep.mubr.msk.bf16.mxu1 %vm15579_vm1, %v19965_v24  ;;  %v14967_v4 = vpop.eup %14966 }
 0xf40   : > { %13806 = vmatprep.subr.bf16.mxu1 %v19965_v24  ;;  %v4169_v19 = vmul.f32 %v14967_v4, %v17040_v37 }
 0xf63   : > { %v4154_v61 = vpop.xlane.xlu1 %4153 }
 0xf64   : > { %14968 = vrcp.f32 %v4154_v61 }
 0xf67   : > { %v4433_v5 = vpop.permute.xlu1 %4432 }
 0xf68   : > { %v4438_v12 = vsel %vm1396_vm2, %v4433_v5, 0 }
 0xf6b   : > { %v4431_v37 = vpop.permute.xlu1 %4430 }
 0xf6d   : > { %v4085_v51 = vpop.xlane.xlu0 %4084 }
 0xf6e   : > { %v14969_v27 = vpop.eup %14968  ;;  %v4107_v60 = vsub.f32 %v3927_v58, %v4085_v51 }
 0xf6f   : > { %v4170_v7 = vmul.f32 %v14969_v27, %v14961_v29  ;;  %v4542_v29 = vsel %vm1396_vm2, %v4537_v30, 0  ;;  %v4535_v31 = vpop.permute.xlu1 %4534 }
 0xf70   : > { %v4115_v45 = vmul.f32 1.442695, %v4107_v60 }
 0xf71   : > { %v4097_v3 = vpop.xlane.xlu0 %4096  ;;  %v4174_v11 = vpack.c.bf16 %v4170_v7, %v4169_v19 }
 0xf72   : > { %14970 = vpow2.f32 %v4115_v45  ;;  %v4111_v0 = vsub.f32 %v4027_v20, %v4097_v3 }
 0xf73   : > { %13797 = vmatmul.mubr.msk.bf16.vlgmr.msra.gmra.mrb[116].mxu1 %vm1594_vm3, %v4174_v11 }
 0xf74   : > { %v4123_v39 = vmul.f32 1.442695, %v4111_v0  ;;  %13807 = vmatpush3.bf16.xpose.msra.mxu1 %v4438_v12  ;;  %13808 = vmatprep.mubr.msk.bf16.mxu1 %vm15579_vm1, %v19965_v24 }
 0xf75   : > { %13818 = vmatprep.subr.bf16.mxu1 %v19965_v24  ;;  %v4100_v46 = vpop.xlane.xlu0 %4099 }
 0xf76   : > { %14972 = vpow2.f32 %v4123_v39  ;;  %v4112_v18 = vsub.f32 %v17070_v55, %v4100_v46 }
 0xf78   : > { %v4125_v41 = vmul.f32 1.442695, %v4112_v18 }
 0xf7b   : > { %13809 = vmatmul.mubr.msk.bf16.vlgmr.msra.gmra.mrb[120].mxu1 %vm1396_vm2, %v4431_v37 }
 0xf7c   : > { %v14971_v58 = vpop.eup %14970  ;;  %13819 = vmatpush3.bf16.xpose.msra.mxu1 %v4542_v29  ;;  %13820 = vmatprep.mubr.msk.bf16.mxu1 %vm15579_vm1, %v19965_v24 }
 0xf7d   : > { %v4131_v20 = vsel %vm1594_vm3, %v14971_v58, 0.0  ;;  %13830 = vmatprep.subr.bf16.mxu1 %v19965_v24 }
 0xf7e   : > { %4132 = vadd.xlane.f32.xlu0 %v4131_v20  ;;  %v12802_v20 = vld [vmem:[%s19873_s7 + $0x150] sm:$0xff] }
 0xf80   : > { %v17106_v14 = vpop.eup %14972 }
 0xf81   : > { %v4143_v52 = vsel %vm1594_vm3, %v17106_v14, 0.0 }
 0xf82   : > { %4144 = vadd.xlane.f32.xlu0 %v4143_v52 }
 0xf83   : > { %13821 = vmatmul.mubr.msk.bf16.vlgmr.msra.gmra.mrb[124].mxu1 %vm1396_vm2, %v4535_v31 }
 0xf84   : > { %13832 = vmatprep.mubr.msk.bf16.mxu1 %vm15579_vm1, %v19965_v24 }
 0xf98   : > { %4175 = vrot.lane.b32.xlu0 %v16245_v17, %s19972_s0 }
 0xf9c   : > { %4484 = vrot.lane.b32.xlu0 %v16325_v59, %s19973_s24 }
 0xfa0   : > { %v4088_v2 = vpop.xlane.xlu1 %4087 }
 0xfa1   : > { %v4108_v21 = vsub.f32 %v17085_v34, %v4088_v2  ;;  %v12803_v2 = vld [vmem:[%s19873_s7 + $0x158] sm:$0xff] }
 0xfa3   : > { %v4117_v56 = vmul.f32 1.442695, %v4108_v21 }
 0xfa5   : > { %14974 = vpow2.f32 %v4117_v56 }
 0xfa6   : > { %14976 = vpow2.f32 %v4125_v41  ;;  %v12806_v41 = vld [vmem:[%s19873_s7 + $0x170] sm:$0xff] }
 0xfaf   : > { %v14975_v50 = vpop.eup %14974 }
 0xfb0   : > { %v4134_v44 = vsel %vm1594_vm3, %v14975_v50, 0.0  ;;  %v17122_v15 = vpop.eup %14976 }
 0xfb1   : > { %4135 = vadd.xlane.f32.xlu1 %v4134_v44  ;;  %v4146_v8 = vsel %vm1594_vm3, %v17122_v15, 0.0 }
 0xfc2   : > { %4269 = vrot.lane.b32.xlu1 %v16325_v59, %s19972_s0 }
 0xfe6   : > { %4147 = vadd.xlane.f32.xlu1 %v4146_v8 }
 0xff7   : > { %4380 = vrot.lane.b32.xlu1 %v16245_v17, %s19973_s24 }
 0xffb   : > { %4378 = vrot.lane.b32.xlu1 %v16257_v28, %s19975_s22 }
 0xfff   : > { %4482 = vrot.lane.b32.xlu1 %v16334_v38, %s19975_s22 }
0x100b   : > { %v4133_v34 = vpop.xlane.xlu0 %4132 }
0x100c   : > { %14978 = vrcp.f32 %v4133_v34  ;;  %v12807_v34 = vld [vmem:[%s19873_s7 + $0x178] sm:$0xff] }
0x100f   : > { %v4145_v61 = vpop.xlane.xlu0 %4144 }
0x1011   : > { %v17132_v55 = vpop.f32.mrb[112].mxu1 }
0x1012   : > { %v13786_v30 = vpop.f32.mrb[113].mxu1 }
0x1013   : > { %v4176_v4 = vpop.permute.xlu0 %4175  ;;  %v17134_v51 = vpop.f32.mrb[114].mxu1 }
0x1014   : > { %13777 = vmatpush3.bf16.msra.mxu0 %v4176_v4  ;;  %v13787_v60 = vpop.f32.mrb[115].mxu1 }
0x1015   : > { %13788 = vmatprep.subr.bf16.mxu0 %v19965_v24 }
0x1016   : > { %v14979_v5 = vpop.eup %14978 }
0x1017   : > { %v4163_v39 = vmul.f32 %v14979_v5, %v14971_v58 }
0x103e   : > { %v4136_v19 = vpop.xlane.xlu1 %4135 }
0x103f   : > { %14980 = vrcp.f32 %v4136_v19 }
0x1040   : > { %14982 = vrcp.f32 %v4145_v61  ;;  %v4485_v61 = vpop.permute.xlu0 %4484 }
0x1042   : > { %v4270_v52 = vpop.permute.xlu1 %4269 }
0x1046   : > { %v17139_v7 = vpop.f32.mrb[116].mxu1 }
0x1047   : > { %v13798_v45 = vpop.f32.mrb[117].mxu1 }
0x1048   : > { %v17141_v3 = vpop.f32.mrb[118].mxu1 }
0x1049   : > { %v14981_v11 = vpop.eup %14980  ;;  %v13799_v12 = vpop.f32.mrb[119].mxu1 }
0x104a   : > { %v4164_v37 = vmul.f32 %v14981_v11, %v14975_v50 }
0x104c   : > { %v4171_v29 = vpack.c.bf16 %v4164_v37, %v4163_v39  ;;  %v14983_v39 = vpop.eup %14982 }
0x104e   : > { %13779 = vmatmul.mubr.msk.bf16.vlgmr.msra.gmra.mrb[72].mxu0 %vm1594_vm3, %v4171_v29  ;;  %v4474_v31 = vpop.f32.mrb[120].mxu1  ;;  %v4167_v29 = vmul.f32 %v14983_v39, %v17106_v14 }
0x104f   : > { %13789 = vmatpush3.bf16.msra.mxu0 %v4270_v52  ;;  %v4475_v21 = vadd.f32 %v12802_v20, %v4474_v31  ;;  %v13810_v56 = vpop.f32.mrb[121].mxu1  ;;  %13790 = vmatprep.mubr.msk.bf16.mxu0 %vm15579_vm1, %v19965_v24 }
0x1050   : > { %v4477_v58 = vpop.f32.mrb[122].mxu1  ;;  %13800 = vmatprep.subr.bf16.mxu0 %v19965_v24 }
0x1051   : > { %v4478_v50 = vadd.f32 %v12803_v2, %v4477_v58  ;;  %v13811_v44 = vpop.f32.mrb[123].mxu1  ;;  %v4591_v46 = vsel %vm1594_vm3, %v4475_v21, -inf  ;;  %v4490_v58 = vsel %vm1396_vm2, %v4485_v61, 0 }
0x1052   : > { %4592 = vmax.xlane.f32.xlu0 %v4591_v46 }
0x1053   : > { %v4594_v18 = vsel %vm1594_vm3, %v4478_v50, -inf }
0x1054   : > { %4595 = vmax.xlane.f32.xlu1 %v4594_v18 }
0x1056   : > { %v4578_v8 = vpop.f32.mrb[124].mxu1 }
0x1057   : > { %v4579_v30 = vadd.f32 %v12806_v41, %v4578_v8  ;;  %v13822_v4 = vpop.f32.mrb[125].mxu1 }
0x1058   : > { %v4581_v60 = vpop.f32.mrb[126].mxu1 }
0x1059   : > { %v4582_v19 = vadd.f32 %v12807_v34, %v4581_v60  ;;  %v13823_v5 = vpop.f32.mrb[127].mxu1  ;;  %v4603_v45 = vsel %vm1594_vm3, %v4579_v30, -inf }
0x105a   : > { %4604 = vmax.xlane.f32.xlu0 %v4603_v45 }
0x105b   : > { %v4606_v11 = vsel %vm1594_vm3, %v4582_v19, -inf }
0x105e   : > { %4607 = vmax.xlane.f32.xlu0 %v4606_v11 }
0x1073   : > { %v4148_v12 = vpop.xlane.xlu1 %4147 }
0x1074   : > { %14984 = vrcp.f32 %v4148_v12 }
0x1077   : > { %v4381_v52 = vpop.permute.xlu1 %4380 }
0x1078   : > { %v4386_v2 = vsel %vm1396_vm2, %v4381_v52, 0 }
0x107b   : > { %v4379_v56 = vpop.permute.xlu1 %4378 }
0x107e   : > { %v14985_v37 = vpop.eup %14984 }
0x107f   : > { %v4168_v20 = vmul.f32 %v14985_v37, %v17122_v15  ;;  %v4483_v14 = vpop.permute.xlu1 %4482 }
0x1081   : > { %v4173_v31 = vpack.c.bf16 %v4168_v20, %v4167_v29 }
0x1083   : > { %13791 = vmatmul.mubr.msk.bf16.vlgmr.msra.gmra.mrb[76].mxu0 %vm1594_vm3, %v4173_v31 }
0x1084   : > { %13801 = vmatpush3.bf16.xpose.msra.mxu0 %v4386_v2  ;;  %13802 = vmatprep.mubr.msk.bf16.mxu0 %vm15579_vm1, %v19965_v24 }
0x1085   : > { %13812 = vmatprep.subr.bf16.mxu0 %v19965_v24 }
0x108b   : > { %13803 = vmatmul.mubr.msk.bf16.vlgmr.msra.gmra.mrb[80].mxu0 %vm1396_vm2, %v4379_v56 }
0x108c   : > { %13813 = vmatpush3.bf16.xpose.msra.mxu0 %v4490_v58  ;;  %13814 = vmatprep.mubr.msk.bf16.mxu0 %vm15579_vm1, %v19965_v24 }
0x108d   : > { %13824 = vmatprep.subr.bf16.mxu0 %v19965_v24 }
0x1093   : > { %13815 = vmatmul.mubr.msk.bf16.vlgmr.msra.gmra.mrb[84].mxu0 %vm1396_vm2, %v4483_v14 }
0x1094   : > { %13826 = vmatprep.mubr.msk.bf16.mxu0 %vm15579_vm1, %v19965_v24 }
0x10df   : > { %v4593_v15 = vpop.xlane.xlu0 %4592 }
0x10e0   : > { %v4611_v44 = vsub.f32 %v4475_v21, %v4593_v15 }
0x10e1   : > { %v4596_v46 = vpop.xlane.xlu1 %4595 }
0x10e2   : > { %v4621_v18 = vmul.f32 1.442695, %v4611_v44  ;;  %v4612_v41 = vsub.f32 %v4478_v50, %v4596_v46  ;;  %v12800_v46 = vld [vmem:[%s19873_s7 + $0x140] sm:$0xff] }
0x10e4   : > { %14986 = vpow2.f32 %v4621_v18  ;;  %v4623_v8 = vmul.f32 1.442695, %v4612_v41 }
0x10e6   : > { %14988 = vpow2.f32 %v4623_v8 }
0x10e7   : > { %v4605_v34 = vpop.xlane.xlu0 %4604 }
0x10e8   : > { %v4615_v4 = vsub.f32 %v4579_v30, %v4605_v34 }
0x10ea   : > { %v4629_v60 = vmul.f32 1.442695, %v4615_v4 }
0x10eb   : > { %v4608_v30 = vpop.xlane.xlu0 %4607 }
0x10ec   : > { %14990 = vpow2.f32 %v4629_v60  ;;  %v4616_v39 = vsub.f32 %v4582_v19, %v4608_v30  ;;  %v12805_v30 = vld [vmem:[%s19873_s7 + $0x168] sm:$0xff] }
0x10ee   : > { %v17180_v5 = vpop.eup %14986  ;;  %v4631_v37 = vmul.f32 1.442695, %v4616_v39 }
0x10ef   : > { %v4639_v45 = vsel %vm1594_vm3, %v17180_v5, 0.0 }
0x10f0   : > { %v17184_v11 = vpop.eup %14988  ;;  %4640 = vadd.xlane.f32.xlu0 %v4639_v45  ;;  %14992 = vpow2.f32 %v4631_v37  ;;  %v12801_v45 = vld [vmem:[%s19873_s7 + $0x148] sm:$0xff] }
0x10f1   : > { %v4642_v21 = vsel %vm1594_vm3, %v17184_v11, 0.0 }
0x10f2   : > { %4643 = vadd.xlane.f32.xlu1 %v4642_v21  ;;  %v12804_v21 = vld [vmem:[%s19873_s7 + $0x160] sm:$0xff] }
0x10f6   : > { %v17188_v50 = vpop.eup %14990 }
0x10f7   : > { %v4651_v12 = vsel %vm1594_vm3, %v17188_v50, 0.0 }
0x10f8   : > { %4652 = vadd.xlane.f32.xlu0 %v4651_v12 }
0x10fa   : > { %v17204_v52 = vpop.eup %14992 }
0x10fb   : > { %v4654_v61 = vsel %vm1594_vm3, %v17204_v52, 0.0 }
0x1103   : > { %4818 = vrot.lane.b32.xlu1 %v16354_v42, %s19963_s19 }
0x110e   : > { %4724 = vrot.lane.b32.xlu0 %v16283_v26, %s19963_s19 }
0x1112   : > { %5092 = vrot.lane.b32.xlu0 %v16283_v26, %s19976_s3 }
0x1116   : > { %5143 = vrot.lane.b32.xlu0 %v16325_v59, %s19976_s3 }
0x111a   : > { %5194 = vrot.lane.b32.xlu0 %v16354_v42, %s19976_s3 }
0x1121   : > { %v17202_v29 = vpop.f32.mrb[72].mxu0 }
0x1122   : > { %v13780_v20 = vpop.f32.mrb[73].mxu0 }
0x1123   : > { %v17206_v31 = vpop.f32.mrb[74].mxu0 }
0x1124   : > { %v13781_v2 = vpop.f32.mrb[75].mxu0 }
0x1127   : > { %4655 = vadd.xlane.f32.xlu1 %v4654_v61 }
0x1138   : > { %5041 = vrot.lane.b32.xlu1 %v16245_v17, %s19976_s3 }
0x113c   : > { %5039 = vrot.lane.b32.xlu1 %v16257_v28, %s19977_s1 }
0x1140   : > { %5090 = vrot.lane.b32.xlu1 %v16312_v13, %s19977_s1 }
0x1144   : > { %5141 = vrot.lane.b32.xlu1 %v16334_v38, %s19977_s1 }
0x1148   : > { %5192 = vrot.lane.b32.xlu1 %v16364_v9, %s19977_s1 }
0x1156   : > { %v17222_v56 = vpop.f32.mrb[76].mxu0 }
0x1157   : > { %v13792_v58 = vpop.f32.mrb[77].mxu0 }
0x1158   : > { %v17224_v14 = vpop.f32.mrb[78].mxu0 }
0x1159   : > { %v13793_v44 = vpop.f32.mrb[79].mxu0 }
0x115e   : > { %v4422_v18 = vpop.f32.mrb[80].mxu0 }
0x115f   : > { %v17231_v41 = vadd.f32 %v12800_v46, %v4422_v18  ;;  %v13804_v8 = vpop.f32.mrb[81].mxu0 }
0x1160   : > { %v4425_v34 = vpop.f32.mrb[82].mxu0 }
0x1161   : > { %v13805_v4 = vpop.f32.mrb[83].mxu0  ;;  %v4585_v60 = vsel %vm1594_vm3, %v17231_v41, -inf  ;;  %v17244_v39 = vadd.f32 %v12801_v45, %v4425_v34 }
0x1162   : > { %4586 = vmax.xlane.f32.xlu0 %v4585_v60 }
0x1163   : > { %v4588_v46 = vsel %vm1594_vm3, %v17244_v39, -inf }
0x1166   : > { %v4526_v12 = vpop.f32.mrb[84].mxu0 }
0x1167   : > { %v17246_v37 = vadd.f32 %v12804_v21, %v4526_v12  ;;  %v13816_v20 = vpop.f32.mrb[85].mxu0 }
0x1168   : > { %v4529_v2 = vpop.f32.mrb[86].mxu0 }
0x1169   : > { %v17248_v61 = vadd.f32 %v12805_v30, %v4529_v2  ;;  %v13817_v58 = vpop.f32.mrb[87].mxu0  ;;  %v4597_v44 = vsel %vm1594_vm3, %v17246_v37, -inf }
0x116a   : > { %4598 = vmax.xlane.f32.xlu0 %v4597_v44 }
0x116b   : > { %v4600_v18 = vsel %vm1594_vm3, %v17248_v61, -inf }
0x116c   : > { %4589 = vmax.xlane.f32.xlu1 %v4588_v46 }
0x116e   : > { %4601 = vmax.xlane.f32.xlu0 %v4600_v18 }
0x117d   : > { %v4641_v8 = vpop.xlane.xlu0 %4640 }
0x117e   : > { %14994 = vrcp.f32 %v4641_v8 }
0x117f   : > { %v4644_v34 = vpop.xlane.xlu1 %4643 }
0x1180   : > { %14996 = vrcp.f32 %v4644_v34 }
0x1183   : > { %v4819_v2 = vpop.permute.xlu1 %4818 }
0x1185   : > { %v4653_v4 = vpop.xlane.xlu0 %4652 }
0x1186   : > { %14998 = vrcp.f32 %v4653_v4 }
0x1188   : > { %v14995_v60 = vpop.eup %14994 }
0x1189   : > { %v4725_v45 = vpop.permute.xlu0 %4724  ;;  %v4667_v12 = vmul.f32 %v14995_v60, %v17180_v5 }
0x118a   : > { %v14997_v21 = vpop.eup %14996  ;;  %13831 = vmatpush3.bf16.msra.mxu1 %v4725_v45 }
0x118b   : > { %v4668_v30 = vmul.f32 %v14997_v21, %v17184_v11  ;;  %13842 = vmatprep.subr.bf16.mxu1 %v19965_v24 }
0x118d   : > { %v4674_v20 = vpack.c.bf16 %v4668_v30, %v4667_v12  ;;  %v5093_v4 = vpop.permute.xlu0 %5092 }
0x118e   : > { %v5098_v45 = vsel %vm1396_vm2, %v5093_v4, 0 }
0x118f   : > { %13833 = vmatmul.mubr.msk.bf16.vlgmr.msra.gmra.mrb[128].mxu1 %vm1594_vm3, %v4674_v20 }
0x1190   : > { %13843 = vmatpush3.bf16.msra.mxu1 %v4819_v2  ;;  %13844 = vmatprep.mubr.msk.bf16.mxu1 %vm15579_vm1, %v19965_v24  ;;  %v14999_v44 = vpop.eup %14998 }
0x1191   : > { %13868 = vmatprep.subr.bf16.mxu1 %v19965_v24  ;;  %v4671_v5 = vmul.f32 %v14999_v44, %v17188_v50  ;;  %v5144_v50 = vpop.permute.xlu0 %5143 }
0x1192   : > { %v5149_v21 = vsel %vm1396_vm2, %v5144_v50, 0 }
0x1195   : > { %v5195_v12 = vpop.permute.xlu0 %5194 }
0x1196   : > { %v5200_v20 = vsel %vm1396_vm2, %v5195_v12, 0 }
0x11b4   : > { %v4656_v58 = vpop.xlane.xlu1 %4655 }
0x11b5   : > { %15000 = vrcp.f32 %v4656_v58 }
0x11b8   : > { %v5042_v18 = vpop.permute.xlu1 %5041 }
0x11b9   : > { %v5047_v34 = vsel %vm1396_vm2, %v5042_v18, 0 }
0x11bc   : > { %v5040_v60 = vpop.permute.xlu1 %5039 }
0x11bf   : > { %v15001_v46 = vpop.eup %15000 }
0x11c0   : > { %v4672_v11 = vmul.f32 %v15001_v46, %v17204_v52  ;;  %v5091_v52 = vpop.permute.xlu1 %5090 }
0x11c2   : > { %v4676_v8 = vpack.c.bf16 %v4672_v11, %v4671_v5 }
0x11c4   : > { %13845 = vmatmul.mubr.msk.bf16.vlgmr.msra.gmra.mrb[132].mxu1 %vm1594_vm3, %v4676_v8  ;;  %v5142_v30 = vpop.permute.xlu1 %5141 }
0x11c5   : > { %13869 = vmatpush3.bf16.xpose.msra.mxu1 %v5047_v34  ;;  %13870 = vmatprep.mubr.msk.bf16.mxu1 %vm15579_vm1, %v19965_v24 }
0x11c6   : > { %13874 = vmatprep.subr.bf16.mxu1 %v19965_v24 }
0x11c8   : > { %v5193_v2 = vpop.permute.xlu1 %5192 }
0x11cc   : > { %13871 = vmatmul.mubr.msk.bf16.vlgmr.msra.gmra.mrb[136].mxu1 %vm1396_vm2, %v5040_v60 }
0x11cd   : > { %13875 = vmatpush3.bf16.xpose.msra.mxu1 %v5098_v45  ;;  %13876 = vmatprep.mubr.msk.bf16.mxu1 %vm15579_vm1, %v19965_v24 }
0x11ce   : > { %13880 = vmatprep.subr.bf16.mxu1 %v19965_v24 }
0x11d4   : > { %13877 = vmatmul.mubr.msk.bf16.vlgmr.msra.gmra.mrb[140].mxu1 %vm1396_vm2, %v5091_v52 }
0x11d5   : > { %13881 = vmatpush3.bf16.xpose.msra.mxu1 %v5149_v21  ;;  %13882 = vmatprep.mubr.msk.bf16.mxu1 %vm15579_vm1, %v19965_v24 }
0x11d6   : > { %13886 = vmatprep.subr.bf16.mxu1 %v19965_v24 }
0x11dc   : > { %13883 = vmatmul.mubr.msk.bf16.vlgmr.msra.gmra.mrb[144].mxu1 %vm1396_vm2, %v5142_v30 }
0x11dd   : > { %13887 = vmatpush3.bf16.xpose.msra.mxu1 %v5200_v20  ;;  %13888 = vmatprep.mubr.msk.bf16.mxu1 %vm15579_vm1, %v19965_v24 }
0x11de   : > { %13898 = vmatprep.subr.bf16.mxu1 %v19965_v24 }
0x11e4   : > { %13889 = vmatmul.mubr.msk.bf16.vlgmr.msra.gmra.mrb[148].mxu1 %vm1396_vm2, %v5193_v2 }
0x11e5   : > { %13900 = vmatprep.mubr.msk.bf16.mxu1 %vm15579_vm1, %v19965_v24 }
0x11ef   : > { %v4587_v58 = vpop.xlane.xlu0 %4586 }
0x11f0   : > { %v4609_v44 = vsub.f32 %v17231_v41, %v4587_v58 }
0x11f2   : > { %v4617_v46 = vmul.f32 1.442695, %v4609_v44 }
0x11f4   : > { %15002 = vpow2.f32 %v4617_v46 }
0x11f7   : > { %v4599_v5 = vpop.xlane.xlu0 %4598 }
0x11f8   : > { %v4613_v11 = vsub.f32 %v17246_v37, %v4599_v5 }
0x11f9   : > { %v4590_v18 = vpop.xlane.xlu1 %4589 }
0x11fa   : > { %v4625_v8 = vmul.f32 1.442695, %v4613_v11  ;;  %v4610_v34 = vsub.f32 %v17244_v39, %v4590_v18 }
0x11fb   : > { %v4602_v4 = vpop.xlane.xlu0 %4601 }
0x11fc   : > { %15004 = vpow2.f32 %v4625_v8  ;;  %v4619_v60 = vmul.f32 1.442695, %v4610_v34  ;;  %v4614_v45 = vsub.f32 %v17248_v61, %v4602_v4 }
0x11fe   : > { %v15003_v50 = vpop.eup %15002  ;;  %15006 = vpow2.f32 %v4619_v60  ;;  %v4627_v52 = vmul.f32 1.442695, %v4614_v45 }
0x11ff   : > { %v4633_v21 = vsel %vm1594_vm3, %v15003_v50, 0.0 }
0x1200   : > { %15008 = vpow2.f32 %v4627_v52  ;;  %4634 = vadd.xlane.f32.xlu0 %v4633_v21 }
0x1206   : > { %v17293_v41 = vpop.eup %15004 }
0x1207   : > { %v4645_v37 = vsel %vm1594_vm3, %v17293_v41, 0.0 }
0x1208   : > { %v15007_v12 = vpop.eup %15006  ;;  %4646 = vadd.xlane.f32.xlu0 %v4645_v37  ;;  %v12824_v37 = vld [vmem:[%s19873_s7 + $0x180] sm:$0xff] }
0x1209   : > { %v4636_v39 = vsel %vm1594_vm3, %v15007_v12, 0.0 }
0x120a   : > { %v15009_v30 = vpop.eup %15008  ;;  %4637 = vadd.xlane.f32.xlu1 %v4636_v39 }
0x120b   : > { %v4648_v61 = vsel %vm1594_vm3, %v15009_v30, 0.0 }
0x120e   : > { %4649 = vadd.xlane.f32.xlu1 %v4648_v61  ;;  %v12825_v61 = vld [vmem:[%s19873_s7 + $0x188] sm:$0xff] }
0x121e   : > { %4677 = vrot.lane.b32.xlu0 %v16245_v17, %s19963_s19 }
0x121f   : > { %4771 = vrot.lane.b32.xlu1 %v16325_v59, %s19963_s19 }
0x1262   : > { %v17303_v20 = vpop.f32.mrb[128].mxu1 }
0x1263   : > { %v13834_v2 = vpop.f32.mrb[129].mxu1 }
0x1264   : > { %v17305_v58 = vpop.f32.mrb[130].mxu1 }
0x1265   : > { %v13835_v46 = vpop.f32.mrb[131].mxu1 }
0x128d   : > { %v4635_v5 = vpop.xlane.xlu0 %4634 }
0x128e   : > { %15010 = vrcp.f32 %v4635_v5 }
0x1295   : > { %v4647_v11 = vpop.xlane.xlu0 %4646 }
0x1297   : > { %v4638_v18 = vpop.xlane.xlu1 %4637  ;;  %v17309_v8 = vpop.f32.mrb[132].mxu1 }
0x1298   : > { %15012 = vrcp.f32 %v4638_v18  ;;  %v13846_v34 = vpop.f32.mrb[133].mxu1  ;;  %v15011_v2 = vpop.eup %15010 }
0x1299   : > { %v4678_v4 = vpop.permute.xlu0 %4677  ;;  %v17311_v60 = vpop.f32.mrb[134].mxu1  ;;  %v4665_v0 = vmul.f32 %v15011_v2, %v15003_v50  ;;  %v12827_v50 = vld [vmem:[%s19873_s7 + $0x198] sm:$0xff] }
0x129a   : > { %13825 = vmatpush3.bf16.msra.mxu0 %v4678_v4  ;;  %v13847_v52 = vpop.f32.mrb[135].mxu1 }
0x129b   : > { %v4650_v21 = vpop.xlane.xlu1 %4649  ;;  %13836 = vmatprep.subr.bf16.mxu0 %v19965_v24 }
0x129c   : > { %15014 = vrcp.f32 %v4650_v21 }
0x129d   : > { %15016 = vrcp.f32 %v4647_v11 }
0x129f   : > { %v5083_v39 = vpop.f32.mrb[136].mxu1 }
0x12a0   : > { %v17322_v46 = vadd.f32 %v12824_v37, %v5083_v39  ;;  %v13872_v5 = vpop.f32.mrb[137].mxu1  ;;  %v12826_v37 = vld [vmem:[%s19873_s7 + $0x190] sm:$0xff] }
0x12a1   : > { %v5086_v18 = vpop.f32.mrb[138].mxu1  ;;  %v4772_v5 = vpop.permute.xlu1 %4771 }
0x12a2   : > { %v15013_v34 = vpop.eup %15012  ;;  %v17324_v4 = vadd.f32 %v12825_v61, %v5086_v18  ;;  %v13873_v52 = vpop.f32.mrb[139].mxu1  ;;  %v5243_v21 = vsel %vm1594_vm3, %v17322_v46, -inf }
0x12a3   : > { %v4666_v15 = vmul.f32 %v15013_v34, %v15007_v12  ;;  %5244 = vmax.xlane.f32.xlu1 %v5243_v21 }
0x12a4   : > { %v5246_v11 = vsel %vm1594_vm3, %v17324_v4, -inf }
0x12a5   : > { %5247 = vmax.xlane.f32.xlu0 %v5246_v11  ;;  %v4673_v27 = vpack.c.bf16 %v4666_v15, %v4665_v0 }
0x12a6   : > { %v15015_v39 = vpop.eup %15014 }
0x12a7   : > { %13827 = vmatmul.mubr.msk.bf16.vlgmr.msra.gmra.mrb[88].mxu0 %vm1594_vm3, %v4673_v27  ;;  %v5134_v61 = vpop.f32.mrb[140].mxu1  ;;  %v15017_v12 = vpop.eup %15016  ;;  %v4670_v0 = vmul.f32 %v15015_v39, %v15009_v30  ;;  %v12829_v30 = vld [vmem:[%s19873_s7 + $0x1a8] sm:$0xff] }
0x12a8   : > { %13837 = vmatpush3.bf16.msra.mxu0 %v4772_v5  ;;  %v5135_v2 = vadd.f32 %v12826_v37, %v5134_v61  ;;  %v13878_v18 = vpop.f32.mrb[141].mxu1  ;;  %13838 = vmatprep.mubr.msk.bf16.mxu0 %vm15579_vm1, %v19965_v24  ;;  %v4669_v27 = vmul.f32 %v15017_v12, %v17293_v41  ;;  %v12828_v37 = vld [vmem:[%s19873_s7 + $0x1a0] sm:$0xff] }
0x12a9   : > { %v5137_v15 = vpop.f32.mrb[142].mxu1 }
0x12aa   : > { %v5138_v34 = vadd.f32 %v12827_v50, %v5137_v15  ;;  %v13879_v52 = vpop.f32.mrb[143].mxu1  ;;  %v5249_v21 = vsel %vm1594_vm3, %v5135_v2, -inf  ;;  %v4675_v19 = vpack.c.bf16 %v4670_v0, %v4669_v27 }
0x12ab   : > { %5250 = vmax.xlane.f32.xlu0 %v5249_v21  ;;  %v12831_v52 = vld [vmem:[%s19873_s7 + $0x1b8] sm:$0xff] }
0x12ac   : > { %v5252_v11 = vsel %vm1594_vm3, %v5138_v34, -inf }
0x12ad   : > { %5253 = vmax.xlane.f32.xlu1 %v5252_v11 }
0x12af   : > { %13839 = vmatmul.mubr.msk.bf16.vlgmr.msra.gmra.mrb[92].mxu0 %vm1594_vm3, %v4675_v19  ;;  %v5185_v5 = vpop.f32.mrb[144].mxu1  ;;  %v12830_v19 = vld [vmem:[%s19873_s7 + $0x1b0] sm:$0xff] }
0x12b0   : > { %v5186_v39 = vadd.f32 %v12828_v37, %v5185_v5  ;;  %v13884_v61 = vpop.f32.mrb[145].mxu1 }
0x12b1   : > { %v5188_v50 = vpop.f32.mrb[146].mxu1 }
0x12b2   : > { %v5189_v41 = vadd.f32 %v12829_v30, %v5188_v50  ;;  %v13885_v12 = vpop.f32.mrb[147].mxu1  ;;  %v5255_v18 = vsel %vm1594_vm3, %v5186_v39, -inf  ;;  %v4869_v50 = vld [vmem:[%s19871_s5 + $0x4] sm:$0xf] }
0x12b3   : > { %5256 = vmax.xlane.f32.xlu0 %v5255_v18  ;;  %14636 = vmatprep.subr.msk.bf16.mxu0 %vm2394_vm4, %v4869_v50  ;;  %v4883_v12 = vsel %vm2394_vm4, %v4869_v50, 0  ;;  %v17370_v18 = vld [vmem:[%s19871_s5] sm:$0xf] }
0x12b4   : > { %v5258_v0 = vsel %vm1594_vm3, %v5189_v41, -inf  ;;  %13849 = vmatpush3.bf16.msra.mxu0 %v4883_v12 }
0x12b5   : > { %5259 = vmax.xlane.f32.xlu1 %v5258_v0  ;;  %14637 = vmatprep.subr.msk.bf16.mxu0 %vm2394_vm4, %v17370_v18 }
0x12b7   : > { %v5236_v15 = vpop.f32.mrb[148].mxu1 }
0x12b8   : > { %v5237_v21 = vadd.f32 %v12830_v19, %v5236_v15  ;;  %v13890_v27 = vpop.f32.mrb[149].mxu1 }
0x12b9   : > { %v5239_v11 = vpop.f32.mrb[150].mxu1 }
0x12ba   : > { %v17357_v37 = vadd.f32 %v12831_v52, %v5239_v11  ;;  %v13891_v5 = vpop.f32.mrb[151].mxu1  ;;  %v5261_v30 = vsel %vm1594_vm3, %v5237_v21, -inf }
0x12bb   : > { %5262 = vmax.xlane.f32.xlu0 %v5261_v30 }
0x12bc   : > { %v5264_v61 = vsel %vm1594_vm3, %v17357_v37, -inf }
0x12bd   : > { %5265 = vmax.xlane.f32.xlu1 %v5264_v61 }
0x1330   : > { %v5245_v0 = vpop.xlane.xlu1 %5244 }
0x1331   : > { %v5267_v19 = vsub.f32 %v17322_v46, %v5245_v0 }
0x1332   : > { %v5248_v15 = vpop.xlane.xlu0 %5247 }
0x1333   : > { %v5275_v52 = vmul.f32 1.442695, %v5267_v19  ;;  %v5268_v27 = vsub.f32 %v17324_v4, %v5248_v15 }
0x1335   : > { %15018 = vpow2.f32 %v5275_v52  ;;  %v5277_v11 = vmul.f32 1.442695, %v5268_v27 }
0x1337   : > { %15020 = vpow2.f32 %v5277_v11 }
0x1338   : > { %v5251_v5 = vpop.xlane.xlu0 %5250 }
0x1339   : > { %v5269_v30 = vsub.f32 %v5135_v2, %v5251_v5 }
0x133a   : > { %v5254_v61 = vpop.xlane.xlu1 %5253 }
0x133b   : > { %v5279_v50 = vmul.f32 1.442695, %v5269_v30  ;;  %v5270_v12 = vsub.f32 %v5138_v34, %v5254_v61 }
0x133d   : > { %15022 = vpow2.f32 %v5279_v50  ;;  %v5281_v45 = vmul.f32 1.442695, %v5270_v12 }
0x133f   : > { %v17376_v44 = vpop.eup %15018  ;;  %15024 = vpow2.f32 %v5281_v45 }
0x1340   : > { %v5257_v22 = vpop.xlane.xlu0 %5256  ;;  %v5291_v46 = vsel %vm1594_vm3, %v17376_v44, 0.0 }
0x1341   : > { %v17380_v0 = vpop.eup %15020  ;;  %v5271_v4 = vsub.f32 %v5186_v39, %v5257_v22  ;;  %5292 = vadd.xlane.f32.xlu0 %v5291_v46 }
0x1342   : > { %v5260_v19 = vpop.xlane.xlu1 %5259  ;;  %v5294_v2 = vsel %vm1594_vm3, %v17380_v0, 0.0 }
0x1343   : > { %v5283_v15 = vmul.f32 1.442695, %v5271_v4  ;;  %v5272_v52 = vsub.f32 %v5189_v41, %v5260_v19  ;;  %5295 = vadd.xlane.f32.xlu1 %v5294_v2 }
0x1345   : > { %15026 = vpow2.f32 %v5283_v15  ;;  %v5285_v34 = vmul.f32 1.442695, %v5272_v52 }
0x1347   : > { %v17384_v27 = vpop.eup %15022  ;;  %15028 = vpow2.f32 %v5285_v34 }
0x1348   : > { %v5263_v45 = vpop.xlane.xlu0 %5262  ;;  %v5297_v11 = vsel %vm1594_vm3, %v17384_v27, 0.0 }
0x1349   : > { %v17388_v5 = vpop.eup %15024  ;;  %v5273_v22 = vsub.f32 %v5237_v21, %v5263_v45  ;;  %5298 = vadd.xlane.f32.xlu0 %v5297_v11 }
0x134a   : > { %v5300_v39 = vsel %vm1594_vm3, %v17388_v5, 0.0  ;;  %v5266_v4 = vpop.xlane.xlu1 %5265 }
0x134b   : > { %v5287_v30 = vmul.f32 1.442695, %v5273_v22  ;;  %5301 = vadd.xlane.f32.xlu1 %v5300_v39  ;;  %v5274_v19 = vsub.f32 %v17357_v37, %v5266_v4  ;;  %v4963_v22 = vsel %vm2394_vm4, %v17370_v18, 0  ;;  %v19981_v37 = vpack.c.bf16 %v17305_v58, %v17303_v20 }
0x134c   : > { %v19983_v20 = vpack.c.bf16 %v17206_v31, %v17202_v29  ;;  %v19985_v4 = vpack.c.bf16 %v17224_v14, %v17222_v56 }
0x134d   : > { %15030 = vpow2.f32 %v5287_v30  ;;  %v5289_v2 = vmul.f32 1.442695, %v5274_v19 }
0x134f   : > { %v17392_v41 = vpop.eup %15026  ;;  %15032 = vpow2.f32 %v5289_v2 }
0x1350   : > { %v5303_v61 = vsel %vm1594_vm3, %v17392_v41, 0.0 }
0x1351   : > { %v17396_v50 = vpop.eup %15028  ;;  %5304 = vadd.xlane.f32.xlu0 %v5303_v61 }
0x1352   : > { %v5306_v12 = vsel %vm1594_vm3, %v17396_v50, 0.0 }
0x1353   : > { %5307 = vadd.xlane.f32.xlu1 %v5306_v12 }
0x1357   : > { %v17400_v21 = vpop.eup %15030 }
0x1358   : > { %v5309_v46 = vsel %vm1594_vm3, %v17400_v21, 0.0 }
0x1359   : > { %5310 = vadd.xlane.f32.xlu0 %v5309_v46  ;;  %v17428_v18 = vpop.eup %15032  ;;  %v19984_v46 = vpack.c.bf16 %v17134_v51, %v17132_v55 }
0x135a   : > { %v5312_v58 = vsel %vm1594_vm3, %v17428_v18, 0.0 }
0x1364   : > { %5382 = vrot.lane.b32.xlu1 %v16283_v26, %s19978_s26 }
0x1368   : > { %5429 = vrot.lane.b32.xlu1 %v16325_v59, %s19978_s26 }
0x136f   : > { %5335 = vrot.lane.b32.xlu0 %v16245_v17, %s19978_s26 }
0x1373   : > { %5627 = vrot.lane.b32.xlu0 %v16245_v17, %s19979_s28 }
0x1377   : > { %5678 = vrot.lane.b32.xlu0 %v16283_v26, %s19979_s28 }
0x137a   : > { %v4717_v15 = vpop.f32.mrb[88].mxu0 }
0x137b   : > { %v13828_v52 = vpop.f32.mrb[89].mxu0  ;;  %5676 = vrot.lane.b32.xlu0 %v16312_v13, %s19980_s27 }
0x137c   : > { %v4720_v34 = vpop.f32.mrb[90].mxu0 }
0x137d   : > { %v4865_v45 = vpack.c.bf16 %v4720_v34, %v4717_v15  ;;  %v13829_v11 = vpop.f32.mrb[91].mxu0 }
0x137f   : > { %13850 = vmatprep.mubr.msk.bf16.mxu0 %vm1396_vm2, %v4865_v45  ;;  %5727 = vrot.lane.b32.xlu0 %v16334_v38, %s19980_s27  ;;  %v19982_v38 = vpack.c.bf16 %v17311_v60, %v17309_v8  ;;  %v19986_v8 = vpack.c.bf16 %v17141_v3, %v17139_v7 }
0x1380   : > { %13851 = vmatmul.mubr.msk.bf16.vlgmr.msra.gmra.mrb[96].mxu0 %vm1396_vm2, %v19981_v37 }
0x1381   : > { %13859 = vmatpush3.bf16.msra.mxu0 %v4963_v22 }
0x1382   : > { %v4811_v39 = vpop.f32.mrb[92].mxu0  ;;  %13892 = vmatprep.subr.bf16.mxu0 %v19965_v24 }
0x1383   : > { %v13840_v13 = vpop.f32.mrb[93].mxu0 }
0x1384   : > { %v4814_v30 = vpop.f32.mrb[94].mxu0 }
0x1385   : > { %v4867_v61 = vpack.c.bf16 %v4814_v30, %v4811_v39  ;;  %v13841_v12 = vpop.f32.mrb[95].mxu0 }
0x1387   : > { %13854 = vmatprep.mubr.msk.bf16.mxu0 %vm1396_vm2, %v4867_v61 }
0x1388   : > { %13855 = vmatmul.mubr.msk.bf16.gmra.mrb[100].mxu0 %vm1396_vm2, %v19982_v38 }
0x1389   : > { %13860 = vmatprep.mubr.msk.bf16.mxu0 %vm1396_vm2, %v19983_v20 }
0x138c   : > { %5313 = vadd.xlane.f32.xlu1 %v5312_v58 }
0x1390   : > { %13861 = vmatmul.mubr.msk.bf16.vlgmr.msra.gmra.mrb[96].mxu0 %vm1396_vm2, %v19984_v46 }
0x1391   : > { %13864 = vmatprep.mubr.msk.bf16.mxu0 %vm1396_vm2, %v19985_v4 }
0x1398   : > { %13865 = vmatmul.mubr.msk.bf16.gmra.mrb[100].mxu0 %vm1396_vm2, %v19986_v8 }
0x1399   : > { %13894 = vmatprep.mubr.msk.bf16.mxu0 %vm15579_vm1, %v19965_v24 }
0x139d   : > { %5476 = vrot.lane.b32.xlu1 %v16354_v42, %s19978_s26 }
0x13a1   : > { %5625 = vrot.lane.b32.xlu1 %v16257_v28, %s19980_s27 }
0x13a5   : > { %5729 = vrot.lane.b32.xlu1 %v16325_v59, %s19979_s28 }
0x13a9   : > { %5780 = vrot.lane.b32.xlu1 %v16354_v42, %s19979_s28 }
0x13ad   : > { %5778 = vrot.lane.b32.xlu1 %v16364_v9, %s19980_s27 }
0x13ce   : > { %v5293_v55 = vpop.xlane.xlu0 %5292 }
0x13d0   : > { %v5296_v51 = vpop.xlane.xlu1 %5295 }
0x13d6   : > { %v5299_v7 = vpop.xlane.xlu0 %5298 }
0x13d7   : > { %15034 = vrcp.f32 %v5299_v7  ;;  %v5527_v7 = vld [vmem:[%s19871_s5 + $0x8] sm:$0xf] }
0x13d8   : > { %v5302_v3 = vpop.xlane.xlu1 %5301 }
0x13d9   : > { %15036 = vrcp.f32 %v5302_v3  ;;  %v5541_v3 = vsel %vm2394_vm4, %v5527_v7, 0 }
0x13da   : > { %15038 = vrcp.f32 %v5296_v51 }
0x13db   : > { %15040 = vrcp.f32 %v5293_v55 }
0x13de   : > { %v5305_v28 = vpop.xlane.xlu0 %5304 }
0x13e0   : > { %v5308_v29 = vpop.xlane.xlu1 %5307 }
0x13e1   : > { %v15035_v31 = vpop.eup %15034  ;;  %15042 = vrcp.f32 %v5308_v29 }
0x13e2   : > { %v5325_v14 = vmul.f32 %v15035_v31, %v17384_v27  ;;  %15044 = vrcp.f32 %v5305_v28 }
0x13e3   : > { %v15037_v56 = vpop.eup %15036 }
0x13e4   : > { %v5326_v60 = vmul.f32 %v15037_v56, %v17388_v5  ;;  %v5383_v19 = vpop.permute.xlu1 %5382  ;;  %v15039_v2 = vpop.eup %15038 }
0x13e5   : > { %13899 = vmatpush3.bf16.msra.mxu1 %v5383_v19  ;;  %v15041_v52 = vpop.eup %15040  ;;  %v5324_v34 = vmul.f32 %v15039_v2, %v17380_v0 }
0x13e6   : > { %v5311_v9 = vpop.xlane.xlu0 %5310  ;;  %v5332_v15 = vpack.c.bf16 %v5326_v60, %v5325_v14  ;;  %13910 = vmatprep.subr.bf16.mxu1 %v19965_v24  ;;  %v5323_v27 = vmul.f32 %v15041_v52, %v17376_v44 }
0x13e7   : > { %15046 = vrcp.f32 %v5311_v9 }
0x13e8   : > { %13901 = vmatmul.mubr.msk.bf16.vlgmr.msra.gmra.mrb[152].mxu1 %vm1594_vm3, %v5332_v15  ;;  %v5331_v5 = vpack.c.bf16 %v5324_v34, %v5323_v27  ;;  %v5430_v22 = vpop.permute.xlu1 %5429 }
0x13e9   : > { %13912 = vmatprep.mubr.msk.bf16.mxu1 %vm15579_vm1, %v19965_v24 }
0x13ea   : > { %v5336_v45 = vpop.permute.xlu0 %5335 }
0x13eb   : > { %13893 = vmatpush3.bf16.msra.mxu0 %v5336_v45  ;;  %v15043_v11 = vpop.eup %15042 }
0x13ec   : > { %13904 = vmatprep.subr.bf16.mxu0 %v19965_v24  ;;  %v15045_v37 = vpop.eup %15044  ;;  %v5328_v0 = vmul.f32 %v15043_v11, %v17396_v50 }
0x13ed   : > { %v5327_v39 = vmul.f32 %v15045_v37, %v17392_v41 }
0x13ee   : > { %13895 = vmatmul.mubr.msk.bf16.vlgmr.msra.gmra.mrb[104].mxu0 %vm1594_vm3, %v5331_v5  ;;  %v5628_v58 = vpop.permute.xlu0 %5627 }
0x13ef   : > { %13905 = vmatpush3.bf16.msra.mxu0 %v5430_v22  ;;  %13906 = vmatprep.mubr.msk.bf16.mxu0 %vm15579_vm1, %v19965_v24  ;;  %v5333_v13 = vpack.c.bf16 %v5328_v0, %v5327_v39  ;;  %v5633_v41 = vsel %vm1396_vm2, %v5628_v58, 0 }
0x13f0   : > { %14638 = vmatprep.subr.msk.bf16.mxu0 %vm2394_vm4, %v5527_v7 }
0x13f1   : > { %v15047_v61 = vpop.eup %15046 }
0x13f2   : > { %v5329_v38 = vmul.f32 %v15047_v61, %v17400_v21  ;;  %v5679_v4 = vpop.permute.xlu0 %5678 }
0x13f3   : > { %v5684_v55 = vsel %vm1396_vm2, %v5679_v4, 0 }
0x13f6   : > { %13907 = vmatmul.mubr.msk.bf16.vlgmr.msra.gmra.mrb[108].mxu0 %vm1594_vm3, %v5333_v13 }
0x13f7   : > { %13917 = vmatpush3.bf16.msra.mxu0 %v5541_v3 }
0x13f8   : > { %13938 = vmatprep.subr.bf16.mxu0 %v19965_v24 }
0x1419   : > { %v5314_v44 = vpop.xlane.xlu1 %5313 }
0x141a   : > { %15048 = vrcp.f32 %v5314_v44 }
0x141d   : > { %v5477_v30 = vpop.permute.xlu1 %5476 }
0x141e   : > { %13911 = vmatpush3.bf16.msra.mxu1 %v5477_v30  ;;  %v12844_v30 = vld [vmem:[%s19873_s7 + $0x1c0] sm:$0xff] }
0x141f   : > { %13926 = vmatprep.subr.bf16.mxu1 %v19965_v24 }
0x1421   : > { %v5626_v46 = vpop.permute.xlu1 %5625 }
0x1424   : > { %v15049_v12 = vpop.eup %15048 }
0x1425   : > { %v5330_v20 = vmul.f32 %v15049_v12, %v17428_v18  ;;  %v5730_v8 = vpop.permute.xlu1 %5729  ;;  %v5677_v18 = vpop.permute.xlu0 %5676  ;;  %v12845_v12 = vld [vmem:[%s19873_s7 + $0x1c8] sm:$0xff] }
0x1426   : > { %v5735_v34 = vsel %vm1396_vm2, %v5730_v8, 0 }
0x1427   : > { %v5334_v50 = vpack.c.bf16 %v5330_v20, %v5329_v38 }
0x1429   : > { %13913 = vmatmul.mubr.msk.bf16.vlgmr.msra.gmra.mrb[156].mxu1 %vm1594_vm3, %v5334_v50  ;;  %v5781_v21 = vpop.permute.xlu1 %5780  ;;  %v5728_v4 = vpop.permute.xlu0 %5727 }
0x142a   : > { %13927 = vmatpush3.bf16.xpose.msra.mxu1 %v5633_v41  ;;  %13928 = vmatprep.mubr.msk.bf16.mxu1 %vm15579_vm1, %v19965_v24  ;;  %v5786_v51 = vsel %vm1396_vm2, %v5781_v21, 0 }
0x142b   : > { %13932 = vmatprep.subr.bf16.mxu1 %v19965_v24 }
0x142d   : > { %v5779_v29 = vpop.permute.xlu1 %5778 }
0x1431   : > { %13929 = vmatmul.mubr.msk.bf16.vlgmr.msra.gmra.mrb[160].mxu1 %vm1396_vm2, %v5626_v46 }
0x1432   : > { %13933 = vmatpush3.bf16.xpose.msra.mxu1 %v5684_v55  ;;  %13934 = vmatprep.mubr.msk.bf16.mxu1 %vm15579_vm1, %v19965_v24  ;;  %v12846_v55 = vld [vmem:[%s19873_s7 + $0x1d0] sm:$0xff] }
0x1433   : > { %13944 = vmatprep.subr.bf16.mxu1 %v19965_v24 }
0x1439   : > { %13935 = vmatmul.mubr.msk.bf16.vlgmr.msra.gmra.mrb[164].mxu1 %vm1396_vm2, %v5677_v18  ;;  %v12847_v18 = vld [vmem:[%s19873_s7 + $0x1d8] sm:$0xff] }
0x143a   : > { %13945 = vmatpush3.bf16.xpose.msra.mxu1 %v5786_v51  ;;  %13946 = vmatprep.mubr.msk.bf16.mxu1 %vm15579_vm1, %v19965_v24 }
0x143b   : > { %13956 = vmatprep.subr.bf16.mxu1 %v19965_v24 }
0x1441   : > { %13947 = vmatmul.mubr.msk.bf16.vlgmr.msra.gmra.mrb[168].mxu1 %vm1396_vm2, %v5779_v29 }
0x1442   : > { %13958 = vmatprep.mubr.msk.bf16.mxu1 %vm15579_vm1, %v19965_v24 }
0x14bb   : > { %v5422_v31 = vpop.f32.mrb[152].mxu1 }
0x14bc   : > { %v13902_v28 = vpop.f32.mrb[153].mxu1 }
0x14bd   : > { %v5425_v56 = vpop.f32.mrb[154].mxu1 }
0x14be   : > { %v5524_v14 = vpack.c.bf16 %v5425_v56, %v5422_v31  ;;  %v13903_v60 = vpop.f32.mrb[155].mxu1 }
0x14c1   : > { %v5375_v19 = vpop.f32.mrb[104].mxu0 }
0x14c2   : > { %v13896_v2 = vpop.f32.mrb[105].mxu0 }
0x14c3   : > { %v5378_v9 = vpop.f32.mrb[106].mxu0 }
0x14c4   : > { %v5523_v15 = vpack.c.bf16 %v5378_v9, %v5375_v19  ;;  %v13897_v52 = vpop.f32.mrb[107].mxu0 }
0x14c6   : > { %13918 = vmatprep.mubr.msk.bf16.mxu0 %vm1396_vm2, %v5523_v15 }
0x14c7   : > { %13919 = vmatmul.mubr.msk.bf16.vlgmr.msra.gmra.mrb[96].mxu0 %vm1396_vm2, %v5524_v14 }
0x14c8   : > { %13939 = vmatpush3.bf16.xpose.msra.mxu0 %v5735_v34 }
0x14c9   : > { %v5469_v27 = vpop.f32.mrb[108].mxu0  ;;  %13950 = vmatprep.subr.bf16.mxu0 %v19965_v24 }
0x14ca   : > { %v13908_v45 = vpop.f32.mrb[109].mxu0 }
0x14cb   : > { %v5472_v5 = vpop.f32.mrb[110].mxu0 }
0x14cc   : > { %v5525_v11 = vpack.c.bf16 %v5472_v5, %v5469_v27  ;;  %v13909_v22 = vpop.f32.mrb[111].mxu0 }
0x14ce   : > { %13922 = vmatprep.mubr.msk.bf16.mxu0 %vm1396_vm2, %v5525_v11 }
0x14fc   : > { %v5516_v37 = vpop.f32.mrb[156].mxu1 }
0x14fd   : > { %v13914_v0 = vpop.f32.mrb[157].mxu1 }
0x14fe   : > { %v5519_v39 = vpop.f32.mrb[158].mxu1 }
0x14ff   : > { %v5526_v13 = vpack.c.bf16 %v5519_v39, %v5516_v37  ;;  %v13915_v44 = vpop.f32.mrb[159].mxu1  ;;  %v12848_v39 = vld [vmem:[%s19873_s7 + $0x1e0] sm:$0xff] }
0x1501   : > { %13923 = vmatmul.mubr.msk.bf16.gmra.mrb[100].mxu0 %vm1396_vm2, %v5526_v13  ;;  %v12850_v13 = vld [vmem:[%s19873_s7 + $0x1f0] sm:$0xff] }
0x1502   : > { %13940 = vmatprep.mubr.msk.bf16.mxu0 %vm15579_vm1, %v19965_v24 }
0x1504   : > { %v5669_v61 = vpop.f32.mrb[160].mxu1 }
0x1505   : > { %v5670_v38 = vadd.f32 %v12844_v30, %v5669_v61  ;;  %v13930_v20 = vpop.f32.mrb[161].mxu1  ;;  %v12849_v61 = vld [vmem:[%s19873_s7 + $0x1e8] sm:$0xff] }
0x1506   : > { %v5672_v58 = vpop.f32.mrb[162].mxu1  ;;  %v12851_v20 = vld [vmem:[%s19873_s7 + $0x1f8] sm:$0xff] }
0x1507   : > { %v5673_v50 = vadd.f32 %v12845_v12, %v5672_v58  ;;  %v13931_v41 = vpop.f32.mrb[163].mxu1  ;;  %v5829_v46 = vsel %vm1594_vm3, %v5670_v38, -inf }
0x1508   : > { %5830 = vmax.xlane.f32.xlu0 %v5829_v46 }
0x1509   : > { %13941 = vmatmul.mubr.msk.bf16.vlgmr.msra.gmra.mrb[112].mxu0 %vm1396_vm2, %v5728_v4  ;;  %v5832_v8 = vsel %vm1594_vm3, %v5673_v50, -inf }
0x150a   : > { %5833 = vmax.xlane.f32.xlu1 %v5832_v8  ;;  %13952 = vmatprep.mubr.msk.bf16.mxu0 %vm15579_vm1, %v19965_v24 }
0x150c   : > { %v5720_v21 = vpop.f32.mrb[164].mxu1 }
0x150d   : > { %v5721_v51 = vadd.f32 %v12846_v55, %v5720_v21  ;;  %v13936_v7 = vpop.f32.mrb[165].mxu1 }
0x150e   : > { %v5723_v3 = vpop.f32.mrb[166].mxu1 }
0x150f   : > { %v5724_v29 = vadd.f32 %v12847_v18, %v5723_v3  ;;  %v13937_v31 = vpop.f32.mrb[167].mxu1  ;;  %v5835_v28 = vsel %vm1594_vm3, %v5721_v51, -inf }
0x1510   : > { %5836 = vmax.xlane.f32.xlu0 %v5835_v28 }
0x1511   : > { %v5838_v56 = vsel %vm1594_vm3, %v5724_v29, -inf }
0x1514   : > { %5839 = vmax.xlane.f32.xlu0 %v5838_v56  ;;  %v5822_v14 = vpop.f32.mrb[168].mxu1 }
0x1515   : > { %v13948_v60 = vpop.f32.mrb[169].mxu1 }
0x1516   : > { %v5825_v19 = vpop.f32.mrb[170].mxu1 }
0x1517   : > { %v13949_v2 = vpop.f32.mrb[171].mxu1  ;;  %v5826_v8 = vadd.f32 %v12851_v20, %v5825_v19 }
0x1595   : > { %v5831_v9 = vpop.xlane.xlu0 %5830 }
0x1596   : > { %v5853_v34 = vsub.f32 %v5670_v38, %v5831_v9 }
0x1597   : > { %v5834_v52 = vpop.xlane.xlu1 %5833 }
0x1598   : > { %v5854_v27 = vsub.f32 %v5673_v50, %v5834_v52  ;;  %v5861_v5 = vmul.f32 1.442695, %v5853_v34  ;;  %v5823_v50 = vadd.f32 %v12850_v13, %v5822_v14 }
0x159a   : > { %v5863_v22 = vmul.f32 1.442695, %v5854_v27  ;;  %15050 = vpow2.f32 %v5861_v5  ;;  %v5847_v21 = vsel %vm1594_vm3, %v5823_v50, -inf }
0x159c   : > { %15052 = vpow2.f32 %v5863_v22 }
0x159d   : > { %v5837_v15 = vpop.xlane.xlu0 %5836 }
0x159e   : > { %v5855_v11 = vsub.f32 %v5721_v51, %v5837_v15  ;;  %v5850_v51 = vsel %vm1594_vm3, %v5826_v8, -inf }
0x15a0   : > { %v5865_v0 = vmul.f32 1.442695, %v5855_v11 }
0x15a1   : > { %v5840_v45 = vpop.xlane.xlu0 %5839 }
0x15a2   : > { %v5856_v37 = vsub.f32 %v5724_v29, %v5840_v45  ;;  %15054 = vpow2.f32 %v5865_v0 }
0x15a4   : > { %v5867_v44 = vmul.f32 1.442695, %v5856_v37  ;;  %v17548_v18 = vpop.eup %15050 }
0x15a5   : > { %v5877_v3 = vsel %vm1594_vm3, %v17548_v18, 0.0 }
0x15a6   : > { %15056 = vpow2.f32 %v5867_v44  ;;  %v17551_v7 = vpop.eup %15052 }
0x15a7   : > { %v5880_v31 = vsel %vm1594_vm3, %v17551_v7, 0.0 }
0x15ac   : > { %v15055_v29 = vpop.eup %15054 }
0x15ad   : > { %v5883_v56 = vsel %vm1594_vm3, %v15055_v29, 0.0 }
0x15b0   : > { %v15057_v28 = vpop.eup %15056 }
0x15b1   : > { %v5886_v14 = vsel %vm1594_vm3, %v15057_v28, 0.0 }
0x15dc   : > { %v5771_v30 = vpop.f32.mrb[112].mxu0 }
0x15dd   : > { %v5772_v12 = vadd.f32 %v12848_v39, %v5771_v30  ;;  %v13942_v38 = vpop.f32.mrb[113].mxu0 }
0x15de   : > { %v5774_v58 = vpop.f32.mrb[114].mxu0 }
0x15df   : > { %v5775_v41 = vadd.f32 %v12849_v61, %v5774_v58  ;;  %v13943_v46 = vpop.f32.mrb[115].mxu0  ;;  %v5841_v4 = vsel %vm1594_vm3, %v5772_v12, -inf }
0x15e0   : > { %5842 = vmax.xlane.f32.xlu0 %v5841_v4 }
0x15e1   : > { %v5844_v55 = vsel %vm1594_vm3, %v5775_v41, -inf }
0x15e2   : > { %5845 = vmax.xlane.f32.xlu1 %v5844_v55 }
0x15e4   : > { %5848 = vmax.xlane.f32.xlu0 %v5847_v21 }
0x15e6   : > { %5851 = vmax.xlane.f32.xlu1 %v5850_v51 }
0x15e8   : > { %5878 = vadd.xlane.f32.xlu0 %v5877_v3 }
0x15ea   : > { %5881 = vadd.xlane.f32.xlu1 %v5880_v31 }
0x15ec   : > { %5884 = vadd.xlane.f32.xlu0 %v5883_v56 }
0x15ee   : > { %5887 = vadd.xlane.f32.xlu1 %v5886_v14 }
0x166d   : > { %v5843_v60 = vpop.xlane.xlu0 %5842 }
0x166e   : > { %v5857_v19 = vsub.f32 %v5772_v12, %v5843_v60 }
0x166f   : > { %v5846_v2 = vpop.xlane.xlu1 %5845 }
0x1670   : > { %v5869_v52 = vmul.f32 1.442695, %v5857_v19  ;;  %v5858_v44 = vsub.f32 %v5775_v41, %v5846_v2 }
0x1671   : > { %v5849_v9 = vpop.xlane.xlu0 %5848 }
0x1672   : > { %v5859_v15 = vsub.f32 %v5823_v50, %v5849_v9  ;;  %v5871_v30 = vmul.f32 1.442695, %v5858_v44 }
0x1673   : > { %v5852_v34 = vpop.xlane.xlu1 %5851 }
0x1674   : > { %v5873_v27 = vmul.f32 1.442695, %v5859_v15  ;;  %v5860_v45 = vsub.f32 %v5826_v8, %v5852_v34 }
0x1676   : > { %15058 = vpow2.f32 %v5873_v27  ;;  %v5875_v5 = vmul.f32 1.442695, %v5860_v45 }
0x1677   : > { %15060 = vpow2.f32 %v5869_v52 }
0x1678   : > { %15062 = vpow2.f32 %v5875_v5 }
0x1679   : > { %15064 = vpow2.f32 %v5871_v30 }
0x1680   : > { %v17559_v11 = vpop.eup %15058 }
0x1681   : > { %v17561_v22 = vpop.eup %15060  ;;  %v5895_v37 = vsel %vm1594_vm3, %v17559_v11, 0.0 }
0x1682   : > { %v15063_v0 = vpop.eup %15062  ;;  %5896 = vadd.xlane.f32.xlu0 %v5895_v37  ;;  %v5889_v13 = vsel %vm1594_vm3, %v17561_v22, 0.0 }
0x1683   : > { %v5898_v39 = vsel %vm1594_vm3, %v15063_v0, 0.0  ;;  %v15065_v61 = vpop.eup %15064 }
0x1684   : > { %5899 = vadd.xlane.f32.xlu1 %v5898_v39  ;;  %v5892_v12 = vsel %vm1594_vm3, %v15065_v61, 0.0 }
0x1686   : > { %5890 = vadd.xlane.f32.xlu0 %v5889_v13 }
0x1695   : > { %5968 = vrot.lane.b32.xlu1 %v16283_v26, %s19987_s14  ;;  %v5879_v26 = vpop.xlane.xlu0 %5878 }
0x1699   : > { %6015 = vrot.lane.b32.xlu1 %v16325_v59, %s19987_s14  ;;  %v5885_v38 = vpop.xlane.xlu0 %5884 }
0x169c   : > { %5921 = vrot.lane.b32.xlu0 %v16245_v17, %s19987_s14  ;;  %v5882_v17 = vpop.xlane.xlu1 %5881 }
0x16a0   : > { %6355 = vrot.lane.b32.xlu0 %v16251_v53, %s19971_s2  ;;  %v5888_v59 = vpop.xlane.xlu1 %5887 }
0x16a1   : > { %15066 = vrcp.f32 %v5888_v59 }
0x16a2   : > { %15068 = vrcp.f32 %v5882_v17 }
0x16a3   : > { %15070 = vrcp.f32 %v5885_v38 }
0x16a4   : > { %6505 = vrot.lane.b32.xlu0 %v16360_v33, %s19971_s2  ;;  %15072 = vrcp.f32 %v5879_v26 }
0x16ab   : > { %v15067_v58 = vpop.eup %15066 }
0x16ac   : > { %v15069_v50 = vpop.eup %15068 }
0x16ad   : > { %v15071_v46 = vpop.eup %15070  ;;  %v5910_v55 = vmul.f32 %v15069_v50, %v17551_v7  ;;  %v6113_v7 = vld [vmem:[%s19871_s5 + $0xc] sm:$0xf] }
0x16ae   : > { %v15073_v8 = vpop.eup %15072  ;;  %v5911_v21 = vmul.f32 %v15071_v46, %v15055_v29 }
0x16af   : > { %v5909_v3 = vmul.f32 %v15073_v8, %v17548_v18 }
0x16b1   : > { %v5917_v14 = vpack.c.bf16 %v5910_v55, %v5909_v3 }
0x16bd   : > { %5893 = vadd.xlane.f32.xlu1 %v5892_v12 }
0x16ce   : > { %6062 = vrot.lane.b32.xlu1 %v16354_v42, %s19987_s14  ;;  %v5912_v42 = vmul.f32 %v15067_v58, %v15057_v28 }
0x16d0   : > { %v5918_v56 = vpack.c.bf16 %v5912_v42, %v5911_v21 }
0x16d2   : > { %6405 = vrot.lane.b32.xlu1 %v16290_v62, %s19971_s2 }
0x16d6   : > { %6455 = vrot.lane.b32.xlu1 %v16331_v10, %s19971_s2 }
0x170f   : > { %v5897_v20 = vpop.xlane.xlu0 %5896 }
0x1711   : > { %v5900_v41 = vpop.xlane.xlu1 %5899 }
0x1712   : > { %15074 = vrcp.f32 %v5900_v41 }
0x1713   : > { %v5891_v4 = vpop.xlane.xlu0 %5890  ;;  %15076 = vrcp.f32 %v5897_v20 }
0x1714   : > { %15078 = vrcp.f32 %v5891_v4 }
0x1715   : > { %v5969_v51 = vpop.permute.xlu1 %5968 }
0x1716   : > { %13957 = vmatpush3.bf16.msra.mxu1 %v5969_v51 }
0x1717   : > { %v5922_v31 = vpop.permute.xlu0 %5921  ;;  %13968 = vmatprep.subr.bf16.mxu1 %v19965_v24 }
0x1718   : > { %13951 = vmatpush3.bf16.msra.mxu0 %v5922_v31 }
0x1719   : > { %13959 = vmatmul.mubr.msk.bf16.vlgmr.msra.gmra.mrb[172].mxu1 %vm1594_vm3, %v5918_v56  ;;  %13962 = vmatprep.subr.bf16.mxu0 %v19965_v24  ;;  %v6016_v29 = vpop.permute.xlu1 %6015 }
0x171a   : > { %13970 = vmatprep.mubr.msk.bf16.mxu1 %vm15579_vm1, %v19965_v24 }
0x171b   : > { %13953 = vmatmul.mubr.msk.bf16.vlgmr.msra.gmra.mrb[116].mxu0 %vm1594_vm3, %v5917_v14  ;;  %v6356_v34 = vpop.permute.xlu0 %6355 }
0x171c   : > { %13963 = vmatpush3.bf16.msra.mxu0 %v6016_v29  ;;  %13964 = vmatprep.mubr.msk.bf16.mxu0 %vm15579_vm1, %v19965_v24  ;;  %v15075_v18 = vpop.eup %15074  ;;  %v6361_v37 = vsel %vm1396_vm2, %v6356_v34, 0 }
0x171d   : > { %14639 = vmatprep.subr.msk.bf16.mxu0 %vm2394_vm4, %v6113_v7  ;;  %v15077_v60 = vpop.eup %15076  ;;  %v5916_v19 = vmul.f32 %v15075_v18, %v15063_v0  ;;  %v6127_v0 = vsel %vm2394_vm4, %v6113_v7, 0 }
0x171e   : > { %v5915_v2 = vmul.f32 %v15077_v60, %v17559_v11  ;;  %v15079_v52 = vpop.eup %15078  ;;  %v12875_v60 = vld [vmem:[%s19873_s7 + $0x210] sm:$0xff] }
0x171f   : > { %v5913_v45 = vmul.f32 %v15079_v52, %v17561_v22  ;;  %v6506_v22 = vpop.permute.xlu0 %6505 }
0x1720   : > { %v5920_v15 = vpack.c.bf16 %v5916_v19, %v5915_v2  ;;  %v6511_v44 = vsel %vm1396_vm2, %v6506_v22, 0  ;;  %v12876_v2 = vld [vmem:[%s19873_s7 + $0x218] sm:$0xff] }
0x174a   : > { %v5894_v28 = vpop.xlane.xlu1 %5893 }
0x174b   : > { %15080 = vrcp.f32 %v5894_v28 }
0x174e   : > { %v6063_v9 = vpop.permute.xlu1 %6062 }
0x174f   : > { %13969 = vmatpush3.bf16.msra.mxu1 %v6063_v9 }
0x1750   : > { %13984 = vmatprep.subr.bf16.mxu1 %v19965_v24 }
0x1752   : > { %13971 = vmatmul.mubr.msk.bf16.vlgmr.msra.gmra.mrb[176].mxu1 %vm1594_vm3, %v5920_v15  ;;  %v6406_v39 = vpop.permute.xlu1 %6405 }
0x1753   : > { %13986 = vmatprep.mubr.msk.bf16.mxu1 %vm15579_vm1, %v19965_v24  ;;  %v6411_v13 = vsel %vm1396_vm2, %v6406_v39, 0 }
0x1755   : > { %v15081_v27 = vpop.eup %15080 }
0x1756   : > { %v5914_v5 = vmul.f32 %v15081_v27, %v15065_v61  ;;  %v6456_v58 = vpop.permute.xlu1 %6455 }
0x1757   : > { %v6461_v46 = vsel %vm1396_vm2, %v6456_v58, 0 }
0x1758   : > { %13985 = vmatpush3.bf16.xpose.msra.mxu1 %v6361_v37  ;;  %v5919_v11 = vpack.c.bf16 %v5914_v5, %v5913_v45  ;;  %v12879_v37 = vld [vmem:[%s19873_s7 + $0x230] sm:$0xff] }
0x1759   : > { %13990 = vmatprep.subr.bf16.mxu1 %v19965_v24 }
0x175a   : > { %13965 = vmatmul.mubr.msk.bf16.vlgmr.msra.gmra.mrb[120].mxu0 %vm1594_vm3, %v5919_v11 }
0x175b   : > { %13975 = vmatpush3.bf16.msra.mxu0 %v6127_v0  ;;  %v12880_v0 = vld [vmem:[%s19873_s7 + $0x238] sm:$0xff] }
0x175c   : > { %13996 = vmatprep.subr.bf16.mxu0 %v19965_v24 }
0x175f   : > { %13987 = vmatmul.mubr.msk.bf16.vlgmr.msra.gmra.mrb[180].mxu1 %vm1396_vm2, %v16269_v63 }
0x1760   : > { %13991 = vmatpush3.bf16.xpose.msra.mxu1 %v6411_v13  ;;  %13992 = vmatprep.mubr.msk.bf16.mxu1 %vm15579_vm1, %v19965_v24 }
0x1761   : > { %14002 = vmatprep.subr.bf16.mxu1 %v19965_v24 }
0x1767   : > { %13993 = vmatmul.mubr.msk.bf16.vlgmr.msra.gmra.mrb[184].mxu1 %vm1396_vm2, %v16314_v16 }
0x1768   : > { %14003 = vmatpush3.bf16.xpose.msra.mxu1 %v6511_v44  ;;  %14004 = vmatprep.mubr.msk.bf16.mxu1 %vm15579_vm1, %v19965_v24 }
0x1769   : > { %14014 = vmatprep.subr.bf16.mxu1 %v19965_v24 }
0x176f   : > { %14005 = vmatmul.mubr.msk.bf16.vlgmr.msra.gmra.mrb[188].mxu1 %vm1396_vm2, %v16366_v47 }
0x1770   : > { %14016 = vmatprep.mubr.msk.bf16.mxu1 %vm15579_vm1, %v19965_v24 }
0x17ec   : > { %v6008_v30 = vpop.f32.mrb[172].mxu1 }
0x17ed   : > { %v13960_v61 = vpop.f32.mrb[173].mxu1 }
0x17ee   : > { %v5961_v12 = vpop.f32.mrb[116].mxu0  ;;  %v6011_v17 = vpop.f32.mrb[174].mxu1 }
0x17ef   : > { %v6110_v26 = vpack.c.bf16 %v6011_v17, %v6008_v30  ;;  %v13954_v59 = vpop.f32.mrb[117].mxu0  ;;  %v13961_v38 = vpop.f32.mrb[175].mxu1 }
0x17f0   : > { %v5964_v20 = vpop.f32.mrb[118].mxu0 }
0x17f1   : > { %v6109_v50 = vpack.c.bf16 %v5964_v20, %v5961_v12  ;;  %v13955_v41 = vpop.f32.mrb[119].mxu0 }
0x17f3   : > { %13976 = vmatprep.mubr.msk.bf16.mxu0 %vm1396_vm2, %v6109_v50 }
0x17f4   : > { %13977 = vmatmul.mubr.msk.bf16.vlgmr.msra.gmra.mrb[96].mxu0 %vm1396_vm2, %v6110_v26 }
0x17f5   : > { %13997 = vmatpush3.bf16.xpose.msra.mxu0 %v6461_v46 }
0x17f6   : > { %14008 = vmatprep.subr.bf16.mxu0 %v19965_v24 }
0x1825   : > { %v6102_v42 = vpop.f32.mrb[176].mxu1 }
0x1826   : > { %v13972_v4 = vpop.f32.mrb[177].mxu1 }
0x1827   : > { %v6105_v8 = vpop.f32.mrb[178].mxu1 }
0x1828   : > { %v6112_v55 = vpack.c.bf16 %v6105_v8, %v6102_v42  ;;  %v13973_v21 = vpop.f32.mrb[179].mxu1 }
0x182d   : > { %v6055_v51 = vpop.f32.mrb[120].mxu0 }
0x182e   : > { %v13966_v3 = vpop.f32.mrb[121].mxu0 }
0x182f   : > { %v6058_v31 = vpop.f32.mrb[122].mxu0 }
0x1830   : > { %v6111_v56 = vpack.c.bf16 %v6058_v31, %v6055_v51  ;;  %v13967_v14 = vpop.f32.mrb[123].mxu0 }
0x1832   : > { %13980 = vmatprep.mubr.msk.bf16.mxu0 %vm1396_vm2, %v6111_v56  ;;  %v17631_v7 = vpop.f32.mrb[180].mxu1 }
0x1833   : > { %13981 = vmatmul.mubr.msk.bf16.gmra.mrb[100].mxu0 %vm1396_vm2, %v6112_v55  ;;  %v13988_v29 = vpop.f32.mrb[181].mxu1 }
0x1834   : > { %v17634_v18 = vpop.f32.mrb[182].mxu1  ;;  %13998 = vmatprep.mubr.msk.bf16.mxu0 %vm15579_vm1, %v19965_v24 }
0x1835   : > { %v13989_v28 = vpop.f32.mrb[183].mxu1 }
0x183a   : > { %v6447_v19 = vpop.f32.mrb[184].mxu1 }
0x183b   : > { %v6448_v9 = vadd.f32 %v12875_v60, %v6447_v19  ;;  %v13994_v15 = vpop.f32.mrb[185].mxu1  ;;  %13999 = vmatmul.mubr.msk.bf16.vlgmr.msra.gmra.mrb[124].mxu0 %vm1396_vm2, %v16338_v1 }
0x183c   : > { %v6450_v52 = vpop.f32.mrb[186].mxu1  ;;  %14010 = vmatprep.mubr.msk.bf16.mxu0 %vm15579_vm1, %v19965_v24 }
0x183d   : > { %v6451_v34 = vadd.f32 %v12876_v2, %v6450_v52  ;;  %v13995_v27 = vpop.f32.mrb[187].mxu1  ;;  %v6560_v45 = vsel %vm1594_vm3, %v6448_v9, -inf }
0x183e   : > { %6561 = vmax.xlane.f32.xlu0 %v6560_v45 }
0x183f   : > { %v6563_v5 = vsel %vm1594_vm3, %v6451_v34, -inf }
0x1840   : > { %6564 = vmax.xlane.f32.xlu1 %v6563_v5 }
0x1842   : > { %v6547_v11 = vpop.f32.mrb[188].mxu1 }
0x1843   : > { %v6548_v39 = vadd.f32 %v12879_v37, %v6547_v11  ;;  %v14006_v13 = vpop.f32.mrb[189].mxu1  ;;  %v12873_v11 = vld [vmem:[%s19873_s7 + $0x200] sm:$0xff] }
0x1844   : > { %v6550_v22 = vpop.f32.mrb[190].mxu1 }
0x1845   : > { %v6551_v44 = vadd.f32 %v12880_v0, %v6550_v22  ;;  %v14007_v30 = vpop.f32.mrb[191].mxu1  ;;  %v6572_v61 = vsel %vm1594_vm3, %v6548_v39, -inf  ;;  %v6398_v0 = vadd.f32 %v12873_v11, %v17631_v7 }
0x1846   : > { %6573 = vmax.xlane.f32.xlu0 %v6572_v61 }
0x1847   : > { %v6575_v12 = vsel %vm1594_vm3, %v6551_v44, -inf  ;;  %v6554_v22 = vsel %vm1594_vm3, %v6398_v0, -inf }
0x184a   : > { %6576 = vmax.xlane.f32.xlu0 %v6575_v12  ;;  %v12874_v12 = vld [vmem:[%s19873_s7 + $0x208] sm:$0xff] }
0x18c7   : > { %v17658_v17 = vpop.f32.mrb[96].mxu0 }
0x18c8   : > { %v17660_v26 = vpop.f32.mrb[97].mxu0 }
0x18c9   : > { %v17662_v59 = vpop.f32.mrb[98].mxu0 }
0x18ca   : > { %v17664_v38 = vpop.f32.mrb[99].mxu0 }
0x18cb   : > { %v6562_v20 = vpop.xlane.xlu0 %6561 }
0x18cc   : > { %v6580_v58 = vsub.f32 %v6448_v9, %v6562_v20  ;;  %v17713_v20 = vadd.f32 %v12874_v12, %v17634_v18 }
0x18cd   : > { %v6565_v50 = vpop.xlane.xlu1 %6564 }
0x18ce   : > { %v6590_v41 = vmul.f32 1.442695, %v6580_v58  ;;  %v6581_v46 = vsub.f32 %v6451_v34, %v6565_v50  ;;  %v6557_v58 = vsel %vm1594_vm3, %v17713_v20, -inf }
0x18d0   : > { %15082 = vpow2.f32 %v6590_v41  ;;  %v6592_v42 = vmul.f32 1.442695, %v6581_v46 }
0x18d2   : > { %15084 = vpow2.f32 %v6592_v42 }
0x18d3   : > { %v6574_v4 = vpop.xlane.xlu0 %6573 }
0x18d4   : > { %v6584_v8 = vsub.f32 %v6548_v39, %v6574_v4  ;;  %v12877_v39 = vld [vmem:[%s19873_s7 + $0x220] sm:$0xff] }
0x18d6   : > { %v6598_v55 = vmul.f32 1.442695, %v6584_v8 }
0x18d7   : > { %v6577_v29 = vpop.xlane.xlu0 %6576 }
0x18d8   : > { %15086 = vpow2.f32 %v6598_v55  ;;  %v6585_v28 = vsub.f32 %v6551_v44, %v6577_v29  ;;  %v12878_v44 = vld [vmem:[%s19873_s7 + $0x228] sm:$0xff] }
0x18da   : > { %v15083_v21 = vpop.eup %15082  ;;  %v6600_v60 = vmul.f32 1.442695, %v6585_v28 }
0x18db   : > { %v6608_v51 = vsel %vm1594_vm3, %v15083_v21, 0.0 }
0x18dc   : > { %v15085_v3 = vpop.eup %15084  ;;  %6609 = vadd.xlane.f32.xlu0 %v6608_v51  ;;  %15088 = vpow2.f32 %v6600_v60 }
0x18dd   : > { %v6611_v31 = vsel %vm1594_vm3, %v15085_v3, 0.0 }
0x18de   : > { %6612 = vadd.xlane.f32.xlu1 %v6611_v31 }
0x18e2   : > { %v17668_v56 = vpop.eup %15086 }
0x18e3   : > { %v6620_v14 = vsel %vm1594_vm3, %v17668_v56, 0.0 }
0x18e4   : > { %6621 = vadd.xlane.f32.xlu0 %v6620_v14 }
0x18e6   : > { %v15089_v34 = vpop.eup %15088 }
0x18e7   : > { %v6623_v37 = vsel %vm1594_vm3, %v15089_v34, 0.0 }
0x18ef   : > { %6787 = vrot.lane.b32.xlu1 %v16360_v33, %s19972_s0 }
0x18fa   : > { %6693 = vrot.lane.b32.xlu0 %v16290_v62, %s19972_s0 }
0x18fe   : > { %7007 = vrot.lane.b32.xlu0 %v16360_v33, %s19973_s24 }
0x1906   : > { %v17678_v19 = vpop.f32.mrb[100].mxu0 }
0x1907   : > { %v17680_v2 = vpop.f32.mrb[101].mxu0 }
0x1908   : > { %v17682_v9 = vpop.f32.mrb[102].mxu0 }
0x1909   : > { %v17684_v15 = vpop.f32.mrb[103].mxu0 }
0x190e   : > { %v6497_v52 = vpop.f32.mrb[124].mxu0 }
0x190f   : > { %v14000_v27 = vpop.f32.mrb[125].mxu0  ;;  %v6498_v13 = vadd.f32 %v12877_v39, %v6497_v52 }
0x1910   : > { %v6500_v45 = vpop.f32.mrb[126].mxu0 }
0x1911   : > { %v14001_v5 = vpop.f32.mrb[127].mxu0  ;;  %v17698_v30 = vadd.f32 %v12878_v44, %v6500_v45  ;;  %v6566_v61 = vsel %vm1594_vm3, %v6498_v13, -inf }
0x1913   : > { %6624 = vadd.xlane.f32.xlu1 %v6623_v37  ;;  %v6569_v7 = vsel %vm1594_vm3, %v17698_v30, -inf }
0x191d   : > { %6555 = vmax.xlane.f32.xlu0 %v6554_v22 }
0x1921   : > { %6567 = vmax.xlane.f32.xlu0 %v6566_v61 }
0x1924   : > { %6903 = vrot.lane.b32.xlu1 %v16290_v62, %s19973_s24 }
0x1925   : > { %6570 = vmax.xlane.f32.xlu0 %v6569_v7 }
0x1928   : > { %6901 = vrot.lane.b32.xlu1 %v16314_v16, %s19975_s22 }
0x192c   : > { %7005 = vrot.lane.b32.xlu1 %v16366_v47, %s19975_s22 }
0x1950   : > { %6558 = vmax.xlane.f32.xlu1 %v6557_v58 }
0x1969   : > { %v6610_v50 = vpop.xlane.xlu0 %6609 }
0x196a   : > { %15090 = vrcp.f32 %v6610_v50 }
0x196b   : > { %v6613_v41 = vpop.xlane.xlu1 %6612 }
0x196c   : > { %15092 = vrcp.f32 %v6613_v41 }
0x196f   : > { %v6788_v18 = vpop.permute.xlu1 %6787 }
0x1971   : > { %v6622_v46 = vpop.xlane.xlu0 %6621 }
0x1972   : > { %15094 = vrcp.f32 %v6622_v46 }
0x1974   : > { %v15091_v42 = vpop.eup %15090 }
0x1975   : > { %v6694_v4 = vpop.permute.xlu0 %6693  ;;  %v6636_v55 = vmul.f32 %v15091_v42, %v15083_v21 }
0x1976   : > { %v15093_v8 = vpop.eup %15092  ;;  %14015 = vmatpush3.bf16.msra.mxu1 %v6694_v4 }
0x1977   : > { %v6637_v51 = vmul.f32 %v15093_v8, %v15085_v3  ;;  %14026 = vmatprep.subr.bf16.mxu1 %v19965_v24 }
0x1979   : > { %v6643_v31 = vpack.c.bf16 %v6637_v51, %v6636_v55  ;;  %v7008_v29 = vpop.permute.xlu0 %7007 }
0x197b   : > { %14017 = vmatmul.mubr.msk.bf16.vlgmr.msra.gmra.mrb[192].mxu1 %vm1594_vm3, %v6643_v31 }
0x197c   : > { %14027 = vmatpush3.bf16.msra.mxu1 %v6788_v18  ;;  %14028 = vmatprep.mubr.msk.bf16.mxu1 %vm15579_vm1, %v19965_v24  ;;  %v15095_v28 = vpop.eup %15094 }
0x197d   : > { %14038 = vmatprep.subr.bf16.mxu1 %v19965_v24  ;;  %v6640_v52 = vmul.f32 %v15095_v28, %v17668_v56 }
0x19a0   : > { %v6625_v14 = vpop.xlane.xlu1 %6624 }
0x19a1   : > { %15096 = vrcp.f32 %v6625_v14 }
0x19a4   : > { %v6904_v45 = vpop.permute.xlu1 %6903 }
0x19a5   : > { %v6909_v22 = vsel %vm1396_vm2, %v6904_v45, 0 }
0x19a8   : > { %v6902_v56 = vpop.permute.xlu1 %6901 }
0x19aa   : > { %v6556_v60 = vpop.xlane.xlu0 %6555 }
0x19ab   : > { %v15097_v21 = vpop.eup %15096  ;;  %v6578_v3 = vsub.f32 %v6398_v0, %v6556_v60 }
0x19ac   : > { %v6641_v27 = vmul.f32 %v15097_v21, %v15089_v34  ;;  %v7013_v34 = vsel %vm1396_vm2, %v7008_v29, 0  ;;  %v7006_v12 = vpop.permute.xlu1 %7005 }
0x19ad   : > { %v6586_v5 = vmul.f32 1.442695, %v6578_v3 }
0x19ae   : > { %v6568_v37 = vpop.xlane.xlu0 %6567  ;;  %v6645_v11 = vpack.c.bf16 %v6641_v27, %v6640_v52 }
0x19af   : > { %15098 = vpow2.f32 %v6586_v5  ;;  %v6582_v39 = vsub.f32 %v6498_v13, %v6568_v37 }
0x19b0   : > { %14029 = vmatmul.mubr.msk.bf16.vlgmr.msra.gmra.mrb[196].mxu1 %vm1594_vm3, %v6645_v11 }
0x19b1   : > { %v6594_v44 = vmul.f32 1.442695, %v6582_v39  ;;  %14039 = vmatpush3.bf16.xpose.msra.mxu1 %v6909_v22  ;;  %14040 = vmatprep.mubr.msk.bf16.mxu1 %vm15579_vm1, %v19965_v24 }
0x19b2   : > { %14050 = vmatprep.subr.bf16.mxu1 %v19965_v24  ;;  %v6571_v4 = vpop.xlane.xlu0 %6570 }
0x19b3   : > { %15100 = vpow2.f32 %v6594_v44  ;;  %v6583_v8 = vsub.f32 %v17698_v30, %v6571_v4 }
0x19b5   : > { %v6596_v55 = vmul.f32 1.442695, %v6583_v8  ;;  %v12895_v8 = vld [vmem:[%s19873_s7 + $0x270] sm:$0xff] }
0x19b8   : > { %14041 = vmatmul.mubr.msk.bf16.vlgmr.msra.gmra.mrb[200].mxu1 %vm1396_vm2, %v6902_v56 }
0x19b9   : > { %v15099_v0 = vpop.eup %15098  ;;  %14051 = vmatpush3.bf16.xpose.msra.mxu1 %v7013_v34  ;;  %14052 = vmatprep.mubr.msk.bf16.mxu1 %vm15579_vm1, %v19965_v24  ;;  %v12891_v34 = vld [vmem:[%s19873_s7 + $0x250] sm:$0xff] }
0x19ba   : > { %v6602_v13 = vsel %vm1594_vm3, %v15099_v0, 0.0  ;;  %14062 = vmatprep.subr.bf16.mxu1 %v19965_v24 }
0x19bb   : > { %6603 = vadd.xlane.f32.xlu0 %v6602_v13 }
0x19bd   : > { %v17734_v61 = vpop.eup %15100 }
0x19be   : > { %v6614_v7 = vsel %vm1594_vm3, %v17734_v61, 0.0 }
0x19bf   : > { %6615 = vadd.xlane.f32.xlu0 %v6614_v7 }
0x19c0   : > { %14053 = vmatmul.mubr.msk.bf16.vlgmr.msra.gmra.mrb[204].mxu1 %vm1396_vm2, %v7006_v12  ;;  %v12892_v12 = vld [vmem:[%s19873_s7 + $0x258] sm:$0xff] }
0x19c1   : > { %14064 = vmatprep.mubr.msk.bf16.mxu1 %vm15579_vm1, %v19965_v24 }
0x19d5   : > { %6646 = vrot.lane.b32.xlu0 %v16251_v53, %s19972_s0 }
0x19d9   : > { %6955 = vrot.lane.b32.xlu0 %v16331_v10, %s19973_s24 }
0x19dd   : > { %v6559_v58 = vpop.xlane.xlu1 %6558 }
0x19de   : > { %v6579_v50 = vsub.f32 %v17713_v20, %v6559_v58 }
0x19e0   : > { %v6588_v41 = vmul.f32 1.442695, %v6579_v50 }
0x19e2   : > { %15102 = vpow2.f32 %v6588_v41 }
0x19e3   : > { %15104 = vpow2.f32 %v6596_v55 }
0x19ec   : > { %v15103_v46 = vpop.eup %15102 }
0x19ed   : > { %v6605_v42 = vsel %vm1594_vm3, %v15103_v46, 0.0  ;;  %v17750_v51 = vpop.eup %15104 }
0x19ee   : > { %6606 = vadd.xlane.f32.xlu1 %v6605_v42  ;;  %v6617_v31 = vsel %vm1594_vm3, %v17750_v51, 0.0 }
0x19ff   : > { %6740 = vrot.lane.b32.xlu1 %v16331_v10, %s19972_s0 }
0x1a23   : > { %6618 = vadd.xlane.f32.xlu1 %v6617_v31  ;;  %v12896_v31 = vld [vmem:[%s19873_s7 + $0x278] sm:$0xff] }
0x1a34   : > { %6851 = vrot.lane.b32.xlu1 %v16251_v53, %s19973_s24 }
0x1a38   : > { %6849 = vrot.lane.b32.xlu1 %v16269_v63, %s19975_s22 }
0x1a3c   : > { %6953 = vrot.lane.b32.xlu1 %v16338_v1, %s19975_s22 }
0x1a48   : > { %v6604_v20 = vpop.xlane.xlu0 %6603 }
0x1a49   : > { %15106 = vrcp.f32 %v6604_v20 }
0x1a4c   : > { %v6616_v18 = vpop.xlane.xlu0 %6615 }
0x1a4e   : > { %v17760_v30 = vpop.f32.mrb[192].mxu1 }
0x1a4f   : > { %v14018_v14 = vpop.f32.mrb[193].mxu1 }
0x1a50   : > { %v6647_v29 = vpop.permute.xlu0 %6646  ;;  %v17762_v28 = vpop.f32.mrb[194].mxu1 }
0x1a51   : > { %14009 = vmatpush3.bf16.msra.mxu0 %v6647_v29  ;;  %v14019_v21 = vpop.f32.mrb[195].mxu1 }
0x1a52   : > { %14020 = vmatprep.subr.bf16.mxu0 %v19965_v24 }
0x1a53   : > { %v15107_v27 = vpop.eup %15106 }
0x1a54   : > { %v6634_v22 = vmul.f32 %v15107_v27, %v15099_v0 }
0x1a7b   : > { %v6607_v3 = vpop.xlane.xlu1 %6606 }
0x1a7c   : > { %15108 = vrcp.f32 %v6607_v3 }
0x1a7d   : > { %15110 = vrcp.f32 %v6616_v18  ;;  %v6956_v18 = vpop.permute.xlu0 %6955 }
0x1a7f   : > { %v6741_v13 = vpop.permute.xlu1 %6740 }
0x1a83   : > { %v17767_v52 = vpop.f32.mrb[196].mxu1 }
0x1a84   : > { %v14030_v45 = vpop.f32.mrb[197].mxu1 }
0x1a85   : > { %v17769_v5 = vpop.f32.mrb[198].mxu1 }
0x1a86   : > { %v15109_v37 = vpop.eup %15108  ;;  %v14031_v39 = vpop.f32.mrb[199].mxu1 }
0x1a87   : > { %v6635_v44 = vmul.f32 %v15109_v37, %v15103_v46  ;;  %v15111_v39 = vpop.eup %15110 }
0x1a89   : > { %v6642_v56 = vpack.c.bf16 %v6635_v44, %v6634_v22  ;;  %v6638_v44 = vmul.f32 %v15111_v39, %v17734_v61 }
0x1a8b   : > { %14011 = vmatmul.mubr.msk.bf16.vlgmr.msra.gmra.mrb[128].mxu0 %vm1594_vm3, %v6642_v56  ;;  %v6945_v7 = vpop.f32.mrb[200].mxu1 }
0x1a8c   : > { %14021 = vmatpush3.bf16.msra.mxu0 %v6741_v13  ;;  %v6946_v58 = vadd.f32 %v12891_v34, %v6945_v7  ;;  %v14042_v50 = vpop.f32.mrb[201].mxu1  ;;  %14022 = vmatprep.mubr.msk.bf16.mxu0 %vm15579_vm1, %v19965_v24 }
0x1a8d   : > { %v6948_v0 = vpop.f32.mrb[202].mxu1  ;;  %14032 = vmatprep.subr.bf16.mxu0 %v19965_v24  ;;  %v6961_v50 = vsel %vm1396_vm2, %v6956_v18, 0 }
0x1a8e   : > { %v6949_v41 = vadd.f32 %v12892_v12, %v6948_v0  ;;  %v14043_v46 = vpop.f32.mrb[203].mxu1  ;;  %v7062_v42 = vsel %vm1594_vm3, %v6946_v58, -inf }
0x1a8f   : > { %7063 = vmax.xlane.f32.xlu0 %v7062_v42 }
0x1a90   : > { %v7065_v4 = vsel %vm1594_vm3, %v6949_v41, -inf }
0x1a91   : > { %7066 = vmax.xlane.f32.xlu1 %v7065_v4 }
0x1a93   : > { %v7049_v55 = vpop.f32.mrb[204].mxu1 }
0x1a94   : > { %v7050_v20 = vadd.f32 %v12895_v8, %v7049_v55  ;;  %v14054_v14 = vpop.f32.mrb[205].mxu1 }
0x1a95   : > { %v7052_v29 = vpop.f32.mrb[206].mxu1 }
0x1a96   : > { %v7053_v21 = vadd.f32 %v12896_v31, %v7052_v29  ;;  %v14055_v3 = vpop.f32.mrb[207].mxu1  ;;  %v7074_v27 = vsel %vm1594_vm3, %v7050_v20, -inf }
0x1a97   : > { %7075 = vmax.xlane.f32.xlu0 %v7074_v27 }
0x1a98   : > { %v7077_v45 = vsel %vm1594_vm3, %v7053_v21, -inf }
0x1a9b   : > { %7078 = vmax.xlane.f32.xlu0 %v7077_v45 }
0x1ab0   : > { %v6619_v37 = vpop.xlane.xlu1 %6618 }
0x1ab1   : > { %15112 = vrcp.f32 %v6619_v37 }
0x1ab4   : > { %v6852_v34 = vpop.permute.xlu1 %6851 }
0x1ab5   : > { %v6857_v7 = vsel %vm1396_vm2, %v6852_v34, 0 }
0x1ab8   : > { %v6850_v12 = vpop.permute.xlu1 %6849 }
0x1abb   : > { %v15113_v22 = vpop.eup %15112 }
0x1abc   : > { %v6639_v56 = vmul.f32 %v15113_v22, %v17750_v51  ;;  %v6954_v61 = vpop.permute.xlu1 %6953 }
0x1abe   : > { %v6644_v13 = vpack.c.bf16 %v6639_v56, %v6638_v44 }
0x1ac0   : > { %14023 = vmatmul.mubr.msk.bf16.vlgmr.msra.gmra.mrb[132].mxu0 %vm1594_vm3, %v6644_v13 }
0x1ac1   : > { %14033 = vmatpush3.bf16.xpose.msra.mxu0 %v6857_v7  ;;  %14034 = vmatprep.mubr.msk.bf16.mxu0 %vm15579_vm1, %v19965_v24 }
0x1ac2   : > { %14044 = vmatprep.subr.bf16.mxu0 %v19965_v24 }
0x1ac8   : > { %14035 = vmatmul.mubr.msk.bf16.vlgmr.msra.gmra.mrb[136].mxu0 %vm1396_vm2, %v6850_v12 }
0x1ac9   : > { %14045 = vmatpush3.bf16.xpose.msra.mxu0 %v6961_v50  ;;  %14046 = vmatprep.mubr.msk.bf16.mxu0 %vm15579_vm1, %v19965_v24 }
0x1aca   : > { %14056 = vmatprep.subr.bf16.mxu0 %v19965_v24 }
0x1ad0   : > { %14047 = vmatmul.mubr.msk.bf16.vlgmr.msra.gmra.mrb[140].mxu0 %vm1396_vm2, %v6954_v61 }
0x1ad1   : > { %14058 = vmatprep.mubr.msk.bf16.mxu0 %vm15579_vm1, %v19965_v24 }
0x1b1c   : > { %v7064_v51 = vpop.xlane.xlu0 %7063 }
0x1b1d   : > { %v7082_v0 = vsub.f32 %v6946_v58, %v7064_v51 }
0x1b1e   : > { %v7067_v46 = vpop.xlane.xlu1 %7066 }
0x1b1f   : > { %v7092_v42 = vmul.f32 1.442695, %v7082_v0  ;;  %v7083_v4 = vsub.f32 %v6949_v41, %v7067_v46  ;;  %v12889_v0 = vld [vmem:[%s19873_s7 + $0x240] sm:$0xff] }
0x1b21   : > { %15114 = vpow2.f32 %v7092_v42  ;;  %v7094_v8 = vmul.f32 1.442695, %v7083_v4 }
0x1b23   : > { %15116 = vpow2.f32 %v7094_v8 }
0x1b24   : > { %v7076_v55 = vpop.xlane.xlu0 %7075 }
0x1b25   : > { %v7086_v31 = vsub.f32 %v7050_v20, %v7076_v55 }
0x1b27   : > { %v7100_v14 = vmul.f32 1.442695, %v7086_v31 }
0x1b28   : > { %v7079_v20 = vpop.xlane.xlu0 %7078 }
0x1b29   : > { %15118 = vpow2.f32 %v7100_v14  ;;  %v7087_v37 = vsub.f32 %v7053_v21, %v7079_v20  ;;  %v12890_v14 = vld [vmem:[%s19873_s7 + $0x248] sm:$0xff] }
0x1b2b   : > { %v17808_v29 = vpop.eup %15114  ;;  %v7102_v39 = vmul.f32 1.442695, %v7087_v37 }
0x1b2c   : > { %v7110_v3 = vsel %vm1594_vm3, %v17808_v29, 0.0 }
0x1b2d   : > { %v17812_v27 = vpop.eup %15116  ;;  %7111 = vadd.xlane.f32.xlu0 %v7110_v3  ;;  %15120 = vpow2.f32 %v7102_v39  ;;  %v12893_v3 = vld [vmem:[%s19873_s7 + $0x260] sm:$0xff] }
0x1b2e   : > { %v7113_v58 = vsel %vm1594_vm3, %v17812_v27, 0.0 }
0x1b2f   : > { %7114 = vadd.xlane.f32.xlu1 %v7113_v58 }
0x1b33   : > { %v17816_v41 = vpop.eup %15118 }
0x1b34   : > { %v7122_v45 = vsel %vm1594_vm3, %v17816_v41, 0.0 }
0x1b35   : > { %7123 = vadd.xlane.f32.xlu0 %v7122_v45  ;;  %v12894_v45 = vld [vmem:[%s19873_s7 + $0x268] sm:$0xff] }
0x1b37   : > { %v17832_v56 = vpop.eup %15120 }
0x1b38   : > { %v7125_v7 = vsel %vm1594_vm3, %v17832_v56, 0.0 }
0x1b40   : > { %7289 = vrot.lane.b32.xlu1 %v16360_v33, %s19963_s19 }
0x1b4b   : > { %7195 = vrot.lane.b32.xlu0 %v16290_v62, %s19963_s19 }
0x1b4f   : > { %7563 = vrot.lane.b32.xlu0 %v16290_v62, %s19976_s3 }
0x1b53   : > { %7614 = vrot.lane.b32.xlu0 %v16331_v10, %s19976_s3 }
0x1b57   : > { %7665 = vrot.lane.b32.xlu0 %v16360_v33, %s19976_s3 }
0x1b5e   : > { %v17830_v22 = vpop.f32.mrb[128].mxu0 }
0x1b5f   : > { %v14012_v44 = vpop.f32.mrb[129].mxu0 }
0x1b60   : > { %v17834_v34 = vpop.f32.mrb[130].mxu0 }
0x1b61   : > { %v14013_v13 = vpop.f32.mrb[131].mxu0 }
0x1b64   : > { %7126 = vadd.xlane.f32.xlu1 %v7125_v7 }
0x1b75   : > { %7512 = vrot.lane.b32.xlu1 %v16251_v53, %s19976_s3 }
0x1b79   : > { %7510 = vrot.lane.b32.xlu1 %v16269_v63, %s19977_s1 }
0x1b7d   : > { %7561 = vrot.lane.b32.xlu1 %v16314_v16, %s19977_s1 }
0x1b81   : > { %7612 = vrot.lane.b32.xlu1 %v16338_v1, %s19977_s1 }
0x1b85   : > { %7663 = vrot.lane.b32.xlu1 %v16366_v47, %s19977_s1 }
0x1b93   : > { %v17850_v18 = vpop.f32.mrb[132].mxu0 }
0x1b94   : > { %v14024_v12 = vpop.f32.mrb[133].mxu0 }
0x1b95   : > { %v17852_v50 = vpop.f32.mrb[134].mxu0 }
0x1b96   : > { %v14025_v51 = vpop.f32.mrb[135].mxu0 }
0x1b9b   : > { %v6893_v46 = vpop.f32.mrb[136].mxu0 }
0x1b9c   : > { %v17859_v42 = vadd.f32 %v12889_v0, %v6893_v46  ;;  %v14036_v4 = vpop.f32.mrb[137].mxu0 }
0x1b9d   : > { %v6896_v8 = vpop.f32.mrb[138].mxu0 }
0x1b9e   : > { %v14037_v55 = vpop.f32.mrb[139].mxu0  ;;  %v7056_v31 = vsel %vm1594_vm3, %v17859_v42, -inf  ;;  %v17872_v20 = vadd.f32 %v12890_v14, %v6896_v8 }
0x1b9f   : > { %7057 = vmax.xlane.f32.xlu0 %v7056_v31 }
0x1ba0   : > { %v7059_v51 = vsel %vm1594_vm3, %v17872_v20, -inf }
0x1ba3   : > { %v6997_v58 = vpop.f32.mrb[140].mxu0 }
0x1ba4   : > { %v17874_v37 = vadd.f32 %v12893_v3, %v6997_v58  ;;  %v14048_v39 = vpop.f32.mrb[141].mxu0 }
0x1ba5   : > { %v7000_v44 = vpop.f32.mrb[142].mxu0 }
0x1ba6   : > { %v17876_v13 = vadd.f32 %v12894_v45, %v7000_v44  ;;  %v14049_v7 = vpop.f32.mrb[143].mxu0  ;;  %v7068_v12 = vsel %vm1594_vm3, %v17874_v37, -inf }
0x1ba7   : > { %7069 = vmax.xlane.f32.xlu0 %v7068_v12 }
0x1ba8   : > { %v7071_v0 = vsel %vm1594_vm3, %v17876_v13, -inf }
0x1ba9   : > { %7060 = vmax.xlane.f32.xlu1 %v7059_v51 }
0x1bab   : > { %7072 = vmax.xlane.f32.xlu0 %v7071_v0 }
0x1bba   : > { %v7112_v46 = vpop.xlane.xlu0 %7111 }
0x1bbb   : > { %15122 = vrcp.f32 %v7112_v46 }
0x1bbc   : > { %v7115_v4 = vpop.xlane.xlu1 %7114 }
0x1bbd   : > { %15124 = vrcp.f32 %v7115_v4 }
0x1bc0   : > { %v7290_v39 = vpop.permute.xlu1 %7289 }
0x1bc2   : > { %v7124_v8 = vpop.xlane.xlu0 %7123 }
0x1bc3   : > { %15126 = vrcp.f32 %v7124_v8 }
0x1bc5   : > { %v15123_v55 = vpop.eup %15122 }
0x1bc6   : > { %v7196_v31 = vpop.permute.xlu0 %7195  ;;  %v7138_v3 = vmul.f32 %v15123_v55, %v17808_v29 }
0x1bc7   : > { %v15125_v14 = vpop.eup %15124  ;;  %14063 = vmatpush3.bf16.msra.mxu1 %v7196_v31 }
0x1bc8   : > { %v7139_v58 = vmul.f32 %v15125_v14, %v17812_v27  ;;  %14074 = vmatprep.subr.bf16.mxu1 %v19965_v24 }
0x1bca   : > { %v7145_v45 = vpack.c.bf16 %v7139_v58, %v7138_v3  ;;  %v7564_v4 = vpop.permute.xlu0 %7563 }
0x1bcb   : > { %v7569_v55 = vsel %vm1396_vm2, %v7564_v4, 0 }
0x1bcc   : > { %14065 = vmatmul.mubr.msk.bf16.vlgmr.msra.gmra.mrb[208].mxu1 %vm1594_vm3, %v7145_v45 }
0x1bcd   : > { %14075 = vmatpush3.bf16.msra.mxu1 %v7290_v39  ;;  %14076 = vmatprep.mubr.msk.bf16.mxu1 %vm15579_vm1, %v19965_v24  ;;  %v15127_v7 = vpop.eup %15126 }
0x1bce   : > { %14100 = vmatprep.subr.bf16.mxu1 %v19965_v24  ;;  %v7142_v29 = vmul.f32 %v15127_v7, %v17816_v41  ;;  %v7615_v41 = vpop.permute.xlu0 %7614 }
0x1bcf   : > { %v7620_v31 = vsel %vm1396_vm2, %v7615_v41, 0 }
0x1bd2   : > { %v7666_v14 = vpop.permute.xlu0 %7665 }
0x1bd3   : > { %v7671_v58 = vsel %vm1396_vm2, %v7666_v14, 0 }
0x1bf1   : > { %v7127_v44 = vpop.xlane.xlu1 %7126 }
0x1bf2   : > { %15128 = vrcp.f32 %v7127_v44 }
0x1bf5   : > { %v7513_v51 = vpop.permute.xlu1 %7512 }
0x1bf6   : > { %v7518_v46 = vsel %vm1396_vm2, %v7513_v51, 0 }
0x1bf9   : > { %v7511_v8 = vpop.permute.xlu1 %7510 }
0x1bfc   : > { %v15129_v12 = vpop.eup %15128 }
0x1bfd   : > { %v7143_v27 = vmul.f32 %v15129_v12, %v17832_v56  ;;  %v7562_v56 = vpop.permute.xlu1 %7561 }
0x1bff   : > { %v7147_v0 = vpack.c.bf16 %v7143_v27, %v7142_v29 }
0x1c01   : > { %14077 = vmatmul.mubr.msk.bf16.vlgmr.msra.gmra.mrb[212].mxu1 %vm1594_vm3, %v7147_v0  ;;  %v7613_v3 = vpop.permute.xlu1 %7612 }
0x1c02   : > { %14101 = vmatpush3.bf16.xpose.msra.mxu1 %v7518_v46  ;;  %14102 = vmatprep.mubr.msk.bf16.mxu1 %vm15579_vm1, %v19965_v24 }
0x1c03   : > { %14106 = vmatprep.subr.bf16.mxu1 %v19965_v24 }
0x1c05   : > { %v7664_v45 = vpop.permute.xlu1 %7663 }
0x1c09   : > { %14103 = vmatmul.mubr.msk.bf16.vlgmr.msra.gmra.mrb[216].mxu1 %vm1396_vm2, %v7511_v8 }
0x1c0a   : > { %14107 = vmatpush3.bf16.xpose.msra.mxu1 %v7569_v55  ;;  %14108 = vmatprep.mubr.msk.bf16.mxu1 %vm15579_vm1, %v19965_v24 }
0x1c0b   : > { %14112 = vmatprep.subr.bf16.mxu1 %v19965_v24 }
0x1c11   : > { %14109 = vmatmul.mubr.msk.bf16.vlgmr.msra.gmra.mrb[220].mxu1 %vm1396_vm2, %v7562_v56 }
0x1c12   : > { %14113 = vmatpush3.bf16.xpose.msra.mxu1 %v7620_v31  ;;  %14114 = vmatprep.mubr.msk.bf16.mxu1 %vm15579_vm1, %v19965_v24 }
0x1c13   : > { %14118 = vmatprep.subr.bf16.mxu1 %v19965_v24 }
0x1c19   : > { %14115 = vmatmul.mubr.msk.bf16.vlgmr.msra.gmra.mrb[224].mxu1 %vm1396_vm2, %v7613_v3 }
0x1c1a   : > { %14119 = vmatpush3.bf16.xpose.msra.mxu1 %v7671_v58  ;;  %14120 = vmatprep.mubr.msk.bf16.mxu1 %vm15579_vm1, %v19965_v24 }
0x1c1b   : > { %14130 = vmatprep.subr.bf16.mxu1 %v19965_v24 }
0x1c21   : > { %14121 = vmatmul.mubr.msk.bf16.vlgmr.msra.gmra.mrb[228].mxu1 %vm1396_vm2, %v7664_v45 }
0x1c22   : > { %14132 = vmatprep.mubr.msk.bf16.mxu1 %vm15579_vm1, %v19965_v24 }
0x1c2c   : > { %v7058_v39 = vpop.xlane.xlu0 %7057 }
0x1c2d   : > { %v7080_v44 = vsub.f32 %v17859_v42, %v7058_v39 }
0x1c2f   : > { %v7088_v7 = vmul.f32 1.442695, %v7080_v44 }
0x1c31   : > { %15130 = vpow2.f32 %v7088_v7 }
0x1c34   : > { %v7070_v12 = vpop.xlane.xlu0 %7069 }
0x1c35   : > { %v7084_v29 = vsub.f32 %v17874_v37, %v7070_v12 }
0x1c36   : > { %v7061_v27 = vpop.xlane.xlu1 %7060 }
0x1c37   : > { %v7096_v51 = vmul.f32 1.442695, %v7084_v29  ;;  %v7081_v0 = vsub.f32 %v17872_v20, %v7061_v27 }
0x1c38   : > { %v7073_v46 = vpop.xlane.xlu0 %7072 }
0x1c39   : > { %15132 = vpow2.f32 %v7096_v51  ;;  %v7090_v4 = vmul.f32 1.442695, %v7081_v0  ;;  %v7085_v8 = vsub.f32 %v17876_v13, %v7073_v46 }
0x1c3b   : > { %v15131_v55 = vpop.eup %15130  ;;  %15134 = vpow2.f32 %v7090_v4  ;;  %v7098_v41 = vmul.f32 1.442695, %v7085_v8 }
0x1c3c   : > { %v7104_v56 = vsel %vm1594_vm3, %v15131_v55, 0.0 }
0x1c3d   : > { %15136 = vpow2.f32 %v7098_v41  ;;  %7105 = vadd.xlane.f32.xlu0 %v7104_v56  ;;  %v12913_v56 = vld [vmem:[%s19873_s7 + $0x280] sm:$0xff] }
0x1c43   : > { %v17921_v42 = vpop.eup %15132 }
0x1c44   : > { %v7116_v37 = vsel %vm1594_vm3, %v17921_v42, 0.0 }
0x1c45   : > { %v15135_v31 = vpop.eup %15134  ;;  %7117 = vadd.xlane.f32.xlu0 %v7116_v37 }
0x1c46   : > { %v7107_v20 = vsel %vm1594_vm3, %v15135_v31, 0.0 }
0x1c47   : > { %v15137_v14 = vpop.eup %15136  ;;  %7108 = vadd.xlane.f32.xlu1 %v7107_v20  ;;  %v12914_v20 = vld [vmem:[%s19873_s7 + $0x288] sm:$0xff] }
0x1c48   : > { %v7119_v13 = vsel %vm1594_vm3, %v15137_v14, 0.0 }
0x1c4b   : > { %7120 = vadd.xlane.f32.xlu1 %v7119_v13 }
0x1c5b   : > { %7148 = vrot.lane.b32.xlu0 %v16251_v53, %s19963_s19 }
0x1c5c   : > { %7242 = vrot.lane.b32.xlu1 %v16331_v10, %s19963_s19 }
0x1c9f   : > { %v17931_v3 = vpop.f32.mrb[208].mxu1 }
0x1ca0   : > { %v14066_v58 = vpop.f32.mrb[209].mxu1 }
0x1ca1   : > { %v17933_v45 = vpop.f32.mrb[210].mxu1 }
0x1ca2   : > { %v14067_v44 = vpop.f32.mrb[211].mxu1 }
0x1cca   : > { %v7106_v7 = vpop.xlane.xlu0 %7105 }
0x1ccb   : > { %15138 = vrcp.f32 %v7106_v7 }
0x1cd2   : > { %v7118_v12 = vpop.xlane.xlu0 %7117 }
0x1cd4   : > { %v7109_v29 = vpop.xlane.xlu1 %7108  ;;  %v17937_v27 = vpop.f32.mrb[212].mxu1 }
0x1cd5   : > { %15140 = vrcp.f32 %v7109_v29  ;;  %v14078_v51 = vpop.f32.mrb[213].mxu1  ;;  %v15139_v13 = vpop.eup %15138 }
0x1cd6   : > { %v7149_v0 = vpop.permute.xlu0 %7148  ;;  %v17939_v46 = vpop.f32.mrb[214].mxu1 }
0x1cd7   : > { %14057 = vmatpush3.bf16.msra.mxu0 %v7149_v0  ;;  %v14079_v8 = vpop.f32.mrb[215].mxu1 }
0x1cd8   : > { %v7121_v41 = vpop.xlane.xlu1 %7120  ;;  %14068 = vmatprep.subr.bf16.mxu0 %v19965_v24 }
0x1cd9   : > { %15142 = vrcp.f32 %v7121_v41  ;;  %v7136_v41 = vmul.f32 %v15139_v13, %v15131_v55  ;;  %v12916_v55 = vld [vmem:[%s19873_s7 + $0x298] sm:$0xff] }
0x1cda   : > { %15144 = vrcp.f32 %v7118_v12 }
0x1cdc   : > { %v7554_v37 = vpop.f32.mrb[216].mxu1 }
0x1cdd   : > { %v17950_v58 = vadd.f32 %v12913_v56, %v7554_v37  ;;  %v14104_v44 = vpop.f32.mrb[217].mxu1  ;;  %v12915_v56 = vld [vmem:[%s19873_s7 + $0x290] sm:$0xff] }
0x1cde   : > { %v7557_v7 = vpop.f32.mrb[218].mxu1  ;;  %v7243_v44 = vpop.permute.xlu1 %7242 }
0x1cdf   : > { %v15141_v29 = vpop.eup %15140  ;;  %v17952_v51 = vadd.f32 %v12914_v20, %v7557_v7  ;;  %v14105_v0 = vpop.f32.mrb[219].mxu1  ;;  %v7714_v8 = vsel %vm1594_vm3, %v17950_v58, -inf }
0x1ce0   : > { %v7137_v11 = vmul.f32 %v15141_v29, %v15135_v31  ;;  %7715 = vmax.xlane.f32.xlu1 %v7714_v8 }
0x1ce1   : > { %v7717_v12 = vsel %vm1594_vm3, %v17952_v51, -inf }
0x1ce2   : > { %7718 = vmax.xlane.f32.xlu0 %v7717_v12  ;;  %v7144_v61 = vpack.c.bf16 %v7137_v11, %v7136_v41 }
0x1ce3   : > { %v15143_v37 = vpop.eup %15142 }
0x1ce4   : > { %14059 = vmatmul.mubr.msk.bf16.vlgmr.msra.gmra.mrb[144].mxu0 %vm1594_vm3, %v7144_v61  ;;  %v7605_v20 = vpop.f32.mrb[220].mxu1  ;;  %v15145_v31 = vpop.eup %15144  ;;  %v7141_v11 = vmul.f32 %v15143_v37, %v15137_v14  ;;  %v12918_v14 = vld [vmem:[%s19873_s7 + $0x2a8] sm:$0xff] }
0x1ce5   : > { %14069 = vmatpush3.bf16.msra.mxu0 %v7243_v44  ;;  %v7606_v13 = vadd.f32 %v12915_v56, %v7605_v20  ;;  %v14110_v7 = vpop.f32.mrb[221].mxu1  ;;  %14070 = vmatprep.mubr.msk.bf16.mxu0 %vm15579_vm1, %v19965_v24  ;;  %v7140_v61 = vmul.f32 %v15145_v31, %v17921_v42  ;;  %v12917_v56 = vld [vmem:[%s19873_s7 + $0x2a0] sm:$0xff] }
0x1ce6   : > { %v7608_v29 = vpop.f32.mrb[222].mxu1 }
0x1ce7   : > { %v7609_v0 = vadd.f32 %v12916_v55, %v7608_v29  ;;  %v14111_v8 = vpop.f32.mrb[223].mxu1  ;;  %v7720_v41 = vsel %vm1594_vm3, %v7606_v13, -inf  ;;  %v7146_v60 = vpack.c.bf16 %v7141_v11, %v7140_v61 }
0x1ce8   : > { %7721 = vmax.xlane.f32.xlu0 %v7720_v41  ;;  %v12920_v8 = vld [vmem:[%s19873_s7 + $0x2b8] sm:$0xff] }
0x1ce9   : > { %v7723_v12 = vsel %vm1594_vm3, %v7609_v0, -inf }
0x1cea   : > { %7724 = vmax.xlane.f32.xlu1 %v7723_v12 }
0x1cec   : > { %14071 = vmatmul.mubr.msk.bf16.vlgmr.msra.gmra.mrb[148].mxu0 %vm1594_vm3, %v7146_v60  ;;  %v7656_v44 = vpop.f32.mrb[224].mxu1  ;;  %v12919_v60 = vld [vmem:[%s19873_s7 + $0x2b0] sm:$0xff] }
0x1ced   : > { %v7657_v37 = vadd.f32 %v12917_v56, %v7656_v44  ;;  %v14116_v20 = vpop.f32.mrb[225].mxu1 }
0x1cee   : > { %v7659_v55 = vpop.f32.mrb[226].mxu1 }
0x1cef   : > { %v7660_v42 = vadd.f32 %v12918_v14, %v7659_v55  ;;  %v14117_v31 = vpop.f32.mrb[227].mxu1  ;;  %v7726_v7 = vsel %vm1594_vm3, %v7657_v37, -inf  ;;  %v7340_v55 = vld [vmem:[%s19871_s5 + $0x4] sm:$0xf] }
0x1cf0   : > { %7727 = vmax.xlane.f32.xlu0 %v7726_v7  ;;  %14640 = vmatprep.subr.msk.bf16.mxu0 %vm2394_vm4, %v7340_v55  ;;  %v7354_v31 = vsel %vm2394_vm4, %v7340_v55, 0  ;;  %v17998_v7 = vld [vmem:[%s19871_s5] sm:$0xf] }
0x1cf1   : > { %v7729_v11 = vsel %vm1594_vm3, %v7660_v42, -inf  ;;  %14081 = vmatpush3.bf16.msra.mxu0 %v7354_v31 }
0x1cf2   : > { %7730 = vmax.xlane.f32.xlu1 %v7729_v11  ;;  %14641 = vmatprep.subr.msk.bf16.mxu0 %vm2394_vm4, %v17998_v7 }
0x1cf4   : > { %v7707_v29 = vpop.f32.mrb[228].mxu1 }
0x1cf5   : > { %v7708_v41 = vadd.f32 %v12919_v60, %v7707_v29  ;;  %v14122_v61 = vpop.f32.mrb[229].mxu1 }
0x1cf6   : > { %v7710_v12 = vpop.f32.mrb[230].mxu1 }
0x1cf7   : > { %v17985_v56 = vadd.f32 %v12920_v8, %v7710_v12  ;;  %v14123_v44 = vpop.f32.mrb[231].mxu1  ;;  %v7732_v14 = vsel %vm1594_vm3, %v7708_v41, -inf }
0x1cf8   : > { %7733 = vmax.xlane.f32.xlu0 %v7732_v14 }
0x1cf9   : > { %v7735_v20 = vsel %vm1594_vm3, %v17985_v56, -inf }
0x1cfa   : > { %7736 = vmax.xlane.f32.xlu1 %v7735_v20 }
0x1d6d   : > { %v7716_v11 = vpop.xlane.xlu1 %7715 }
0x1d6e   : > { %v7738_v60 = vsub.f32 %v17950_v58, %v7716_v11 }
0x1d6f   : > { %v7719_v29 = vpop.xlane.xlu0 %7718 }
0x1d70   : > { %v7746_v8 = vmul.f32 1.442695, %v7738_v60  ;;  %v7739_v61 = vsub.f32 %v17952_v51, %v7719_v29 }
0x1d72   : > { %15146 = vpow2.f32 %v7746_v8  ;;  %v7748_v12 = vmul.f32 1.442695, %v7739_v61 }
0x1d74   : > { %15148 = vpow2.f32 %v7748_v12 }
0x1d75   : > { %v7722_v44 = vpop.xlane.xlu0 %7721 }
0x1d76   : > { %v7740_v14 = vsub.f32 %v7606_v13, %v7722_v44 }
0x1d77   : > { %v7725_v20 = vpop.xlane.xlu1 %7724 }
0x1d78   : > { %v7750_v55 = vmul.f32 1.442695, %v7740_v14  ;;  %v7741_v31 = vsub.f32 %v7609_v0, %v7725_v20 }
0x1d7a   : > { %15150 = vpow2.f32 %v7750_v55  ;;  %v7752_v21 = vmul.f32 1.442695, %v7741_v31 }
0x1d7c   : > { %v18004_v4 = vpop.eup %15146  ;;  %15152 = vpow2.f32 %v7752_v21 }
0x1d7d   : > { %v7728_v39 = vpop.xlane.xlu0 %7727  ;;  %v7762_v58 = vsel %vm1594_vm3, %v18004_v4, 0.0 }
0x1d7e   : > { %v18008_v11 = vpop.eup %15148  ;;  %v7742_v51 = vsub.f32 %v7657_v37, %v7728_v39  ;;  %7763 = vadd.xlane.f32.xlu0 %v7762_v58 }
0x1d7f   : > { %v7731_v60 = vpop.xlane.xlu1 %7730  ;;  %v7765_v13 = vsel %vm1594_vm3, %v18008_v11, 0.0 }
0x1d80   : > { %v7754_v29 = vmul.f32 1.442695, %v7742_v51  ;;  %v7743_v8 = vsub.f32 %v7660_v42, %v7731_v60  ;;  %7766 = vadd.xlane.f32.xlu1 %v7765_v13 }
0x1d82   : > { %15154 = vpow2.f32 %v7754_v29  ;;  %v7756_v0 = vmul.f32 1.442695, %v7743_v8 }
0x1d84   : > { %v18012_v61 = vpop.eup %15150  ;;  %15156 = vpow2.f32 %v7756_v0 }
0x1d85   : > { %v7734_v21 = vpop.xlane.xlu0 %7733  ;;  %v7768_v12 = vsel %vm1594_vm3, %v18012_v61, 0.0 }
0x1d86   : > { %v18016_v44 = vpop.eup %15152  ;;  %v7744_v39 = vsub.f32 %v7708_v41, %v7734_v21  ;;  %7769 = vadd.xlane.f32.xlu0 %v7768_v12 }
0x1d87   : > { %v7771_v37 = vsel %vm1594_vm3, %v18016_v44, 0.0  ;;  %v7737_v51 = vpop.xlane.xlu1 %7736 }
0x1d88   : > { %v7758_v14 = vmul.f32 1.442695, %v7744_v39  ;;  %7772 = vadd.xlane.f32.xlu1 %v7771_v37  ;;  %v7745_v60 = vsub.f32 %v17985_v56, %v7737_v51  ;;  %v7434_v39 = vsel %vm2394_vm4, %v17998_v7, 0  ;;  %v19988_v56 = vpack.c.bf16 %v17933_v45, %v17931_v3 }
0x1d89   : > { %v19990_v3 = vpack.c.bf16 %v17834_v34, %v17830_v22  ;;  %v19992_v51 = vpack.c.bf16 %v17852_v50, %v17850_v18 }
0x1d8a   : > { %15158 = vpow2.f32 %v7758_v14  ;;  %v7760_v13 = vmul.f32 1.442695, %v7745_v60 }
0x1d8c   : > { %v18020_v42 = vpop.eup %15154  ;;  %15160 = vpow2.f32 %v7760_v13 }
0x1d8d   : > { %v7774_v20 = vsel %vm1594_vm3, %v18020_v42, 0.0 }
0x1d8e   : > { %v18024_v55 = vpop.eup %15156  ;;  %7775 = vadd.xlane.f32.xlu0 %v7774_v20 }
0x1d8f   : > { %v7777_v31 = vsel %vm1594_vm3, %v18024_v55, 0.0 }
0x1d90   : > { %7778 = vadd.xlane.f32.xlu1 %v7777_v31 }
0x1d94   : > { %v18028_v41 = vpop.eup %15158 }
0x1d95   : > { %v7780_v58 = vsel %vm1594_vm3, %v18028_v41, 0.0 }
0x1d96   : > { %7781 = vadd.xlane.f32.xlu0 %v7780_v58  ;;  %v18056_v7 = vpop.eup %15160  ;;  %v19991_v58 = vpack.c.bf16 %v17762_v28, %v17760_v30 }
0x1d97   : > { %v7783_v45 = vsel %vm1594_vm3, %v18056_v7, 0.0 }
0x1da1   : > { %7853 = vrot.lane.b32.xlu1 %v16290_v62, %s19978_s26 }
0x1da5   : > { %7900 = vrot.lane.b32.xlu1 %v16331_v10, %s19978_s26 }
0x1dac   : > { %7806 = vrot.lane.b32.xlu0 %v16251_v53, %s19978_s26 }
0x1db0   : > { %8098 = vrot.lane.b32.xlu0 %v16251_v53, %s19979_s28 }
0x1db4   : > { %8149 = vrot.lane.b32.xlu0 %v16290_v62, %s19979_s28 }
0x1db7   : > { %v7188_v29 = vpop.f32.mrb[144].mxu0 }
0x1db8   : > { %v14060_v8 = vpop.f32.mrb[145].mxu0  ;;  %8147 = vrot.lane.b32.xlu0 %v16314_v16, %s19980_s27 }
0x1db9   : > { %v7191_v0 = vpop.f32.mrb[146].mxu0 }
0x1dba   : > { %v7336_v21 = vpack.c.bf16 %v7191_v0, %v7188_v29  ;;  %v14061_v12 = vpop.f32.mrb[147].mxu0 }
0x1dbc   : > { %14082 = vmatprep.mubr.msk.bf16.mxu0 %vm1396_vm2, %v7336_v21  ;;  %8198 = vrot.lane.b32.xlu0 %v16338_v1, %s19980_s27  ;;  %v19989_v1 = vpack.c.bf16 %v17939_v46, %v17937_v27  ;;  %v19993_v27 = vpack.c.bf16 %v17769_v5, %v17767_v52 }
0x1dbd   : > { %14083 = vmatmul.mubr.msk.bf16.vlgmr.msra.gmra.mrb[152].mxu0 %vm1396_vm2, %v19988_v56 }
0x1dbe   : > { %14091 = vmatpush3.bf16.msra.mxu0 %v7434_v39 }
0x1dbf   : > { %v7282_v37 = vpop.f32.mrb[148].mxu0  ;;  %14124 = vmatprep.subr.bf16.mxu0 %v19965_v24 }
0x1dc0   : > { %v14072_v16 = vpop.f32.mrb[149].mxu0 }
0x1dc1   : > { %v7285_v14 = vpop.f32.mrb[150].mxu0 }
0x1dc2   : > { %v7338_v20 = vpack.c.bf16 %v7285_v14, %v7282_v37  ;;  %v14073_v31 = vpop.f32.mrb[151].mxu0 }
0x1dc4   : > { %14086 = vmatprep.mubr.msk.bf16.mxu0 %vm1396_vm2, %v7338_v20 }
0x1dc5   : > { %14087 = vmatmul.mubr.msk.bf16.gmra.mrb[156].mxu0 %vm1396_vm2, %v19989_v1 }
0x1dc6   : > { %14092 = vmatprep.mubr.msk.bf16.mxu0 %vm1396_vm2, %v19990_v3 }
0x1dc9   : > { %7784 = vadd.xlane.f32.xlu1 %v7783_v45 }
0x1dcd   : > { %14093 = vmatmul.mubr.msk.bf16.vlgmr.msra.gmra.mrb[152].mxu0 %vm1396_vm2, %v19991_v58 }
0x1dce   : > { %14096 = vmatprep.mubr.msk.bf16.mxu0 %vm1396_vm2, %v19992_v51 }
0x1dd5   : > { %14097 = vmatmul.mubr.msk.bf16.gmra.mrb[156].mxu0 %vm1396_vm2, %v19993_v27 }
0x1dd6   : > { %14126 = vmatprep.mubr.msk.bf16.mxu0 %vm15579_vm1, %v19965_v24 }
0x1dda   : > { %7947 = vrot.lane.b32.xlu1 %v16360_v33, %s19978_s26 }
0x1dde   : > { %8096 = vrot.lane.b32.xlu1 %v16269_v63, %s19980_s27 }
0x1de2   : > { %8200 = vrot.lane.b32.xlu1 %v16331_v10, %s19979_s28 }
0x1de6   : > { %8251 = vrot.lane.b32.xlu1 %v16360_v33, %s19979_s28 }
0x1dea   : > { %8249 = vrot.lane.b32.xlu1 %v16366_v47, %s19980_s27 }
0x1e0b   : > { %v7764_v30 = vpop.xlane.xlu0 %7763 }
0x1e0d   : > { %v7767_v28 = vpop.xlane.xlu1 %7766 }
0x1e13   : > { %v7770_v52 = vpop.xlane.xlu0 %7769 }
0x1e14   : > { %15162 = vrcp.f32 %v7770_v52  ;;  %v7998_v52 = vld [vmem:[%s19871_s5 + $0x8] sm:$0xf] }
0x1e15   : > { %v7773_v5 = vpop.xlane.xlu1 %7772 }
0x1e16   : > { %15164 = vrcp.f32 %v7773_v5  ;;  %v8012_v5 = vsel %vm2394_vm4, %v7998_v52, 0 }
0x1e17   : > { %15166 = vrcp.f32 %v7767_v28 }
0x1e18   : > { %15168 = vrcp.f32 %v7764_v30 }
0x1e1b   : > { %v7776_v63 = vpop.xlane.xlu0 %7775 }
0x1e1d   : > { %v7779_v22 = vpop.xlane.xlu1 %7778 }
0x1e1e   : > { %v15163_v34 = vpop.eup %15162  ;;  %15170 = vrcp.f32 %v7779_v22 }
0x1e1f   : > { %v7796_v50 = vmul.f32 %v15163_v34, %v18012_v61  ;;  %15172 = vrcp.f32 %v7776_v63 }
0x1e20   : > { %v15165_v18 = vpop.eup %15164 }
0x1e21   : > { %v7797_v46 = vmul.f32 %v15165_v18, %v18016_v44  ;;  %v7854_v60 = vpop.permute.xlu1 %7853  ;;  %v15167_v13 = vpop.eup %15166 }
0x1e22   : > { %14131 = vmatpush3.bf16.msra.mxu1 %v7854_v60  ;;  %v15169_v8 = vpop.eup %15168  ;;  %v7795_v0 = vmul.f32 %v15167_v13, %v18008_v11 }
0x1e23   : > { %v7782_v47 = vpop.xlane.xlu0 %7781  ;;  %v7803_v29 = vpack.c.bf16 %v7797_v46, %v7796_v50  ;;  %14142 = vmatprep.subr.bf16.mxu1 %v19965_v24  ;;  %v7794_v61 = vmul.f32 %v15169_v8, %v18004_v4 }
0x1e24   : > { %15174 = vrcp.f32 %v7782_v47 }
0x1e25   : > { %14133 = vmatmul.mubr.msk.bf16.vlgmr.msra.gmra.mrb[232].mxu1 %vm1594_vm3, %v7803_v29  ;;  %v7802_v44 = vpack.c.bf16 %v7795_v0, %v7794_v61  ;;  %v7901_v39 = vpop.permute.xlu1 %7900 }
0x1e26   : > { %14144 = vmatprep.mubr.msk.bf16.mxu1 %vm15579_vm1, %v19965_v24 }
0x1e27   : > { %v7807_v21 = vpop.permute.xlu0 %7806 }
0x1e28   : > { %14125 = vmatpush3.bf16.msra.mxu0 %v7807_v21  ;;  %v15171_v12 = vpop.eup %15170 }
0x1e29   : > { %14136 = vmatprep.subr.bf16.mxu0 %v19965_v24  ;;  %v15173_v56 = vpop.eup %15172  ;;  %v7799_v11 = vmul.f32 %v15171_v12, %v18024_v55 }
0x1e2a   : > { %v7798_v37 = vmul.f32 %v15173_v56, %v18020_v42 }
0x1e2b   : > { %14127 = vmatmul.mubr.msk.bf16.vlgmr.msra.gmra.mrb[160].mxu0 %vm1594_vm3, %v7802_v44  ;;  %v8099_v45 = vpop.permute.xlu0 %8098 }
0x1e2c   : > { %14137 = vmatpush3.bf16.msra.mxu0 %v7901_v39  ;;  %14138 = vmatprep.mubr.msk.bf16.mxu0 %vm15579_vm1, %v19965_v24  ;;  %v7804_v16 = vpack.c.bf16 %v7799_v11, %v7798_v37  ;;  %v8104_v42 = vsel %vm1396_vm2, %v8099_v45, 0 }
0x1e2d   : > { %14642 = vmatprep.subr.msk.bf16.mxu0 %vm2394_vm4, %v7998_v52 }
0x1e2e   : > { %v15175_v20 = vpop.eup %15174 }
0x1e2f   : > { %v7800_v1 = vmul.f32 %v15175_v20, %v18028_v41  ;;  %v8150_v51 = vpop.permute.xlu0 %8149 }
0x1e30   : > { %v8155_v30 = vsel %vm1396_vm2, %v8150_v51, 0 }
0x1e33   : > { %14139 = vmatmul.mubr.msk.bf16.vlgmr.msra.gmra.mrb[164].mxu0 %vm1594_vm3, %v7804_v16 }
0x1e34   : > { %14149 = vmatpush3.bf16.msra.mxu0 %v8012_v5 }
0x1e35   : > { %14170 = vmatprep.subr.bf16.mxu0 %v19965_v24 }
0x1e56   : > { %v7785_v4 = vpop.xlane.xlu1 %7784 }
0x1e57   : > { %15176 = vrcp.f32 %v7785_v4 }
0x1e5a   : > { %v7948_v14 = vpop.permute.xlu1 %7947 }
0x1e5b   : > { %14143 = vmatpush3.bf16.msra.mxu1 %v7948_v14  ;;  %v12933_v14 = vld [vmem:[%s19873_s7 + $0x2c0] sm:$0xff] }
0x1e5c   : > { %14158 = vmatprep.subr.bf16.mxu1 %v19965_v24 }
0x1e5e   : > { %v8097_v58 = vpop.permute.xlu1 %8096 }
0x1e61   : > { %v15177_v31 = vpop.eup %15176 }
0x1e62   : > { %v7801_v3 = vmul.f32 %v15177_v31, %v18056_v7  ;;  %v8201_v27 = vpop.permute.xlu1 %8200  ;;  %v8148_v7 = vpop.permute.xlu0 %8147  ;;  %v12934_v31 = vld [vmem:[%s19873_s7 + $0x2c8] sm:$0xff] }
0x1e63   : > { %v8206_v0 = vsel %vm1396_vm2, %v8201_v27, 0 }
0x1e64   : > { %v7805_v55 = vpack.c.bf16 %v7801_v3, %v7800_v1 }
0x1e66   : > { %14145 = vmatmul.mubr.msk.bf16.vlgmr.msra.gmra.mrb[236].mxu1 %vm1594_vm3, %v7805_v55  ;;  %v8252_v41 = vpop.permute.xlu1 %8251  ;;  %v8199_v51 = vpop.permute.xlu0 %8198 }
0x1e67   : > { %14159 = vmatpush3.bf16.xpose.msra.mxu1 %v8104_v42  ;;  %14160 = vmatprep.mubr.msk.bf16.mxu1 %vm15579_vm1, %v19965_v24  ;;  %v8257_v28 = vsel %vm1396_vm2, %v8252_v41, 0 }
0x1e68   : > { %14164 = vmatprep.subr.bf16.mxu1 %v19965_v24 }
0x1e6a   : > { %v8250_v22 = vpop.permute.xlu1 %8249 }
0x1e6e   : > { %14161 = vmatmul.mubr.msk.bf16.vlgmr.msra.gmra.mrb[240].mxu1 %vm1396_vm2, %v8097_v58 }
0x1e6f   : > { %14165 = vmatpush3.bf16.xpose.msra.mxu1 %v8155_v30  ;;  %14166 = vmatprep.mubr.msk.bf16.mxu1 %vm15579_vm1, %v19965_v24  ;;  %v12935_v30 = vld [vmem:[%s19873_s7 + $0x2d0] sm:$0xff] }
0x1e70   : > { %14176 = vmatprep.subr.bf16.mxu1 %v19965_v24 }
0x1e76   : > { %14167 = vmatmul.mubr.msk.bf16.vlgmr.msra.gmra.mrb[244].mxu1 %vm1396_vm2, %v8148_v7  ;;  %v12936_v7 = vld [vmem:[%s19873_s7 + $0x2d8] sm:$0xff] }
0x1e77   : > { %14177 = vmatpush3.bf16.xpose.msra.mxu1 %v8257_v28  ;;  %14178 = vmatprep.mubr.msk.bf16.mxu1 %vm15579_vm1, %v19965_v24 }
0x1e78   : > { %14188 = vmatprep.subr.bf16.mxu1 %v19965_v24 }
0x1e7e   : > { %14179 = vmatmul.mubr.msk.bf16.vlgmr.msra.gmra.mrb[248].mxu1 %vm1396_vm2, %v8250_v22 }
0x1e7f   : > { %14190 = vmatprep.mubr.msk.bf16.mxu1 %vm15579_vm1, %v19965_v24 }
0x1ef8   : > { %v7893_v34 = vpop.f32.mrb[232].mxu1 }
0x1ef9   : > { %v14134_v63 = vpop.f32.mrb[233].mxu1 }
0x1efa   : > { %v7896_v18 = vpop.f32.mrb[234].mxu1 }
0x1efb   : > { %v7995_v50 = vpack.c.bf16 %v7896_v18, %v7893_v34  ;;  %v14135_v46 = vpop.f32.mrb[235].mxu1 }
0x1efe   : > { %v7846_v60 = vpop.f32.mrb[160].mxu0 }
0x1eff   : > { %v14128_v13 = vpop.f32.mrb[161].mxu0 }
0x1f00   : > { %v7849_v47 = vpop.f32.mrb[162].mxu0 }
0x1f01   : > { %v7994_v29 = vpack.c.bf16 %v7849_v47, %v7846_v60  ;;  %v14129_v8 = vpop.f32.mrb[163].mxu0 }
0x1f03   : > { %14150 = vmatprep.mubr.msk.bf16.mxu0 %vm1396_vm2, %v7994_v29 }
0x1f04   : > { %14151 = vmatmul.mubr.msk.bf16.vlgmr.msra.gmra.mrb[152].mxu0 %vm1396_vm2, %v7995_v50 }
0x1f05   : > { %14171 = vmatpush3.bf16.xpose.msra.mxu0 %v8206_v0 }
0x1f06   : > { %v7940_v61 = vpop.f32.mrb[164].mxu0  ;;  %14182 = vmatprep.subr.bf16.mxu0 %v19965_v24 }
0x1f07   : > { %v14140_v21 = vpop.f32.mrb[165].mxu0 }
0x1f08   : > { %v7943_v44 = vpop.f32.mrb[166].mxu0 }
0x1f09   : > { %v7996_v12 = vpack.c.bf16 %v7943_v44, %v7940_v61  ;;  %v14141_v39 = vpop.f32.mrb[167].mxu0 }
0x1f0b   : > { %14154 = vmatprep.mubr.msk.bf16.mxu0 %vm1396_vm2, %v7996_v12 }
0x1f39   : > { %v7987_v56 = vpop.f32.mrb[236].mxu1 }
0x1f3a   : > { %v14146_v11 = vpop.f32.mrb[237].mxu1 }
0x1f3b   : > { %v7990_v37 = vpop.f32.mrb[238].mxu1 }
0x1f3c   : > { %v7997_v16 = vpack.c.bf16 %v7990_v37, %v7987_v56  ;;  %v14147_v4 = vpop.f32.mrb[239].mxu1  ;;  %v12937_v37 = vld [vmem:[%s19873_s7 + $0x2e0] sm:$0xff] }
0x1f3e   : > { %14155 = vmatmul.mubr.msk.bf16.gmra.mrb[156].mxu0 %vm1396_vm2, %v7997_v16  ;;  %v12939_v16 = vld [vmem:[%s19873_s7 + $0x2f0] sm:$0xff] }
0x1f3f   : > { %14172 = vmatprep.mubr.msk.bf16.mxu0 %vm15579_vm1, %v19965_v24 }
0x1f41   : > { %v8140_v20 = vpop.f32.mrb[240].mxu1 }
0x1f42   : > { %v8141_v1 = vadd.f32 %v12933_v14, %v8140_v20  ;;  %v14162_v3 = vpop.f32.mrb[241].mxu1  ;;  %v12938_v20 = vld [vmem:[%s19873_s7 + $0x2e8] sm:$0xff] }
0x1f43   : > { %v8143_v45 = vpop.f32.mrb[242].mxu1  ;;  %v12940_v3 = vld [vmem:[%s19873_s7 + $0x2f8] sm:$0xff] }
0x1f44   : > { %v8144_v55 = vadd.f32 %v12934_v31, %v8143_v45  ;;  %v14163_v42 = vpop.f32.mrb[243].mxu1  ;;  %v8300_v58 = vsel %vm1594_vm3, %v8141_v1, -inf }
0x1f45   : > { %8301 = vmax.xlane.f32.xlu0 %v8300_v58 }
0x1f46   : > { %14173 = vmatmul.mubr.msk.bf16.vlgmr.msra.gmra.mrb[168].mxu0 %vm1396_vm2, %v8199_v51  ;;  %v8303_v27 = vsel %vm1594_vm3, %v8144_v55, -inf }
0x1f47   : > { %8304 = vmax.xlane.f32.xlu1 %v8303_v27  ;;  %14184 = vmatprep.mubr.msk.bf16.mxu0 %vm15579_vm1, %v19965_v24 }
0x1f49   : > { %v8191_v41 = vpop.f32.mrb[244].mxu1 }
0x1f4a   : > { %v8192_v28 = vadd.f32 %v12935_v30, %v8191_v41  ;;  %v14168_v52 = vpop.f32.mrb[245].mxu1 }
0x1f4b   : > { %v8194_v5 = vpop.f32.mrb[246].mxu1 }
0x1f4c   : > { %v8195_v22 = vadd.f32 %v12936_v7, %v8194_v5  ;;  %v14169_v34 = vpop.f32.mrb[247].mxu1  ;;  %v8306_v63 = vsel %vm1594_vm3, %v8192_v28, -inf }
0x1f4d   : > { %8307 = vmax.xlane.f32.xlu0 %v8306_v63 }
0x1f4e   : > { %v8309_v18 = vsel %vm1594_vm3, %v8195_v22, -inf }
0x1f51   : > { %8310 = vmax.xlane.f32.xlu0 %v8309_v18  ;;  %v8293_v50 = vpop.f32.mrb[248].mxu1 }
0x1f52   : > { %v14180_v46 = vpop.f32.mrb[249].mxu1 }
0x1f53   : > { %v8296_v60 = vpop.f32.mrb[250].mxu1 }
0x1f54   : > { %v14181_v13 = vpop.f32.mrb[251].mxu1  ;;  %v8297_v27 = vadd.f32 %v12940_v3, %v8296_v60 }
0x1fd2   : > { %v8302_v47 = vpop.xlane.xlu0 %8301 }
0x1fd3   : > { %v8324_v0 = vsub.f32 %v8141_v1, %v8302_v47 }
0x1fd4   : > { %v8305_v8 = vpop.xlane.xlu1 %8304 }
0x1fd5   : > { %v8325_v61 = vsub.f32 %v8144_v55, %v8305_v8  ;;  %v8332_v44 = vmul.f32 1.442695, %v8324_v0  ;;  %v8294_v55 = vadd.f32 %v12939_v16, %v8293_v50 }
0x1fd7   : > { %v8334_v39 = vmul.f32 1.442695, %v8325_v61  ;;  %15178 = vpow2.f32 %v8332_v44  ;;  %v8318_v41 = vsel %vm1594_vm3, %v8294_v55, -inf }
0x1fd9   : > { %15180 = vpow2.f32 %v8334_v39 }
0x1fda   : > { %v8308_v29 = vpop.xlane.xlu0 %8307 }
0x1fdb   : > { %v8326_v12 = vsub.f32 %v8192_v28, %v8308_v29  ;;  %v8321_v28 = vsel %vm1594_vm3, %v8297_v27, -inf }
0x1fdd   : > { %v8336_v11 = vmul.f32 1.442695, %v8326_v12 }
0x1fde   : > { %v8311_v21 = vpop.xlane.xlu0 %8310 }
0x1fdf   : > { %v8327_v56 = vsub.f32 %v8195_v22, %v8311_v21  ;;  %15182 = vpow2.f32 %v8336_v11 }
0x1fe1   : > { %v8338_v4 = vmul.f32 1.442695, %v8327_v56  ;;  %v18176_v7 = vpop.eup %15178 }
0x1fe2   : > { %v8348_v5 = vsel %vm1594_vm3, %v18176_v7, 0.0 }
0x1fe3   : > { %15184 = vpow2.f32 %v8338_v4  ;;  %v18179_v52 = vpop.eup %15180 }
0x1fe4   : > { %v8351_v34 = vsel %vm1594_vm3, %v18179_v52, 0.0 }
0x1fe9   : > { %v15183_v22 = vpop.eup %15182 }
0x1fea   : > { %v8354_v18 = vsel %vm1594_vm3, %v15183_v22, 0.0 }
0x1fed   : > { %v15185_v63 = vpop.eup %15184 }
0x1fee   : > { %v8357_v50 = vsel %vm1594_vm3, %v15185_v63, 0.0 }
0x2019   : > { %v8242_v14 = vpop.f32.mrb[168].mxu0 }
0x201a   : > { %v8243_v31 = vadd.f32 %v12937_v37, %v8242_v14  ;;  %v14174_v1 = vpop.f32.mrb[169].mxu0 }
0x201b   : > { %v8245_v45 = vpop.f32.mrb[170].mxu0 }
0x201c   : > { %v8246_v42 = vadd.f32 %v12938_v20, %v8245_v45  ;;  %v14175_v58 = vpop.f32.mrb[171].mxu0  ;;  %v8312_v51 = vsel %vm1594_vm3, %v8243_v31, -inf }
0x201d   : > { %8313 = vmax.xlane.f32.xlu0 %v8312_v51 }
0x201e   : > { %v8315_v30 = vsel %vm1594_vm3, %v8246_v42, -inf }
0x201f   : > { %8316 = vmax.xlane.f32.xlu1 %v8315_v30 }
0x2021   : > { %8319 = vmax.xlane.f32.xlu0 %v8318_v41 }
0x2023   : > { %8322 = vmax.xlane.f32.xlu1 %v8321_v28 }
0x2025   : > { %8349 = vadd.xlane.f32.xlu0 %v8348_v5 }
0x2027   : > { %8352 = vadd.xlane.f32.xlu1 %v8351_v34 }
0x2029   : > { %8355 = vadd.xlane.f32.xlu0 %v8354_v18 }
0x202b   : > { %8358 = vadd.xlane.f32.xlu1 %v8357_v50 }
0x20aa   : > { %v8314_v46 = vpop.xlane.xlu0 %8313 }
0x20ab   : > { %v8328_v60 = vsub.f32 %v8243_v31, %v8314_v46 }
0x20ac   : > { %v8317_v13 = vpop.xlane.xlu1 %8316 }
0x20ad   : > { %v8340_v8 = vmul.f32 1.442695, %v8328_v60  ;;  %v8329_v4 = vsub.f32 %v8246_v42, %v8317_v13 }
0x20ae   : > { %v8320_v47 = vpop.xlane.xlu0 %8319 }
0x20af   : > { %v8330_v29 = vsub.f32 %v8294_v55, %v8320_v47  ;;  %v8342_v14 = vmul.f32 1.442695, %v8329_v4 }
0x20b0   : > { %v8323_v0 = vpop.xlane.xlu1 %8322 }
0x20b1   : > { %v8344_v61 = vmul.f32 1.442695, %v8330_v29  ;;  %v8331_v21 = vsub.f32 %v8297_v27, %v8323_v0 }
0x20b3   : > { %15186 = vpow2.f32 %v8344_v61  ;;  %v8346_v44 = vmul.f32 1.442695, %v8331_v21 }
0x20b4   : > { %15188 = vpow2.f32 %v8340_v8 }
0x20b5   : > { %15190 = vpow2.f32 %v8346_v44 }
0x20b6   : > { %15192 = vpow2.f32 %v8342_v14  ;;  %v19994_v14 = vld [vmem:[#allocation13_spill] sm:$0xff] }
0x20bd   : > { %v18187_v12 = vpop.eup %15186 }
0x20be   : > { %v18189_v39 = vpop.eup %15188  ;;  %v8366_v56 = vsel %vm1594_vm3, %v18187_v12, 0.0 }
0x20bf   : > { %v15191_v11 = vpop.eup %15190  ;;  %8367 = vadd.xlane.f32.xlu0 %v8366_v56  ;;  %v8360_v16 = vsel %vm1594_vm3, %v18189_v39, 0.0 }
0x20c0   : > { %v8369_v37 = vsel %vm1594_vm3, %v15191_v11, 0.0  ;;  %v15193_v20 = vpop.eup %15192 }
0x20c1   : > { %8370 = vadd.xlane.f32.xlu1 %v8369_v37  ;;  %v8363_v31 = vsel %vm1594_vm3, %v15193_v20, 0.0 }
0x20c3   : > { %8361 = vadd.xlane.f32.xlu0 %v8360_v16 }
0x20d2   : > { %8439 = vrot.lane.b32.xlu1 %v16290_v62, %s19987_s14  ;;  %v8350_v62 = vpop.xlane.xlu0 %8349 }
0x20d6   : > { %8486 = vrot.lane.b32.xlu1 %v16331_v10, %s19987_s14  ;;  %v8356_v1 = vpop.xlane.xlu0 %8355 }
0x20d9   : > { %8392 = vrot.lane.b32.xlu0 %v16251_v53, %s19987_s14  ;;  %v8353_v53 = vpop.xlane.xlu1 %8352 }
0x20dd   : > { %8842 = vrot.lane.b32.xlu0 %v16254_v57, %s19971_s2  ;;  %v8359_v10 = vpop.xlane.xlu1 %8358 }
0x20de   : > { %15194 = vrcp.f32 %v8359_v10 }
0x20df   : > { %15196 = vrcp.f32 %v8353_v53 }
0x20e0   : > { %15198 = vrcp.f32 %v8356_v1 }
0x20e1   : > { %8992 = vrot.lane.b32.xlu0 %v16362_v36, %s19971_s2  ;;  %15200 = vrcp.f32 %v8350_v62 }
0x20e8   : > { %v15195_v45 = vpop.eup %15194 }
0x20e9   : > { %v15197_v55 = vpop.eup %15196 }
0x20ea   : > { %v15199_v58 = vpop.eup %15198  ;;  %v8381_v30 = vmul.f32 %v15197_v55, %v18179_v52  ;;  %v8584_v52 = vld [vmem:[%s19871_s5 + $0xc] sm:$0xf] }
0x20eb   : > { %v15201_v27 = vpop.eup %15200  ;;  %v8382_v41 = vmul.f32 %v15199_v58, %v15183_v22 }
0x20ec   : > { %v8380_v5 = vmul.f32 %v15201_v27, %v18176_v7 }
0x20ee   : > { %v8388_v50 = vpack.c.bf16 %v8381_v30, %v8380_v5 }
0x20fa   : > { %8364 = vadd.xlane.f32.xlu1 %v8363_v31 }
0x210b   : > { %8533 = vrot.lane.b32.xlu1 %v16360_v33, %s19987_s14  ;;  %v8383_v33 = vmul.f32 %v15195_v45, %v15185_v63 }
0x210d   : > { %v8389_v18 = vpack.c.bf16 %v8383_v33, %v8382_v41 }
0x210f   : > { %8892 = vrot.lane.b32.xlu1 %v16293_v40, %s19971_s2 }
0x2113   : > { %8942 = vrot.lane.b32.xlu1 %v16336_v49, %s19971_s2 }
0x214c   : > { %v8368_v3 = vpop.xlane.xlu0 %8367 }
0x214e   : > { %v8371_v42 = vpop.xlane.xlu1 %8370 }
0x214f   : > { %15202 = vrcp.f32 %v8371_v42 }
0x2150   : > { %v8362_v51 = vpop.xlane.xlu0 %8361  ;;  %15204 = vrcp.f32 %v8368_v3 }
0x2151   : > { %15206 = vrcp.f32 %v8362_v51 }
0x2152   : > { %v8440_v28 = vpop.permute.xlu1 %8439 }
0x2153   : > { %14189 = vmatpush3.bf16.msra.mxu1 %v8440_v28 }
0x2154   : > { %v8393_v34 = vpop.permute.xlu0 %8392  ;;  %14200 = vmatprep.subr.bf16.mxu1 %v19965_v24 }
0x2155   : > { %14183 = vmatpush3.bf16.msra.mxu0 %v8393_v34 }
0x2156   : > { %14191 = vmatmul.mubr.msk.bf16.vlgmr.msra.gmra.mrb[252].mxu1 %vm1594_vm3, %v8389_v18  ;;  %14194 = vmatprep.subr.bf16.mxu0 %v19965_v24  ;;  %v8487_v22 = vpop.permute.xlu1 %8486 }
0x2157   : > { %14202 = vmatprep.mubr.msk.bf16.mxu1 %vm15579_vm1, %v19965_v24 }
0x2158   : > { %14185 = vmatmul.mubr.msk.bf16.vlgmr.msra.gmra.mrb[172].mxu0 %vm1594_vm3, %v8388_v50  ;;  %v8843_v0 = vpop.permute.xlu0 %8842 }
0x2159   : > { %14195 = vmatpush3.bf16.msra.mxu0 %v8487_v22  ;;  %14196 = vmatprep.mubr.msk.bf16.mxu0 %vm15579_vm1, %v19965_v24  ;;  %v15203_v7 = vpop.eup %15202  ;;  %v8848_v56 = vsel %vm1396_vm2, %v8843_v0, 0 }
0x215a   : > { %14643 = vmatprep.subr.msk.bf16.mxu0 %vm2394_vm4, %v8584_v52  ;;  %v15205_v46 = vpop.eup %15204  ;;  %v8387_v60 = vmul.f32 %v15203_v7, %v15191_v11  ;;  %v8598_v11 = vsel %vm2394_vm4, %v8584_v52, 0 }
0x215b   : > { %v8386_v13 = vmul.f32 %v15205_v46, %v18187_v12  ;;  %v15207_v8 = vpop.eup %15206 }
0x215c   : > { %v8384_v21 = vmul.f32 %v15207_v8, %v18189_v39  ;;  %v8993_v39 = vpop.permute.xlu0 %8992 }
0x215d   : > { %v8391_v29 = vpack.c.bf16 %v8387_v60, %v8386_v13  ;;  %v8998_v4 = vsel %vm1396_vm2, %v8993_v39, 0  ;;  %v12964_v13 = vld [vmem:[%s19873_s7 + $0x310] sm:$0xff]  ;;  %v12969_v39 = vld [vmem:[%s19873_s7 + $0x338] sm:$0xff] }
0x2187   : > { %v8365_v63 = vpop.xlane.xlu1 %8364 }
0x2188   : > { %15208 = vrcp.f32 %v8365_v63 }
0x218b   : > { %v8534_v47 = vpop.permute.xlu1 %8533 }
0x218c   : > { %14201 = vmatpush3.bf16.msra.mxu1 %v8534_v47 }
0x218d   : > { %14216 = vmatprep.subr.bf16.mxu1 %v19965_v24 }
0x218f   : > { %14203 = vmatmul.mubr.msk.bf16.vlgmr.msra.gmra.mrb[0].mxu1 %vm1594_vm3, %v8391_v29  ;;  %v8893_v37 = vpop.permute.xlu1 %8892  ;;  %v12965_v29 = vld [vmem:[%s19873_s7 + $0x318] sm:$0xff] }
0x2190   : > { %14218 = vmatprep.mubr.msk.bf16.mxu1 %vm15579_vm1, %v19965_v24  ;;  %v8898_v16 = vsel %vm1396_vm2, %v8893_v37, 0  ;;  %v12968_v37 = vld [vmem:[%s19873_s7 + $0x330] sm:$0xff] }
0x2192   : > { %v15209_v61 = vpop.eup %15208 }
0x2193   : > { %v8385_v44 = vmul.f32 %v15209_v61, %v15193_v20  ;;  %v19995_v20 = vld [vmem:[#allocation15_spill] sm:$0xff]  ;;  %v8943_v42 = vpop.permute.xlu1 %8942  ;;  %v19996_v61 = vld [vmem:[#allocation14_spill] sm:$0xff] }
0x2194   : > { %v8948_v51 = vsel %vm1396_vm2, %v8943_v42, 0 }
0x2195   : > { %14217 = vmatpush3.bf16.xpose.msra.mxu1 %v8848_v56  ;;  %v8390_v12 = vpack.c.bf16 %v8385_v44, %v8384_v21 }
0x2196   : > { %14222 = vmatprep.subr.bf16.mxu1 %v19965_v24 }
0x2197   : > { %14197 = vmatmul.mubr.msk.bf16.vlgmr.msra.gmra.mrb[176].mxu0 %vm1594_vm3, %v8390_v12 }
0x2198   : > { %14207 = vmatpush3.bf16.msra.mxu0 %v8598_v11 }
0x2199   : > { %14228 = vmatprep.subr.bf16.mxu0 %v19965_v24 }
0x219c   : > { %14219 = vmatmul.mubr.msk.bf16.vlgmr.msra.gmra.mrb[4].mxu1 %vm1396_vm2, %v16260_v6 }
0x219d   : > { %14223 = vmatpush3.bf16.xpose.msra.mxu1 %v8898_v16  ;;  %14224 = vmatprep.mubr.msk.bf16.mxu1 %vm15579_vm1, %v19965_v24 }
0x219e   : > { %14234 = vmatprep.subr.bf16.mxu1 %v19965_v24 }
0x21a4   : > { %14225 = vmatmul.mubr.msk.bf16.vlgmr.msra.gmra.mrb[8].mxu1 %vm1396_vm2, %v19994_v14 }
0x21a5   : > { %14235 = vmatpush3.bf16.xpose.msra.mxu1 %v8998_v4  ;;  %14236 = vmatprep.mubr.msk.bf16.mxu1 %vm15579_vm1, %v19965_v24 }
0x21a6   : > { %14246 = vmatprep.subr.bf16.mxu1 %v19965_v24 }
0x21ac   : > { %14237 = vmatmul.mubr.msk.bf16.vlgmr.msra.gmra.mrb[12].mxu1 %vm1396_vm2, %v19995_v20 }
0x21ad   : > { %14248 = vmatprep.mubr.msk.bf16.mxu1 %vm15579_vm1, %v19965_v24 }
0x2229   : > { %v8479_v31 = vpop.f32.mrb[252].mxu1 }
0x222a   : > { %v14192_v53 = vpop.f32.mrb[253].mxu1 }
0x222b   : > { %v8432_v62 = vpop.f32.mrb[172].mxu0  ;;  %v8482_v10 = vpop.f32.mrb[254].mxu1 }
0x222c   : > { %v8581_v1 = vpack.c.bf16 %v8482_v10, %v8479_v31  ;;  %v14186_v3 = vpop.f32.mrb[173].mxu0  ;;  %v14193_v45 = vpop.f32.mrb[255].mxu1 }
0x222d   : > { %v8435_v55 = vpop.f32.mrb[174].mxu0 }
0x222e   : > { %v8580_v58 = vpack.c.bf16 %v8435_v55, %v8432_v62  ;;  %v14187_v33 = vpop.f32.mrb[175].mxu0 }
0x2230   : > { %14208 = vmatprep.mubr.msk.bf16.mxu0 %vm1396_vm2, %v8580_v58 }
0x2231   : > { %14209 = vmatmul.mubr.msk.bf16.vlgmr.msra.gmra.mrb[152].mxu0 %vm1396_vm2, %v8581_v1 }
0x2232   : > { %14229 = vmatpush3.bf16.xpose.msra.mxu0 %v8948_v51 }
0x2233   : > { %14240 = vmatprep.subr.bf16.mxu0 %v19965_v24 }
0x2262   : > { %v8573_v27 = vpop.f32.mrb[0].mxu1 }
0x2263   : > { %v14204_v30 = vpop.f32.mrb[1].mxu1 }
0x2264   : > { %v8576_v41 = vpop.f32.mrb[2].mxu1 }
0x2265   : > { %v8583_v28 = vpack.c.bf16 %v8576_v41, %v8573_v27  ;;  %v14205_v5 = vpop.f32.mrb[3].mxu1 }
0x226a   : > { %v8526_v34 = vpop.f32.mrb[176].mxu0 }
0x226b   : > { %v14198_v18 = vpop.f32.mrb[177].mxu0 }
0x226c   : > { %v8529_v50 = vpop.f32.mrb[178].mxu0 }
0x226d   : > { %v8582_v52 = vpack.c.bf16 %v8529_v50, %v8526_v34  ;;  %v14199_v22 = vpop.f32.mrb[179].mxu0 }
0x226f   : > { %14212 = vmatprep.mubr.msk.bf16.mxu0 %vm1396_vm2, %v8582_v52  ;;  %v18259_v7 = vpop.f32.mrb[4].mxu1 }
0x2270   : > { %14213 = vmatmul.mubr.msk.bf16.gmra.mrb[156].mxu0 %vm1396_vm2, %v8583_v28  ;;  %v14220_v63 = vpop.f32.mrb[5].mxu1 }
0x2271   : > { %v18262_v46 = vpop.f32.mrb[6].mxu1  ;;  %14230 = vmatprep.mubr.msk.bf16.mxu0 %vm15579_vm1, %v19965_v24 }
0x2272   : > { %v14221_v60 = vpop.f32.mrb[7].mxu1 }
0x2277   : > { %v8934_v47 = vpop.f32.mrb[8].mxu1 }
0x2278   : > { %v8935_v8 = vadd.f32 %v12964_v13, %v8934_v47  ;;  %v14226_v0 = vpop.f32.mrb[9].mxu1  ;;  %14231 = vmatmul.mubr.msk.bf16.vlgmr.msra.gmra.mrb[180].mxu0 %vm1396_vm2, %v19996_v61 }
0x2279   : > { %v8937_v21 = vpop.f32.mrb[10].mxu1  ;;  %14242 = vmatprep.mubr.msk.bf16.mxu0 %vm15579_vm1, %v19965_v24 }
0x227a   : > { %v8938_v44 = vadd.f32 %v12965_v29, %v8937_v21  ;;  %v14227_v56 = vpop.f32.mrb[11].mxu1  ;;  %v9047_v12 = vsel %vm1594_vm3, %v8935_v8, -inf }
0x227b   : > { %9048 = vmax.xlane.f32.xlu0 %v9047_v12 }
0x227c   : > { %v9050_v11 = vsel %vm1594_vm3, %v8938_v44, -inf }
0x227d   : > { %9051 = vmax.xlane.f32.xlu1 %v9050_v11 }
0x227f   : > { %v9034_v16 = vpop.f32.mrb[12].mxu1 }
0x2280   : > { %v9035_v4 = vadd.f32 %v12968_v37, %v9034_v16  ;;  %v14238_v31 = vpop.f32.mrb[13].mxu1 }
0x2281   : > { %v9037_v53 = vpop.f32.mrb[14].mxu1  ;;  %v12962_v31 = vld [vmem:[%s19873_s7 + $0x300] sm:$0xff] }
0x2282   : > { %v9038_v62 = vadd.f32 %v12969_v39, %v9037_v53  ;;  %v14239_v10 = vpop.f32.mrb[15].mxu1  ;;  %v9059_v1 = vsel %vm1594_vm3, %v9035_v4, -inf  ;;  %v8885_v53 = vadd.f32 %v12962_v31, %v18259_v7 }
0x2283   : > { %9060 = vmax.xlane.f32.xlu0 %v9059_v1 }
0x2284   : > { %v9062_v3 = vsel %vm1594_vm3, %v9038_v62, -inf  ;;  %v9041_v1 = vsel %vm1594_vm3, %v8885_v53, -inf }
0x2287   : > { %9063 = vmax.xlane.f32.xlu0 %v9062_v3  ;;  %v12967_v3 = vld [vmem:[%s19873_s7 + $0x328] sm:$0xff] }
0x2304   : > { %v18286_v45 = vpop.f32.mrb[152].mxu0 }
0x2305   : > { %v18288_v55 = vpop.f32.mrb[153].mxu0 }
0x2306   : > { %v18290_v42 = vpop.f32.mrb[154].mxu0 }
0x2307   : > { %19997 = vst [vmem:[#allocation13_spill] sm:$0xff] %v18290_v42  ;;  %v18292_v58 = vpop.f32.mrb[155].mxu0 }
0x2308   : > { %v9049_v33 = vpop.xlane.xlu0 %9048 }
0x2309   : > { %v9067_v51 = vsub.f32 %v8935_v8, %v9049_v33 }
0x230a   : > { %v9052_v27 = vpop.xlane.xlu1 %9051 }
0x230b   : > { %v9077_v30 = vmul.f32 1.442695, %v9067_v51  ;;  %v9068_v41 = vsub.f32 %v8938_v44, %v9052_v27  ;;  %v12963_v27 = vld [vmem:[%s19873_s7 + $0x308] sm:$0xff] }
0x230d   : > { %15210 = vpow2.f32 %v9077_v30  ;;  %v9079_v28 = vmul.f32 1.442695, %v9068_v41  ;;  %v18341_v30 = vadd.f32 %v12963_v27, %v18262_v46 }
0x230f   : > { %15212 = vpow2.f32 %v9079_v28  ;;  %v9044_v41 = vsel %vm1594_vm3, %v18341_v30, -inf }
0x2310   : > { %v9061_v5 = vpop.xlane.xlu0 %9060 }
0x2311   : > { %v9071_v34 = vsub.f32 %v9035_v4, %v9061_v5 }
0x2313   : > { %v9085_v18 = vmul.f32 1.442695, %v9071_v34 }
0x2314   : > { %v9064_v47 = vpop.xlane.xlu0 %9063 }
0x2315   : > { %15214 = vpow2.f32 %v9085_v18  ;;  %v9072_v29 = vsub.f32 %v9038_v62, %v9064_v47  ;;  %v12966_v62 = vld [vmem:[%s19873_s7 + $0x320] sm:$0xff] }
0x2317   : > { %v15211_v50 = vpop.eup %15210  ;;  %v9087_v8 = vmul.f32 1.442695, %v9072_v29 }
0x2318   : > { %v9095_v52 = vsel %vm1594_vm3, %v15211_v50, 0.0 }
0x2319   : > { %v15213_v22 = vpop.eup %15212  ;;  %9096 = vadd.xlane.f32.xlu0 %v9095_v52  ;;  %15216 = vpow2.f32 %v9087_v8 }
0x231a   : > { %v9098_v63 = vsel %vm1594_vm3, %v15213_v22, 0.0 }
0x231b   : > { %9099 = vadd.xlane.f32.xlu1 %v9098_v63 }
0x231f   : > { %v18296_v60 = vpop.eup %15214 }
0x2320   : > { %v9107_v13 = vsel %vm1594_vm3, %v18296_v60, 0.0 }
0x2321   : > { %9108 = vadd.xlane.f32.xlu0 %v9107_v13 }
0x2323   : > { %v15217_v11 = vpop.eup %15216 }
0x2324   : > { %v9110_v4 = vsel %vm1594_vm3, %v15217_v11, 0.0 }
0x232c   : > { %9274 = vrot.lane.b32.xlu1 %v16362_v36, %s19972_s0 }
0x2337   : > { %9180 = vrot.lane.b32.xlu0 %v16293_v40, %s19972_s0 }
0x233b   : > { %9494 = vrot.lane.b32.xlu0 %v16362_v36, %s19973_s24 }
0x2343   : > { %v18306_v0 = vpop.f32.mrb[156].mxu0 }
0x2344   : > { %v18308_v21 = vpop.f32.mrb[157].mxu0 }
0x2345   : > { %v18310_v44 = vpop.f32.mrb[158].mxu0 }
0x2346   : > { %19998 = vst [vmem:[#allocation15_spill] sm:$0xff] %v18310_v44  ;;  %v18312_v56 = vpop.f32.mrb[159].mxu0 }
0x2347   : > { %19999 = vst [vmem:[#allocation14_spill] sm:$0xff] %v18312_v56 }
0x234b   : > { %v8984_v12 = vpop.f32.mrb[180].mxu0 }
0x234c   : > { %v14232_v37 = vpop.f32.mrb[181].mxu0  ;;  %v8985_v10 = vadd.f32 %v12966_v62, %v8984_v12 }
0x234d   : > { %v8987_v16 = vpop.f32.mrb[182].mxu0 }
0x234e   : > { %v14233_v39 = vpop.f32.mrb[183].mxu0  ;;  %v18326_v33 = vadd.f32 %v12967_v3, %v8987_v16  ;;  %v9053_v51 = vsel %vm1594_vm3, %v8985_v10, -inf }
0x2350   : > { %9111 = vadd.xlane.f32.xlu1 %v9110_v4  ;;  %v9056_v7 = vsel %vm1594_vm3, %v18326_v33, -inf }
0x235a   : > { %9042 = vmax.xlane.f32.xlu0 %v9041_v1 }
0x235e   : > { %9054 = vmax.xlane.f32.xlu0 %v9053_v51 }
0x2361   : > { %9390 = vrot.lane.b32.xlu1 %v16293_v40, %s19973_s24 }
0x2362   : > { %9057 = vmax.xlane.f32.xlu0 %v9056_v7 }
0x2365   : > { %9388 = vrot.lane.b32.xlu1 %v19994_v14, %s19975_s22 }
0x2369   : > { %9492 = vrot.lane.b32.xlu1 %v19995_v20, %s19975_s22 }
0x238d   : > { %9045 = vmax.xlane.f32.xlu1 %v9044_v41 }
0x23a6   : > { %v9097_v28 = vpop.xlane.xlu0 %9096 }
0x23a7   : > { %15218 = vrcp.f32 %v9097_v28 }
0x23a8   : > { %v9100_v5 = vpop.xlane.xlu1 %9099 }
0x23a9   : > { %15220 = vrcp.f32 %v9100_v5 }
0x23ac   : > { %v9275_v46 = vpop.permute.xlu1 %9274 }
0x23ae   : > { %v9109_v34 = vpop.xlane.xlu0 %9108 }
0x23af   : > { %15222 = vrcp.f32 %v9109_v34 }
0x23b1   : > { %v15219_v18 = vpop.eup %15218 }
0x23b2   : > { %v9181_v52 = vpop.permute.xlu0 %9180  ;;  %v9123_v13 = vmul.f32 %v15219_v18, %v15211_v50 }
0x23b3   : > { %v15221_v63 = vpop.eup %15220  ;;  %14247 = vmatpush3.bf16.msra.mxu1 %v9181_v52 }
0x23b4   : > { %v9124_v47 = vmul.f32 %v15221_v63, %v15213_v22  ;;  %14258 = vmatprep.subr.bf16.mxu1 %v19965_v24 }
0x23b6   : > { %v9130_v29 = vpack.c.bf16 %v9124_v47, %v9123_v13  ;;  %v9495_v12 = vpop.permute.xlu0 %9494 }
0x23b8   : > { %14249 = vmatmul.mubr.msk.bf16.vlgmr.msra.gmra.mrb[16].mxu1 %vm1594_vm3, %v9130_v29 }
0x23b9   : > { %14259 = vmatpush3.bf16.msra.mxu1 %v9275_v46  ;;  %14260 = vmatprep.mubr.msk.bf16.mxu1 %vm15579_vm1, %v19965_v24  ;;  %v15223_v37 = vpop.eup %15222 }
0x23ba   : > { %14270 = vmatprep.subr.bf16.mxu1 %v19965_v24  ;;  %v9127_v39 = vmul.f32 %v15223_v37, %v18296_v60 }
0x23dd   : > { %v9112_v8 = vpop.xlane.xlu1 %9111 }
0x23de   : > { %15224 = vrcp.f32 %v9112_v8 }
0x23e1   : > { %v9391_v31 = vpop.permute.xlu1 %9390 }
0x23e2   : > { %v9396_v7 = vsel %vm1396_vm2, %v9391_v31, 0 }
0x23e5   : > { %v9389_v60 = vpop.permute.xlu1 %9388 }
0x23e7   : > { %v9043_v16 = vpop.xlane.xlu0 %9042 }
0x23e8   : > { %v15225_v50 = vpop.eup %15224  ;;  %v9065_v22 = vsub.f32 %v8885_v53, %v9043_v16 }
0x23e9   : > { %v9128_v4 = vmul.f32 %v15225_v50, %v15217_v11  ;;  %v9500_v11 = vsel %vm1396_vm2, %v9495_v12, 0  ;;  %v9493_v5 = vpop.permute.xlu1 %9492 }
0x23ea   : > { %v9073_v62 = vmul.f32 1.442695, %v9065_v22 }
0x23eb   : > { %v9132_v1 = vpack.c.bf16 %v9128_v4, %v9127_v39  ;;  %v9055_v3 = vpop.xlane.xlu0 %9054  ;;  %v13006_v39 = vld [vmem:[%s19873_s7 + $0x3a0] sm:$0xff] }
0x23ec   : > { %15226 = vpow2.f32 %v9073_v62  ;;  %v9069_v51 = vsub.f32 %v8985_v10, %v9055_v3 }
0x23ed   : > { %14261 = vmatmul.mubr.msk.bf16.vlgmr.msra.gmra.mrb[20].mxu1 %vm1594_vm3, %v9132_v1 }
0x23ee   : > { %v9081_v27 = vmul.f32 1.442695, %v9069_v51  ;;  %14271 = vmatpush3.bf16.xpose.msra.mxu1 %v9396_v7  ;;  %14272 = vmatprep.mubr.msk.bf16.mxu1 %vm15579_vm1, %v19965_v24 }
0x23ef   : > { %14282 = vmatprep.subr.bf16.mxu1 %v19965_v24  ;;  %v9058_v47 = vpop.xlane.xlu0 %9057 }
0x23f0   : > { %15228 = vpow2.f32 %v9081_v27  ;;  %v9070_v29 = vsub.f32 %v18326_v33, %v9058_v47  ;;  %v13004_v27 = vld [vmem:[%s19873_s7 + $0x390] sm:$0xff] }
0x23f2   : > { %v9083_v46 = vmul.f32 1.442695, %v9070_v29 }
0x23f5   : > { %14273 = vmatmul.mubr.msk.bf16.vlgmr.msra.gmra.mrb[24].mxu1 %vm1396_vm2, %v9389_v60 }
0x23f6   : > { %v15227_v53 = vpop.eup %15226  ;;  %14283 = vmatpush3.bf16.xpose.msra.mxu1 %v9500_v11  ;;  %14284 = vmatprep.mubr.msk.bf16.mxu1 %vm15579_vm1, %v19965_v24 }
0x23f7   : > { %v9089_v10 = vsel %vm1594_vm3, %v15227_v53, 0.0  ;;  %14294 = vmatprep.subr.bf16.mxu1 %v19965_v24 }
0x23f8   : > { %9090 = vadd.xlane.f32.xlu0 %v9089_v10 }
0x23fa   : > { %v18362_v41 = vpop.eup %15228 }
0x23fb   : > { %v9101_v28 = vsel %vm1594_vm3, %v18362_v41, 0.0 }
0x23fc   : > { %9102 = vadd.xlane.f32.xlu0 %v9101_v28 }
0x23fd   : > { %14285 = vmatmul.mubr.msk.bf16.vlgmr.msra.gmra.mrb[28].mxu1 %vm1396_vm2, %v9493_v5  ;;  %v12980_v5 = vld [vmem:[%s19873_s7 + $0x350] sm:$0xff] }
0x23fe   : > { %14296 = vmatprep.mubr.msk.bf16.mxu1 %vm15579_vm1, %v19965_v24 }
0x2412   : > { %9133 = vrot.lane.b32.xlu0 %v16254_v57, %s19972_s0 }
0x2416   : > { %9442 = vrot.lane.b32.xlu0 %v16336_v49, %s19973_s24 }
0x241a   : > { %v9046_v34 = vpop.xlane.xlu1 %9045 }
0x241b   : > { %v9066_v18 = vsub.f32 %v18341_v30, %v9046_v34 }
0x241d   : > { %v9075_v52 = vmul.f32 1.442695, %v9066_v18 }
0x241f   : > { %15230 = vpow2.f32 %v9075_v52  ;;  %v12981_v52 = vld [vmem:[%s19873_s7 + $0x358] sm:$0xff] }
0x2420   : > { %15232 = vpow2.f32 %v9083_v46 }
0x2429   : > { %v15231_v63 = vpop.eup %15230 }
0x242a   : > { %v9092_v13 = vsel %vm1594_vm3, %v15231_v63, 0.0  ;;  %v18378_v8 = vpop.eup %15232 }
0x242b   : > { %9093 = vadd.xlane.f32.xlu1 %v9092_v13  ;;  %v9104_v12 = vsel %vm1594_vm3, %v18378_v8, 0.0 }
0x243c   : > { %9227 = vrot.lane.b32.xlu1 %v16336_v49, %s19972_s0 }
0x2460   : > { %9105 = vadd.xlane.f32.xlu1 %v9104_v12 }
0x2471   : > { %9338 = vrot.lane.b32.xlu1 %v16254_v57, %s19973_s24 }
0x2475   : > { %9336 = vrot.lane.b32.xlu1 %v16260_v6, %s19975_s22 }
0x2479   : > { %9440 = vrot.lane.b32.xlu1 %v19996_v61, %s19975_s22 }
0x2485   : > { %v9091_v30 = vpop.xlane.xlu0 %9090 }
0x2486   : > { %15234 = vrcp.f32 %v9091_v30  ;;  %v12984_v30 = vld [vmem:[%s19873_s7 + $0x370] sm:$0xff] }
0x2489   : > { %v9103_v37 = vpop.xlane.xlu0 %9102 }
0x248b   : > { %v18388_v33 = vpop.f32.mrb[16].mxu1 }
0x248c   : > { %v14250_v16 = vpop.f32.mrb[17].mxu1 }
0x248d   : > { %v9134_v50 = vpop.permute.xlu0 %9133  ;;  %v18390_v22 = vpop.f32.mrb[18].mxu1 }
0x248e   : > { %14241 = vmatpush3.bf16.msra.mxu0 %v9134_v50  ;;  %v14251_v4 = vpop.f32.mrb[19].mxu1  ;;  %v12985_v50 = vld [vmem:[%s19873_s7 + $0x378] sm:$0xff] }
0x248f   : > { %14252 = vmatprep.subr.bf16.mxu0 %v19965_v24 }
0x2490   : > { %v15235_v1 = vpop.eup %15234 }
0x2491   : > { %v9121_v11 = vmul.f32 %v15235_v1, %v15227_v53 }
0x24b8   : > { %v9094_v31 = vpop.xlane.xlu1 %9093 }
0x24b9   : > { %15236 = vrcp.f32 %v9094_v31 }
0x24ba   : > { %15238 = vrcp.f32 %v9103_v37  ;;  %v9443_v37 = vpop.permute.xlu0 %9442 }
0x24bc   : > { %v9228_v34 = vpop.permute.xlu1 %9227 }
0x24c0   : > { %v18395_v62 = vpop.f32.mrb[20].mxu1 }
0x24c1   : > { %v14262_v3 = vpop.f32.mrb[21].mxu1 }
0x24c2   : > { %v18397_v51 = vpop.f32.mrb[22].mxu1 }
0x24c3   : > { %v15237_v7 = vpop.eup %15236  ;;  %v14263_v60 = vpop.f32.mrb[23].mxu1 }
0x24c4   : > { %v9122_v10 = vmul.f32 %v15237_v7, %v15231_v63 }
0x24c6   : > { %v9129_v28 = vpack.c.bf16 %v9122_v10, %v9121_v11 }
0x24c8   : > { %14243 = vmatmul.mubr.msk.bf16.vlgmr.msra.gmra.mrb[184].mxu0 %vm1594_vm3, %v9129_v28  ;;  %v9432_v18 = vpop.f32.mrb[24].mxu1  ;;  %v15239_v28 = vpop.eup %15238 }
0x24c9   : > { %14253 = vmatpush3.bf16.msra.mxu0 %v9228_v34  ;;  %v9433_v13 = vadd.f32 %v12980_v5, %v9432_v18  ;;  %v14274_v47 = vpop.f32.mrb[25].mxu1  ;;  %14254 = vmatprep.mubr.msk.bf16.mxu0 %vm15579_vm1, %v19965_v24  ;;  %v9125_v34 = vmul.f32 %v15239_v28, %v18362_v41 }
0x24ca   : > { %v9435_v53 = vpop.f32.mrb[26].mxu1  ;;  %14264 = vmatprep.subr.bf16.mxu0 %v19965_v24 }
0x24cb   : > { %v9436_v63 = vadd.f32 %v12981_v52, %v9435_v53  ;;  %v14275_v29 = vpop.f32.mrb[27].mxu1  ;;  %v9549_v46 = vsel %vm1594_vm3, %v9433_v13, -inf }
0x24cc   : > { %9550 = vmax.xlane.f32.xlu0 %v9549_v46  ;;  %v9448_v46 = vsel %vm1396_vm2, %v9443_v37, 0 }
0x24cd   : > { %v9552_v12 = vsel %vm1594_vm3, %v9436_v63, -inf }
0x24ce   : > { %9553 = vmax.xlane.f32.xlu1 %v9552_v12 }
0x24d0   : > { %v9536_v16 = vpop.f32.mrb[28].mxu1 }
0x24d1   : > { %v9537_v4 = vadd.f32 %v12984_v30, %v9536_v16  ;;  %v14286_v31 = vpop.f32.mrb[29].mxu1 }
0x24d2   : > { %v9539_v1 = vpop.f32.mrb[30].mxu1 }
0x24d3   : > { %v9540_v3 = vadd.f32 %v12985_v50, %v9539_v1  ;;  %v14287_v7 = vpop.f32.mrb[31].mxu1  ;;  %v9561_v60 = vsel %vm1594_vm3, %v9537_v4, -inf }
0x24d4   : > { %9562 = vmax.xlane.f32.xlu0 %v9561_v60 }
0x24d5   : > { %v9564_v11 = vsel %vm1594_vm3, %v9540_v3, -inf }
0x24d8   : > { %9565 = vmax.xlane.f32.xlu0 %v9564_v11 }
0x24ed   : > { %v9106_v10 = vpop.xlane.xlu1 %9105 }
0x24ee   : > { %15240 = vrcp.f32 %v9106_v10 }
0x24f1   : > { %v9339_v52 = vpop.permute.xlu1 %9338 }
0x24f2   : > { %v9344_v53 = vsel %vm1396_vm2, %v9339_v52, 0 }
0x24f5   : > { %v9337_v29 = vpop.permute.xlu1 %9336 }
0x24f8   : > { %v15241_v5 = vpop.eup %15240 }
0x24f9   : > { %v9126_v18 = vmul.f32 %v15241_v5, %v18378_v8  ;;  %v9441_v41 = vpop.permute.xlu1 %9440 }
0x24fb   : > { %v9131_v47 = vpack.c.bf16 %v9126_v18, %v9125_v34 }
0x24fd   : > { %14255 = vmatmul.mubr.msk.bf16.vlgmr.msra.gmra.mrb[188].mxu0 %vm1594_vm3, %v9131_v47 }
0x24fe   : > { %14265 = vmatpush3.bf16.xpose.msra.mxu0 %v9344_v53  ;;  %14266 = vmatprep.mubr.msk.bf16.mxu0 %vm15579_vm1, %v19965_v24 }
0x24ff   : > { %14276 = vmatprep.subr.bf16.mxu0 %v19965_v24 }
0x2505   : > { %14267 = vmatmul.mubr.msk.bf16.vlgmr.msra.gmra.mrb[192].mxu0 %vm1396_vm2, %v9337_v29 }
0x2506   : > { %14277 = vmatpush3.bf16.xpose.msra.mxu0 %v9448_v46  ;;  %14278 = vmatprep.mubr.msk.bf16.mxu0 %vm15579_vm1, %v19965_v24 }
0x2507   : > { %14288 = vmatprep.subr.bf16.mxu0 %v19965_v24 }
0x250d   : > { %14279 = vmatmul.mubr.msk.bf16.vlgmr.msra.gmra.mrb[196].mxu0 %vm1396_vm2, %v9441_v41 }
0x250e   : > { %14290 = vmatprep.mubr.msk.bf16.mxu0 %vm15579_vm1, %v19965_v24 }
0x2559   : > { %v9551_v8 = vpop.xlane.xlu0 %9550 }
0x255a   : > { %v9569_v12 = vsub.f32 %v9433_v13, %v9551_v8 }
0x255b   : > { %v9554_v30 = vpop.xlane.xlu1 %9553 }
0x255c   : > { %v9579_v16 = vmul.f32 1.442695, %v9569_v12  ;;  %v9570_v50 = vsub.f32 %v9436_v63, %v9554_v30 }
0x255e   : > { %15242 = vpow2.f32 %v9579_v16  ;;  %v9581_v31 = vmul.f32 1.442695, %v9570_v50  ;;  %v12978_v50 = vld [vmem:[%s19873_s7 + $0x340] sm:$0xff] }
0x2560   : > { %15244 = vpow2.f32 %v9581_v31 }
0x2561   : > { %v9563_v1 = vpop.xlane.xlu0 %9562 }
0x2562   : > { %v9573_v7 = vsub.f32 %v9537_v4, %v9563_v1  ;;  %v12979_v1 = vld [vmem:[%s19873_s7 + $0x348] sm:$0xff] }
0x2564   : > { %v9587_v60 = vmul.f32 1.442695, %v9573_v7 }
0x2565   : > { %v9566_v11 = vpop.xlane.xlu0 %9565 }
0x2566   : > { %15246 = vpow2.f32 %v9587_v60  ;;  %v9574_v10 = vsub.f32 %v9540_v3, %v9566_v11 }
0x2568   : > { %v18436_v28 = vpop.eup %15242  ;;  %v9589_v5 = vmul.f32 1.442695, %v9574_v10 }
0x2569   : > { %v9597_v34 = vsel %vm1594_vm3, %v18436_v28, 0.0 }
0x256a   : > { %v18440_v18 = vpop.eup %15244  ;;  %15248 = vpow2.f32 %v9589_v5  ;;  %9598 = vadd.xlane.f32.xlu0 %v9597_v34 }
0x256b   : > { %v9600_v13 = vsel %vm1594_vm3, %v18440_v18, 0.0 }
0x256c   : > { %9601 = vadd.xlane.f32.xlu1 %v9600_v13 }
0x2570   : > { %v18444_v63 = vpop.eup %15246 }
0x2571   : > { %v9609_v4 = vsel %vm1594_vm3, %v18444_v63, 0.0 }
0x2572   : > { %9610 = vadd.xlane.f32.xlu0 %v9609_v4  ;;  %v12982_v4 = vld [vmem:[%s19873_s7 + $0x360] sm:$0xff] }
0x2574   : > { %v18448_v3 = vpop.eup %15248 }
0x2575   : > { %v9612_v52 = vsel %vm1594_vm3, %v18448_v3, 0.0 }
0x2576   : > { %9613 = vadd.xlane.f32.xlu1 %v9612_v52 }
0x2587   : > { %9776 = vrot.lane.b32.xlu1 %v16362_v36, %s19963_s19 }
0x2588   : > { %9682 = vrot.lane.b32.xlu0 %v16293_v40, %s19963_s19 }
0x258b   : > { %9999 = vrot.lane.b32.xlu1 %v16254_v57, %s19976_s3 }
0x258c   : > { %10050 = vrot.lane.b32.xlu0 %v16293_v40, %s19976_s3 }
0x258f   : > { %9997 = vrot.lane.b32.xlu1 %v16260_v6, %s19977_s1 }
0x2590   : > { %10101 = vrot.lane.b32.xlu0 %v16336_v49, %s19976_s3 }
0x2593   : > { %10048 = vrot.lane.b32.xlu1 %v19994_v14, %s19977_s1 }
0x2594   : > { %10152 = vrot.lane.b32.xlu0 %v16362_v36, %s19976_s3  ;;  %s20051_s3 = sld [smem:[#allocation37_spill]] }
0x2597   : > { %10099 = vrot.lane.b32.xlu1 %v19996_v61, %s19977_s1 }
0x259b   : > { %v18470_v47 = vpop.f32.mrb[184].mxu0  ;;  %10150 = vrot.lane.b32.xlu1 %v19995_v20, %s19977_s1  ;;  %s15591_s1 = smov [#allocation2]  }
0x259c   : > { %v14244_v53 = vpop.f32.mrb[185].mxu0  ;;  %s15502_s15 = sshll.u32 %s15591_s1, 4  ;;  %s15503_s15 = int_to_ptr.vmem [resolvable:$false] %s15502_s15 }
0x259d   : > { %v18474_v37 = vpop.f32.mrb[186].mxu0  ;;  %v12983_v53 = vld [vmem:[%s19873_s7 + $0x368] sm:$0xff]  ;;  %s15504_s4 = scalar_lea.vmem %s15503_s15, 8192 }
0x259e   : > { %v14245_v46 = vpop.f32.mrb[187].mxu0 }
0x25d0   : > { %v18478_v41 = vpop.f32.mrb[188].mxu0 }
0x25d1   : > { %v14256_v8 = vpop.f32.mrb[189].mxu0 }
0x25d2   : > { %v18480_v12 = vpop.f32.mrb[190].mxu0 }
0x25d3   : > { %v14257_v16 = vpop.f32.mrb[191].mxu0 }
0x25d8   : > { %v9380_v31 = vpop.f32.mrb[192].mxu0 }
0x25d9   : > { %v18490_v7 = vadd.f32 %v12978_v50, %v9380_v31  ;;  %v14268_v60 = vpop.f32.mrb[193].mxu0 }
0x25da   : > { %v9383_v11 = vpop.f32.mrb[194].mxu0 }
0x25db   : > { %v18492_v10 = vadd.f32 %v12979_v1, %v9383_v11  ;;  %v14269_v5 = vpop.f32.mrb[195].mxu0  ;;  %v9543_v34 = vsel %vm1594_vm3, %v18490_v7, -inf }
0x25dc   : > { %9544 = vmax.xlane.f32.xlu0 %v9543_v34 }
0x25dd   : > { %v9546_v13 = vsel %vm1594_vm3, %v18492_v10, -inf }
0x25de   : > { %9547 = vmax.xlane.f32.xlu1 %v9546_v13 }
0x25e0   : > { %v9484_v52 = vpop.f32.mrb[196].mxu0 }
0x25e1   : > { %v18504_v46 = vadd.f32 %v12982_v4, %v9484_v52  ;;  %v14280_v8 = vpop.f32.mrb[197].mxu0 }
0x25e2   : > { %v9487_v16 = vpop.f32.mrb[198].mxu0 }
0x25e3   : > { %v18506_v50 = vadd.f32 %v12983_v53, %v9487_v16  ;;  %v14281_v31 = vpop.f32.mrb[199].mxu0  ;;  %v9555_v1 = vsel %vm1594_vm3, %v18504_v46, -inf }
0x25e4   : > { %9556 = vmax.xlane.f32.xlu0 %v9555_v1 }
0x25e5   : > { %v9558_v60 = vsel %vm1594_vm3, %v18506_v50, -inf }
0x25e8   : > { %9559 = vmax.xlane.f32.xlu0 %v9558_v60 }
0x25f7   : > { %v9599_v11 = vpop.xlane.xlu0 %9598 }
0x25f8   : > { %15250 = vrcp.f32 %v9599_v11 }
0x25f9   : > { %v9602_v5 = vpop.xlane.xlu1 %9601 }
0x25fa   : > { %15252 = vrcp.f32 %v9602_v5 }
0x25ff   : > { %v9611_v34 = vpop.xlane.xlu0 %9610 }
0x2600   : > { %15254 = vrcp.f32 %v9611_v34 }
0x2602   : > { %v15251_v13 = vpop.eup %15250 }
0x2603   : > { %v9614_v4 = vpop.xlane.xlu1 %9613  ;;  %v9683_v52 = vpop.permute.xlu0 %9682  ;;  %v9625_v8 = vmul.f32 %v15251_v13, %v18436_v28 }
0x2604   : > { %v15253_v53 = vpop.eup %15252  ;;  %15256 = vrcp.f32 %v9614_v4  ;;  %14295 = vmatpush3.bf16.msra.mxu1 %v9683_v52 }
0x2605   : > { %v9626_v16 = vmul.f32 %v15253_v53, %v18440_v18  ;;  %14306 = vmatprep.subr.bf16.mxu1 %v19965_v24 }
0x2607   : > { %v9632_v31 = vpack.c.bf16 %v9626_v16, %v9625_v8  ;;  %v9777_v1 = vpop.permute.xlu1 %9776  ;;  %v10051_v4 = vpop.permute.xlu0 %10050 }
0x2608   : > { %v10056_v53 = vsel %vm1396_vm2, %v10051_v4, 0 }
0x2609   : > { %14297 = vmatmul.mubr.msk.bf16.vlgmr.msra.gmra.mrb[32].mxu1 %vm1594_vm3, %v9632_v31 }
0x260a   : > { %14307 = vmatpush3.bf16.msra.mxu1 %v9777_v1  ;;  %14308 = vmatprep.mubr.msk.bf16.mxu1 %vm15579_vm1, %v19965_v24  ;;  %v15255_v60 = vpop.eup %15254 }
0x260b   : > { %14332 = vmatprep.subr.bf16.mxu1 %v19965_v24  ;;  %v9629_v5 = vmul.f32 %v15255_v60, %v18444_v63  ;;  %v10000_v34 = vpop.permute.xlu1 %9999  ;;  %v10102_v63 = vpop.permute.xlu0 %10101 }
0x260c   : > { %v10005_v13 = vsel %vm1396_vm2, %v10000_v34, 0  ;;  %v10107_v8 = vsel %vm1396_vm2, %v10102_v63, 0 }
0x260e   : > { %v15257_v11 = vpop.eup %15256 }
0x260f   : > { %v9630_v28 = vmul.f32 %v15257_v11, %v18448_v3  ;;  %v9998_v52 = vpop.permute.xlu1 %9997  ;;  %v10153_v16 = vpop.permute.xlu0 %10152 }
0x2610   : > { %v10158_v1 = vsel %vm1396_vm2, %v10153_v16, 0 }
0x2611   : > { %v9634_v18 = vpack.c.bf16 %v9630_v28, %v9629_v5 }
0x2613   : > { %14309 = vmatmul.mubr.msk.bf16.vlgmr.msra.gmra.mrb[36].mxu1 %vm1594_vm3, %v9634_v18  ;;  %v10049_v3 = vpop.permute.xlu1 %10048 }
0x2614   : > { %14333 = vmatpush3.bf16.xpose.msra.mxu1 %v10005_v13  ;;  %14334 = vmatprep.mubr.msk.bf16.mxu1 %vm15579_vm1, %v19965_v24 }
0x2615   : > { %14338 = vmatprep.subr.bf16.mxu1 %v19965_v24 }
0x2617   : > { %v10100_v31 = vpop.permute.xlu1 %10099 }
0x261b   : > { %14335 = vmatmul.mubr.msk.bf16.vlgmr.msra.gmra.mrb[40].mxu1 %vm1396_vm2, %v9998_v52  ;;  %v10151_v60 = vpop.permute.xlu1 %10150 }
0x261c   : > { %14339 = vmatpush3.bf16.xpose.msra.mxu1 %v10056_v53  ;;  %14340 = vmatprep.mubr.msk.bf16.mxu1 %vm15579_vm1, %v19965_v24 }
0x261d   : > { %14344 = vmatprep.subr.bf16.mxu1 %v19965_v24 }
0x2623   : > { %14341 = vmatmul.mubr.msk.bf16.vlgmr.msra.gmra.mrb[44].mxu1 %vm1396_vm2, %v10049_v3 }
0x2624   : > { %14345 = vmatpush3.bf16.xpose.msra.mxu1 %v10107_v8  ;;  %14346 = vmatprep.mubr.msk.bf16.mxu1 %vm15579_vm1, %v19965_v24 }
0x2625   : > { %14350 = vmatprep.subr.bf16.mxu1 %v19965_v24 }
0x262b   : > { %14347 = vmatmul.mubr.msk.bf16.vlgmr.msra.gmra.mrb[48].mxu1 %vm1396_vm2, %v10100_v31 }
0x262c   : > { %14351 = vmatpush3.bf16.xpose.msra.mxu1 %v10158_v1  ;;  %14352 = vmatprep.mubr.msk.bf16.mxu1 %vm15579_vm1, %v19965_v24 }
0x262d   : > { %14362 = vmatprep.subr.bf16.mxu1 %v19965_v24 }
0x2633   : > { %14353 = vmatmul.mubr.msk.bf16.vlgmr.msra.gmra.mrb[52].mxu1 %vm1396_vm2, %v10151_v60 }
0x2634   : > { %14364 = vmatprep.mubr.msk.bf16.mxu1 %vm15579_vm1, %v19965_v24 }
0x2669   : > { %v9545_v11 = vpop.xlane.xlu0 %9544 }
0x266a   : > { %v9567_v5 = vsub.f32 %v18490_v7, %v9545_v11 }
0x266b   : > { %v9548_v28 = vpop.xlane.xlu1 %9547 }
0x266c   : > { %v9575_v34 = vmul.f32 1.442695, %v9567_v5  ;;  %v9568_v18 = vsub.f32 %v18492_v10, %v9548_v28 }
0x266e   : > { %15258 = vpow2.f32 %v9575_v34  ;;  %v9577_v13 = vmul.f32 1.442695, %v9568_v18 }
0x2670   : > { %15260 = vpow2.f32 %v9577_v13 }
0x2671   : > { %v9557_v4 = vpop.xlane.xlu0 %9556 }
0x2672   : > { %v9571_v52 = vsub.f32 %v18504_v46, %v9557_v4 }
0x2674   : > { %v9583_v53 = vmul.f32 1.442695, %v9571_v52 }
0x2675   : > { %v9560_v63 = vpop.xlane.xlu0 %9559 }
0x2676   : > { %15262 = vpow2.f32 %v9583_v53  ;;  %v9572_v3 = vsub.f32 %v18506_v50, %v9560_v63  ;;  %v13008_v53 = vld [vmem:[%s19873_s7 + $0x3b0] sm:$0xff] }
0x2678   : > { %v18548_v8 = vpop.eup %15258  ;;  %v9585_v16 = vmul.f32 1.442695, %v9572_v3  ;;  %v13002_v3 = vld [vmem:[%s19873_s7 + $0x380] sm:$0xff] }
0x2679   : > { %v9591_v7 = vsel %vm1594_vm3, %v18548_v8, 0.0 }
0x267a   : > { %v18552_v31 = vpop.eup %15260  ;;  %15264 = vpow2.f32 %v9585_v16  ;;  %9592 = vadd.xlane.f32.xlu0 %v9591_v7  ;;  %v13003_v7 = vld [vmem:[%s19873_s7 + $0x388] sm:$0xff] }
0x267b   : > { %v9594_v10 = vsel %vm1594_vm3, %v18552_v31, 0.0 }
0x267c   : > { %9595 = vadd.xlane.f32.xlu1 %v9594_v10 }
0x2680   : > { %v18556_v46 = vpop.eup %15262 }
0x2681   : > { %v9603_v1 = vsel %vm1594_vm3, %v18556_v46, 0.0 }
0x2682   : > { %9604 = vadd.xlane.f32.xlu0 %v9603_v1 }
0x2684   : > { %v18560_v50 = vpop.eup %15264 }
0x2685   : > { %v9606_v60 = vsel %vm1594_vm3, %v18560_v50, 0.0 }
0x2686   : > { %9607 = vadd.xlane.f32.xlu1 %v9606_v60 }
0x2697   : > { %9729 = vrot.lane.b32.xlu1 %v16336_v49, %s19963_s19 }
0x2698   : > { %9635 = vrot.lane.b32.xlu0 %v16254_v57, %s19963_s19  ;;  %s500_s19 = sand.u32 1, %s15560_s30  }
0x2699   : > { %s12679_s18 = sshll.u32 %s500_s19, 8 }
0x26dc   : > { %v18568_v11 = vpop.f32.mrb[32].mxu1 }
0x26dd   : > { %v14298_v5 = vpop.f32.mrb[33].mxu1 }
0x26de   : > { %v18570_v28 = vpop.f32.mrb[34].mxu1 }
0x26df   : > { %v14299_v18 = vpop.f32.mrb[35].mxu1 }
0x26e6   : > { %v18574_v13 = vpop.f32.mrb[36].mxu1 }
0x26e7   : > { %v14310_v4 = vpop.f32.mrb[37].mxu1 }
0x26e8   : > { %v18576_v52 = vpop.f32.mrb[38].mxu1 }
0x26e9   : > { %v14311_v63 = vpop.f32.mrb[39].mxu1 }
0x26ee   : > { %v10041_v16 = vpop.f32.mrb[40].mxu1 }
0x26ef   : > { %v18586_v10 = vadd.f32 %v13002_v3, %v10041_v16  ;;  %v14336_v1 = vpop.f32.mrb[41].mxu1  ;;  %v13005_v3 = vld [vmem:[%s19873_s7 + $0x398] sm:$0xff] }
0x26f0   : > { %v10044_v60 = vpop.f32.mrb[42].mxu1 }
0x26f1   : > { %v18588_v5 = vadd.f32 %v13003_v7, %v10044_v60  ;;  %v14337_v18 = vpop.f32.mrb[43].mxu1  ;;  %v10201_v4 = vsel %vm1594_vm3, %v18586_v10, -inf }
0x26f2   : > { %10202 = vmax.xlane.f32.xlu1 %v10201_v4 }
0x26f3   : > { %v10204_v63 = vsel %vm1594_vm3, %v18588_v5, -inf }
0x26f4   : > { %10205 = vmax.xlane.f32.xlu0 %v10204_v63 }
0x26f6   : > { %v10092_v30 = vpop.f32.mrb[44].mxu1 }
0x26f7   : > { %v18600_v16 = vadd.f32 %v13004_v27, %v10092_v30  ;;  %v14342_v7 = vpop.f32.mrb[45].mxu1  ;;  %v13007_v27 = vld [vmem:[%s19873_s7 + $0x3a8] sm:$0xff] }
0x26f8   : > { %v10095_v1 = vpop.f32.mrb[46].mxu1 }
0x26f9   : > { %v18602_v60 = vadd.f32 %v13005_v3, %v10095_v1  ;;  %v14343_v18 = vpop.f32.mrb[47].mxu1  ;;  %v10207_v4 = vsel %vm1594_vm3, %v18600_v16, -inf }
0x26fa   : > { %10208 = vmax.xlane.f32.xlu0 %v10207_v4 }
0x26fb   : > { %v10210_v63 = vsel %vm1594_vm3, %v18602_v60, -inf }
0x26fc   : > { %10211 = vmax.xlane.f32.xlu1 %v10210_v63 }
0x26fe   : > { %v10143_v29 = vpop.f32.mrb[48].mxu1 }
0x26ff   : > { %v18614_v30 = vadd.f32 %v13006_v39, %v10143_v29  ;;  %v14348_v3 = vpop.f32.mrb[49].mxu1  ;;  %v13009_v39 = vld [vmem:[%s19873_s7 + $0x3b8] sm:$0xff] }
0x2700   : > { %v10146_v7 = vpop.f32.mrb[50].mxu1 }
0x2701   : > { %v18616_v1 = vadd.f32 %v13007_v27, %v10146_v7  ;;  %v14349_v18 = vpop.f32.mrb[51].mxu1  ;;  %v10213_v4 = vsel %vm1594_vm3, %v18614_v30, -inf }
0x2702   : > { %10214 = vmax.xlane.f32.xlu0 %v10213_v4 }
0x2703   : > { %v10216_v63 = vsel %vm1594_vm3, %v18616_v1, -inf }
0x2704   : > { %10217 = vmax.xlane.f32.xlu1 %v10216_v63 }
0x2706   : > { %v10194_v34 = vpop.f32.mrb[52].mxu1 }
0x2707   : > { %v18628_v29 = vadd.f32 %v13008_v53, %v10194_v34  ;;  %v9593_v27 = vpop.xlane.xlu0 %9592  ;;  %v14354_v3 = vpop.f32.mrb[53].mxu1 }
0x2708   : > { %15266 = vrcp.f32 %v9593_v27  ;;  %v10197_v7 = vpop.f32.mrb[54].mxu1 }
0x2709   : > { %v18630_v18 = vadd.f32 %v13009_v39, %v10197_v7  ;;  %v9596_v4 = vpop.xlane.xlu1 %9595  ;;  %v14355_v44 = vpop.f32.mrb[55].mxu1  ;;  %v10219_v63 = vsel %vm1594_vm3, %v18628_v29, -inf }
0x270a   : > { %15268 = vrcp.f32 %v9596_v4  ;;  %10220 = vmax.xlane.f32.xlu0 %v10219_v63 }
0x270b   : > { %v10222_v56 = vsel %vm1594_vm3, %v18630_v18, -inf }
0x270c   : > { %10223 = vmax.xlane.f32.xlu1 %v10222_v56 }
0x270f   : > { %v9605_v42 = vpop.xlane.xlu0 %9604 }
0x2710   : > { %15270 = vrcp.f32 %v9605_v42 }
0x2712   : > { %v15267_v34 = vpop.eup %15266 }
0x2713   : > { %v9608_v53 = vpop.xlane.xlu1 %9607  ;;  %v9636_v3 = vpop.permute.xlu0 %9635  ;;  %v9623_v39 = vmul.f32 %v15267_v34, %v18548_v8  ;;  %v9827_v8 = vld [vmem:[%s19871_s5 + $0x4] sm:$0xf]  ;;  %v18653_v34 = vld [vmem:[%s19871_s5] sm:$0xf] }
0x2714   : > { %v15269_v27 = vpop.eup %15268  ;;  %15272 = vrcp.f32 %v9608_v53  ;;  %14289 = vmatpush3.bf16.msra.mxu0 %v9636_v3 }
0x2715   : > { %v9624_v44 = vmul.f32 %v15269_v27, %v18552_v31  ;;  %14300 = vmatprep.subr.bf16.mxu0 %v19965_v24  ;;  %v9841_v31 = vsel %vm2394_vm4, %v9827_v8, 0 }
0x2717   : > { %v9730_v7 = vpop.permute.xlu1 %9729  ;;  %v9631_v4 = vpack.c.bf16 %v9624_v44, %v9623_v39 }
0x2719   : > { %14291 = vmatmul.mubr.msk.bf16.vlgmr.msra.gmra.mrb[200].mxu0 %vm1594_vm3, %v9631_v4 }
0x271a   : > { %14301 = vmatpush3.bf16.msra.mxu0 %v9730_v7  ;;  %14302 = vmatprep.mubr.msk.bf16.mxu0 %vm15579_vm1, %v19965_v24  ;;  %v15271_v42 = vpop.eup %15270 }
0x271b   : > { %v9627_v63 = vmul.f32 %v15271_v42, %v18556_v46  ;;  %14644 = vmatprep.subr.msk.bf16.mxu0 %vm2394_vm4, %v9827_v8 }
0x271e   : > { %v15273_v56 = vpop.eup %15272 }
0x271f   : > { %v9628_v53 = vmul.f32 %v15273_v56, %v18560_v50 }
0x2721   : > { %v9633_v3 = vpack.c.bf16 %v9628_v53, %v9627_v63 }
0x2723   : > { %14303 = vmatmul.mubr.msk.bf16.vlgmr.msra.gmra.mrb[204].mxu0 %vm1594_vm3, %v9633_v3 }
0x2724   : > { %14313 = vmatpush3.bf16.msra.mxu0 %v9841_v31 }
0x2725   : > { %14645 = vmatprep.subr.msk.bf16.mxu0 %vm2394_vm4, %v18653_v34 }
0x277f   : > { %v10203_v46 = vpop.xlane.xlu1 %10202 }
0x2780   : > { %v10225_v50 = vsub.f32 %v18586_v10, %v10203_v46 }
0x2781   : > { %v10206_v27 = vpop.xlane.xlu0 %10205 }
0x2782   : > { %v10233_v39 = vmul.f32 1.442695, %v10225_v50  ;;  %v10226_v44 = vsub.f32 %v18588_v5, %v10206_v27 }
0x2784   : > { %15274 = vpow2.f32 %v10233_v39  ;;  %v10235_v7 = vmul.f32 1.442695, %v10226_v44 }
0x2786   : > { %15276 = vpow2.f32 %v10235_v7 }
0x2787   : > { %v10209_v4 = vpop.xlane.xlu0 %10208 }
0x2788   : > { %v10227_v42 = vsub.f32 %v18600_v16, %v10209_v4 }
0x2789   : > { %v10212_v56 = vpop.xlane.xlu1 %10211 }
0x278a   : > { %v10237_v63 = vmul.f32 1.442695, %v10227_v42  ;;  %v10228_v53 = vsub.f32 %v18602_v60, %v10212_v56 }
0x278c   : > { %15278 = vpow2.f32 %v10237_v63  ;;  %v10239_v3 = vmul.f32 1.442695, %v10228_v53 }
0x278e   : > { %v18661_v8 = vpop.eup %15274  ;;  %15280 = vpow2.f32 %v10239_v3 }
0x278f   : > { %v10215_v10 = vpop.xlane.xlu0 %10214  ;;  %v10249_v31 = vsel %vm1594_vm3, %v18661_v8, 0.0 }
0x2790   : > { %v18665_v5 = vpop.eup %15276  ;;  %v10229_v46 = vsub.f32 %v18614_v30, %v10215_v10  ;;  %10250 = vadd.xlane.f32.xlu0 %v10249_v31 }
0x2791   : > { %v10218_v50 = vpop.xlane.xlu1 %10217  ;;  %v10252_v16 = vsel %vm1594_vm3, %v18665_v5, 0.0 }
0x2792   : > { %v10241_v27 = vmul.f32 1.442695, %v10229_v46  ;;  %v10230_v60 = vsub.f32 %v18616_v1, %v10218_v50  ;;  %10253 = vadd.xlane.f32.xlu1 %v10252_v16 }
0x2794   : > { %15282 = vpow2.f32 %v10241_v27  ;;  %v10243_v39 = vmul.f32 1.442695, %v10230_v60 }
0x2796   : > { %v18671_v44 = vpop.eup %15278  ;;  %15284 = vpow2.f32 %v10243_v39 }
0x2797   : > { %v10221_v7 = vpop.xlane.xlu0 %10220  ;;  %v10255_v4 = vsel %vm1594_vm3, %v18671_v44, 0.0 }
0x2798   : > { %v18675_v42 = vpop.eup %15280  ;;  %v10231_v30 = vsub.f32 %v18628_v29, %v10221_v7  ;;  %10256 = vadd.xlane.f32.xlu0 %v10255_v4 }
0x2799   : > { %v10224_v56 = vpop.xlane.xlu1 %10223  ;;  %v10258_v63 = vsel %vm1594_vm3, %v18675_v42, 0.0 }
0x279a   : > { %v10245_v1 = vmul.f32 1.442695, %v10231_v30  ;;  %v10232_v53 = vsub.f32 %v18630_v18, %v10224_v56  ;;  %10259 = vadd.xlane.f32.xlu1 %v10258_v63  ;;  %v20000_v30 = vpack.c.bf16 %v18570_v28, %v18568_v11  ;;  %v20002_v11 = vpack.c.bf16 %v18474_v37, %v18470_v47 }
0x279b   : > { %v20003_v28 = vpack.c.bf16 %v18390_v22, %v18388_v33 }
0x279c   : > { %15286 = vpow2.f32 %v10245_v1  ;;  %v10247_v3 = vmul.f32 1.442695, %v10232_v53  ;;  %v20004_v53 = vpack.c.bf16 %v18480_v12, %v18478_v41 }
0x279e   : > { %v18681_v10 = vpop.eup %15282  ;;  %15288 = vpow2.f32 %v10247_v3 }
0x279f   : > { %v10261_v31 = vsel %vm1594_vm3, %v18681_v10, 0.0 }
0x27a0   : > { %v18685_v46 = vpop.eup %15284  ;;  %10262 = vadd.xlane.f32.xlu0 %v10261_v31 }
0x27a1   : > { %v10264_v29 = vsel %vm1594_vm3, %v18685_v46, 0.0 }
0x27a2   : > { %10265 = vadd.xlane.f32.xlu1 %v10264_v29 }
0x27a6   : > { %v18689_v50 = vpop.eup %15286 }
0x27a7   : > { %v10267_v18 = vsel %vm1594_vm3, %v18689_v50, 0.0 }
0x27a8   : > { %v18693_v16 = vpop.eup %15288  ;;  %10268 = vadd.xlane.f32.xlu0 %v10267_v18 }
0x27a9   : > { %v10270_v27 = vsel %vm1594_vm3, %v18693_v16, 0.0 }
0x27aa   : > { %10271 = vadd.xlane.f32.xlu1 %v10270_v27 }
0x27bb   : > { %10340 = vrot.lane.b32.xlu1 %v16293_v40, %s19978_s26 }
0x27be   : > { %10293 = vrot.lane.b32.xlu0 %v16254_v57, %s19978_s26 }
0x27bf   : > { %10387 = vrot.lane.b32.xlu1 %v16336_v49, %s19978_s26 }
0x27c2   : > { %10585 = vrot.lane.b32.xlu0 %v16254_v57, %s19979_s28 }
0x27c3   : > { %10434 = vrot.lane.b32.xlu1 %v16362_v36, %s19978_s26  ;;  %s19621_s26 = scalar_lea.vmem [#allocation2], %s12679_s18 }
0x27c6   : > { %10636 = vrot.lane.b32.xlu0 %v16293_v40, %s19979_s28 }
0x27c7   : > { %10583 = vrot.lane.b32.xlu1 %v16260_v6, %s19980_s27 }
0x27ca   : > { %10634 = vrot.lane.b32.xlu0 %v19994_v14, %s19980_s27  ;;  %v9921_v14 = vsel %vm2394_vm4, %v18653_v34, 0  ;;  %v20001_v34 = vpack.c.bf16 %v18576_v52, %v18574_v13  ;;  %v20005_v13 = vpack.c.bf16 %v18397_v51, %v18395_v62 }
0x27cb   : > { %10687 = vrot.lane.b32.xlu1 %v16336_v49, %s19979_s28 }
0x27ce   : > { %10685 = vrot.lane.b32.xlu0 %v19996_v61, %s19980_s27 }
0x27cf   : > { %10738 = vrot.lane.b32.xlu1 %v16362_v36, %s19979_s28  ;;  %s13087_s28 = sshll.u32 %s15568_s16, 12 }
0x27d3   : > { %10736 = vrot.lane.b32.xlu1 %v19995_v20, %s19980_s27  ;;  %s12576_s27 = sshll.u32 %s19621_s26, 4  ;;  %s19808_s27 = int_to_ptr.vmem [resolvable:$true] %s12576_s27 }
0x27d4   : > { %s15498_s20 = scalar_lea.vmem %s19808_s27, 4096  ;;  %p15505_p1 = scmp.lt.s32.totalorder %s19808_s27, %s15503_s15 }
0x27d5   : > { %p15499_p12 = scmp.ne.s32.totalorder %s19808_s27, %s15498_s20  ;;  %p15506_p2 = scmp.lt.s32.totalorder %s15504_s4, %s15498_s20 }
0x27d7   : > { %p15500_p13 = pnand %p15499_p12, %p15709_p4  ;;  %p15507_p3 = por %p15506_p2, %p15505_p1 }
0x27d9   : > { %p15501_p0 = pneg %p15500_p13 }
0x27db   : > { %p15508_p5 = pnand %p15507_p3, %p15501_p0 }
0x27ec   : > { %v9675_v60 = vpop.f32.mrb[200].mxu0 }
0x27ed   : > { %v14292_v39 = vpop.f32.mrb[201].mxu0 }
0x27ee   : > { %v9678_v7 = vpop.f32.mrb[202].mxu0 }
0x27ef   : > { %v9823_v4 = vpack.c.bf16 %v9678_v7, %v9675_v60  ;;  %v14293_v6 = vpop.f32.mrb[203].mxu0 }
0x27f1   : > { %14314 = vmatprep.mubr.msk.bf16.mxu0 %vm1396_vm2, %v9823_v4 }
0x27f2   : > { %14315 = vmatmul.mubr.msk.bf16.vlgmr.msra.gmra.mrb[208].mxu0 %vm1396_vm2, %v20000_v30 }
0x27f3   : > { %14323 = vmatpush3.bf16.msra.mxu0 %v9921_v14 }
0x27f4   : > { %14356 = vmatprep.subr.bf16.mxu0 %v19965_v24 }
0x27f6   : > { %v9769_v61 = vpop.f32.mrb[204].mxu0 }
0x27f7   : > { %v14304_v20 = vpop.f32.mrb[205].mxu0 }
0x27f8   : > { %v9772_v56 = vpop.f32.mrb[206].mxu0 }
0x27f9   : > { %v9825_v63 = vpack.c.bf16 %v9772_v56, %v9769_v61  ;;  %v14305_v1 = vpop.f32.mrb[207].mxu0 }
0x27fb   : > { %14318 = vmatprep.mubr.msk.bf16.mxu0 %vm1396_vm2, %v9825_v63 }
0x27fc   : > { %14319 = vmatmul.mubr.msk.bf16.gmra.mrb[212].mxu0 %vm1396_vm2, %v20001_v34 }
0x27fd   : > { %14324 = vmatprep.mubr.msk.bf16.mxu0 %vm1396_vm2, %v20002_v11 }
0x2804   : > { %14325 = vmatmul.mubr.msk.bf16.vlgmr.msra.gmra.mrb[208].mxu0 %vm1396_vm2, %v20003_v28 }
0x2805   : > { %14328 = vmatprep.mubr.msk.bf16.mxu0 %vm1396_vm2, %v20004_v53 }
0x280c   : > { %14329 = vmatmul.mubr.msk.bf16.gmra.mrb[212].mxu0 %vm1396_vm2, %v20005_v13 }
0x280d   : > { %14358 = vmatprep.mubr.msk.bf16.mxu0 %vm15579_vm1, %v19965_v24 }
0x281d   : > { %v10251_v37 = vpop.xlane.xlu0 %10250 }
0x281f   : > { %v10254_v47 = vpop.xlane.xlu1 %10253 }
0x2820   : > { %15290 = vrcp.f32 %v10254_v47 }
0x2821   : > { %15292 = vrcp.f32 %v10251_v37 }
0x2825   : > { %v10257_v33 = vpop.xlane.xlu0 %10256 }
0x2827   : > { %v10260_v52 = vpop.xlane.xlu1 %10259 }
0x2828   : > { %15294 = vrcp.f32 %v10260_v52 }
0x2829   : > { %15296 = vrcp.f32 %v10257_v33 }
0x282a   : > { %v15291_v12 = vpop.eup %15290 }
0x282b   : > { %v15293_v3 = vpop.eup %15292  ;;  %v10282_v31 = vmul.f32 %v15291_v12, %v18665_v5 }
0x282c   : > { %v10281_v27 = vmul.f32 %v15293_v3, %v18661_v8  ;;  %v10485_v8 = vld [vmem:[%s19871_s5 + $0x8] sm:$0xf] }
0x282d   : > { %v10263_v41 = vpop.xlane.xlu0 %10262 }
0x282e   : > { %v10289_v7 = vpack.c.bf16 %v10282_v31, %v10281_v27 }
0x282f   : > { %v10266_v22 = vpop.xlane.xlu1 %10265 }
0x2830   : > { %15298 = vrcp.f32 %v10266_v22 }
0x2831   : > { %15300 = vrcp.f32 %v10263_v41 }
0x2832   : > { %v15295_v51 = vpop.eup %15294 }
0x2833   : > { %v15297_v18 = vpop.eup %15296  ;;  %v10284_v60 = vmul.f32 %v15295_v51, %v18675_v42 }
0x2834   : > { %v10283_v4 = vmul.f32 %v15297_v18, %v18671_v44 }
0x2835   : > { %v10269_v62 = vpop.xlane.xlu0 %10268 }
0x2836   : > { %15302 = vrcp.f32 %v10269_v62  ;;  %v10290_v30 = vpack.c.bf16 %v10284_v60, %v10283_v4 }
0x2837   : > { %v10272_v29 = vpop.xlane.xlu1 %10271 }
0x2838   : > { %15304 = vrcp.f32 %v10272_v29 }
0x2839   : > { %v10294_v39 = vpop.permute.xlu0 %10293 }
0x283a   : > { %14357 = vmatpush3.bf16.msra.mxu0 %v10294_v39  ;;  %v15299_v14 = vpop.eup %15298 }
0x283b   : > { %v10341_v6 = vpop.permute.xlu1 %10340  ;;  %14368 = vmatprep.subr.bf16.mxu0 %v19965_v24  ;;  %v15301_v5 = vpop.eup %15300  ;;  %v10286_v44 = vmul.f32 %v15299_v14, %v18685_v46  ;;  %v10499_v46 = vsel %vm2394_vm4, %v10485_v8, 0 }
0x283c   : > { %14363 = vmatpush3.bf16.msra.mxu1 %v10341_v6  ;;  %v10285_v20 = vmul.f32 %v15301_v5, %v18681_v10 }
0x283d   : > { %14359 = vmatmul.mubr.msk.bf16.vlgmr.msra.gmra.mrb[216].mxu0 %vm1594_vm3, %v10289_v7  ;;  %14374 = vmatprep.subr.bf16.mxu1 %v19965_v24  ;;  %v10586_v10 = vpop.permute.xlu0 %10585 }
0x283e   : > { %14370 = vmatprep.mubr.msk.bf16.mxu0 %vm15579_vm1, %v19965_v24  ;;  %v10291_v11 = vpack.c.bf16 %v10286_v44, %v10285_v20  ;;  %v13022_v20 = vld [vmem:[%s19873_s7 + $0x3c0] sm:$0xff] }
0x283f   : > { %14365 = vmatmul.mubr.msk.bf16.vlgmr.msra.gmra.mrb[56].mxu1 %vm1594_vm3, %v10290_v30  ;;  %v10388_v42 = vpop.permute.xlu1 %10387 }
0x2840   : > { %v15303_v61 = vpop.eup %15302  ;;  %14369 = vmatpush3.bf16.msra.mxu0 %v10388_v42  ;;  %14376 = vmatprep.mubr.msk.bf16.mxu1 %vm15579_vm1, %v19965_v24 }
0x2841   : > { %14646 = vmatprep.subr.msk.bf16.mxu0 %vm2394_vm4, %v10485_v8  ;;  %v10287_v63 = vmul.f32 %v15303_v61, %v18689_v50  ;;  %v10591_v50 = vsel %vm1396_vm2, %v10586_v10, 0  ;;  %v10637_v53 = vpop.permute.xlu0 %10636 }
0x2842   : > { %v15305_v56 = vpop.eup %15304  ;;  %v10642_v47 = vsel %vm1396_vm2, %v10637_v53, 0  ;;  %v13024_v53 = vld [vmem:[%s19873_s7 + $0x3d0] sm:$0xff] }
0x2843   : > { %v10288_v1 = vmul.f32 %v15305_v56, %v18693_v16  ;;  %v10435_v34 = vpop.permute.xlu1 %10434 }
0x2844   : > { %14375 = vmatpush3.bf16.msra.mxu1 %v10435_v34 }
0x2845   : > { %v10292_v28 = vpack.c.bf16 %v10288_v1, %v10287_v63  ;;  %14371 = vmatmul.mubr.msk.bf16.vlgmr.msra.gmra.mrb[220].mxu0 %vm1594_vm3, %v10291_v11  ;;  %14390 = vmatprep.subr.bf16.mxu1 %v19965_v24  ;;  %v10635_v52 = vpop.permute.xlu0 %10634  ;;  %v13023_v1 = vld [vmem:[%s19873_s7 + $0x3c8] sm:$0xff] }
0x2846   : > { %14381 = vmatpush3.bf16.msra.mxu0 %v10499_v46 }
0x2847   : > { %14377 = vmatmul.mubr.msk.bf16.vlgmr.msra.gmra.mrb[60].mxu1 %vm1594_vm3, %v10292_v28  ;;  %14402 = vmatprep.subr.bf16.mxu0 %v19965_v24  ;;  %v10584_v16 = vpop.permute.xlu1 %10583 }
0x2848   : > { %14392 = vmatprep.mubr.msk.bf16.mxu1 %vm15579_vm1, %v19965_v24 }
0x2849   : > { %v10686_v56 = vpop.permute.xlu0 %10685 }
0x284b   : > { %v10688_v13 = vpop.permute.xlu1 %10687 }
0x284c   : > { %v10693_v39 = vsel %vm1396_vm2, %v10688_v13, 0 }
0x284d   : > { %14391 = vmatpush3.bf16.xpose.msra.mxu1 %v10591_v50 }
0x284e   : > { %14396 = vmatprep.subr.bf16.mxu1 %v19965_v24 }
0x284f   : > { %v10739_v37 = vpop.permute.xlu1 %10738 }
0x2850   : > { %v10744_v33 = vsel %vm1396_vm2, %v10739_v37, 0 }
0x2853   : > { %v10737_v22 = vpop.permute.xlu1 %10736 }
0x2854   : > { %14393 = vmatmul.mubr.msk.bf16.vlgmr.msra.gmra.mrb[64].mxu1 %vm1396_vm2, %v10584_v16 }
0x2855   : > { %14397 = vmatpush3.bf16.xpose.msra.mxu1 %v10642_v47  ;;  %14398 = vmatprep.mubr.msk.bf16.mxu1 %vm15579_vm1, %v19965_v24  ;;  %v13025_v47 = vld [vmem:[%s19873_s7 + $0x3d8] sm:$0xff] }
0x2856   : > { %14408 = vmatprep.subr.bf16.mxu1 %v19965_v24 }
0x285c   : > { %14399 = vmatmul.mubr.msk.bf16.vlgmr.msra.gmra.mrb[68].mxu1 %vm1396_vm2, %v10635_v52 }
0x285d   : > { %14409 = vmatpush3.bf16.xpose.msra.mxu1 %v10744_v33  ;;  %14410 = vmatprep.mubr.msk.bf16.mxu1 %vm15579_vm1, %v19965_v24 }
0x285e   : > { %14420 = vmatprep.subr.bf16.mxu1 %v19965_v24 }
0x2864   : > { %14411 = vmatmul.mubr.msk.bf16.vlgmr.msra.gmra.mrb[72].mxu1 %vm1396_vm2, %v10737_v22 }
0x2865   : > { %14422 = vmatprep.mubr.msk.bf16.mxu1 %vm15579_vm1, %v19965_v24 }
0x2910   : > { %v10333_v41 = vpop.f32.mrb[216].mxu0 }
0x2911   : > { %v14360_v12 = vpop.f32.mrb[217].mxu0 }
0x2912   : > { %v10336_v3 = vpop.f32.mrb[218].mxu0  ;;  %v10380_v62 = vpop.f32.mrb[56].mxu1 }
0x2913   : > { %v10481_v51 = vpack.c.bf16 %v10336_v3, %v10333_v41  ;;  %v14361_v31 = vpop.f32.mrb[219].mxu0  ;;  %v14366_v29 = vpop.f32.mrb[57].mxu1 }
0x2914   : > { %v10383_v18 = vpop.f32.mrb[58].mxu1 }
0x2915   : > { %v10482_v27 = vpack.c.bf16 %v10383_v18, %v10380_v62  ;;  %v14367_v60 = vpop.f32.mrb[59].mxu1  ;;  %14382 = vmatprep.mubr.msk.bf16.mxu0 %vm1396_vm2, %v10481_v51 }
0x2917   : > { %14383 = vmatmul.mubr.msk.bf16.vlgmr.msra.gmra.mrb[208].mxu0 %vm1396_vm2, %v10482_v27 }
0x2918   : > { %14403 = vmatpush3.bf16.xpose.msra.mxu0 %v10693_v39  ;;  %v10427_v7 = vpop.f32.mrb[220].mxu0 }
0x2919   : > { %v14372_v4 = vpop.f32.mrb[221].mxu0  ;;  %14414 = vmatprep.subr.bf16.mxu0 %v19965_v24 }
0x291a   : > { %v10430_v6 = vpop.f32.mrb[222].mxu0  ;;  %v10474_v14 = vpop.f32.mrb[60].mxu1 }
0x291b   : > { %v10483_v30 = vpack.c.bf16 %v10430_v6, %v10427_v7  ;;  %v14373_v5 = vpop.f32.mrb[223].mxu0  ;;  %v14378_v8 = vpop.f32.mrb[61].mxu1 }
0x291c   : > { %v10477_v44 = vpop.f32.mrb[62].mxu1 }
0x291d   : > { %v10484_v42 = vpack.c.bf16 %v10477_v44, %v10474_v14  ;;  %v14379_v61 = vpop.f32.mrb[63].mxu1  ;;  %14386 = vmatprep.mubr.msk.bf16.mxu0 %vm1396_vm2, %v10483_v30  ;;  %v13026_v44 = vld [vmem:[%s19873_s7 + $0x3e0] sm:$0xff] }
0x291f   : > { %14387 = vmatmul.mubr.msk.bf16.gmra.mrb[212].mxu0 %vm1396_vm2, %v10484_v42  ;;  %v13028_v42 = vld [vmem:[%s19873_s7 + $0x3f0] sm:$0xff] }
0x2920   : > { %14404 = vmatprep.mubr.msk.bf16.mxu0 %vm15579_vm1, %v19965_v24 }
0x2927   : > { %v10627_v63 = vpop.f32.mrb[64].mxu1  ;;  %14405 = vmatmul.mubr.msk.bf16.vlgmr.msra.gmra.mrb[224].mxu0 %vm1396_vm2, %v10686_v56  ;;  %v13027_v56 = vld [vmem:[%s19873_s7 + $0x3e8] sm:$0xff] }
0x2928   : > { %v10628_v34 = vadd.f32 %v13022_v20, %v10627_v63  ;;  %v14394_v11 = vpop.f32.mrb[65].mxu1  ;;  %14416 = vmatprep.mubr.msk.bf16.mxu0 %vm15579_vm1, %v19965_v24 }
0x2929   : > { %v10630_v46 = vpop.f32.mrb[66].mxu1 }
0x292a   : > { %v10631_v28 = vadd.f32 %v13023_v1, %v10630_v46  ;;  %v14395_v10 = vpop.f32.mrb[67].mxu1  ;;  %v10787_v50 = vsel %vm1594_vm3, %v10628_v34, -inf }
0x292b   : > { %10788 = vmax.xlane.f32.xlu0 %v10787_v50 }
0x292c   : > { %v10790_v16 = vsel %vm1594_vm3, %v10631_v28, -inf }
0x292d   : > { %10791 = vmax.xlane.f32.xlu1 %v10790_v16 }
0x292f   : > { %v10678_v13 = vpop.f32.mrb[68].mxu1 }
0x2930   : > { %v10679_v37 = vadd.f32 %v13024_v53, %v10678_v13  ;;  %v14400_v52 = vpop.f32.mrb[69].mxu1 }
0x2931   : > { %v10681_v33 = vpop.f32.mrb[70].mxu1 }
0x2932   : > { %v10682_v22 = vadd.f32 %v13025_v47, %v10681_v33  ;;  %v14401_v41 = vpop.f32.mrb[71].mxu1  ;;  %v10793_v12 = vsel %vm1594_vm3, %v10679_v37, -inf }
0x2933   : > { %10794 = vmax.xlane.f32.xlu0 %v10793_v12 }
0x2934   : > { %v10796_v3 = vsel %vm1594_vm3, %v10682_v22, -inf }
0x2937   : > { %10797 = vmax.xlane.f32.xlu0 %v10796_v3  ;;  %v10780_v62 = vpop.f32.mrb[72].mxu1 }
0x2938   : > { %v14412_v51 = vpop.f32.mrb[73].mxu1  ;;  %v10781_v46 = vadd.f32 %v13028_v42, %v10780_v62 }
0x2939   : > { %v10783_v31 = vpop.f32.mrb[74].mxu1 }
0x293a   : > { %v14413_v29 = vpop.f32.mrb[75].mxu1  ;;  %v10805_v13 = vsel %vm1594_vm3, %v10781_v46, -inf }
0x29b8   : > { %v10789_v18 = vpop.xlane.xlu0 %10788 }
0x29b9   : > { %v10811_v39 = vsub.f32 %v10628_v34, %v10789_v18  ;;  %v13029_v34 = vld [vmem:[%s19873_s7 + $0x3f8] sm:$0xff] }
0x29ba   : > { %v10792_v60 = vpop.xlane.xlu1 %10791  ;;  %v10784_v16 = vadd.f32 %v13029_v34, %v10783_v31 }
0x29bb   : > { %v10812_v7 = vsub.f32 %v10631_v28, %v10792_v60  ;;  %v10819_v6 = vmul.f32 1.442695, %v10811_v39 }
0x29bd   : > { %v10821_v30 = vmul.f32 1.442695, %v10812_v7  ;;  %15306 = vpow2.f32 %v10819_v6 }
0x29bf   : > { %15308 = vpow2.f32 %v10821_v30 }
0x29c0   : > { %v10795_v27 = vpop.xlane.xlu0 %10794 }
0x29c1   : > { %v10813_v14 = vsub.f32 %v10679_v37, %v10795_v27  ;;  %v10808_v37 = vsel %vm1594_vm3, %v10784_v16, -inf }
0x29c3   : > { %v10823_v8 = vmul.f32 1.442695, %v10813_v14 }
0x29c4   : > { %v10798_v4 = vpop.xlane.xlu0 %10797 }
0x29c5   : > { %v10814_v5 = vsub.f32 %v10682_v22, %v10798_v4  ;;  %15310 = vpow2.f32 %v10823_v8 }
0x29c7   : > { %v10825_v61 = vmul.f32 1.442695, %v10814_v5  ;;  %v18836_v47 = vpop.eup %15306 }
0x29c8   : > { %v10835_v33 = vsel %vm1594_vm3, %v18836_v47, 0.0 }
0x29c9   : > { %15312 = vpow2.f32 %v10825_v61  ;;  %v18839_v52 = vpop.eup %15308 }
0x29ca   : > { %v10838_v41 = vsel %vm1594_vm3, %v18839_v52, 0.0 }
0x29cf   : > { %v18843_v22 = vpop.eup %15310 }
0x29d0   : > { %v10841_v3 = vsel %vm1594_vm3, %v18843_v22, 0.0 }
0x29d3   : > { %v18847_v12 = vpop.eup %15312 }
0x29d4   : > { %v10844_v62 = vsel %vm1594_vm3, %v18847_v12, 0.0 }
0x29fa   : > { %v10729_v20 = vpop.f32.mrb[224].mxu0 }
0x29fb   : > { %v10730_v63 = vadd.f32 %v13026_v44, %v10729_v20  ;;  %v14406_v1 = vpop.f32.mrb[225].mxu0 }
0x29fc   : > { %v10732_v11 = vpop.f32.mrb[226].mxu0  ;;  %v15467_v1 = vld [vmem:[%s15729_s21 + $0x10] sm:$0xff] }
0x29fd   : > { %v10733_v28 = vadd.f32 %v13027_v56, %v10732_v11  ;;  %v14407_v10 = vpop.f32.mrb[227].mxu0  ;;  %v10799_v50 = vsel %vm1594_vm3, %v10730_v63, -inf  ;;  %v18874_v56 = vld [vmem:[%s19872_s6] ss:$0 sm:$0xff]  ;;  %v15469_v11 = vld [vmem:[%s15729_s21 + $0x50] sm:$0xff] }
0x29fe   : > { %10800 = vmax.xlane.f32.xlu0 %v10799_v50 }
0x29ff   : > { %v10802_v53 = vsel %vm1594_vm3, %v10733_v28, -inf }
0x2a00   : > { %10803 = vmax.xlane.f32.xlu1 %v10802_v53  ;;  %v18896_v53 = vld [vmem:[%s15729_s21 + $0x70] sm:$0xff] }
0x2a02   : > { %10806 = vmax.xlane.f32.xlu0 %v10805_v13 }
0x2a04   : > { %10809 = vmax.xlane.f32.xlu1 %v10808_v37 }
0x2a06   : > { %10836 = vadd.xlane.f32.xlu0 %v10835_v33 }
0x2a08   : > { %10839 = vadd.xlane.f32.xlu1 %v10838_v41  ;;  %v15472_v41 = vld [vmem:[%s15729_s21 + $0x80] sm:$0xff] }
0x2a0a   : > { %10842 = vadd.xlane.f32.xlu0 %v10841_v3  ;;  %v15473_v3 = vld [vmem:[%s15729_s21 + $0x90] sm:$0xff] }
0x2a0c   : > { %10845 = vadd.xlane.f32.xlu1 %v10844_v62  ;;  %v3750_v62 = vcombine.low %v15472_v41, %v15473_v3 }
0x2a8b   : > { %v10801_v51 = vpop.xlane.xlu0 %10800 }
0x2a8c   : > { %v10815_v31 = vsub.f32 %v10730_v63, %v10801_v51  ;;  %v3722_v63 = vadd.f32 %v18874_v56, %v17032_v54  ;;  %v3725_v54 = vadd.f32 %v17034_v23, %v18874_v56  ;;  %v3726_v23 = vadd.f32 %v18874_v56, %v17052_v35  ;;  %v18923_v35 = vld [vmem:[%s19872_s6] ss:$0 sm:$0xff] }
0x2a8d   : > { %v10804_v29 = vpop.xlane.xlu1 %10803 }
0x2a8e   : > { %v10827_v60 = vmul.f32 1.442695, %v10815_v31  ;;  %v10816_v61 = vsub.f32 %v10733_v28, %v10804_v29  ;;  %v3728_v31 = vadd.f32 %v17050_v48, %v18874_v56  ;;  %v15474_v29 = vld [vmem:[%s15729_s21 + $0xc0] sm:$0xff] }
0x2a8f   : > { %v10807_v18 = vpop.xlane.xlu0 %10806 }
0x2a90   : > { %v10817_v27 = vsub.f32 %v10781_v46, %v10807_v18  ;;  %v10829_v20 = vmul.f32 1.442695, %v10816_v61  ;;  %v15475_v18 = vld [vmem:[%s15729_s21 + $0xd0] sm:$0xff] }
0x2a91   : > { %v10810_v39 = vpop.xlane.xlu1 %10809 }
0x2a92   : > { %v10831_v7 = vmul.f32 1.442695, %v10817_v27  ;;  %v10818_v4 = vsub.f32 %v10784_v16, %v10810_v39  ;;  %v18893_v16 = vld [vmem:[%s15729_s21 + $0x60] sm:$0xff]  ;;  %v3752_v27 = vcombine.low %v15474_v29, %v15475_v18 }
0x2a94   : > { %15314 = vpow2.f32 %v10831_v7  ;;  %v10833_v6 = vmul.f32 1.442695, %v10818_v4  ;;  %v18925_v7 = vadd.f32 %v3752_v27, %v3728_v31  ;;  %v6209_v4 = vadd.f32 %v18923_v35, %v17660_v26  ;;  %v19001_v27 = vld [vmem:[%s15729_s21 + $0xc8] sm:$0xff] }
0x2a95   : > { %15316 = vpow2.f32 %v10827_v60  ;;  %v18916_v60 = vadd.f32 %v3750_v62, %v3726_v23  ;;  %v6213_v26 = vadd.f32 %v18923_v35, %v17680_v2  ;;  %v18954_v2 = vld [vmem:[%s19872_s6] ss:$0 sm:$0xff] }
0x2a96   : > { %15318 = vpow2.f32 %v10833_v6  ;;  %v11233_v61 = vsel %vm553_vm0, %v18925_v7, 0.0  ;;  %v8684_v62 = vadd.f32 %v18954_v2, %v18308_v21 }
0x2a97   : > { %15320 = vpow2.f32 %v10829_v20  ;;  %v11227_v6 = vsel %vm553_vm0, %v18916_v60, 0.0 }
0x2a9e   : > { %v18853_v14 = vpop.eup %15314 }
0x2a9f   : > { %v18855_v30 = vpop.eup %15316  ;;  %v10853_v5 = vsel %vm1594_vm3, %v18853_v14, 0.0 }
0x2aa0   : > { %v18859_v8 = vpop.eup %15318  ;;  %10854 = vadd.xlane.f32.xlu0 %v10853_v5  ;;  %v10847_v42 = vsel %vm1594_vm3, %v18855_v30, 0.0  ;;  %v6211_v5 = vadd.f32 %v17658_v17, %v18923_v35 }
0x2aa1   : > { %v10856_v44 = vsel %vm1594_vm3, %v18859_v8, 0.0  ;;  %v18886_v10 = vpop.eup %15320 }
0x2aa2   : > { %10857 = vadd.xlane.f32.xlu1 %v10856_v44  ;;  %v10850_v37 = vsel %vm1594_vm3, %v18886_v10, 0.0 }
0x2aa4   : > { %10848 = vadd.xlane.f32.xlu0 %v10847_v42 }
0x2ab3   : > { %10926 = vrot.lane.b32.xlu1 %v16293_v40, %s19987_s14  ;;  %v15466_v40 = vld [vmem:[%s15729_s21] sm:$0xff] }
0x2ab4   : > { %v3746_v34 = vcombine.low %v15466_v40, %v15467_v1  ;;  %v12865_v48 = vcombine.high %v15466_v40, %v15467_v1  ;;  %v6215_v40 = vadd.f32 %v17678_v19, %v18923_v35  ;;  %v12871_v1 = vcombine.high %v15474_v29, %v15475_v18  ;;  %v18961_v19 = vld [vmem:[%s15729_s21 + $0x8] sm:$0xff] }
0x2ab5   : > { %v8686_v18 = vadd.f32 %v18306_v0, %v18954_v2 }
0x2ab6   : > { %v18884_v28 = vadd.f32 %v3746_v34, %v3722_v63  ;;  %v18933_v42 = vadd.f32 %v12865_v48, %v6209_v4  ;;  %v12869_v63 = vcombine.high %v15472_v41, %v15473_v3 }
0x2ab7   : > { %10973 = vrot.lane.b32.xlu1 %v16336_v49, %s19987_s14  ;;  %v3724_v49 = vadd.f32 %v17030_v32, %v18874_v56  ;;  %v3749_v32 = vcombine.low %v18893_v16, %v18896_v53 }
0x2ab8   : > { %v11215_v13 = vsel %vm553_vm0, %v18884_v28, 0.0  ;;  %v11239_v17 = vsel %vm553_vm0, %v18933_v42, 0.0  ;;  %v18947_v34 = vadd.f32 %v12869_v63, %v6213_v26 }
0x2ab9   : > { %v18904_v33 = vadd.f32 %v3749_v32, %v3725_v54  ;;  %v8682_v32 = vadd.f32 %v18286_v45, %v18954_v2  ;;  %v18989_v45 = vld [vmem:[%s15729_s21 + $0x88] sm:$0xff] }
0x2aba   : > { %10879 = vrot.lane.b32.xlu0 %v16254_v57, %s19987_s14  ;;  %v15468_v57 = vld [vmem:[%s15729_s21 + $0x40] sm:$0xff]  ;;  %20006 = vst [vmem:[#allocation17_spill] sm:$0xff] %v18947_v34  ;;  %v11251_v54 = vsel %vm553_vm0, %v18947_v34, 0.0 }
0x2abb   : > { %v3748_v46 = vcombine.low %v15468_v57, %v15469_v11  ;;  %v11224_v39 = vsel %vm553_vm0, %v18904_v33, 0.0  ;;  %v12867_v44 = vcombine.high %v15468_v57, %v15469_v11  ;;  %v8680_v57 = vadd.f32 %v18954_v2, %v18288_v55  ;;  %v18964_v11 = vld [vmem:[%s15729_s21 + $0x18] sm:$0xff] }
0x2abc   : > { %v18976_v55 = vld [vmem:[%s15729_s21 + $0x58] sm:$0xff] }
0x2abd   : > { %v18888_v50 = vadd.f32 %v3748_v46, %v3724_v49  ;;  %v18937_v20 = vadd.f32 %v12867_v44, %v6211_v5  ;;  %v8704_v46 = vcombine.low %v18961_v19, %v18964_v11  ;;  %v3723_v5 = vadd.f32 %v18874_v56, %v17036_v43  ;;  %v15484_v44 = vld [vmem:[%s15729_s21 + $0x20] sm:$0xff]  ;;  %v15489_v43 = vld [vmem:[%s15729_s21 + $0xf0] sm:$0xff] }
0x2abf   : > { %v11221_v51 = vsel %vm553_vm0, %v18888_v50, 0.0  ;;  %v11245_v49 = vsel %vm553_vm0, %v18937_v20, 0.0  ;;  %v18980_v23 = vadd.f32 %v8704_v46, %v8680_v57  ;;  %v20011_v46 = vld [vmem:[#allocation16_spill] sm:$0xff] }
0x2ac1   : > { %20007 = vst [vmem:[#allocation18_spill] sm:$0xff] %v18980_v23  ;;  %v11263_v29 = vsel %vm553_vm0, %v18980_v23, 0.0 }
0x2ad9   : > { %11216 = vadd.xlane.f32.xlu0 %v11215_v13  ;;  %v18973_v13 = vld [vmem:[%s15729_s21 + $0x48] sm:$0xff] }
0x2adb   : > { %10851 = vadd.xlane.f32.xlu1 %v10850_v37  ;;  %v8706_v37 = vcombine.low %v18973_v13, %v18976_v55 }
0x2add   : > { %11222 = vadd.xlane.f32.xlu0 %v11221_v51  ;;  %v18984_v3 = vadd.f32 %v8706_v37, %v8682_v32  ;;  %v18992_v51 = vld [vmem:[%s15729_s21 + $0x98] sm:$0xff]  ;;  %v15488_v32 = vld [vmem:[%s15729_s21 + $0xe0] sm:$0xff] }
0x2ade   : > { %v8708_v31 = vcombine.low %v18989_v45, %v18992_v51  ;;  %v3753_v37 = vcombine.low %v15488_v32, %v15489_v43 }
0x2adf   : > { %20008 = vst [vmem:[#allocation19_spill] sm:$0xff] %v18984_v3  ;;  %v11269_v48 = vsel %vm553_vm0, %v18984_v3, 0.0 }
0x2ae0   : > { %v19008_v4 = vadd.f32 %v8708_v31, %v8684_v62 }
0x2ae1   : > { %11225 = vadd.xlane.f32.xlu0 %v11224_v39  ;;  %v19004_v39 = vld [vmem:[%s15729_s21 + $0xd8] sm:$0xff] }
0x2ae2   : > { %v8710_v21 = vcombine.low %v19001_v27, %v19004_v39  ;;  %20009 = vst [vmem:[#allocation20_spill] sm:$0xff] %v19008_v4  ;;  %v11275_v0 = vsel %vm553_vm0, %v19008_v4, 0.0 }
0x2ae5   : > { %11228 = vadd.xlane.f32.xlu0 %v11227_v6  ;;  %v19012_v6 = vadd.f32 %v8710_v21, %v8686_v18  ;;  %v12868_v21 = vcombine.high %v18893_v16, %v18896_v53  ;;  %v10837_v16 = vpop.xlane.xlu0 %10836  ;;  %v6216_v53 = vadd.f32 %v17682_v9, %v18923_v35 }
0x2ae7   : > { %20010 = vst [vmem:[#allocation21_spill] sm:$0xff] %v19012_v6  ;;  %v11281_v63 = vsel %vm553_vm0, %v19012_v6, 0.0 }
0x2ae9   : > { %11234 = vadd.xlane.f32.xlu0 %v11233_v61  ;;  %v15485_v61 = vld [vmem:[%s15729_s21 + $0x30] sm:$0xff] }
0x2aea   : > { %v3747_v26 = vcombine.low %v15484_v44, %v15485_v61 }
0x2aec   : > { %11020 = vrot.lane.b32.xlu1 %v16362_v36, %s19987_s14  ;;  %v18956_v36 = vadd.f32 %v12871_v1, %v6215_v40  ;;  %v3727_v40 = vadd.f32 %v18874_v56, %v17056_v25  ;;  %v15486_v1 = vld [vmem:[%s15729_s21 + $0xa0] sm:$0xff]  ;;  %v6210_v25 = vadd.f32 %v18923_v35, %v17664_v38  ;;  %v6214_v38 = vadd.f32 %v18923_v35, %v17684_v15  ;;  %s19820_s14 = scalar_lea.sflag [#allocation3], %s500_s19 }
0x2aed   : > { %11240 = vadd.xlane.f32.xlu0 %v11239_v17  ;;  %v19022_v17 = vadd.f32 %v3747_v26, %v3723_v5  ;;  %v12872_v26 = vcombine.high %v15488_v32, %v15489_v43  ;;  %v20014_v32 = vld [vmem:[#allocation13_spill] sm:$0xff]  ;;  %v19079_v43 = vld [vmem:[%s15729_s21 + $0x68] sm:$0xff] }
0x2aee   : > { %v11257_v41 = vsel %vm553_vm0, %v18956_v36, 0.0 }
0x2aef   : > { %v11218_v62 = vsel %vm553_vm0, %v19022_v17, 0.0 }
0x2af1   : > { %11246 = vadd.xlane.f32.xlu0 %v11245_v49  ;;  %v15487_v49 = vld [vmem:[%s15729_s21 + $0xb0] sm:$0xff] }
0x2af2   : > { %v3751_v57 = vcombine.low %v15486_v1, %v15487_v49 }
0x2af5   : > { %11252 = vadd.xlane.f32.xlu0 %v11251_v54  ;;  %v3729_v54 = vadd.f32 %v20011_v46, %v18874_v56  ;;  %v6212_v56 = vadd.f32 %v17662_v59, %v18923_v35  ;;  %v19070_v46 = vld [vmem:[%s15729_s21 + $0x38] sm:$0xff]  ;;  %v10843_v35 = vpop.xlane.xlu0 %10842 }
0x2af7   : > { %v19036_v31 = vadd.f32 %v3753_v37, %v3729_v54  ;;  %v19050_v5 = vadd.f32 %v12868_v21, %v6212_v56  ;;  %v19082_v37 = vld [vmem:[%s15729_s21 + $0x78] sm:$0xff]  ;;  %v20017_v56 = vld [vmem:[#allocation14_spill] sm:$0xff] }
0x2af8   : > { %v8685_v21 = vadd.f32 %v18954_v2, %v20017_v56 }
0x2af9   : > { %11258 = vadd.xlane.f32.xlu0 %v11257_v41  ;;  %v19032_v41 = vadd.f32 %v3751_v57, %v3727_v40  ;;  %v11248_v40 = vsel %vm553_vm0, %v19050_v5, 0.0  ;;  %v19067_v57 = vld [vmem:[%s15729_s21 + $0x28] sm:$0xff] }
0x2afa   : > { %v8705_v9 = vcombine.low %v19067_v57, %v19070_v46 }
0x2afb   : > { %v11230_v18 = vsel %vm553_vm0, %v19032_v41, 0.0 }
0x2afd   : > { %11264 = vadd.xlane.f32.xlu0 %v11263_v29  ;;  %v12866_v29 = vcombine.high %v15484_v44, %v15485_v61  ;;  %v12870_v44 = vcombine.high %v15486_v1, %v15487_v49  ;;  %v10840_v61 = vpop.xlane.xlu1 %10839  ;;  %v19062_v1 = vadd.f32 %v12872_v26, %v6216_v53  ;;  %v8681_v49 = vadd.f32 %v18954_v2, %v18292_v58  ;;  %v20018_v26 = vld [vmem:[#allocation15_spill] sm:$0xff] }
0x2afe   : > { %v8683_v58 = vadd.f32 %v20014_v32, %v18954_v2 }
0x2aff   : > { %20013 = vst [vmem:[#allocation22_spill] sm:$0xff] %v19062_v1 }
0x2b01   : > { %11270 = vadd.xlane.f32.xlu0 %v11269_v48  ;;  %v19046_v48 = vadd.f32 %v12866_v29, %v6210_v25  ;;  %v10846_v15 = vpop.xlane.xlu1 %10845  ;;  %v19086_v25 = vadd.f32 %v8705_v9, %v8681_v49  ;;  %v11260_v29 = vsel %vm553_vm0, %v19062_v1, 0.0  ;;  %v19110_v49 = vld [vmem:[%s15729_s21 + $0xf8] sm:$0xff] }
0x2b02   : > { %15322 = vrcp.f32 %v10846_v15  ;;  %v19107_v15 = vld [vmem:[%s15729_s21 + $0xe8] sm:$0xff] }
0x2b03   : > { %v11242_v59 = vsel %vm553_vm0, %v19046_v48, 0.0  ;;  %15324 = vrcp.f32 %v10840_v61  ;;  %20015 = vst [vmem:[#allocation13_spill] sm:$0xff] %v19086_v25  ;;  %v11266_v61 = vsel %vm553_vm0, %v19086_v25, 0.0  ;;  %v8711_v9 = vcombine.low %v19107_v15, %v19110_v49 }
0x2b04   : > { %15326 = vrcp.f32 %v10843_v35 }
0x2b05   : > { %11276 = vadd.xlane.f32.xlu0 %v11275_v0  ;;  %v11236_v0 = vsel %vm553_vm0, %v19036_v31, 0.0  ;;  %15328 = vrcp.f32 %v10837_v16 }
0x2b09   : > { %11282 = vadd.xlane.f32.xlu0 %v11281_v63  ;;  %v19058_v63 = vadd.f32 %v12870_v44, %v6214_v38  ;;  %v19098_v38 = vld [vmem:[%s15729_s21 + $0xb8] sm:$0xff] }
0x2b0b   : > { %20012 = vst [vmem:[#allocation16_spill] sm:$0xff] %v19058_v63  ;;  %v11254_v54 = vsel %vm553_vm0, %v19058_v63, 0.0 }
0x2b0c   : > { %v15323_v53 = vpop.eup %15322 }
0x2b0d   : > { %v15325_v16 = vpop.eup %15324 }
0x2b10   : > { %11219 = vadd.xlane.f32.xlu1 %v11218_v62  ;;  %v8707_v62 = vcombine.low %v19079_v43, %v19082_v37 }
0x2b14   : > { %11231 = vadd.xlane.f32.xlu1 %v11230_v18  ;;  %v19090_v18 = vadd.f32 %v8707_v62, %v8683_v58  ;;  %v15327_v58 = vpop.eup %15326  ;;  %v10870_v62 = vmul.f32 %v15323_v53, %v18847_v12 }
0x2b15   : > { %v15329_v56 = vpop.eup %15328 }
0x2b16   : > { %20016 = vst [vmem:[#allocation23_spill] sm:$0xff] %v19090_v18  ;;  %v11272_v32 = vsel %vm553_vm0, %v19090_v18, 0.0 }
0x2b18   : > { %11237 = vadd.xlane.f32.xlu1 %v11236_v0  ;;  %v19095_v0 = vld [vmem:[%s15729_s21 + $0xa8] sm:$0xff]  ;;  %s19806_s21 = scalar_lea.hbm %s20051_s3, %s13087_s28 }
0x2b19   : > { %v8709_v44 = vcombine.low %v19095_v0, %v19098_v38 }
0x2b1b   : > { %v19114_v35 = vadd.f32 %v8709_v44, %v8685_v21  ;;  %v10867_v44 = vmul.f32 %v15329_v56, %v18836_v47 }
0x2b1c   : > { %11243 = vadd.xlane.f32.xlu1 %v11242_v59 }
0x2b1d   : > { %20019 = vst [vmem:[#allocation14_spill] sm:$0xff] %v19114_v35  ;;  %v11278_v21 = vsel %vm553_vm0, %v19114_v35, 0.0 }
0x2b20   : > { %11249 = vadd.xlane.f32.xlu1 %v11248_v40  ;;  %v8687_v40 = vadd.f32 %v20018_v26, %v18954_v2  ;;  %v10869_v26 = vmul.f32 %v15327_v58, %v18843_v22 }
0x2b22   : > { %v19119_v2 = vadd.f32 %v8711_v9, %v8687_v40  ;;  %v10876_v4 = vpack.c.bf16 %v10870_v62, %v10869_v26 }
0x2b24   : > { %11255 = vadd.xlane.f32.xlu1 %v11254_v54  ;;  %20020 = vst [vmem:[#allocation15_spill] sm:$0xff] %v19119_v2 }
0x2b28   : > { %11261 = vadd.xlane.f32.xlu1 %v11260_v29 }
0x2b2c   : > { %11267 = vadd.xlane.f32.xlu1 %v11266_v61  ;;  %v10868_v61 = vmul.f32 %v15325_v16, %v18839_v52  ;;  %v11284_v52 = vsel %vm553_vm0, %v19119_v2, 0.0 }
0x2b2d   : > { %v10855_v59 = vpop.xlane.xlu0 %10854 }
0x2b2e   : > { %v10875_v12 = vpack.c.bf16 %v10868_v61, %v10867_v44 }
0x2b2f   : > { %v10858_v54 = vpop.xlane.xlu1 %10857 }
0x2b30   : > { %11273 = vadd.xlane.f32.xlu1 %v11272_v32  ;;  %15330 = vrcp.f32 %v10858_v54 }
0x2b31   : > { %v10849_v29 = vpop.xlane.xlu0 %10848  ;;  %15332 = vrcp.f32 %v10855_v59 }
0x2b32   : > { %15334 = vrcp.f32 %v10849_v29 }
0x2b33   : > { %v10927_v6 = vpop.permute.xlu1 %10926 }
0x2b34   : > { %11279 = vadd.xlane.f32.xlu1 %v11278_v21  ;;  %14421 = vmatpush3.bf16.msra.mxu1 %v10927_v6 }
0x2b35   : > { %v10880_v32 = vpop.permute.xlu0 %10879  ;;  %14432 = vmatprep.subr.bf16.mxu1 %v19965_v24 }
0x2b36   : > { %14415 = vmatpush3.bf16.msra.mxu0 %v10880_v32 }
0x2b37   : > { %14423 = vmatmul.mubr.msk.bf16.vlgmr.msra.gmra.mrb[76].mxu1 %vm1594_vm3, %v10876_v4  ;;  %14426 = vmatprep.subr.bf16.mxu0 %v19965_v24  ;;  %v10974_v22 = vpop.permute.xlu1 %10973 }
0x2b38   : > { %11285 = vadd.xlane.f32.xlu1 %v11284_v52  ;;  %14434 = vmatprep.mubr.msk.bf16.mxu1 %vm15579_vm1, %v19965_v24 }
0x2b39   : > { %14417 = vmatmul.mubr.msk.bf16.vlgmr.msra.gmra.mrb[228].mxu0 %vm1594_vm3, %v10875_v12 }
0x2b3a   : > { %14427 = vmatpush3.bf16.msra.mxu0 %v10974_v22  ;;  %14428 = vmatprep.mubr.msk.bf16.mxu0 %vm15579_vm1, %v19965_v24  ;;  %v15331_v47 = vpop.eup %15330 }
0x2b3b   : > { %v15333_v6 = vpop.eup %15332  ;;  %v10874_v53 = vmul.f32 %v15331_v47, %v18859_v8  ;;  %v11071_v8 = vld [vmem:[%s19871_s5 + $0xc] sm:$0xf] }
0x2b3c   : > { %v10873_v16 = vmul.f32 %v15333_v6, %v18853_v14  ;;  %v15335_v58 = vpop.eup %15334  ;;  %14647 = vmatprep.subr.msk.bf16.mxu0 %vm2394_vm4, %v11071_v8  ;;  %v11085_v14 = vsel %vm2394_vm4, %v11071_v8, 0 }
0x2b3d   : > { %v10871_v24 = vmul.f32 %v15335_v58, %v18855_v30 }
0x2b3e   : > { %v10878_v9 = vpack.c.bf16 %v10874_v53, %v10873_v16 }
0x2b68   : > { %v10852_v4 = vpop.xlane.xlu1 %10851 }
0x2b69   : > { %15336 = vrcp.f32 %v10852_v4 }
0x2b6c   : > { %v11021_v40 = vpop.permute.xlu1 %11020 }
0x2b6d   : > { %14433 = vmatpush3.bf16.msra.mxu1 %v11021_v40 }
0x2b70   : > { %14435 = vmatmul.mubr.msk.bf16.vlgmr.msra.gmra.mrb[80].mxu1 %vm1594_vm3, %v10878_v9 }
0x2b73   : > { %v15337_v62 = vpop.eup %15336 }
0x2b74   : > { %v10872_v59 = vmul.f32 %v15337_v62, %v18886_v10  ;;  %v13042_v62 = vld [vmem:[%s19872_s6] ss:$0 sm:$0xff] }
0x2b76   : > { %v10877_v54 = vpack.c.bf16 %v10872_v59, %v10871_v24  ;;  %v13043_v59 = vcombine.high %v18961_v19, %v18964_v11 }
0x2b78   : > { %14429 = vmatmul.mubr.msk.bf16.vlgmr.msra.gmra.mrb[232].mxu0 %vm1594_vm3, %v10877_v54 }
0x2b79   : > { %14439 = vmatpush3.bf16.msra.mxu0 %v11085_v14  ;;  %v13045_v14 = vcombine.high %v18973_v13, %v18976_v55 }
0x2c0a   : > { %v10966_v29 = vpop.f32.mrb[76].mxu1 }
0x2c0b   : > { %v14424_v56 = vpop.f32.mrb[77].mxu1 }
0x2c0c   : > { %v10919_v61 = vpop.f32.mrb[228].mxu0  ;;  %v10969_v26 = vpop.f32.mrb[78].mxu1 }
0x2c0d   : > { %v11068_v21 = vpack.c.bf16 %v10969_v26, %v10966_v29  ;;  %v14418_v30 = vpop.f32.mrb[229].mxu0  ;;  %v14425_v44 = vpop.f32.mrb[79].mxu1 }
0x2c0e   : > { %v10922_v10 = vpop.f32.mrb[230].mxu0  ;;  %v13046_v44 = vcombine.high %v19079_v43, %v19082_v37  ;;  %v11217_v43 = vpop.xlane.xlu0 %11216 }
0x2c0f   : > { %v11067_v32 = vpack.c.bf16 %v10922_v10, %v10919_v61  ;;  %v14419_v52 = vpop.f32.mrb[231].mxu0  ;;  %v13044_v61 = vcombine.high %v19067_v57, %v19070_v46 }
0x2c11   : > { %14440 = vmatprep.mubr.msk.bf16.mxu0 %vm1396_vm2, %v11067_v32 }
0x2c12   : > { %14441 = vmatmul.mubr.msk.bf16.vlgmr.msra.gmra.mrb[208].mxu0 %vm1396_vm2, %v11068_v21  ;;  %v11223_v37 = vpop.xlane.xlu0 %11222 }
0x2c16   : > { %v11226_v52 = vpop.xlane.xlu0 %11225 }
0x2c43   : > { %v11060_v12 = vpop.f32.mrb[80].mxu1 }
0x2c44   : > { %v14436_v22 = vpop.f32.mrb[81].mxu1 }
0x2c45   : > { %v11063_v47 = vpop.f32.mrb[82].mxu1  ;;  %v11229_v22 = vpop.xlane.xlu0 %11228 }
0x2c46   : > { %v11070_v4 = vpack.c.bf16 %v11063_v47, %v11060_v12  ;;  %v14437_v6 = vpop.f32.mrb[83].mxu1  ;;  %v11220_v12 = vpop.xlane.xlu1 %11219 }
0x2c4a   : > { %v11232_v47 = vpop.xlane.xlu1 %11231 }
0x2c4b   : > { %v11013_v53 = vpop.f32.mrb[232].mxu0 }
0x2c4c   : > { %v14430_v16 = vpop.f32.mrb[233].mxu0 }
0x2c4d   : > { %v11016_v40 = vpop.f32.mrb[234].mxu0  ;;  %v13047_v16 = vcombine.high %v18989_v45, %v18992_v51  ;;  %v13050_v45 = vcombine.high %v19107_v15, %v19110_v49 }
0x2c4e   : > { %v11069_v9 = vpack.c.bf16 %v11016_v40, %v11013_v53  ;;  %v14431_v58 = vpop.f32.mrb[235].mxu0  ;;  %v11238_v6 = vpop.xlane.xlu1 %11237  ;;  %v11311_v40 = vmul.f32 0.03125, %v11217_v43 }
0x2c50   : > { %14444 = vmatprep.mubr.msk.bf16.mxu0 %vm1396_vm2, %v11069_v9 }
0x2c51   : > { %14445 = vmatmul.mubr.msk.bf16.gmra.mrb[212].mxu0 %vm1396_vm2, %v11070_v4  ;;  %v11235_v4 = vpop.xlane.xlu0 %11234 }
0x2c55   : > { %v11241_v9 = vpop.xlane.xlu0 %11240 }
0x2ce5   : > { %v14442_v24 = vpop.f32.mrb[208].mxu0 }
0x2ce6   : > { %v11121_v54 = vpop.f32.mrb[209].mxu0  ;;  %v11169_v8 = vadd.f32 %v14442_v24, %v13042_v62 }
0x2ce7   : > { %v11167_v29 = vadd.f32 %v13042_v62, %v11121_v54  ;;  %v14443_v56 = vpop.f32.mrb[210].mxu0 }
0x2ce8   : > { %v11124_v26 = vpop.f32.mrb[211].mxu0  ;;  %v11170_v30 = vadd.f32 %v14443_v56, %v13042_v62  ;;  %v19164_v32 = vadd.f32 %v13045_v14, %v11169_v8  ;;  %v13048_v14 = vcombine.high %v19095_v0, %v19098_v38  ;;  %v11244_v56 = vpop.xlane.xlu1 %11243 }
0x2ce9   : > { %v19160_v21 = vadd.f32 %v13043_v59, %v11167_v29  ;;  %v11168_v10 = vadd.f32 %v13042_v62, %v11124_v26  ;;  %v13049_v59 = vcombine.high %v19001_v27, %v19004_v39  ;;  %v11312_v29 = vmul.f32 0.03125, %v11220_v12  ;;  %v11247_v38 = vpop.xlane.xlu0 %11246 }
0x2cea   : > { %20022 = vst [vmem:[#allocation25_spill] sm:$0xff] %v19164_v32  ;;  %v19170_v13 = vadd.f32 %v13046_v44, %v11170_v30  ;;  %v11293_v57 = vsel %vm553_vm0, %v19164_v32, 0.0  ;;  %v19189_v44 = vsub.f32 %v18884_v28, %v11311_v40  ;;  %v11316_v12 = vmul.f32 0.03125, %v11232_v47 }
0x2ceb   : > { %20021 = vst [vmem:[#allocation24_spill] sm:$0xff] %v19160_v21  ;;  %v19166_v19 = vadd.f32 %v13044_v61, %v11168_v10  ;;  %v11287_v11 = vsel %vm553_vm0, %v19160_v21, 0.0  ;;  %v11313_v10 = vmul.f32 0.03125, %v11223_v37 }
0x2cec   : > { %11288 = vadd.xlane.f32.xlu0 %v11287_v11  ;;  %20024 = vst [vmem:[#allocation27_spill] sm:$0xff] %v19170_v13  ;;  %v11296_v46 = vsel %vm553_vm0, %v19170_v13, 0.0  ;;  %v11314_v11 = vmul.f32 0.03125, %v11226_v52  ;;  %v11250_v49 = vpop.xlane.xlu1 %11249  ;;  %v11375_v37 = vmul.f32 %v19189_v44, %v19189_v44  ;;  %v19225_v47 = vsub.f32 %v19032_v41, %v11316_v12 }
0x2ced   : > { %20023 = vst [vmem:[#allocation26_spill] sm:$0xff] %v19166_v19  ;;  %v11290_v55 = vsel %vm553_vm0, %v19166_v19, 0.0  ;;  %v11253_v40 = vpop.xlane.xlu0 %11252 }
0x2cee   : > { %11291 = vadd.xlane.f32.xlu1 %v11290_v55  ;;  %v19198_v55 = vsub.f32 %v19022_v17, %v11312_v29  ;;  %v19212_v52 = vsub.f32 %v18904_v33, %v11314_v11  ;;  %v11380_v11 = vmul.f32 %v19225_v47, %v19225_v47 }
0x2cf0   : > { %11294 = vadd.xlane.f32.xlu0 %v11293_v57  ;;  %v11378_v29 = vmul.f32 %v19212_v52, %v19212_v52 }
0x2cf2   : > { %11297 = vadd.xlane.f32.xlu1 %v11296_v46  ;;  %v11315_v46 = vmul.f32 0.03125, %v11229_v22 }
0x2cf4   : > { %v19219_v22 = vsub.f32 %v18916_v60, %v11315_v46  ;;  %v11321_v46 = vmul.f32 0.03125, %v11247_v38  ;;  %v11323_v38 = vmul.f32 0.03125, %v11253_v40 }
0x2d24   : > { %v14446_v53 = vpop.f32.mrb[212].mxu0 }
0x2d25   : > { %v11137_v58 = vpop.f32.mrb[213].mxu0  ;;  %v11173_v24 = vadd.f32 %v14446_v53, %v13042_v62 }
0x2d26   : > { %v11171_v54 = vadd.f32 %v13042_v62, %v11137_v58  ;;  %v14447_v8 = vpop.f32.mrb[214].mxu0  ;;  %v11317_v58 = vmul.f32 0.03125, %v11235_v4  ;;  %v11319_v4 = vmul.f32 0.03125, %v11241_v9 }
0x2d27   : > { %v11140_v61 = vpop.f32.mrb[215].mxu0  ;;  %v11174_v30 = vadd.f32 %v14447_v8, %v13042_v62  ;;  %v19191_v27 = vadd.f32 %v13049_v59, %v11173_v24  ;;  %v11407_v24 = vsel %vm553_vm0, %v11375_v37, 0.0  ;;  %v11318_v8 = vmul.f32 0.03125, %v11238_v6 }
0x2d28   : > { %v19184_v26 = vadd.f32 %v13047_v16, %v11171_v54  ;;  %v11172_v51 = vadd.f32 %v13042_v62, %v11140_v61  ;;  %v19205_v62 = vsub.f32 %v18888_v50, %v11313_v10  ;;  %v11376_v16 = vmul.f32 %v19198_v55, %v19198_v55  ;;  %v11256_v54 = vpop.xlane.xlu1 %11255 }
0x2d29   : > { %20026 = vst [vmem:[#allocation29_spill] sm:$0xff] %v19191_v27  ;;  %v19200_v57 = vadd.f32 %v13050_v45, %v11174_v30  ;;  %v11305_v43 = vsel %vm553_vm0, %v19191_v27, 0.0  ;;  %v19231_v61 = vsub.f32 %v18925_v7, %v11317_v58  ;;  %v11379_v45 = vmul.f32 %v19219_v22, %v19219_v22 }
0x2d2a   : > { %20025 = vst [vmem:[#allocation28_spill] sm:$0xff] %v19184_v26  ;;  %v19193_v39 = vadd.f32 %v13048_v14, %v11172_v51  ;;  %v11299_v0 = vsel %vm553_vm0, %v19184_v26, 0.0  ;;  %v11377_v59 = vmul.f32 %v19205_v62, %v19205_v62  ;;  %v11410_v14 = vsel %vm553_vm0, %v11376_v16, 0.0  ;;  %v11259_v51 = vpop.xlane.xlu0 %11258 }
0x2d2b   : > { %11300 = vadd.xlane.f32.xlu0 %v11299_v0  ;;  %20028 = vst [vmem:[#allocation31_spill] sm:$0xff] %v19200_v57  ;;  %v11308_v53 = vsel %vm553_vm0, %v19200_v57, 0.0  ;;  %v19237_v10 = vsub.f32 %v19036_v31, %v11318_v8  ;;  %v11320_v6 = vmul.f32 0.03125, %v11244_v56  ;;  %v11416_v0 = vsel %vm553_vm0, %v11378_v29, 0.0 }
0x2d2c   : > { %20027 = vst [vmem:[#allocation30_spill] sm:$0xff] %v19193_v39  ;;  %v11302_v15 = vsel %vm553_vm0, %v19193_v39, 0.0  ;;  %v11413_v30 = vsel %vm553_vm0, %v11377_v59, 0.0  ;;  %v19243_v9 = vsub.f32 %v18933_v42, %v11319_v4  ;;  %v11381_v37 = vmul.f32 %v19231_v61, %v19231_v61 }
0x2d2d   : > { %11303 = vadd.xlane.f32.xlu1 %v11302_v15  ;;  %v11262_v15 = vpop.xlane.xlu1 %11261  ;;  %v19249_v12 = vsub.f32 %v19046_v48, %v11320_v6  ;;  %v11322_v56 = vmul.f32 0.03125, %v11250_v49  ;;  %v11382_v16 = vmul.f32 %v19237_v10, %v19237_v10  ;;  %v11324_v29 = vmul.f32 0.03125, %v11256_v54 }
0x2d2e   : > { %v11265_v58 = vpop.xlane.xlu0 %11264  ;;  %v11425_v59 = vsel %vm553_vm0, %v11381_v37, 0.0  ;;  %v11383_v8 = vmul.f32 %v19243_v9, %v19243_v9  ;;  %v11325_v40 = vmul.f32 0.03125, %v11259_v51  ;;  %v11326_v54 = vmul.f32 0.03125, %v11262_v15 }
0x2d2f   : > { %11306 = vadd.xlane.f32.xlu0 %v11305_v43  ;;  %v11419_v43 = vsel %vm553_vm0, %v11379_v45, 0.0  ;;  %v19261_v49 = vsub.f32 %v19050_v5, %v11322_v56  ;;  %v11428_v4 = vsel %vm553_vm0, %v11382_v16, 0.0  ;;  %v19267_v45 = vsub.f32 %v18947_v34, %v11323_v38 }
0x2d30   : > { %v11431_v6 = vsel %vm553_vm0, %v11383_v8, 0.0  ;;  %v19279_v51 = vsub.f32 %v18956_v36, %v11325_v40 }
0x2d31   : > { %11309 = vadd.xlane.f32.xlu1 %v11308_v53  ;;  %v11422_v53 = vsel %vm553_vm0, %v11380_v11, 0.0  ;;  %v11386_v37 = vmul.f32 %v19261_v49, %v19261_v49  ;;  %v11387_v38 = vmul.f32 %v19267_v45, %v19267_v45 }
0x2d32   : > { %v11271_v11 = vpop.xlane.xlu0 %11270 }
0x2d33   : > { %11408 = vadd.xlane.f32.xlu0 %v11407_v24  ;;  %v19255_v24 = vsub.f32 %v18937_v20, %v11321_v46  ;;  %v19273_v46 = vsub.f32 %v19058_v63, %v11324_v29  ;;  %v11440_v8 = vsel %vm553_vm0, %v11386_v37, 0.0  ;;  %v11443_v40 = vsel %vm553_vm0, %v11387_v38, 0.0 }
0x2d35   : > { %11411 = vadd.xlane.f32.xlu1 %v11410_v14  ;;  %v11268_v14 = vpop.xlane.xlu1 %11267  ;;  %v11388_v29 = vmul.f32 %v19273_v46, %v19273_v46 }
0x2d36   : > { %v11328_v15 = vmul.f32 0.03125, %v11268_v14 }
0x2d37   : > { %11414 = vadd.xlane.f32.xlu0 %v11413_v30  ;;  %v11384_v30 = vmul.f32 %v19249_v12, %v19249_v12 }
0x2d38   : > { %v19297_v14 = vsub.f32 %v19086_v25, %v11328_v15 }
0x2d39   : > { %11417 = vadd.xlane.f32.xlu1 %v11416_v0  ;;  %v11385_v0 = vmul.f32 %v19255_v24, %v19255_v24  ;;  %v11274_v56 = vpop.xlane.xlu1 %11273 }
0x2d3b   : > { %11420 = vadd.xlane.f32.xlu0 %v11419_v43  ;;  %v11434_v43 = vsel %vm553_vm0, %v11384_v30, 0.0  ;;  %v11437_v16 = vsel %vm553_vm0, %v11385_v0, 0.0 }
0x2d3d   : > { %11423 = vadd.xlane.f32.xlu1 %v11422_v53  ;;  %v11327_v53 = vmul.f32 0.03125, %v11265_v58  ;;  %v11329_v58 = vmul.f32 0.03125, %v11271_v11  ;;  %v11280_v0 = vpop.xlane.xlu1 %11279 }
0x2d3f   : > { %11426 = vadd.xlane.f32.xlu0 %v11425_v59  ;;  %v19285_v59 = vsub.f32 %v19062_v1, %v11326_v54  ;;  %v19291_v30 = vsub.f32 %v18980_v23, %v11327_v53  ;;  %v11330_v54 = vmul.f32 0.03125, %v11274_v56  ;;  %v19303_v53 = vsub.f32 %v18984_v3, %v11329_v58  ;;  %v20029_v58 = vld [vmem:[#allocation20_spill] sm:$0xff] }
0x2d40   : > { %v11332_v56 = vmul.f32 0.03125, %v11280_v0 }
0x2d41   : > { %11429 = vadd.xlane.f32.xlu1 %v11428_v4  ;;  %v11277_v4 = vpop.xlane.xlu0 %11276  ;;  %v11390_v37 = vmul.f32 %v19285_v59, %v19285_v59  ;;  %v11391_v38 = vmul.f32 %v19291_v30, %v19291_v30  ;;  %v19309_v15 = vsub.f32 %v19090_v18, %v11330_v54 }
0x2d42   : > { %v11331_v11 = vmul.f32 0.03125, %v11277_v4  ;;  %v19321_v54 = vsub.f32 %v19114_v35, %v11332_v56 }
0x2d43   : > { %11432 = vadd.xlane.f32.xlu0 %v11431_v6  ;;  %v11389_v6 = vmul.f32 %v19279_v51, %v19279_v51  ;;  %v11455_v25 = vsel %vm553_vm0, %v11391_v38, 0.0  ;;  %v11394_v18 = vmul.f32 %v19309_v15, %v19309_v15 }
0x2d44   : > { %v19315_v4 = vsub.f32 %v20029_v58, %v11331_v11 }
0x2d45   : > { %11435 = vadd.xlane.f32.xlu1 %v11434_v43  ;;  %v11446_v43 = vsel %vm553_vm0, %v11388_v29, 0.0  ;;  %v11452_v29 = vsel %vm553_vm0, %v11390_v37, 0.0  ;;  %v11464_v56 = vsel %vm553_vm0, %v11394_v18, 0.0  ;;  %v14752_v18 = vld [vmem:[%s19876_s10] sm:$0xff]  }
0x2d46   : > { %v11395_v38 = vmul.f32 %v19315_v4, %v19315_v4  ;;  %14448 = vmatprep.subr.bf16.mxu1 %v14752_v18 }
0x2d47   : > { %11438 = vadd.xlane.f32.xlu0 %v11437_v16  ;;  %v11449_v16 = vsel %vm553_vm0, %v11389_v6, 0.0  ;;  %14449 = vmatpush3.bf16.msra.mxu1 %v14752_v18 }
0x2d49   : > { %11441 = vadd.xlane.f32.xlu1 %v11440_v8  ;;  %v11283_v8 = vpop.xlane.xlu0 %11282 }
0x2d4a   : > { %v11333_v6 = vmul.f32 0.03125, %v11283_v8 }
0x2d4b   : > { %11444 = vadd.xlane.f32.xlu0 %v11443_v40  ;;  %v11392_v40 = vmul.f32 %v19297_v14, %v19297_v14 }
0x2d4d   : > { %11447 = vadd.xlane.f32.xlu1 %v11446_v43  ;;  %v11286_v43 = vpop.xlane.xlu1 %11285  ;;  %v11458_v37 = vsel %vm553_vm0, %v11392_v40, 0.0  ;;  %v11396_v40 = vmul.f32 %v19321_v54, %v19321_v54 }
0x2d4e   : > { %v11334_v0 = vmul.f32 0.03125, %v11286_v43  ;;  %v11467_v43 = vsel %vm553_vm0, %v11395_v38, 0.0  ;;  %v14753_v38 = vld [vmem:[%s19876_s10 + $0x8] sm:$0xff]  }
0x2d4f   : > { %11450 = vadd.xlane.f32.xlu0 %v11449_v16  ;;  %v11393_v16 = vmul.f32 %v19303_v53, %v19303_v53  ;;  %14450 = vmatprep.subr.bf16.mxu1 %v14753_v38 }
0x2d50   : > { %14451 = vmatpush3.bf16.msra.mxu1 %v14753_v38 }
0x2d51   : > { %11453 = vadd.xlane.f32.xlu1 %v11452_v29  ;;  %v20030_v29 = vld [vmem:[#allocation21_spill] sm:$0xff]  ;;  %v11461_v8 = vsel %vm553_vm0, %v11393_v16, 0.0  ;;  %v11470_v16 = vsel %vm553_vm0, %v11396_v40, 0.0 }
0x2d52   : > { %v19327_v11 = vsub.f32 %v20030_v29, %v11333_v6 }
0x2d53   : > { %11456 = vadd.xlane.f32.xlu0 %v11455_v25  ;;  %v19333_v25 = vsub.f32 %v19119_v2, %v11334_v0 }
0x2d54   : > { %v11397_v6 = vmul.f32 %v19327_v11, %v19327_v11 }
0x2d55   : > { %11459 = vadd.xlane.f32.xlu1 %v11458_v37  ;;  %v11398_v37 = vmul.f32 %v19333_v25, %v19333_v25 }
0x2d56   : > { %v11473_v0 = vsel %vm553_vm0, %v11397_v6, 0.0 }
0x2d57   : > { %11462 = vadd.xlane.f32.xlu0 %v11461_v8  ;;  %v11476_v8 = vsel %vm553_vm0, %v11398_v37, 0.0 }
0x2d59   : > { %11465 = vadd.xlane.f32.xlu1 %v11464_v56 }
0x2d5b   : > { %11468 = vadd.xlane.f32.xlu0 %v11467_v43 }
0x2d5d   : > { %11471 = vadd.xlane.f32.xlu1 %v11470_v16 }
0x2d5f   : > { %11474 = vadd.xlane.f32.xlu0 %v11473_v0 }
0x2d61   : > { %11477 = vadd.xlane.f32.xlu1 %v11476_v8 }
0x2d79   : > { %v11289_v56 = vpop.xlane.xlu0 %11288 }
0x2d7a   : > { %v11335_v40 = vmul.f32 0.03125, %v11289_v56 }
0x2d7b   : > { %v11292_v43 = vpop.xlane.xlu1 %11291 }
0x2d7c   : > { %v19353_v6 = vsub.f32 %v19160_v21, %v11335_v40  ;;  %v11336_v16 = vmul.f32 0.03125, %v11292_v43 }
0x2d7d   : > { %v11295_v35 = vpop.xlane.xlu0 %11294 }
0x2d7e   : > { %v19356_v0 = vsub.f32 %v19166_v19, %v11336_v16  ;;  %v11337_v37 = vmul.f32 0.03125, %v11295_v35  ;;  %v11399_v18 = vmul.f32 %v19353_v6, %v19353_v6 }
0x2d7f   : > { %v11298_v8 = vpop.xlane.xlu1 %11297 }
0x2d80   : > { %v19361_v2 = vsub.f32 %v19164_v32, %v11337_v37  ;;  %v11338_v38 = vmul.f32 0.03125, %v11298_v8  ;;  %v11479_v56 = vsel %vm553_vm0, %v11399_v18, 0.0  ;;  %v11400_v40 = vmul.f32 %v19356_v0, %v19356_v0 }
0x2d81   : > { %11480 = vadd.xlane.f32.xlu0 %v11479_v56 }
0x2d82   : > { %v19367_v43 = vsub.f32 %v19170_v13, %v11338_v38  ;;  %v11482_v16 = vsel %vm553_vm0, %v11400_v40, 0.0  ;;  %v11401_v35 = vmul.f32 %v19361_v2, %v19361_v2 }
0x2d83   : > { %11483 = vadd.xlane.f32.xlu1 %v11482_v16 }
0x2d84   : > { %v11485_v19 = vsel %vm553_vm0, %v11401_v35, 0.0  ;;  %v11402_v37 = vmul.f32 %v19367_v43, %v19367_v43 }
0x2d85   : > { %11486 = vadd.xlane.f32.xlu0 %v11485_v19 }
0x2d86   : > { %v11488_v18 = vsel %vm553_vm0, %v11402_v37, 0.0 }
0x2d87   : > { %11489 = vadd.xlane.f32.xlu1 %v11488_v18 }
0x2db8   : > { %v11301_v8 = vpop.xlane.xlu0 %11300 }
0x2db9   : > { %v11339_v56 = vmul.f32 0.03125, %v11301_v8 }
0x2dba   : > { %v11304_v21 = vpop.xlane.xlu1 %11303 }
0x2dbb   : > { %v19377_v38 = vsub.f32 %v19184_v26, %v11339_v56  ;;  %v11340_v40 = vmul.f32 0.03125, %v11304_v21 }
0x2dbc   : > { %v11307_v13 = vpop.xlane.xlu0 %11306 }
0x2dbd   : > { %v19380_v32 = vsub.f32 %v19193_v39, %v11340_v40  ;;  %v11341_v16 = vmul.f32 0.03125, %v11307_v13  ;;  %v11403_v35 = vmul.f32 %v19377_v38, %v19377_v38 }
0x2dbe   : > { %v11310_v58 = vpop.xlane.xlu1 %11309 }
0x2dbf   : > { %v19385_v19 = vsub.f32 %v19191_v27, %v11341_v16  ;;  %v11342_v37 = vmul.f32 0.03125, %v11310_v58  ;;  %v11491_v18 = vsel %vm553_vm0, %v11403_v35, 0.0  ;;  %v11404_v8 = vmul.f32 %v19380_v32, %v19380_v32 }
0x2dc0   : > { %11492 = vadd.xlane.f32.xlu0 %v11491_v18  ;;  %v11409_v21 = vpop.xlane.xlu0 %11408 }
0x2dc1   : > { %v19391_v56 = vsub.f32 %v19200_v57, %v11342_v37  ;;  %v11503_v40 = vmul.f32 0.03125, %v11409_v21  ;;  %v11494_v13 = vsel %vm553_vm0, %v11404_v8, 0.0  ;;  %v11405_v39 = vmul.f32 %v19385_v19, %v19385_v19 }
0x2dc2   : > { %11495 = vadd.xlane.f32.xlu1 %v11494_v13  ;;  %v11412_v16 = vpop.xlane.xlu1 %11411 }
0x2dc3   : > { %v11535_v26 = vadd.f32 1e-05, %v11503_v40  ;;  %v11504_v58 = vmul.f32 0.03125, %v11412_v16  ;;  %v11497_v35 = vsel %vm553_vm0, %v11405_v39, 0.0  ;;  %v11406_v27 = vmul.f32 %v19391_v56, %v19391_v56 }
0x2dc4   : > { %11498 = vadd.xlane.f32.xlu0 %v11497_v35  ;;  %v11415_v18 = vpop.xlane.xlu0 %11414 }
0x2dc5   : > { %15338 = vrsqrt.f32 %v11535_v26  ;;  %v11536_v37 = vadd.f32 1e-05, %v11504_v58  ;;  %v11505_v57 = vmul.f32 0.03125, %v11415_v18  ;;  %v11500_v21 = vsel %vm553_vm0, %v11406_v27, 0.0  ;;  %v19403_v27 = vld [vmem:[%s19874_s8] ss:$0 sm:$0xff] }
0x2dc6   : > { %11501 = vadd.xlane.f32.xlu1 %v11500_v21  ;;  %v11418_v8 = vpop.xlane.xlu1 %11417 }
0x2dc7   : > { %15340 = vrsqrt.f32 %v11536_v37  ;;  %v11537_v29 = vadd.f32 1e-05, %v11505_v57  ;;  %v11506_v13 = vmul.f32 0.03125, %v11418_v8 }
0x2dc8   : > { %v11421_v23 = vpop.xlane.xlu0 %11420 }
0x2dc9   : > { %15342 = vrsqrt.f32 %v11537_v29  ;;  %v11538_v40 = vadd.f32 1e-05, %v11506_v13  ;;  %v11507_v16 = vmul.f32 0.03125, %v11421_v23 }
0x2dca   : > { %v11424_v39 = vpop.xlane.xlu1 %11423 }
0x2dcb   : > { %15344 = vrsqrt.f32 %v11538_v40  ;;  %v11539_v3 = vadd.f32 1e-05, %v11507_v16  ;;  %v11508_v63 = vmul.f32 0.03125, %v11424_v39  ;;  %v19411_v39 = vld [vmem:[%s19875_s9] ss:$0 sm:$0xff] }
0x2dcc   : > { %v11427_v35 = vpop.xlane.xlu0 %11426 }
0x2dcd   : > { %15346 = vrsqrt.f32 %v11539_v3  ;;  %v11540_v26 = vadd.f32 1e-05, %v11508_v63  ;;  %v11509_v58 = vmul.f32 0.03125, %v11427_v35 }
0x2dce   : > { %v11430_v18 = vpop.xlane.xlu1 %11429 }
0x2dcf   : > { %v15339_v1 = vpop.eup %15338  ;;  %15348 = vrsqrt.f32 %v11540_v26  ;;  %v11541_v57 = vadd.f32 1e-05, %v11509_v58  ;;  %v11510_v29 = vmul.f32 0.03125, %v11430_v18 }
0x2dd0   : > { %v11599_v23 = vmul.f32 %v15339_v1, %v19189_v44  ;;  %v11433_v37 = vpop.xlane.xlu0 %11432 }
0x2dd1   : > { %v15341_v21 = vpop.eup %15340  ;;  %15350 = vrsqrt.f32 %v11541_v57  ;;  %v11542_v8 = vadd.f32 1e-05, %v11510_v29  ;;  %v11511_v13 = vmul.f32 0.03125, %v11433_v37 }
0x2dd2   : > { %v11600_v3 = vmul.f32 %v15341_v21, %v19198_v55  ;;  %v11436_v63 = vpop.xlane.xlu1 %11435  ;;  %v11638_v40 = vmul.f32 %v19403_v27, %v11599_v23 }
0x2dd3   : > { %v15343_v16 = vpop.eup %15342  ;;  %15352 = vrsqrt.f32 %v11542_v8  ;;  %v11543_v35 = vadd.f32 1e-05, %v11511_v13  ;;  %v11512_v26 = vmul.f32 0.03125, %v11436_v63 }
0x2dd4   : > { %v11601_v1 = vmul.f32 %v15343_v16, %v19205_v62  ;;  %v11439_v44 = vpop.xlane.xlu0 %11438  ;;  %v11639_v58 = vmul.f32 %v19403_v27, %v11600_v3  ;;  %v11677_v21 = vadd.f32 %v19411_v39, %v11638_v40 }
0x2dd5   : > { %v15345_v18 = vpop.eup %15344  ;;  %15354 = vrsqrt.f32 %v11543_v35  ;;  %v11544_v55 = vadd.f32 1e-05, %v11512_v26  ;;  %v11513_v57 = vmul.f32 0.03125, %v11439_v44 }
0x2dd6   : > { %v11640_v29 = vmul.f32 %v19403_v27, %v11601_v1  ;;  %v11602_v23 = vmul.f32 %v15345_v18, %v19212_v52  ;;  %v11442_v37 = vpop.xlane.xlu1 %11441  ;;  %v11678_v8 = vadd.f32 %v19411_v39, %v11639_v58 }
0x2dd7   : > { %v15347_v13 = vpop.eup %15346  ;;  %15356 = vrsqrt.f32 %v11544_v55  ;;  %v11545_v63 = vadd.f32 1e-05, %v11513_v57  ;;  %v11514_v62 = vmul.f32 0.03125, %v11442_v37 }
0x2dd8   : > { %v11641_v16 = vmul.f32 %v19403_v27, %v11602_v23  ;;  %v11603_v3 = vmul.f32 %v15347_v13, %v19219_v22  ;;  %v11445_v35 = vpop.xlane.xlu0 %11444  ;;  %v11709_v26 = vpack.c.bf16 %v11678_v8, %v11677_v21  ;;  %v11679_v52 = vadd.f32 %v19411_v39, %v11640_v29 }
0x2dd9   : > { %v15349_v44 = vpop.eup %15348  ;;  %15358 = vrsqrt.f32 %v11545_v63  ;;  %v11546_v1 = vadd.f32 1e-05, %v11514_v62  ;;  %v11515_v34 = vmul.f32 0.03125, %v11445_v35 }
0x2dda   : > { %v11680_v40 = vadd.f32 %v19411_v39, %v11641_v16  ;;  %v11604_v58 = vmul.f32 %v15349_v44, %v19225_v47  ;;  %14452 = vmatprep.mubr.msk.bf16.mxu1 %vm553_vm0, %v11709_v26  ;;  %v11448_v18 = vpop.xlane.xlu1 %11447  ;;  %v11642_v55 = vmul.f32 %v19403_v27, %v11603_v3 }
0x2ddb   : > { %v15351_v57 = vpop.eup %15350  ;;  %15360 = vrsqrt.f32 %v11546_v1  ;;  %v11547_v22 = vadd.f32 1e-05, %v11515_v34  ;;  %v11516_v23 = vmul.f32 0.03125, %v11448_v18 }
0x2ddc   : > { %v11710_v37 = vpack.c.bf16 %v11680_v40, %v11679_v52  ;;  %v11605_v21 = vmul.f32 %v15351_v57, %v19231_v61  ;;  %v11451_v8 = vpop.xlane.xlu0 %11450  ;;  %v11643_v13 = vmul.f32 %v19403_v27, %v11604_v58  ;;  %v11681_v34 = vadd.f32 %v19411_v39, %v11642_v55 }
0x2ddd   : > { %v15353_v29 = vpop.eup %15352  ;;  %15362 = vrsqrt.f32 %v11547_v22  ;;  %v11548_v63 = vadd.f32 1e-05, %v11516_v23  ;;  %v11517_v62 = vmul.f32 0.03125, %v11451_v8 }
0x2dde   : > { %v11644_v47 = vmul.f32 %v19403_v27, %v11605_v21  ;;  %v11606_v16 = vmul.f32 %v15353_v29, %v19237_v10  ;;  %14453 = vmatmul.mubr.msk.bf16.vlgmr.msra.gmra.mrb[84].mxu1 %vm553_vm0, %v11710_v37  ;;  %v11454_v3 = vpop.xlane.xlu1 %11453  ;;  %v11682_v35 = vadd.f32 %v19411_v39, %v11643_v13 }
0x2ddf   : > { %v15355_v26 = vpop.eup %15354  ;;  %15364 = vrsqrt.f32 %v11548_v63  ;;  %v11549_v61 = vadd.f32 1e-05, %v11517_v62  ;;  %v11518_v44 = vmul.f32 0.03125, %v11454_v3 }
0x2de0   : > { %v11645_v1 = vmul.f32 %v19403_v27, %v11606_v16  ;;  %v11607_v52 = vmul.f32 %v15355_v26, %v19243_v9  ;;  %v11457_v40 = vpop.xlane.xlu0 %11456  ;;  %v11711_v58 = vpack.c.bf16 %v11682_v35, %v11681_v34  ;;  %v11683_v22 = vadd.f32 %v19411_v39, %v11644_v47 }
0x2de1   : > { %v15357_v18 = vpop.eup %15356  ;;  %15366 = vrsqrt.f32 %v11549_v61  ;;  %v11550_v10 = vadd.f32 1e-05, %v11518_v44  ;;  %v11519_v57 = vmul.f32 0.03125, %v11457_v40 }
0x2de2   : > { %v11684_v55 = vadd.f32 %v19411_v39, %v11645_v1  ;;  %v11608_v23 = vmul.f32 %v15357_v18, %v19249_v12  ;;  %14456 = vmatprep.mubr.msk.bf16.mxu1 %vm553_vm0, %v11711_v58  ;;  %v11460_v37 = vpop.xlane.xlu1 %11459  ;;  %v11646_v21 = vmul.f32 %v19403_v27, %v11607_v52 }
0x2de3   : > { %v15359_v8 = vpop.eup %15358  ;;  %15368 = vrsqrt.f32 %v11550_v10  ;;  %v11551_v9 = vadd.f32 1e-05, %v11519_v57  ;;  %v11520_v13 = vmul.f32 0.03125, %v11460_v37 }
0x2de4   : > { %v11712_v29 = vpack.c.bf16 %v11684_v55, %v11683_v22  ;;  %v11609_v63 = vmul.f32 %v15359_v8, %v19255_v24  ;;  %v11463_v62 = vpop.xlane.xlu0 %11462  ;;  %v11647_v16 = vmul.f32 %v19403_v27, %v11608_v23  ;;  %v11685_v61 = vadd.f32 %v19411_v39, %v11646_v21 }
0x2de5   : > { %v15361_v47 = vpop.eup %15360  ;;  %15370 = vrsqrt.f32 %v11551_v9  ;;  %v11552_v3 = vadd.f32 1e-05, %v11520_v13  ;;  %v11521_v34 = vmul.f32 0.03125, %v11463_v62 }
0x2de6   : > { %v11648_v12 = vmul.f32 %v19403_v27, %v11609_v63  ;;  %v11610_v35 = vmul.f32 %v15361_v47, %v19261_v49  ;;  %14457 = vmatmul.mubr.msk.bf16.gmra.mrb[88].mxu1 %vm553_vm0, %v11712_v29  ;;  %v11466_v26 = vpop.xlane.xlu1 %11465  ;;  %v11686_v44 = vadd.f32 %v19411_v39, %v11647_v16  ;;  %v14754_v29 = vld [vmem:[%s19878_s12] sm:$0xff]   ;;  %v14755_v63 = vld [vmem:[%s19878_s12 + $0x8] sm:$0xff]  }
0x2de7   : > { %v15363_v1 = vpop.eup %15362  ;;  %15372 = vrsqrt.f32 %v11552_v3  ;;  %v11553_v24 = vadd.f32 1e-05, %v11521_v34  ;;  %v11522_v52 = vmul.f32 0.03125, %v11466_v26  ;;  %14484 = vmatprep.subr.bf16.mxu0 %v14754_v29 }
0x2de8   : > { %v11649_v40 = vmul.f32 %v19403_v27, %v11610_v35  ;;  %v11611_v58 = vmul.f32 %v15363_v1, %v19267_v45  ;;  %v11469_v18 = vpop.xlane.xlu0 %11468  ;;  %v11713_v10 = vpack.c.bf16 %v11686_v44, %v11685_v61  ;;  %v11687_v55 = vadd.f32 %v19411_v39, %v11648_v12  ;;  %14485 = vmatpush3.bf16.msra.mxu0 %v14754_v29 }
0x2de9   : > { %v15365_v57 = vpop.eup %15364  ;;  %15374 = vrsqrt.f32 %v11553_v24  ;;  %v11554_v49 = vadd.f32 1e-05, %v11522_v52  ;;  %v11523_v22 = vmul.f32 0.03125, %v11469_v18  ;;  %14486 = vmatprep.subr.bf16.mxu0 %v14755_v63 }
0x2dea   : > { %v11688_v23 = vadd.f32 %v19411_v39, %v11649_v40  ;;  %v11612_v37 = vmul.f32 %v15365_v57, %v19273_v46  ;;  %14460 = vmatprep.mubr.msk.bf16.mxu1 %vm553_vm0, %v11713_v10  ;;  %v11472_v21 = vpop.xlane.xlu1 %11471  ;;  %v11650_v8 = vmul.f32 %v19403_v27, %v11611_v58 }
0x2deb   : > { %v15367_v9 = vpop.eup %15366  ;;  %15376 = vrsqrt.f32 %v11554_v49  ;;  %v11555_v45 = vadd.f32 1e-05, %v11523_v22  ;;  %v11524_v13 = vmul.f32 0.03125, %v11472_v21 }
0x2dec   : > { %v11714_v62 = vpack.c.bf16 %v11688_v23, %v11687_v55  ;;  %v11613_v46 = vmul.f32 %v15367_v9, %v19279_v51  ;;  %v11475_v16 = vpop.xlane.xlu0 %11474  ;;  %v11651_v47 = vmul.f32 %v19403_v27, %v11612_v37  ;;  %v11689_v35 = vadd.f32 %v19411_v39, %v11650_v8  ;;  %14487 = vmatpush3.bf16.msra.mxu0 %v14755_v63 }
0x2ded   : > { %v15369_v3 = vpop.eup %15368  ;;  %15378 = vrsqrt.f32 %v11555_v45  ;;  %v11556_v34 = vadd.f32 1e-05, %v11524_v13  ;;  %v11525_v12 = vmul.f32 0.03125, %v11475_v16 }
0x2dee   : > { %v11652_v26 = vmul.f32 %v19403_v27, %v11613_v46  ;;  %v11614_v61 = vmul.f32 %v15369_v3, %v19285_v59  ;;  %14461 = vmatmul.mubr.msk.bf16.gmra.mrb[92].mxu1 %vm553_vm0, %v11714_v62  ;;  %v11478_v44 = vpop.xlane.xlu1 %11477  ;;  %v11690_v1 = vadd.f32 %v19411_v39, %v11651_v47 }
0x2def   : > { %v15371_v51 = vpop.eup %15370  ;;  %15380 = vrsqrt.f32 %v11556_v34  ;;  %v11557_v24 = vadd.f32 1e-05, %v11525_v12  ;;  %v11526_v52 = vmul.f32 0.03125, %v11478_v44 }
0x2df0   : > { %v11653_v40 = vmul.f32 %v19403_v27, %v11614_v61  ;;  %v11615_v58 = vmul.f32 %v15371_v51, %v19291_v30  ;;  %v11715_v18 = vpack.c.bf16 %v11690_v1, %v11689_v35  ;;  %v11691_v57 = vadd.f32 %v19411_v39, %v11652_v26 }
0x2df1   : > { %v15373_v10 = vpop.eup %15372  ;;  %15382 = vrsqrt.f32 %v11557_v24  ;;  %v11558_v59 = vadd.f32 1e-05, %v11526_v52 }
0x2df2   : > { %v11692_v49 = vadd.f32 %v19411_v39, %v11653_v40  ;;  %v11616_v22 = vmul.f32 %v15373_v10, %v19297_v14  ;;  %14464 = vmatprep.mubr.msk.bf16.mxu1 %vm553_vm0, %v11715_v18  ;;  %v11654_v55 = vmul.f32 %v19403_v27, %v11615_v58 }
0x2df3   : > { %v15375_v23 = vpop.eup %15374  ;;  %15384 = vrsqrt.f32 %v11558_v59 }
0x2df4   : > { %v11716_v37 = vpack.c.bf16 %v11692_v49, %v11691_v57  ;;  %v11617_v30 = vmul.f32 %v15375_v23, %v19303_v53  ;;  %v11655_v21 = vmul.f32 %v19403_v27, %v11616_v22  ;;  %v11693_v14 = vadd.f32 %v19411_v39, %v11654_v55 }
0x2df5   : > { %v15377_v8 = vpop.eup %15376 }
0x2df6   : > { %v11656_v9 = vmul.f32 %v19403_v27, %v11617_v30  ;;  %v11618_v45 = vmul.f32 %v15377_v8, %v19309_v15  ;;  %14465 = vmatmul.mubr.msk.bf16.gmra.mrb[96].mxu1 %vm553_vm0, %v11716_v37  ;;  %v11694_v13 = vadd.f32 %v19411_v39, %v11655_v21 }
0x2df7   : > { %v15379_v29 = vpop.eup %15378 }
0x2df8   : > { %v11657_v63 = vmul.f32 %v19403_v27, %v11618_v45  ;;  %v11619_v62 = vmul.f32 %v15379_v29, %v19315_v4  ;;  %v11717_v46 = vpack.c.bf16 %v11694_v13, %v11693_v14  ;;  %v11695_v16 = vadd.f32 %v19411_v39, %v11656_v9 }
0x2df9   : > { %v15381_v53 = vpop.eup %15380 }
0x2dfa   : > { %v11696_v47 = vadd.f32 %v19411_v39, %v11657_v63  ;;  %v11620_v3 = vmul.f32 %v15381_v53, %v19321_v54  ;;  %14468 = vmatprep.mubr.msk.bf16.mxu1 %vm553_vm0, %v11717_v46  ;;  %v11658_v15 = vmul.f32 %v19403_v27, %v11619_v62 }
0x2dfb   : > { %v15383_v34 = vpop.eup %15382 }
0x2dfc   : > { %v11718_v12 = vpack.c.bf16 %v11696_v47, %v11695_v16  ;;  %v11621_v35 = vmul.f32 %v15383_v34, %v19327_v11  ;;  %v11659_v26 = vmul.f32 %v19403_v27, %v11620_v3  ;;  %v11697_v1 = vadd.f32 %v19411_v39, %v11658_v15  ;;  %v14757_v34 = vld [vmem:[%s19878_s12 + $0x18] sm:$0xff]  }
0x2dfd   : > { %v15385_v61 = vpop.eup %15384 }
0x2dfe   : > { %v11660_v4 = vmul.f32 %v19403_v27, %v11621_v35  ;;  %v11622_v44 = vmul.f32 %v15385_v61, %v19333_v25  ;;  %14469 = vmatmul.mubr.msk.bf16.gmra.mrb[100].mxu1 %vm553_vm0, %v11718_v12  ;;  %v11698_v54 = vadd.f32 %v19411_v39, %v11659_v26  ;;  %v14758_v12 = vld [vmem:[%s19878_s12 + $0x20] sm:$0xff]   ;;  %v14759_v35 = vld [vmem:[%s19878_s12 + $0x28] sm:$0xff]   ;;  %v14760_v26 = vld [vmem:[%s19878_s12 + $0x30] sm:$0xff]  }
0x2e00   : > { %v11661_v51 = vmul.f32 %v19403_v27, %v11622_v44  ;;  %v11719_v24 = vpack.c.bf16 %v11698_v54, %v11697_v1  ;;  %v11699_v52 = vadd.f32 %v19411_v39, %v11660_v4  ;;  %v14761_v1 = vld [vmem:[%s19878_s12 + $0x38] sm:$0xff]  }
0x2e02   : > { %v11700_v11 = vadd.f32 %v19411_v39, %v11661_v51  ;;  %14472 = vmatprep.mubr.msk.bf16.mxu1 %vm553_vm0, %v11719_v24 }
0x2e04   : > { %v11720_v40 = vpack.c.bf16 %v11700_v11, %v11699_v52 }
0x2e06   : > { %14473 = vmatmul.mubr.msk.bf16.gmra.mrb[104].mxu1 %vm553_vm0, %v11720_v40 }
0x2e0e   : > { %v11481_v58 = vpop.xlane.xlu0 %11480 }
0x2e0f   : > { %v11527_v25 = vmul.f32 0.03125, %v11481_v58 }
0x2e10   : > { %v11484_v18 = vpop.xlane.xlu1 %11483 }
0x2e11   : > { %v11559_v10 = vadd.f32 1e-05, %v11527_v25  ;;  %v11528_v57 = vmul.f32 0.03125, %v11484_v18 }
0x2e12   : > { %v11487_v59 = vpop.xlane.xlu0 %11486 }
0x2e13   : > { %15386 = vrsqrt.f32 %v11559_v10  ;;  %v11560_v49 = vadd.f32 1e-05, %v11528_v57  ;;  %v11529_v22 = vmul.f32 0.03125, %v11487_v59 }
0x2e14   : > { %v11490_v55 = vpop.xlane.xlu1 %11489 }
0x2e15   : > { %15388 = vrsqrt.f32 %v11560_v49  ;;  %v11561_v23 = vadd.f32 1e-05, %v11529_v22  ;;  %v11530_v37 = vmul.f32 0.03125, %v11490_v55 }
0x2e17   : > { %15390 = vrsqrt.f32 %v11561_v23  ;;  %v11562_v30 = vadd.f32 1e-05, %v11530_v37 }
0x2e19   : > { %15392 = vrsqrt.f32 %v11562_v30 }
0x2e1d   : > { %v15387_v21 = vpop.eup %15386 }
0x2e1e   : > { %v11623_v8 = vmul.f32 %v15387_v21, %v19353_v6 }
0x2e1f   : > { %v15389_v9 = vpop.eup %15388 }
0x2e20   : > { %v11624_v45 = vmul.f32 %v15389_v9, %v19356_v0  ;;  %v11662_v14 = vmul.f32 %v19403_v27, %v11623_v8 }
0x2e21   : > { %v15391_v13 = vpop.eup %15390 }
0x2e22   : > { %v11625_v29 = vmul.f32 %v15391_v13, %v19361_v2  ;;  %v11663_v63 = vmul.f32 %v19403_v27, %v11624_v45  ;;  %v11701_v16 = vadd.f32 %v19411_v39, %v11662_v14 }
0x2e23   : > { %v15393_v62 = vpop.eup %15392 }
0x2e24   : > { %v11664_v46 = vmul.f32 %v19403_v27, %v11625_v29  ;;  %v11626_v53 = vmul.f32 %v15393_v62, %v19367_v43  ;;  %v11702_v47 = vadd.f32 %v19411_v39, %v11663_v63  ;;  %v14756_v43 = vld [vmem:[%s19878_s12 + $0x10] sm:$0xff]  }
0x2e25   : > { %14488 = vmatprep.subr.bf16.mxu0 %v14756_v43 }
0x2e26   : > { %v11665_v6 = vmul.f32 %v19403_v27, %v11626_v53  ;;  %v11721_v3 = vpack.c.bf16 %v11702_v47, %v11701_v16  ;;  %v11703_v0 = vadd.f32 %v19411_v39, %v11664_v46  ;;  %14489 = vmatpush3.bf16.msra.mxu0 %v14756_v43 }
0x2e27   : > { %14490 = vmatprep.subr.bf16.mxu0 %v14757_v34 }
0x2e28   : > { %v11704_v15 = vadd.f32 %v19411_v39, %v11665_v6  ;;  %14476 = vmatprep.mubr.msk.bf16.mxu1 %vm553_vm0, %v11721_v3 }
0x2e2a   : > { %v11722_v2 = vpack.c.bf16 %v11704_v15, %v11703_v0  ;;  %14491 = vmatpush3.bf16.msra.mxu0 %v14757_v34 }
0x2e2b   : > { %14492 = vmatprep.subr.bf16.mxu0 %v14758_v12 }
0x2e2c   : > { %14477 = vmatmul.mubr.msk.bf16.gmra.mrb[108].mxu1 %vm553_vm0, %v11722_v2 }
0x2e2e   : > { %14493 = vmatpush3.bf16.msra.mxu0 %v14758_v12 }
0x2e2f   : > { %14494 = vmatprep.subr.bf16.mxu0 %v14759_v35 }
0x2e32   : > { %14495 = vmatpush3.bf16.msra.mxu0 %v14759_v35 }
0x2e33   : > { %14496 = vmatprep.subr.bf16.mxu0 %v14760_v26 }
0x2e36   : > { %14497 = vmatpush3.bf16.msra.mxu0 %v14760_v26 }
0x2e37   : > { %14498 = vmatprep.subr.bf16.mxu0 %v14761_v1 }
0x2e3a   : > { %14499 = vmatpush3.bf16.msra.mxu0 %v14761_v1 }
0x2e4d   : > { %v11493_v61 = vpop.xlane.xlu0 %11492 }
0x2e4e   : > { %v11531_v4 = vmul.f32 0.03125, %v11493_v61 }
0x2e4f   : > { %v11496_v44 = vpop.xlane.xlu1 %11495 }
0x2e50   : > { %v11563_v54 = vadd.f32 1e-05, %v11531_v4  ;;  %v11532_v51 = vmul.f32 0.03125, %v11496_v44 }
0x2e51   : > { %v11499_v24 = vpop.xlane.xlu0 %11498 }
0x2e52   : > { %15394 = vrsqrt.f32 %v11563_v54  ;;  %v11564_v52 = vadd.f32 1e-05, %v11532_v51  ;;  %v11533_v11 = vmul.f32 0.03125, %v11499_v24 }
0x2e53   : > { %v11502_v40 = vpop.xlane.xlu1 %11501 }
0x2e54   : > { %15396 = vrsqrt.f32 %v11564_v52  ;;  %v11565_v58 = vadd.f32 1e-05, %v11533_v11  ;;  %v11534_v25 = vmul.f32 0.03125, %v11502_v40 }
0x2e56   : > { %15398 = vrsqrt.f32 %v11565_v58  ;;  %v11566_v18 = vadd.f32 1e-05, %v11534_v25 }
0x2e58   : > { %15400 = vrsqrt.f32 %v11566_v18 }
0x2e5c   : > { %v15395_v10 = vpop.eup %15394 }
0x2e5d   : > { %v11627_v57 = vmul.f32 %v15395_v10, %v19377_v38 }
0x2e5e   : > { %v15397_v59 = vpop.eup %15396 }
0x2e5f   : > { %v11628_v49 = vmul.f32 %v15397_v59, %v19380_v32  ;;  %v11666_v22 = vmul.f32 %v19403_v27, %v11627_v57 }
0x2e60   : > { %v15399_v55 = vpop.eup %15398 }
0x2e61   : > { %v11629_v23 = vmul.f32 %v15399_v55, %v19385_v19  ;;  %v11667_v37 = vmul.f32 %v19403_v27, %v11628_v49  ;;  %v11705_v9 = vadd.f32 %v19411_v39, %v11666_v22 }
0x2e62   : > { %v15401_v30 = vpop.eup %15400 }
0x2e63   : > { %v11668_v21 = vmul.f32 %v19403_v27, %v11629_v23  ;;  %v11630_v8 = vmul.f32 %v15401_v30, %v19391_v56  ;;  %v11706_v45 = vadd.f32 %v19411_v39, %v11667_v37  ;;  %v19549_v56 = vld [vmem:[%s19877_s11] ss:$0 sm:$0xff] }
0x2e65   : > { %v11669_v38 = vmul.f32 %v19403_v27, %v11630_v8  ;;  %v11723_v14 = vpack.c.bf16 %v11706_v45, %v11705_v9  ;;  %v11707_v32 = vadd.f32 %v19411_v39, %v11668_v21 }
0x2e67   : > { %v11708_v13 = vadd.f32 %v19411_v39, %v11669_v38  ;;  %14480 = vmatprep.mubr.msk.bf16.mxu1 %vm553_vm0, %v11723_v14 }
0x2e69   : > { %v11724_v19 = vpack.c.bf16 %v11708_v13, %v11707_v32 }
0x2e6b   : > { %14481 = vmatmul.mubr.msk.bf16.gmra.mrb[112].mxu1 %vm553_vm0, %v11724_v19 }
0x2eb1   : > { %v14454_v29 = vpop.f32.mrb[84].mxu1 }
0x2eb2   : > { %v11839_v63 = vadd.f32 %v14454_v29, %v19549_v56  ;;  %v11830_v62 = vpop.f32.mrb[85].mxu1 }
0x2eb3   : > { %v11831_v27 = vadd.f32 %v19549_v56, %v11830_v62  ;;  %v14455_v46 = vpop.f32.mrb[86].mxu1 }
0x2eb4   : > { %v11992_v53 = vmul.f32 0.70710677, %v11839_v63  ;;  %v11842_v39 = vadd.f32 %v14455_v46, %v19549_v56  ;;  %v11833_v16 = vpop.f32.mrb[87].mxu1  ;;  %v11959_v57 = vmul.f32 0.5, %v11839_v63 }
0x2eb5   : > { %v11990_v47 = vmul.f32 0.70710677, %v11831_v27  ;;  %v11834_v6 = vadd.f32 %v19549_v56, %v11833_v16  ;;  %v11957_v23 = vmul.f32 0.5, %v11831_v27 }
0x2eb6   : > { %15402 = verf.f32 %v11992_v53  ;;  %v11993_v3 = vmul.f32 0.70710677, %v11842_v39  ;;  %v11960_v59 = vmul.f32 0.5, %v11842_v39 }
0x2eb7   : > { %15404 = verf.f32 %v11990_v47  ;;  %v11991_v0 = vmul.f32 0.70710677, %v11834_v6  ;;  %v11958_v37 = vmul.f32 0.5, %v11834_v6 }
0x2eb8   : > { %15406 = verf.f32 %v11993_v3 }
0x2eb9   : > { %15408 = verf.f32 %v11991_v0  ;;  %v14458_v15 = vpop.f32.mrb[88].mxu1 }
0x2eba   : > { %v11855_v2 = vadd.f32 %v14458_v15, %v19549_v56  ;;  %v11846_v43 = vpop.f32.mrb[89].mxu1 }
0x2ebb   : > { %v11847_v34 = vadd.f32 %v19549_v56, %v11846_v43  ;;  %v14459_v12 = vpop.f32.mrb[90].mxu1 }
0x2ebc   : > { %v11996_v35 = vmul.f32 0.70710677, %v11855_v2  ;;  %v11858_v26 = vadd.f32 %v14459_v12, %v19549_v56  ;;  %v11849_v61 = vpop.f32.mrb[91].mxu1  ;;  %v11963_v43 = vmul.f32 0.5, %v11855_v2 }
0x2ebd   : > { %v11994_v4 = vmul.f32 0.70710677, %v11847_v34  ;;  %v11850_v44 = vadd.f32 %v19549_v56, %v11849_v61 }
0x2ebe   : > { %15410 = verf.f32 %v11996_v35  ;;  %v11997_v1 = vmul.f32 0.70710677, %v11858_v26  ;;  %v11964_v12 = vmul.f32 0.5, %v11858_v26 }
0x2ebf   : > { %15412 = verf.f32 %v11994_v4  ;;  %v11995_v54 = vmul.f32 0.70710677, %v11850_v44 }
0x2ec0   : > { %v15403_v51 = vpop.eup %15402  ;;  %15414 = verf.f32 %v11997_v1  ;;  %v11961_v1 = vmul.f32 0.5, %v11847_v34 }
0x2ec1   : > { %v15405_v24 = vpop.eup %15404  ;;  %v12056_v52 = vadd.f32 1.0, %v15403_v51  ;;  %15416 = verf.f32 %v11995_v54  ;;  %v14462_v11 = vpop.f32.mrb[92].mxu1  ;;  %v11962_v54 = vmul.f32 0.5, %v11850_v44 }
0x2ec2   : > { %v15407_v40 = vpop.eup %15406  ;;  %v12054_v58 = vadd.f32 1.0, %v15405_v24  ;;  %v19560_v25 = vadd.f32 %v14462_v11, %v19549_v56  ;;  %v11862_v18 = vpop.f32.mrb[93].mxu1 }
0x2ec3   : > { %v15409_v10 = vpop.eup %15408  ;;  %v12057_v49 = vadd.f32 1.0, %v15407_v40  ;;  %v19563_v22 = vadd.f32 %v19549_v56, %v11862_v18  ;;  %v14463_v55 = vpop.f32.mrb[94].mxu1  ;;  %v12088_v9 = vmul.f32 %v12056_v52, %v11959_v57 }
0x2ec4   : > { %v12055_v30 = vadd.f32 1.0, %v15409_v10  ;;  %v12000_v21 = vmul.f32 0.70710677, %v19560_v25  ;;  %v11865_v8 = vpop.f32.mrb[95].mxu1  ;;  %v11874_v14 = vadd.f32 %v14463_v55, %v19549_v56  ;;  %v12086_v32 = vmul.f32 %v12054_v58, %v11957_v23 }
0x2ec5   : > { %v12089_v45 = vmul.f32 %v12057_v49, %v11960_v59  ;;  %v11998_v38 = vmul.f32 0.70710677, %v19563_v22  ;;  %v11866_v19 = vadd.f32 %v19549_v56, %v11865_v8 }
0x2ec6   : > { %v12087_v13 = vmul.f32 %v12055_v30, %v11958_v37  ;;  %15418 = verf.f32 %v12000_v21  ;;  %v12001_v63 = vmul.f32 0.70710677, %v11874_v14 }
0x2ec7   : > { %v12119_v29 = vpack.c.bf16 %v12089_v45, %v12088_v9  ;;  %15420 = verf.f32 %v11998_v38  ;;  %v11999_v27 = vmul.f32 0.70710677, %v11866_v19  ;;  %v11967_v9 = vmul.f32 0.5, %v19560_v25 }
0x2ec8   : > { %v15411_v62 = vpop.eup %15410  ;;  %v12118_v46 = vpack.c.bf16 %v12087_v13, %v12086_v32  ;;  %15422 = verf.f32 %v12001_v63  ;;  %v11968_v63 = vmul.f32 0.5, %v11874_v14 }
0x2ec9   : > { %v15413_v53 = vpop.eup %15412  ;;  %v12060_v39 = vadd.f32 1.0, %v15411_v62  ;;  %v14466_v16 = vpop.f32.mrb[96].mxu1  ;;  %15424 = verf.f32 %v11999_v27 }
0x2eca   : > { %v15415_v47 = vpop.eup %15414  ;;  %v12058_v6 = vadd.f32 1.0, %v15413_v53  ;;  %v19570_v3 = vadd.f32 %v14466_v16, %v19549_v56  ;;  %v11878_v0 = vpop.f32.mrb[97].mxu1  ;;  %14500 = vmatprep.mubr.bf16.mxu0 %v12118_v46  ;;  %v11966_v53 = vmul.f32 0.5, %v11866_v19 }
0x2ecb   : > { %v15417_v15 = vpop.eup %15416  ;;  %v12061_v35 = vadd.f32 1.0, %v15415_v47  ;;  %v19573_v61 = vadd.f32 %v19549_v56, %v11878_v0  ;;  %v14467_v4 = vpop.f32.mrb[98].mxu1  ;;  %14501 = vmatmul.mubr.bf16.vlgmr.msra.gmra.mrb[236].mxu0 %v12119_v29  ;;  %v12092_v11 = vmul.f32 %v12060_v39, %v11963_v43  ;;  %v11965_v29 = vmul.f32 0.5, %v19563_v22 }
0x2ecc   : > { %v12059_v51 = vadd.f32 1.0, %v15417_v15  ;;  %v12004_v24 = vmul.f32 0.70710677, %v19570_v3  ;;  %v11881_v52 = vpop.f32.mrb[99].mxu1  ;;  %v11890_v18 = vadd.f32 %v14467_v4, %v19549_v56  ;;  %v12090_v2 = vmul.f32 %v12058_v6, %v11961_v1 }
0x2ecd   : > { %v12093_v40 = vmul.f32 %v12061_v35, %v11964_v12  ;;  %v12002_v58 = vmul.f32 0.70710677, %v19573_v61  ;;  %v11882_v10 = vadd.f32 %v19549_v56, %v11881_v52 }
0x2ece   : > { %v12091_v26 = vmul.f32 %v12059_v51, %v11962_v54  ;;  %15426 = verf.f32 %v12004_v24  ;;  %v12005_v57 = vmul.f32 0.70710677, %v11890_v18 }
0x2ecf   : > { %15428 = verf.f32 %v12002_v58  ;;  %v12121_v59 = vpack.c.bf16 %v12093_v40, %v12092_v11  ;;  %v12003_v44 = vmul.f32 0.70710677, %v11882_v10  ;;  %v11971_v11 = vmul.f32 0.5, %v19570_v3 }
0x2ed0   : > { %v15419_v34 = vpop.eup %15418  ;;  %v12120_v49 = vpack.c.bf16 %v12091_v26, %v12090_v2  ;;  %15430 = verf.f32 %v12005_v57  ;;  %v11969_v57 = vmul.f32 0.5, %v19573_v61 }
0x2ed1   : > { %v15421_v55 = vpop.eup %15420  ;;  %v14470_v23 = vpop.f32.mrb[100].mxu1  ;;  %v12064_v37 = vadd.f32 1.0, %v15419_v34  ;;  %15432 = verf.f32 %v12003_v44 }
0x2ed2   : > { %v19580_v30 = vadd.f32 %v14470_v23, %v19549_v56  ;;  %v11894_v21 = vpop.f32.mrb[101].mxu1  ;;  %14504 = vmatprep.mubr.bf16.mxu0 %v12120_v49  ;;  %v15423_v8 = vpop.eup %15422  ;;  %v12062_v45 = vadd.f32 1.0, %v15421_v55  ;;  %v11970_v55 = vmul.f32 0.5, %v11882_v10 }
0x2ed3   : > { %v19584_v38 = vadd.f32 %v19549_v56, %v11894_v21  ;;  %v14471_v32 = vpop.f32.mrb[102].mxu1  ;;  %14505 = vmatmul.mubr.bf16.gmra.mrb[240].mxu0 %v12121_v59  ;;  %v15425_v13 = vpop.eup %15424  ;;  %v12065_v62 = vadd.f32 1.0, %v15423_v8  ;;  %v12096_v47 = vmul.f32 %v12064_v37, %v11967_v9  ;;  %v11972_v59 = vmul.f32 0.5, %v11890_v18 }
0x2ed4   : > { %v12008_v27 = vmul.f32 0.70710677, %v19580_v30  ;;  %v11897_v46 = vpop.f32.mrb[103].mxu1  ;;  %v12063_v39 = vadd.f32 1.0, %v15425_v13  ;;  %v11906_v25 = vadd.f32 %v14471_v32, %v19549_v56  ;;  %v12094_v15 = vmul.f32 %v12062_v45, %v11965_v29 }
0x2ed5   : > { %v12006_v16 = vmul.f32 0.70710677, %v19584_v38  ;;  %v12097_v6 = vmul.f32 %v12065_v62, %v11968_v63  ;;  %v11898_v0 = vadd.f32 %v19549_v56, %v11897_v46 }
0x2ed6   : > { %15434 = verf.f32 %v12008_v27  ;;  %v12095_v43 = vmul.f32 %v12063_v39, %v11966_v53  ;;  %v12009_v22 = vmul.f32 0.70710677, %v11906_v25  ;;  %v11975_v39 = vmul.f32 0.5, %v19580_v30 }
0x2ed7   : > { %15436 = verf.f32 %v12006_v16  ;;  %v12007_v12 = vmul.f32 0.70710677, %v11898_v0  ;;  %v12123_v35 = vpack.c.bf16 %v12097_v6, %v12096_v47  ;;  %v11976_v16 = vmul.f32 0.5, %v11906_v25 }
0x2ed8   : > { %v15427_v14 = vpop.eup %15426  ;;  %15438 = verf.f32 %v12009_v22  ;;  %v12122_v1 = vpack.c.bf16 %v12095_v43, %v12094_v15  ;;  %v11973_v6 = vmul.f32 0.5, %v19584_v38  ;;  %v11974_v15 = vmul.f32 0.5, %v11898_v0 }
0x2ed9   : > { %v15429_v4 = vpop.eup %15428  ;;  %v14474_v19 = vpop.f32.mrb[104].mxu1  ;;  %v12068_v54 = vadd.f32 1.0, %v15427_v14  ;;  %15440 = verf.f32 %v12007_v12 }
0x2eda   : > { %v11919_v51 = vadd.f32 %v14474_v19, %v19549_v56  ;;  %v11910_v24 = vpop.f32.mrb[105].mxu1  ;;  %v15431_v52 = vpop.eup %15430  ;;  %v12066_v40 = vadd.f32 1.0, %v15429_v4  ;;  %14508 = vmatprep.mubr.bf16.mxu0 %v12122_v1 }
0x2edb   : > { %v11911_v58 = vadd.f32 %v19549_v56, %v11910_v24  ;;  %v14475_v2 = vpop.f32.mrb[106].mxu1  ;;  %v15433_v26 = vpop.eup %15432  ;;  %v12069_v34 = vadd.f32 1.0, %v15431_v52  ;;  %14509 = vmatmul.mubr.bf16.gmra.mrb[244].mxu0 %v12123_v35  ;;  %v12100_v8 = vmul.f32 %v12068_v54, %v11971_v11 }
0x2edc   : > { %v12012_v44 = vmul.f32 0.70710677, %v11919_v51  ;;  %v11913_v49 = vpop.f32.mrb[107].mxu1  ;;  %v12067_v23 = vadd.f32 1.0, %v15433_v26  ;;  %v11922_v21 = vadd.f32 %v14475_v2, %v19549_v56  ;;  %v12098_v45 = vmul.f32 %v12066_v40, %v11969_v57 }
0x2edd   : > { %v12010_v37 = vmul.f32 0.70710677, %v11911_v58  ;;  %v12101_v3 = vmul.f32 %v12069_v34, %v11972_v59  ;;  %v11914_v9 = vadd.f32 %v19549_v56, %v11913_v49  ;;  %v11979_v25 = vmul.f32 0.5, %v11919_v51 }
0x2ede   : > { %15442 = verf.f32 %v12012_v44  ;;  %v12099_v32 = vmul.f32 %v12067_v23, %v11970_v55  ;;  %v12013_v13 = vmul.f32 0.70710677, %v11922_v21  ;;  %v11980_v40 = vmul.f32 0.5, %v11922_v21 }
0x2edf   : > { %15444 = verf.f32 %v12010_v37  ;;  %v12011_v18 = vmul.f32 0.70710677, %v11914_v9  ;;  %v12125_v29 = vpack.c.bf16 %v12101_v3, %v12100_v8  ;;  %v11977_v38 = vmul.f32 0.5, %v11911_v58 }
0x2ee0   : > { %v15435_v61 = vpop.eup %15434  ;;  %15446 = verf.f32 %v12013_v13  ;;  %v12124_v62 = vpack.c.bf16 %v12099_v32, %v12098_v45  ;;  %v11978_v0 = vmul.f32 0.5, %v11914_v9 }
0x2ee1   : > { %v15437_v63 = vpop.eup %15436  ;;  %v12072_v10 = vadd.f32 1.0, %v15435_v61  ;;  %15448 = verf.f32 %v12011_v18 }
0x2ee2   : > { %v15439_v27 = vpop.eup %15438  ;;  %v12070_v46 = vadd.f32 1.0, %v15437_v63  ;;  %14512 = vmatprep.mubr.bf16.mxu0 %v12124_v62 }
0x2ee3   : > { %v15441_v53 = vpop.eup %15440  ;;  %v12073_v47 = vadd.f32 1.0, %v15439_v27  ;;  %14513 = vmatmul.mubr.bf16.gmra.mrb[248].mxu0 %v12125_v29  ;;  %v12104_v22 = vmul.f32 %v12072_v10, %v11975_v39 }
0x2ee4   : > { %v12071_v43 = vadd.f32 1.0, %v15441_v53  ;;  %v12102_v12 = vmul.f32 %v12070_v46, %v11973_v6 }
0x2ee5   : > { %v12105_v14 = vmul.f32 %v12073_v47, %v11976_v16 }
0x2ee6   : > { %v12103_v35 = vmul.f32 %v12071_v43, %v11974_v15 }
0x2ee7   : > { %v12127_v19 = vpack.c.bf16 %v12105_v14, %v12104_v22 }
0x2ee8   : > { %v15443_v4 = vpop.eup %15442  ;;  %v12126_v54 = vpack.c.bf16 %v12103_v35, %v12102_v12 }
0x2ee9   : > { %v15445_v1 = vpop.eup %15444  ;;  %v12076_v24 = vadd.f32 1.0, %v15443_v4 }
0x2eea   : > { %v15447_v52 = vpop.eup %15446  ;;  %v12074_v11 = vadd.f32 1.0, %v15445_v1  ;;  %14516 = vmatprep.mubr.bf16.mxu0 %v12126_v54 }
0x2eeb   : > { %v15449_v30 = vpop.eup %15448  ;;  %v12077_v2 = vadd.f32 1.0, %v15447_v52  ;;  %14517 = vmatmul.mubr.bf16.gmra.mrb[252].mxu0 %v12127_v19  ;;  %v12108_v57 = vmul.f32 %v12076_v24, %v11979_v25 }
0x2eec   : > { %v12075_v26 = vadd.f32 1.0, %v15449_v30  ;;  %v12106_v34 = vmul.f32 %v12074_v11, %v11977_v38 }
0x2eed   : > { %v12109_v59 = vmul.f32 %v12077_v2, %v11980_v40 }
0x2eee   : > { %v12107_v44 = vmul.f32 %v12075_v26, %v11978_v0 }
0x2eef   : > { %v12129_v49 = vpack.c.bf16 %v12109_v59, %v12108_v57 }
0x2ef0   : > { %v12128_v55 = vpack.c.bf16 %v12107_v44, %v12106_v34 }
0x2ef2   : > { %14520 = vmatprep.mubr.bf16.mxu0 %v12128_v55 }
0x2ef3   : > { %14521 = vmatmul.mubr.bf16.gmra.mrb[0].mxu0 %v12129_v49 }
0x2eff   : > { %v14478_v23 = vpop.f32.mrb[108].mxu1 }
0x2f00   : > { %v11935_v37 = vadd.f32 %v14478_v23, %v19549_v56  ;;  %v11926_v8 = vpop.f32.mrb[109].mxu1 }
0x2f01   : > { %v11927_v51 = vadd.f32 %v19549_v56, %v11926_v8  ;;  %v14479_v21 = vpop.f32.mrb[110].mxu1 }
0x2f02   : > { %v12016_v3 = vmul.f32 0.70710677, %v11935_v37  ;;  %v11938_v58 = vadd.f32 %v14479_v21, %v19549_v56  ;;  %v11929_v9 = vpop.f32.mrb[111].mxu1  ;;  %v11983_v46 = vmul.f32 0.5, %v11935_v37 }
0x2f03   : > { %v12014_v45 = vmul.f32 0.70710677, %v11927_v51  ;;  %v11930_v32 = vadd.f32 %v19549_v56, %v11929_v9  ;;  %v11981_v16 = vmul.f32 0.5, %v11927_v51 }
0x2f04   : > { %15450 = verf.f32 %v12016_v3  ;;  %v12017_v13 = vmul.f32 0.70710677, %v11938_v58  ;;  %v11984_v53 = vmul.f32 0.5, %v11938_v58 }
0x2f05   : > { %15452 = verf.f32 %v12014_v45  ;;  %v12015_v61 = vmul.f32 0.70710677, %v11930_v32  ;;  %v11982_v47 = vmul.f32 0.5, %v11930_v32  ;;  %v19611_v32 = vld [vmem:[%s19879_s13] ss:$0 sm:$0xff] }
0x2f06   : > { %15454 = verf.f32 %v12017_v13 }
0x2f07   : > { %15456 = verf.f32 %v12015_v61 }
0x2f0e   : > { %v15451_v18 = vpop.eup %15450 }
0x2f0f   : > { %v15453_v29 = vpop.eup %15452  ;;  %v12080_v63 = vadd.f32 1.0, %v15451_v18 }
0x2f10   : > { %v15455_v62 = vpop.eup %15454  ;;  %v12078_v10 = vadd.f32 1.0, %v15453_v29 }
0x2f11   : > { %v15457_v27 = vpop.eup %15456  ;;  %v12081_v39 = vadd.f32 1.0, %v15455_v62  ;;  %v12112_v15 = vmul.f32 %v12080_v63, %v11983_v46 }
0x2f12   : > { %v12079_v6 = vadd.f32 1.0, %v15457_v27  ;;  %v12110_v22 = vmul.f32 %v12078_v10, %v11981_v16 }
0x2f13   : > { %v12113_v43 = vmul.f32 %v12081_v39, %v11984_v53 }
0x2f14   : > { %v12111_v14 = vmul.f32 %v12079_v6, %v11982_v47 }
0x2f15   : > { %v12131_v12 = vpack.c.bf16 %v12113_v43, %v12112_v15 }
0x2f16   : > { %v12130_v35 = vpack.c.bf16 %v12111_v14, %v12110_v22 }
0x2f18   : > { %14524 = vmatprep.mubr.bf16.mxu0 %v12130_v35 }
0x2f19   : > { %14525 = vmatmul.mubr.bf16.gmra.mrb[4].mxu0 %v12131_v12 }
0x2f3e   : > { %v14482_v4 = vpop.f32.mrb[112].mxu1 }
0x2f3f   : > { %v11951_v19 = vadd.f32 %v14482_v4, %v19549_v56  ;;  %v11942_v1 = vpop.f32.mrb[113].mxu1 }
0x2f40   : > { %v11943_v54 = vadd.f32 %v19549_v56, %v11942_v1  ;;  %v14483_v24 = vpop.f32.mrb[114].mxu1 }
0x2f41   : > { %v12020_v52 = vmul.f32 0.70710677, %v11951_v19  ;;  %v11954_v11 = vadd.f32 %v14483_v24, %v19549_v56  ;;  %v11945_v30 = vpop.f32.mrb[115].mxu1  ;;  %v11987_v49 = vmul.f32 0.5, %v11951_v19 }
0x2f42   : > { %v12018_v25 = vmul.f32 0.70710677, %v11943_v54  ;;  %v11946_v40 = vadd.f32 %v19549_v56, %v11945_v30  ;;  %v11985_v37 = vmul.f32 0.5, %v11943_v54 }
0x2f43   : > { %15458 = verf.f32 %v12020_v52  ;;  %v12021_v2 = vmul.f32 0.70710677, %v11954_v11  ;;  %v11988_v55 = vmul.f32 0.5, %v11954_v11 }
0x2f44   : > { %15460 = verf.f32 %v12018_v25  ;;  %v12019_v38 = vmul.f32 0.70710677, %v11946_v40  ;;  %v11986_v8 = vmul.f32 0.5, %v11946_v40 }
0x2f45   : > { %15462 = verf.f32 %v12021_v2 }
0x2f46   : > { %15464 = verf.f32 %v12019_v38 }
0x2f4d   : > { %v15459_v0 = vpop.eup %15458 }
0x2f4e   : > { %v15461_v26 = vpop.eup %15460  ;;  %v12084_v57 = vadd.f32 1.0, %v15459_v0 }
0x2f4f   : > { %v15463_v59 = vpop.eup %15462  ;;  %v12082_v34 = vadd.f32 1.0, %v15461_v26 }
0x2f50   : > { %v15465_v44 = vpop.eup %15464  ;;  %v12085_v23 = vadd.f32 1.0, %v15463_v59  ;;  %v12116_v51 = vmul.f32 %v12084_v57, %v11987_v49 }
0x2f51   : > { %v12083_v56 = vadd.f32 1.0, %v15465_v44  ;;  %v12114_v3 = vmul.f32 %v12082_v34, %v11985_v37 }
0x2f52   : > { %v12117_v21 = vmul.f32 %v12085_v23, %v11988_v55 }
0x2f53   : > { %v12115_v58 = vmul.f32 %v12083_v56, %v11986_v8 }
0x2f54   : > { %v12133_v9 = vpack.c.bf16 %v12117_v21, %v12116_v51  ;;  %v20031_v51 = vld [vmem:[#allocation17_spill] sm:$0xff] }
0x2f55   : > { %v12132_v45 = vpack.c.bf16 %v12115_v58, %v12114_v3 }
0x2f57   : > { %14528 = vmatprep.mubr.bf16.mxu0 %v12132_v45 }
0x2f58   : > { %14529 = vmatmul.mubr.bf16.gmra.mrb[8].mxu0 %v12133_v9  ;;  %v20032_v9 = vld [vmem:[#allocation22_spill] sm:$0xff] }
0x2f9e   : > { %v14502_v13 = vpop.f32.mrb[236].mxu0 }
0x2f9f   : > { %v12248_v61 = vadd.f32 %v14502_v13, %v19611_v32  ;;  %v12239_v18 = vpop.f32.mrb[237].mxu0 }
0x2fa0   : > { %v12240_v29 = vadd.f32 %v19611_v32, %v12239_v18  ;;  %v14503_v63 = vpop.f32.mrb[238].mxu0 }
0x2fa1   : > { %v12368_v62 = vadd.f32 %v12248_v61, %v18888_v50  ;;  %v12251_v10 = vadd.f32 %v14503_v63, %v19611_v32  ;;  %v12242_v27 = vpop.f32.mrb[239].mxu0  ;;  %v20033_v61 = vld [vmem:[#allocation16_spill] sm:$0xff] }
0x2fa2   : > { %v12366_v46 = vadd.f32 %v12240_v29, %v18884_v28  ;;  %v12243_v53 = vadd.f32 %v19611_v32, %v12242_v27 }
0x2fa3   : > { %v12432_v39 = vcombine.high %v12368_v62, %v12368_v62  ;;  %12499 = vst.msk [vmem:[%s19621_s26 + $0x40] sm:$0xf] %vm12494_vm5, %v12368_v62  ;;  %v12369_v50 = vadd.f32 %v12251_v10, %v18904_v33 }
0x2fa4   : > { %v12430_v16 = vcombine.high %v12366_v46, %v12366_v46  ;;  %12495 = vst.msk [vmem:[%s19621_s26] sm:$0xf] %vm12494_vm5, %v12366_v46  ;;  %v12367_v28 = vadd.f32 %v12243_v53, %v19022_v17  ;;  %v20034_v53 = vld [vmem:[#allocation19_spill] sm:$0xff] }
0x2fa5   : > { %12500 = vst.msk [vmem:[%s19621_s26 + $0x50] sm:$0xf] %vm12494_vm5, %v12432_v39  ;;  %v12433_v47 = vcombine.high %v12369_v50, %v12369_v50  ;;  %12501 = vst.msk [vmem:[%s19621_s26 + $0x60] sm:$0xf] %vm12494_vm5, %v12369_v50 }
0x2fa6   : > { %12496 = vst.msk [vmem:[%s19621_s26 + $0x10] sm:$0xf] %vm12494_vm5, %v12430_v16  ;;  %v12431_v6 = vcombine.high %v12367_v28, %v12367_v28  ;;  %12497 = vst.msk [vmem:[%s19621_s26 + $0x20] sm:$0xf] %vm12494_vm5, %v12367_v28  ;;  %v14506_v15 = vpop.f32.mrb[240].mxu0  ;;  %v20035_v28 = vld [vmem:[#allocation18_spill] sm:$0xff] }
0x2fa7   : > { %12502 = vst.msk [vmem:[%s19621_s26 + $0x70] sm:$0xf] %vm12494_vm5, %v12433_v47  ;;  %v12264_v33 = vadd.f32 %v14506_v15, %v19611_v32  ;;  %v12255_v43 = vpop.f32.mrb[241].mxu0 }
0x2fa8   : > { %12498 = vst.msk [vmem:[%s19621_s26 + $0x30] sm:$0xf] %vm12494_vm5, %v12431_v6  ;;  %v12256_v17 = vadd.f32 %v19611_v32, %v12255_v43  ;;  %v14507_v22 = vpop.f32.mrb[242].mxu0 }
0x2fa9   : > { %v12372_v14 = vadd.f32 %v12264_v33, %v18925_v7  ;;  %v12267_v12 = vadd.f32 %v14507_v22, %v19611_v32  ;;  %v12258_v35 = vpop.f32.mrb[243].mxu0  ;;  %v20036_v33 = vld [vmem:[#allocation23_spill] sm:$0xff]  ;;  %v20037_v22 = vld [vmem:[#allocation13_spill] sm:$0xff] }
0x2faa   : > { %v12370_v4 = vadd.f32 %v12256_v17, %v18916_v60  ;;  %v12259_v19 = vadd.f32 %v19611_v32, %v12258_v35 }
0x2fab   : > { %v12436_v1 = vcombine.high %v12372_v14, %v12372_v14  ;;  %12507 = vst.msk [vmem:[%s19621_s26 + $0xc0] sm:$0xf] %vm12494_vm5, %v12372_v14  ;;  %v12373_v54 = vadd.f32 %v12267_v12, %v19036_v31 }
0x2fac   : > { %v12434_v24 = vcombine.high %v12370_v4, %v12370_v4  ;;  %12503 = vst.msk [vmem:[%s19621_s26 + $0x80] sm:$0xf] %vm12494_vm5, %v12370_v4  ;;  %v12371_v7 = vadd.f32 %v12259_v19, %v19032_v41 }
0x2fad   : > { %12508 = vst.msk [vmem:[%s19621_s26 + $0xd0] sm:$0xf] %vm12494_vm5, %v12436_v1  ;;  %v12437_v52 = vcombine.high %v12373_v54, %v12373_v54  ;;  %12509 = vst.msk [vmem:[%s19621_s26 + $0xe0] sm:$0xf] %vm12494_vm5, %v12373_v54 }
0x2fae   : > { %12504 = vst.msk [vmem:[%s19621_s26 + $0x90] sm:$0xf] %vm12494_vm5, %v12434_v24  ;;  %v12435_v60 = vcombine.high %v12371_v7, %v12371_v7  ;;  %12505 = vst.msk [vmem:[%s19621_s26 + $0xa0] sm:$0xf] %vm12494_vm5, %v12371_v7  ;;  %v14510_v31 = vpop.f32.mrb[244].mxu0  ;;  %v20038_v7 = vld [vmem:[#allocation21_spill] sm:$0xff] }
0x2faf   : > { %12510 = vst.msk [vmem:[%s19621_s26 + $0xf0] sm:$0xf] %vm12494_vm5, %v12437_v52  ;;  %v12280_v41 = vadd.f32 %v14510_v31, %v19611_v32  ;;  %v12271_v11 = vpop.f32.mrb[245].mxu0 }
0x2fb0   : > { %12506 = vst.msk [vmem:[%s19621_s26 + $0xb0] sm:$0xf] %vm12494_vm5, %v12435_v60  ;;  %v12272_v30 = vadd.f32 %v19611_v32, %v12271_v11  ;;  %v14511_v25 = vpop.f32.mrb[246].mxu0 }
0x2fb1   : > { %v12376_v40 = vadd.f32 %v12280_v41, %v18937_v20  ;;  %v12283_v2 = vadd.f32 %v14511_v25, %v19611_v32  ;;  %v12274_v38 = vpop.f32.mrb[247].mxu0  ;;  %v20039_v41 = vld [vmem:[#allocation20_spill] sm:$0xff] }
0x2fb2   : > { %v12374_v0 = vadd.f32 %v12272_v30, %v18933_v42  ;;  %v12275_v26 = vadd.f32 %v19611_v32, %v12274_v38 }
0x2fb3   : > { %v12440_v57 = vcombine.high %v12376_v40, %v12376_v40  ;;  %12515 = vst.msk [vmem:[%s19621_s26 + $0x44] sm:$0xf] %vm12494_vm5, %v12376_v40  ;;  %v12377_v59 = vadd.f32 %v12283_v2, %v19050_v5  ;;  %v20040_v40 = vld [vmem:[#allocation15_spill] sm:$0xff] }
0x2fb4   : > { %v12438_v34 = vcombine.high %v12374_v0, %v12374_v0  ;;  %12511 = vst.msk [vmem:[%s19621_s26 + $0x4] sm:$0xf] %vm12494_vm5, %v12374_v0  ;;  %v12375_v20 = vadd.f32 %v12275_v26, %v19046_v48  ;;  %v20041_v0 = vld [vmem:[#allocation14_spill] sm:$0xff] }
0x2fb5   : > { %12516 = vst.msk [vmem:[%s19621_s26 + $0x54] sm:$0xf] %vm12494_vm5, %v12440_v57  ;;  %v12441_v44 = vcombine.high %v12377_v59, %v12377_v59  ;;  %12517 = vst.msk [vmem:[%s19621_s26 + $0x64] sm:$0xf] %vm12494_vm5, %v12377_v59 }
0x2fb6   : > { %12512 = vst.msk [vmem:[%s19621_s26 + $0x14] sm:$0xf] %vm12494_vm5, %v12438_v34  ;;  %v12439_v42 = vcombine.high %v12375_v20, %v12375_v20  ;;  %12513 = vst.msk [vmem:[%s19621_s26 + $0x24] sm:$0xf] %vm12494_vm5, %v12375_v20  ;;  %v14514_v49 = vpop.f32.mrb[248].mxu0 }
0x2fb7   : > { %12518 = vst.msk [vmem:[%s19621_s26 + $0x74] sm:$0xf] %vm12494_vm5, %v12441_v44  ;;  %v12296_v5 = vadd.f32 %v14514_v49, %v19611_v32  ;;  %v12287_v55 = vpop.f32.mrb[249].mxu0 }
0x2fb8   : > { %12514 = vst.msk [vmem:[%s19621_s26 + $0x34] sm:$0xf] %vm12494_vm5, %v12439_v42  ;;  %v12288_v48 = vadd.f32 %v19611_v32, %v12287_v55  ;;  %v14515_v23 = vpop.f32.mrb[250].mxu0 }
0x2fb9   : > { %v12380_v37 = vadd.f32 %v12296_v5, %v18956_v36  ;;  %v12299_v8 = vadd.f32 %v14515_v23, %v19611_v32  ;;  %v12290_v56 = vpop.f32.mrb[251].mxu0  ;;  %v20042_v5 = vld [vmem:[#allocation25_spill] sm:$0xff] }
0x2fba   : > { %v12378_v21 = vadd.f32 %v12288_v48, %v20031_v51  ;;  %v12291_v3 = vadd.f32 %v19611_v32, %v12290_v56 }
0x2fbb   : > { %v12444_v58 = vcombine.high %v12380_v37, %v12380_v37  ;;  %12523 = vst.msk [vmem:[%s19621_s26 + $0xc4] sm:$0xf] %vm12494_vm5, %v12380_v37  ;;  %v12381_v45 = vadd.f32 %v12299_v8, %v20032_v9  ;;  %v20043_v37 = vld [vmem:[#allocation24_spill] sm:$0xff]  ;;  %v20045_v9 = vld [vmem:[#allocation26_spill] sm:$0xff] }
0x2fbc   : > { %v12442_v13 = vcombine.high %v12378_v21, %v12378_v21  ;;  %12519 = vst.msk [vmem:[%s19621_s26 + $0x84] sm:$0xf] %vm12494_vm5, %v12378_v21  ;;  %v12379_v36 = vadd.f32 %v12291_v3, %v20033_v61  ;;  %v20044_v21 = vld [vmem:[#allocation27_spill] sm:$0xff] }
0x2fbd   : > { %12524 = vst.msk [vmem:[%s19621_s26 + $0xd4] sm:$0xf] %vm12494_vm5, %v12444_v58  ;;  %v12445_v18 = vcombine.high %v12381_v45, %v12381_v45  ;;  %12525 = vst.msk [vmem:[%s19621_s26 + $0xe4] sm:$0xf] %vm12494_vm5, %v12381_v45 }
0x2fbe   : > { %12520 = vst.msk [vmem:[%s19621_s26 + $0x94] sm:$0xf] %vm12494_vm5, %v12442_v13  ;;  %v12443_v29 = vcombine.high %v12379_v36, %v12379_v36  ;;  %12521 = vst.msk [vmem:[%s19621_s26 + $0xa4] sm:$0xf] %vm12494_vm5, %v12379_v36  ;;  %v14518_v63 = vpop.f32.mrb[252].mxu0 }
0x2fbf   : > { %12526 = vst.msk [vmem:[%s19621_s26 + $0xf4] sm:$0xf] %vm12494_vm5, %v12445_v18  ;;  %v12312_v62 = vadd.f32 %v14518_v63, %v19611_v32  ;;  %v12303_v10 = vpop.f32.mrb[253].mxu0 }
0x2fc0   : > { %12522 = vst.msk [vmem:[%s19621_s26 + $0xb4] sm:$0xf] %vm12494_vm5, %v12443_v29  ;;  %v12304_v27 = vadd.f32 %v19611_v32, %v12303_v10  ;;  %v14519_v46 = vpop.f32.mrb[254].mxu0  ;;  %v20046_v10 = vld [vmem:[#allocation29_spill] sm:$0xff] }
0x2fc1   : > { %v12384_v39 = vadd.f32 %v12312_v62, %v20034_v53  ;;  %v12315_v50 = vadd.f32 %v14519_v46, %v19611_v32  ;;  %v12306_v16 = vpop.f32.mrb[255].mxu0 }
0x2fc2   : > { %v12382_v47 = vadd.f32 %v12304_v27, %v20035_v28  ;;  %v12307_v6 = vadd.f32 %v19611_v32, %v12306_v16 }
0x2fc3   : > { %v12448_v15 = vcombine.high %v12384_v39, %v12384_v39  ;;  %12531 = vst.msk [vmem:[%s19621_s26 + $0x48] sm:$0xf] %vm12494_vm5, %v12384_v39  ;;  %v12385_v43 = vadd.f32 %v12315_v50, %v20036_v33  ;;  %v20047_v39 = vld [vmem:[#allocation28_spill] sm:$0xff]  ;;  %v20050_v33 = vld [vmem:[#allocation30_spill] sm:$0xff] }
0x2fc4   : > { %v12446_v17 = vcombine.high %v12382_v47, %v12382_v47  ;;  %12527 = vst.msk [vmem:[%s19621_s26 + $0x8] sm:$0xf] %vm12494_vm5, %v12382_v47  ;;  %v12383_v14 = vadd.f32 %v12307_v6, %v20037_v22  ;;  %v20048_v47 = vld [vmem:[#allocation31_spill] sm:$0xff] }
0x2fc5   : > { %12532 = vst.msk [vmem:[%s19621_s26 + $0x58] sm:$0xf] %vm12494_vm5, %v12448_v15  ;;  %v12449_v12 = vcombine.high %v12385_v43, %v12385_v43  ;;  %12533 = vst.msk [vmem:[%s19621_s26 + $0x68] sm:$0xf] %vm12494_vm5, %v12385_v43 }
0x2fc6   : > { %12528 = vst.msk [vmem:[%s19621_s26 + $0x18] sm:$0xf] %vm12494_vm5, %v12446_v17  ;;  %v12447_v35 = vcombine.high %v12383_v14, %v12383_v14  ;;  %12529 = vst.msk [vmem:[%s19621_s26 + $0x28] sm:$0xf] %vm12494_vm5, %v12383_v14  ;;  %v14522_v4 = vpop.f32.mrb[0].mxu0 }
0x2fc7   : > { %12534 = vst.msk [vmem:[%s19621_s26 + $0x78] sm:$0xf] %vm12494_vm5, %v12449_v12  ;;  %v12328_v19 = vadd.f32 %v14522_v4, %v19611_v32  ;;  %v12319_v1 = vpop.f32.mrb[1].mxu0 }
0x2fc8   : > { %12530 = vst.msk [vmem:[%s19621_s26 + $0x38] sm:$0xf] %vm12494_vm5, %v12447_v35  ;;  %v12320_v54 = vadd.f32 %v19611_v32, %v12319_v1  ;;  %v14523_v24 = vpop.f32.mrb[2].mxu0 }
0x2fc9   : > { %v12388_v52 = vadd.f32 %v12328_v19, %v20038_v7  ;;  %v12331_v60 = vadd.f32 %v14523_v24, %v19611_v32  ;;  %v12322_v31 = vpop.f32.mrb[3].mxu0 }
0x2fca   : > { %v12386_v11 = vadd.f32 %v12320_v54, %v20039_v41  ;;  %v12323_v30 = vadd.f32 %v19611_v32, %v12322_v31 }
0x2fcb   : > { %v12452_v25 = vcombine.high %v12388_v52, %v12388_v52  ;;  %12539 = vst.msk [vmem:[%s19621_s26 + $0xc8] sm:$0xf] %vm12494_vm5, %v12388_v52  ;;  %v12389_v2 = vadd.f32 %v12331_v60, %v20040_v40 }
0x2fcc   : > { %v12450_v38 = vcombine.high %v12386_v11, %v12386_v11  ;;  %12535 = vst.msk [vmem:[%s19621_s26 + $0x88] sm:$0xf] %vm12494_vm5, %v12386_v11  ;;  %v12387_v26 = vadd.f32 %v12323_v30, %v20041_v0 }
0x2fcd   : > { %12540 = vst.msk [vmem:[%s19621_s26 + $0xd8] sm:$0xf] %vm12494_vm5, %v12452_v25  ;;  %v12453_v57 = vcombine.high %v12389_v2, %v12389_v2  ;;  %12541 = vst.msk [vmem:[%s19621_s26 + $0xe8] sm:$0xf] %vm12494_vm5, %v12389_v2 }
0x2fce   : > { %12536 = vst.msk [vmem:[%s19621_s26 + $0x98] sm:$0xf] %vm12494_vm5, %v12450_v38  ;;  %v12451_v59 = vcombine.high %v12387_v26, %v12387_v26  ;;  %12537 = vst.msk [vmem:[%s19621_s26 + $0xa8] sm:$0xf] %vm12494_vm5, %v12387_v26 }
0x2fcf   : > { %12542 = vst.msk [vmem:[%s19621_s26 + $0xf8] sm:$0xf] %vm12494_vm5, %v12453_v57 }
0x2fd0   : > { %12538 = vst.msk [vmem:[%s19621_s26 + $0xb8] sm:$0xf] %vm12494_vm5, %v12451_v59 }
0x2fec   : > { %v14526_v34 = vpop.f32.mrb[4].mxu0 }
0x2fed   : > { %v12344_v20 = vadd.f32 %v14526_v34, %v19611_v32  ;;  %v12335_v44 = vpop.f32.mrb[5].mxu0 }
0x2fee   : > { %v12336_v42 = vadd.f32 %v19611_v32, %v12335_v44  ;;  %v14527_v49 = vpop.f32.mrb[6].mxu0 }
0x2fef   : > { %v12392_v55 = vadd.f32 %v12344_v20, %v20042_v5  ;;  %v12347_v48 = vadd.f32 %v14527_v49, %v19611_v32  ;;  %v12338_v23 = vpop.f32.mrb[7].mxu0 }
0x2ff0   : > { %v12390_v8 = vadd.f32 %v12336_v42, %v20043_v37  ;;  %v12339_v56 = vadd.f32 %v19611_v32, %v12338_v23 }
0x2ff1   : > { %v12456_v51 = vcombine.high %v12392_v55, %v12392_v55  ;;  %12547 = vst.msk [vmem:[%s19621_s26 + $0x4c] sm:$0xf] %vm12494_vm5, %v12392_v55  ;;  %v12393_v3 = vadd.f32 %v12347_v48, %v20044_v21 }
0x2ff2   : > { %v12454_v58 = vcombine.high %v12390_v8, %v12390_v8  ;;  %12543 = vst.msk [vmem:[%s19621_s26 + $0xc] sm:$0xf] %vm12494_vm5, %v12390_v8  ;;  %v12391_v45 = vadd.f32 %v12339_v56, %v20045_v9 }
0x2ff3   : > { %12548 = vst.msk [vmem:[%s19621_s26 + $0x5c] sm:$0xf] %vm12494_vm5, %v12456_v51  ;;  %v12457_v13 = vcombine.high %v12393_v3, %v12393_v3  ;;  %12549 = vst.msk [vmem:[%s19621_s26 + $0x6c] sm:$0xf] %vm12494_vm5, %v12393_v3 }
0x2ff4   : > { %12544 = vst.msk [vmem:[%s19621_s26 + $0x1c] sm:$0xf] %vm12494_vm5, %v12454_v58  ;;  %v12455_v61 = vcombine.high %v12391_v45, %v12391_v45  ;;  %12545 = vst.msk [vmem:[%s19621_s26 + $0x2c] sm:$0xf] %vm12494_vm5, %v12391_v45 }
0x2ff5   : > { %12550 = vst.msk [vmem:[%s19621_s26 + $0x7c] sm:$0xf] %vm12494_vm5, %v12457_v13 }
0x2ff6   : > { %12546 = vst.msk [vmem:[%s19621_s26 + $0x3c] sm:$0xf] %vm12494_vm5, %v12455_v61 }
0x302b   : > { %v14530_v36 = vpop.f32.mrb[8].mxu0 }
0x302c   : > { %v12360_v18 = vadd.f32 %v14530_v36, %v19611_v32  ;;  %v12351_v29 = vpop.f32.mrb[9].mxu0 }
0x302d   : > { %v12352_v63 = vadd.f32 %v19611_v32, %v12351_v29  ;;  %v14531_v62 = vpop.f32.mrb[10].mxu0 }
0x302e   : > { %v12396_v27 = vadd.f32 %v12360_v18, %v20046_v10  ;;  %v12363_v46 = vadd.f32 %v14531_v62, %v19611_v32  ;;  %v12354_v53 = vpop.f32.mrb[11].mxu0 }
0x302f   : > { %v12394_v50 = vadd.f32 %v12352_v63, %v20047_v39  ;;  %v12355_v16 = vadd.f32 %v19611_v32, %v12354_v53 }
0x3030   : > { %v12460_v28 = vcombine.high %v12396_v27, %v12396_v27  ;;  %12555 = vst.msk [vmem:[%s19621_s26 + $0xcc] sm:$0xf] %vm12494_vm5, %v12396_v27  ;;  %v12397_v6 = vadd.f32 %v12363_v46, %v20048_v47 }
0x3031   : > { %v12458_v15 = vcombine.high %v12394_v50, %v12394_v50  ;;  %12551 = vst.msk [vmem:[%s19621_s26 + $0x8c] sm:$0xf] %vm12494_vm5, %v12394_v50  ;;  %v12395_v43 = vadd.f32 %v12355_v16, %v20050_v33 }
0x3032   : > { %12556 = vst.msk [vmem:[%s19621_s26 + $0xdc] sm:$0xf] %vm12494_vm5, %v12460_v28  ;;  %v12461_v32 = vcombine.high %v12397_v6, %v12397_v6  ;;  %12557 = vst.msk [vmem:[%s19621_s26 + $0xec] sm:$0xf] %vm12494_vm5, %v12397_v6 }
0x3033   : > { %12552 = vst.msk [vmem:[%s19621_s26 + $0x9c] sm:$0xf] %vm12494_vm5, %v12458_v15  ;;  %v12459_v17 = vcombine.high %v12395_v43, %v12395_v43  ;;  %12553 = vst.msk [vmem:[%s19621_s26 + $0xac] sm:$0xf] %vm12494_vm5, %v12395_v43 }
0x3034   : > { %12558 = vst.msk [vmem:[%s19621_s26 + $0xfc] sm:$0xf] %vm12494_vm5, %v12461_v32 }
0x3035   : > { %12554 = vst.msk [vmem:[%s19621_s26 + $0xbc] sm:$0xf] %vm12494_vm5, %v12459_v17 }
0x3036   : > { %15511 = shalt.err (!%p15508_p5)
}
0x3037   : > { %s15512_s29 = scalar_lea.hbm %s19806_s21, 4096  ;;  %s15516_s22 = scalar_lea.hbm %s20051_s3, 8192 }
0x3038   : > { %p15513_p6 = scmp.ne.s32.totalorder %s19806_s21, %s15512_s29  ;;  %p15517_p10 = scmp.lt.u32.totalorder %s19806_s21, %s20051_s3 }
0x3039   : > { %p15518_p11 = scmp.lt.u32.totalorder %s15516_s22, %s15512_s29  ;;  %p15520_p13 = scmp.lt.u32.totalorder %s15512_s29, %s19806_s21 }
0x303a   : > { %p15514_p7 = pnand %p15513_p6, %p15709_p4 }
0x303b   : > { %p15519_p12 = por %p15518_p11, %p15517_p10 }
0x303c   : > { %p15515_p9 = pneg %p15514_p7 }
0x303d   : > { %p15521_p0 = por %p15520_p13, %p15519_p12 }
0x303f   : > { %p15522_p1 = pnand %p15521_p0, %p15515_p9 }
0x3041   : > { %15525 = shalt.err (!%p15522_p1)
}
0x3042   : > { %s15592_s2 = smov 128   ;;  %s15593_s18 = smov 8  }
0x3043   : > { %14648 = dma.vmem_to_hbm [thread:$0]  (%p15709_p4), %s19808_s27, 4096, %s19806_s21, %s19820_s14, %s15592_s2, %s15592_s2, %s15593_s18  }
0x3044 PF: > { %s20052_s26 = sld [smem:[#allocation8_spill]]  ;;  %s20053_s28 = sld [smem:[#allocation5_spill]] }
0x304a   : > { %p14654_p2 = scmp.ge.s32.totalorder %s20052_s26, 2  ;;  %s12591_s17 = sand.u32 1, %s20053_s28  }
0x304b   : > { %s12592_s20 = scalar_lea.sflag [#allocation3], %s12591_s17 }
0x304c   : > { %p14651_p3 = pnand %p14654_p2, %p15716_p8 }
0x304e   : > { %15551 = dma.done.wait (!%p14651_p3), %s12592_s20, 4096  }
0x304f   : > { %15553 = vsyncadd (!%p14651_p3), %s12592_s20, 4294963200  ;;  %s27_s18 = sadd.s32 1, %s20052_s26   ;;  %s20055_s1 = sld [smem:[#allocation6_spill]] }
0x3050   : > { %p24_p5 = scmp.ge.s32.totalorder %s27_s18, 4   ;;  %s20056_s15 = sld [smem:[#allocation12_spill]] }
0x3051   : > { %s20057_s16 = sld [smem:[#allocation7_spill]]  ;;  %s20058_s17 = sld [smem:[#allocation9_spill]] }
0x3052   : > { %s20059_s29 = smov %s15560_s30  ;;  %26 = sbr.rel (!%p24_p5) target bundleno = 11 (0xb), region = 129 }
0x3055   : > { %s20060_s30 = smov %s20055_s1 }
0x3059   :  { %12597 = vsyncpa [#allocation3], 1 }
0x305a   :  { %12599 = vsyncpa [#allocation3 + $0x1], 1 }

</bundles_post_ra>
